<compile_context>
chip_gen: v7x
topology: tpu7x:2x2x1
jax: 0.10.0
libtpu: 0.0.40
codegen_flags: <defaults>
</compile_context>

<pallas_src>
import numpy as np

import jax
import jax.numpy as jnp
from jax.experimental import pallas as pl
from jax.experimental.pallas import tpu as pltpu


# -----------------------------------------------------------------------------
# Fused kernel: avg-pool + 1x1 conv + ReLU + flatten + fc1 + ReLU + fc2.
# One batch tile (bn images) per grid step; all weights resident (constant index
# maps -> fetched once, reused across steps).
#   x_ref   : (bn, H*W, Cin)    activations, channels on the 128-lane axis
#   p_ref   : (pp, H*W)         constant pooling matrix (1/25 folded in)
#   wc_ref  : (Cin, 128)        1x1 conv weight          bc_ref: (1, 128)
#   w1_ref  : (pp*128, hidden)  fc1 weight (pre-permuted) b1_ref: (1, hidden)
#   w2_ref  : (hidden, cpad)    fc2 weight (lane-padded)  b2_ref: (1, cpad)
#   out_ref : (1, bn, cpad)
#   flat_ref: VMEM scratch (bn, pp*128) f32
# -----------------------------------------------------------------------------
def inception_aux_kernel(x_ref, p_ref, wc_ref, bc_ref, w1_ref, b1_ref,
                         w2_ref, b2_ref, out_ref, flat_ref):
    bn = x_ref.shape[0]
    pp = p_ref.shape[0]
    cconv = wc_ref.shape[1]

    # --- per-image AvgPool2d(5,3) as a constant-matrix matmul + 1x1 conv + ReLU
    for i in range(bn):                                    # static unroll, bn small
        pooled = jnp.dot(p_ref[...], x_ref[i],
                         preferred_element_type=jnp.float32)            # (pp, Cin)
        conv = jnp.dot(pooled.astype(wc_ref.dtype), wc_ref[...],
                       preferred_element_type=jnp.float32)              # (pp, 128)
        act = jnp.maximum(conv + bc_ref[...], 0.0)                      # (pp, 128)
        # Position-major flatten (w1 is pre-permuted to match): lane-aligned
        # (1,128) stores into scratch -- no in-kernel transpose/reshape.
        for p in range(pp):
            flat_ref[i:i + 1, p * cconv:(p + 1) * cconv] = act[p:p + 1, :]

    # TODO(synk): dropout(p=0.5) before fc1 / before fc2 is identity (eval mode).

    # --- fc1 + ReLU + fc2, whole batch tile as the MXU M dimension --------------
    h = jnp.maximum(
        jnp.dot(flat_ref[...].astype(w1_ref.dtype), w1_ref[...],
                preferred_element_type=jnp.float32) + b1_ref[...], 0.0)  # (bn, hidden)
    out = jnp.dot(h.astype(w2_ref.dtype), w2_ref[...],
                  preferred_element_type=jnp.float32) + b2_ref[...]      # (bn, cpad)
    out_ref[0] = out.astype(out_ref.dtype)


# -----------------------------------------------------------------------------
# Host-side helpers.
# -----------------------------------------------------------------------------
def _pooling_matrix(h, w, hp, wp):
    """(HP*WP, H*W) matrix implementing AvgPool2d(kernel=5, stride=3), 1/25 folded."""
    pmat = np.zeros((hp * wp, h * w), np.float32)
    for ph in range(hp):
        for pw in range(wp):
            p = ph * wp + pw
            for dh in range(5):
                for dw in range(5):
                    pmat[p, (ph * 3 + dh) * w + (pw * 3 + dw)] = 1.0 / 25.0
    return jnp.asarray(pmat)


def _pick_batch_tile(n):
    """Largest batch tile that divides N and still leaves enough grid steps."""
    for c in (8, 4, 2):
        if n % c == 0 and n // c >= 4:
            return c
    for c in (8, 4, 2):
        if n % c == 0 and n // c >= 2:
            return c
    return 1


def _vmem_limit_bytes(total_block_bytes):
    # 2x for double-buffered pipelining + headroom; cap at ~75% of physical VMEM
    # for the actual generation (128 MiB on v5e/v6e, 64 MiB on v7x).
    need = 2 * int(total_block_bytes) + (4 << 20)
    try:
        cap = int(pltpu.get_tpu_info().vmem_capacity_bytes)
    except Exception:
        cap = 64 << 20
    return int(min(max(need, 16 << 20), (cap * 3) // 4))


def inception_aux_forward(x_nchw, params, *, weights_dtype=jnp.bfloat16):
    wc, bc, w1, b1, w2, b2 = params
    n, cin, h, w = x_nchw.shape
    hp = (h - 5) // 3 + 1
    wp = (w - 5) // 3 + 1
    pp = hp * wp
    cconv = wc.shape[1]                       # 128
    hidden = w1.shape[1]                      # 1024
    num_classes = w2.shape[1]
    assert cconv * pp == w1.shape[0], "flattened size must match fc1 in-features"

    bn = _pick_batch_tile(n)
    nb = n // bn

    # ---- layout prep (host/XLA side, one-time, cheap) -------------------------
    # NCHW -> NHWC -> (N, H*W, Cin): channels on the 128-lane axis.  (Real
    # InceptionAux has Cin=512/528, i.e. lane-dense.)
    x3d = jnp.transpose(x_nchw, (0, 2, 3, 1)).astype(jnp.float32).reshape(n, h * w, cin)
    pmat = _pooling_matrix(h, w, hp, wp)                          # (pp, H*W)
    wc_k = wc.astype(weights_dtype)                               # (Cin, 128)
    bc_k = bc.reshape(1, cconv).astype(jnp.float32)

    # torch.flatten on NCHW is channel-major; absorb that permutation into w1 so
    # the kernel-side flatten is position-major (lane-aligned row stores).
    w1p = (w1.reshape(cconv, pp, hidden).transpose(1, 0, 2)
             .reshape(pp * cconv, hidden).astype(weights_dtype))
    b1_k = b1.reshape(1, hidden).astype(jnp.float32)

    # Lane-pad fc2 to a multiple of 128 output columns (unmasked stores).
    cpad = max(128, ((num_classes + 127) // 128) * 128)
    w2p = jnp.pad(w2.astype(weights_dtype), ((0, 0), (0, cpad - num_classes)))
    b2p = jnp.pad(b2.reshape(1, num_classes).astype(jnp.float32),
                  ((0, 0), (0, cpad - num_classes)))

    itemw = jnp.dtype(weights_dtype).itemsize
    block_bytes = (bn * h * w * cin * 4 + pp * h * w * 4
                   + cin * cconv * itemw + cconv * 4
                   + pp * cconv * hidden * itemw + hidden * 4
                   + hidden * cpad * itemw + cpad * 4
                   + bn * cpad * 4 + bn * pp * cconv * 4)

    out3 = pl.pallas_call(
        inception_aux_kernel,
        out_shape=jax.ShapeDtypeStruct((nb, bn, cpad), jnp.float32),
        grid_spec=pltpu.PrefetchScalarGridSpec(
            num_scalar_prefetch=0,
            grid=(nb,),
            in_specs=[
                pl.BlockSpec((bn, h * w, cin), lambda b: (b, 0, 0)),     # x batch tile
                pl.BlockSpec((pp, h * w), lambda b: (0, 0)),             # pooling matrix
                pl.BlockSpec((cin, cconv), lambda b: (0, 0)),            # conv weight
                pl.BlockSpec((1, cconv), lambda b: (0, 0)),              # conv bias
                pl.BlockSpec((pp * cconv, hidden), lambda b: (0, 0)),    # fc1 weight
                pl.BlockSpec((1, hidden), lambda b: (0, 0)),             # fc1 bias
                pl.BlockSpec((hidden, cpad), lambda b: (0, 0)),          # fc2 weight
                pl.BlockSpec((1, cpad), lambda b: (0, 0)),               # fc2 bias
            ],
            out_specs=pl.BlockSpec((1, bn, cpad), lambda b: (b, 0, 0)),
            scratch_shapes=[pltpu.VMEM((bn, pp * cconv), jnp.float32)],
        ),
        compiler_params=pltpu.CompilerParams(
            # Batch axis is embarrassingly parallel -> megacore split on v7x.
            dimension_semantics=("parallel",),
            vmem_limit_bytes=_vmem_limit_bytes(block_bytes),
        ),
    )(x3d, pmat, wc_k, bc_k, w1p, b1_k, w2p, b2p)

    return out3.reshape(n, cpad)[:, :num_classes]


def reference_forward(x_nchw, params):
    """Plain-JAX reference with identical semantics (eval-mode dropout)."""
    wc, bc, w1, b1, w2, b2 = params
    n, cin, h, w = x_nchw.shape
    hp = (h - 5) // 3 + 1
    wp = (w - 5) // 3 + 1
    x = jnp.transpose(x_nchw, (0, 2, 3, 1)).astype(jnp.float32)   # NHWC
    pooled = jnp.stack(
        [x[:, ph * 3:ph * 3 + 5, pw * 3:pw * 3 + 5, :].mean(axis=(1, 2))
         for ph in range(hp) for pw in range(wp)],
        axis=1)                                                    # (N, HP*WP, Cin)
    conv = jnp.maximum(
        jnp.einsum("npc,ck->npk", pooled, wc,
                   precision=jax.lax.Precision.HIGHEST) + bc, 0.0)
    flat = jnp.transpose(conv, (0, 2, 1)).reshape(n, -1)           # channel-major flatten
    hdn = jnp.maximum(
        jnp.dot(flat, w1, precision=jax.lax.Precision.HIGHEST) + b1, 0.0)
    return jnp.dot(hdn, w2, precision=jax.lax.Precision.HIGHEST) + b2


if __name__ == "__main__":
    # fc1 expects 1536 = 128 * (HP*WP) -> pooled spatial size 12 -> H=14, W=11 (4x3).
    N, CIN, H, W = 2, 128, 14, 11
    NUM_CLASSES = 10

    key = jax.random.PRNGKey(0)
    kx, kwc, kbc, kw1, kb1, kw2, kb2 = jax.random.split(key, 7)

    x = jax.random.normal(kx, (N, CIN, H, W), dtype=jnp.float32)

    # Deterministic synthetic parameters (shapes match the PyTorch module).
    wc = jax.random.normal(kwc, (CIN, 128), dtype=jnp.float32) * 0.05       # 1x1 conv
    bc = jax.random.normal(kbc, (1, 128), dtype=jnp.float32) * 0.05
    w1 = jax.random.normal(kw1, (1536, 1024), dtype=jnp.float32) * 0.02     # fc1
    b1 = jax.random.normal(kb1, (1, 1024), dtype=jnp.float32) * 0.02
    w2 = jax.random.normal(kw2, (1024, NUM_CLASSES), dtype=jnp.float32) * 0.02  # fc2
    b2 = jax.random.normal(kb2, (1, NUM_CLASSES), dtype=jnp.float32) * 0.02

    params = (wc, bc, w1, b1, w2, b2)

    ref = jax.block_until_ready(reference_forward(x, params))

    # f32 weight path: tight tolerance vs the f32 reference.
    out_f32 = jax.block_until_ready(
        inception_aux_forward(x, params, weights_dtype=jnp.float32))
    assert out_f32.shape == (N, NUM_CLASSES), out_f32.shape
    err_f32 = float(jnp.max(jnp.abs(out_f32 - ref)))
    assert jnp.allclose(out_f32, ref, rtol=2e-3, atol=2e-3), ("f32 mismatch", err_f32)

    # Default bf16 weight-streaming path (f32 accumulation): looser tolerance.
    out_bf16 = jax.block_until_ready(inception_aux_forward(x, params))
    assert out_bf16.shape == (N, NUM_CLASSES), out_bf16.shape
    err_bf16 = float(jnp.max(jnp.abs(out_bf16 - ref)))
    assert jnp.allclose(out_bf16, ref, rtol=2e-2, atol=2e-2), ("bf16 mismatch", err_bf16)

    print("KERNEL_OK")
</pallas_src>

<mosaic_0001>
module attributes {stable_mosaic.version = 11 : i64} {
  func.func @inception_aux_kernel(%arg0: i32, %arg1: memref<1x154x128xf32, #tpu.memory_space<vmem>>, %arg2: memref<12x154xf32, #tpu.memory_space<vmem>>, %arg3: memref<128x128xf32, #tpu.memory_space<vmem>>, %arg4: memref<1x128xf32, #tpu.memory_space<vmem>>, %arg5: memref<1536x1024xf32, #tpu.memory_space<vmem>>, %arg6: memref<1x1024xf32, #tpu.memory_space<vmem>>, %arg7: memref<1024x128xf32, #tpu.memory_space<vmem>>, %arg8: memref<1x128xf32, #tpu.memory_space<vmem>>, %arg9: memref<1x1x128xf32, #tpu.memory_space<vmem>>, %arg10: memref<1x1536xf32, #tpu.memory_space<vmem>>) attributes {dimension_semantics = [#tpu.dimension_semantics<parallel>], iteration_bounds = array<i64: 2>, scalar_prefetch = 0 : i64, scratch_operands = 1 : i64, tpu.core_type = #tpu.core_type<tc>, window_params = [{transform_indices = @transform_0, window_bounds = array<i64: 1, 154, 128>}, {pipeline_mode = #tpu.pipeline_mode<synchronous>, transform_indices = @transform_1, window_bounds = array<i64: 12, 154>}, {pipeline_mode = #tpu.pipeline_mode<synchronous>, transform_indices = @transform_2, window_bounds = array<i64: 128, 128>}, {pipeline_mode = #tpu.pipeline_mode<synchronous>, transform_indices = @transform_3, window_bounds = array<i64: 1, 128>}, {pipeline_mode = #tpu.pipeline_mode<synchronous>, transform_indices = @transform_4, window_bounds = array<i64: 1536, 1024>}, {pipeline_mode = #tpu.pipeline_mode<synchronous>, transform_indices = @transform_5, window_bounds = array<i64: 1, 1024>}, {pipeline_mode = #tpu.pipeline_mode<synchronous>, transform_indices = @transform_6, window_bounds = array<i64: 1024, 128>}, {pipeline_mode = #tpu.pipeline_mode<synchronous>, transform_indices = @transform_7, window_bounds = array<i64: 1, 128>}, {transform_indices = @transform_8, window_bounds = array<i64: 1, 1, 128>}]} {
    %c0 = arith.constant 0 : index
    %c0_0 = arith.constant 0 : index
    %0 = vector.load %arg2[%c0, %c0_0] : memref<12x154xf32, #tpu.memory_space<vmem>>, vector<12x154xf32>
    %c0_1 = arith.constant 0 : index
    %c0_2 = arith.constant 0 : index
    %c0_3 = arith.constant 0 : index
    %1 = vector.load %arg1[%c0_1, %c0_2, %c0_3] : memref<1x154x128xf32, #tpu.memory_space<vmem>>, vector<1x154x128xf32>
    %2 = vector.shape_cast %1 : vector<1x154x128xf32> to vector<154x128xf32>
    %cst = arith.constant dense<0.000000e+00> : vector<12x128xf32>
    %3 = tpu.matmul %0, %2, %cst {dimension_numbers = #tpu.dot_dimension_numbers<[1], [0], [0], [1], [0, 0, 1, 1], [], []>} : vector<12x154xf32>, vector<154x128xf32>, vector<12x128xf32> -> vector<12x128xf32>
    %c0_4 = arith.constant 0 : index
    %c0_5 = arith.constant 0 : index
    %4 = vector.load %arg3[%c0_4, %c0_5] : memref<128x128xf32, #tpu.memory_space<vmem>>, vector<128x128xf32>
    %cst_6 = arith.constant dense<0.000000e+00> : vector<12x128xf32>
    %5 = tpu.matmul %3, %4, %cst_6 {dimension_numbers = #tpu.dot_dimension_numbers<[1], [0], [0], [1], [0, 0, 1, 1], [], []>} : vector<12x128xf32>, vector<128x128xf32>, vector<12x128xf32> -> vector<12x128xf32>
    %c0_7 = arith.constant 0 : index
    %c0_8 = arith.constant 0 : index
    %6 = vector.load %arg4[%c0_7, %c0_8] : memref<1x128xf32, #tpu.memory_space<vmem>>, vector<1x128xf32>
    %7 = vector.broadcast %6 : vector<1x128xf32> to vector<12x128xf32>
    %8 = arith.addf %5, %7 : vector<12x128xf32>
    %cst_9 = arith.constant 0.000000e+00 : f32
    %9 = vector.broadcast %cst_9 : f32 to vector<12x128xf32>
    %10 = arith.maximumf %8, %9 : vector<12x128xf32>
    %11 = vector.extract_strided_slice %10 {offsets = [0, 0], sizes = [1, 128], strides = [1, 1]} : vector<12x128xf32> to vector<1x128xf32>
    %c0_10 = arith.constant 0 : index
    %c0_11 = arith.constant 0 : index
    %12 = vector.load %arg10[%c0_10, %c0_11] : memref<1x1536xf32, #tpu.memory_space<vmem>>, vector<1x128xf32>
    tpu.vector_store %arg10[%c0_10, %c0_11], %11 {strides = array<i32>} : memref<1x1536xf32, #tpu.memory_space<vmem>>, vector<1x128xf32>,
    %13 = vector.extract_strided_slice %10 {offsets = [1, 0], sizes = [1, 128], strides = [1, 1]} : vector<12x128xf32> to vector<1x128xf32>
    %c0_12 = arith.constant 0 : index
    %c128 = arith.constant 128 : index
    %14 = vector.load %arg10[%c0_12, %c128] : memref<1x1536xf32, #tpu.memory_space<vmem>>, vector<1x128xf32>
    tpu.vector_store %arg10[%c0_12, %c128], %13 {strides = array<i32>} : memref<1x1536xf32, #tpu.memory_space<vmem>>, vector<1x128xf32>,
    %15 = vector.extract_strided_slice %10 {offsets = [2, 0], sizes = [1, 128], strides = [1, 1]} : vector<12x128xf32> to vector<1x128xf32>
    %c0_13 = arith.constant 0 : index
    %c256 = arith.constant 256 : index
    %16 = vector.load %arg10[%c0_13, %c256] : memref<1x1536xf32, #tpu.memory_space<vmem>>, vector<1x128xf32>
    tpu.vector_store %arg10[%c0_13, %c256], %15 {strides = array<i32>} : memref<1x1536xf32, #tpu.memory_space<vmem>>, vector<1x128xf32>,
    %17 = vector.extract_strided_slice %10 {offsets = [3, 0], sizes = [1, 128], strides = [1, 1]} : vector<12x128xf32> to vector<1x128xf32>
    %c0_14 = arith.constant 0 : index
    %c384 = arith.constant 384 : index
    %18 = vector.load %arg10[%c0_14, %c384] : memref<1x1536xf32, #tpu.memory_space<vmem>>, vector<1x128xf32>
    tpu.vector_store %arg10[%c0_14, %c384], %17 {strides = array<i32>} : memref<1x1536xf32, #tpu.memory_space<vmem>>, vector<1x128xf32>,
    %19 = vector.extract_strided_slice %10 {offsets = [4, 0], sizes = [1, 128], strides = [1, 1]} : vector<12x128xf32> to vector<1x128xf32>
    %c0_15 = arith.constant 0 : index
    %c512 = arith.constant 512 : index
    %20 = vector.load %arg10[%c0_15, %c512] : memref<1x1536xf32, #tpu.memory_space<vmem>>, vector<1x128xf32>
    tpu.vector_store %arg10[%c0_15, %c512], %19 {strides = array<i32>} : memref<1x1536xf32, #tpu.memory_space<vmem>>, vector<1x128xf32>,
    %21 = vector.extract_strided_slice %10 {offsets = [5, 0], sizes = [1, 128], strides = [1, 1]} : vector<12x128xf32> to vector<1x128xf32>
    %c0_16 = arith.constant 0 : index
    %c640 = arith.constant 640 : index
    %22 = vector.load %arg10[%c0_16, %c640] : memref<1x1536xf32, #tpu.memory_space<vmem>>, vector<1x128xf32>
    tpu.vector_store %arg10[%c0_16, %c640], %21 {strides = array<i32>} : memref<1x1536xf32, #tpu.memory_space<vmem>>, vector<1x128xf32>,
    %23 = vector.extract_strided_slice %10 {offsets = [6, 0], sizes = [1, 128], strides = [1, 1]} : vector<12x128xf32> to vector<1x128xf32>
    %c0_17 = arith.constant 0 : index
    %c768 = arith.constant 768 : index
    %24 = vector.load %arg10[%c0_17, %c768] : memref<1x1536xf32, #tpu.memory_space<vmem>>, vector<1x128xf32>
    tpu.vector_store %arg10[%c0_17, %c768], %23 {strides = array<i32>} : memref<1x1536xf32, #tpu.memory_space<vmem>>, vector<1x128xf32>,
    %25 = vector.extract_strided_slice %10 {offsets = [7, 0], sizes = [1, 128], strides = [1, 1]} : vector<12x128xf32> to vector<1x128xf32>
    %c0_18 = arith.constant 0 : index
    %c896 = arith.constant 896 : index
    %26 = vector.load %arg10[%c0_18, %c896] : memref<1x1536xf32, #tpu.memory_space<vmem>>, vector<1x128xf32>
    tpu.vector_store %arg10[%c0_18, %c896], %25 {strides = array<i32>} : memref<1x1536xf32, #tpu.memory_space<vmem>>, vector<1x128xf32>,
    %27 = vector.extract_strided_slice %10 {offsets = [8, 0], sizes = [1, 128], strides = [1, 1]} : vector<12x128xf32> to vector<1x128xf32>
    %c0_19 = arith.constant 0 : index
    %c1024 = arith.constant 1024 : index
    %28 = vector.load %arg10[%c0_19, %c1024] : memref<1x1536xf32, #tpu.memory_space<vmem>>, vector<1x128xf32>
    tpu.vector_store %arg10[%c0_19, %c1024], %27 {strides = array<i32>} : memref<1x1536xf32, #tpu.memory_space<vmem>>, vector<1x128xf32>,
    %29 = vector.extract_strided_slice %10 {offsets = [9, 0], sizes = [1, 128], strides = [1, 1]} : vector<12x128xf32> to vector<1x128xf32>
    %c0_20 = arith.constant 0 : index
    %c1152 = arith.constant 1152 : index
    %30 = vector.load %arg10[%c0_20, %c1152] : memref<1x1536xf32, #tpu.memory_space<vmem>>, vector<1x128xf32>
    tpu.vector_store %arg10[%c0_20, %c1152], %29 {strides = array<i32>} : memref<1x1536xf32, #tpu.memory_space<vmem>>, vector<1x128xf32>,
    %31 = vector.extract_strided_slice %10 {offsets = [10, 0], sizes = [1, 128], strides = [1, 1]} : vector<12x128xf32> to vector<1x128xf32>
    %c0_21 = arith.constant 0 : index
    %c1280 = arith.constant 1280 : index
    %32 = vector.load %arg10[%c0_21, %c1280] : memref<1x1536xf32, #tpu.memory_space<vmem>>, vector<1x128xf32>
    tpu.vector_store %arg10[%c0_21, %c1280], %31 {strides = array<i32>} : memref<1x1536xf32, #tpu.memory_space<vmem>>, vector<1x128xf32>,
    %33 = vector.extract_strided_slice %10 {offsets = [11, 0], sizes = [1, 128], strides = [1, 1]} : vector<12x128xf32> to vector<1x128xf32>
    %c0_22 = arith.constant 0 : index
    %c1408 = arith.constant 1408 : index
    %34 = vector.load %arg10[%c0_22, %c1408] : memref<1x1536xf32, #tpu.memory_space<vmem>>, vector<1x128xf32>
    tpu.vector_store %arg10[%c0_22, %c1408], %33 {strides = array<i32>} : memref<1x1536xf32, #tpu.memory_space<vmem>>, vector<1x128xf32>,
    %c0_23 = arith.constant 0 : index
    %c0_24 = arith.constant 0 : index
    %35 = vector.load %arg10[%c0_23, %c0_24] : memref<1x1536xf32, #tpu.memory_space<vmem>>, vector<1x1536xf32>
    %c0_25 = arith.constant 0 : index
    %c0_26 = arith.constant 0 : index
    %36 = vector.load %arg5[%c0_25, %c0_26] : memref<1536x1024xf32, #tpu.memory_space<vmem>>, vector<1536x1024xf32>
    %cst_27 = arith.constant dense<0.000000e+00> : vector<1x1024xf32>
    %37 = tpu.matmul %35, %36, %cst_27 {dimension_numbers = #tpu.dot_dimension_numbers<[1], [0], [0], [1], [0, 0, 1, 1], [], []>} : vector<1x1536xf32>, vector<1536x1024xf32>, vector<1x1024xf32> -> vector<1x1024xf32>
    %c0_28 = arith.constant 0 : index
    %c0_29 = arith.constant 0 : index
    %38 = vector.load %arg6[%c0_28, %c0_29] : memref<1x1024xf32, #tpu.memory_space<vmem>>, vector<1x1024xf32>
    %39 = arith.addf %37, %38 : vector<1x1024xf32>
    %cst_30 = arith.constant 0.000000e+00 : f32
    %40 = vector.broadcast %cst_30 : f32 to vector<1x1024xf32>
    %41 = arith.maximumf %39, %40 : vector<1x1024xf32>
    %c0_31 = arith.constant 0 : index
    %c0_32 = arith.constant 0 : index
    %42 = vector.load %arg7[%c0_31, %c0_32] : memref<1024x128xf32, #tpu.memory_space<vmem>>, vector<1024x128xf32>
    %cst_33 = arith.constant dense<0.000000e+00> : vector<1x128xf32>
    %43 = tpu.matmul %41, %42, %cst_33 {dimension_numbers = #tpu.dot_dimension_numbers<[1], [0], [0], [1], [0, 0, 1, 1], [], []>} : vector<1x1024xf32>, vector<1024x128xf32>, vector<1x128xf32> -> vector<1x128xf32>
    %c0_34 = arith.constant 0 : index
    %c0_35 = arith.constant 0 : index
    %44 = vector.load %arg8[%c0_34, %c0_35] : memref<1x128xf32, #tpu.memory_space<vmem>>, vector<1x128xf32>
    %45 = arith.addf %43, %44 : vector<1x128xf32>
    %c0_36 = arith.constant 0 : index
    %c0_37 = arith.constant 0 : index
    %c0_38 = arith.constant 0 : index
    %46 = vector.load %arg9[%c0_36, %c0_37, %c0_38] : memref<1x1x128xf32, #tpu.memory_space<vmem>>, vector<1x1x128xf32>
    %47 = vector.shape_cast %46 : vector<1x1x128xf32> to vector<1x128xf32>
    %48 = vector.shape_cast %45 : vector<1x128xf32> to vector<1x1x128xf32>
    tpu.vector_store %arg9[%c0_36, %c0_37, %c0_38], %48 {strides = array<i32>} : memref<1x1x128xf32, #tpu.memory_space<vmem>>, vector<1x1x128xf32>,
    return
  }
  func.func @transform_0(%arg0: i32) -> (i32, i32, i32) {
    %c0_i32 = arith.constant 0 : i32
    %c0_i32_0 = arith.constant 0 : i32
    %c0_i32_1 = arith.constant 0 : i32
    return %arg0, %c0_i32, %c0_i32_0 : i32, i32, i32
  }
  func.func @transform_1(%arg0: i32) -> (i32, i32) {
    %c0_i32 = arith.constant 0 : i32
    %c0_i32_0 = arith.constant 0 : i32
    %c0_i32_1 = arith.constant 0 : i32
    return %c0_i32, %c0_i32_0 : i32, i32
  }
  func.func @transform_2(%arg0: i32) -> (i32, i32) {
    %c0_i32 = arith.constant 0 : i32
    %c0_i32_0 = arith.constant 0 : i32
    %c0_i32_1 = arith.constant 0 : i32
    return %c0_i32, %c0_i32_0 : i32, i32
  }
  func.func @transform_3(%arg0: i32) -> (i32, i32) {
    %c0_i32 = arith.constant 0 : i32
    %c0_i32_0 = arith.constant 0 : i32
    %c0_i32_1 = arith.constant 0 : i32
    return %c0_i32, %c0_i32_0 : i32, i32
  }
  func.func @transform_4(%arg0: i32) -> (i32, i32) {
    %c0_i32 = arith.constant 0 : i32
    %c0_i32_0 = arith.constant 0 : i32
    %c0_i32_1 = arith.constant 0 : i32
    return %c0_i32, %c0_i32_0 : i32, i32
  }
  func.func @transform_5(%arg0: i32) -> (i32, i32) {
    %c0_i32 = arith.constant 0 : i32
    %c0_i32_0 = arith.constant 0 : i32
    %c0_i32_1 = arith.constant 0 : i32
    return %c0_i32, %c0_i32_0 : i32, i32
  }
  func.func @transform_6(%arg0: i32) -> (i32, i32) {
    %c0_i32 = arith.constant 0 : i32
    %c0_i32_0 = arith.constant 0 : i32
    %c0_i32_1 = arith.constant 0 : i32
    return %c0_i32, %c0_i32_0 : i32, i32
  }
  func.func @transform_7(%arg0: i32) -> (i32, i32) {
    %c0_i32 = arith.constant 0 : i32
    %c0_i32_0 = arith.constant 0 : i32
    %c0_i32_1 = arith.constant 0 : i32
    return %c0_i32, %c0_i32_0 : i32, i32
  }
  func.func @transform_8(%arg0: i32) -> (i32, i32, i32) {
    %c0_i32 = arith.constant 0 : i32
    %c0_i32_0 = arith.constant 0 : i32
    %c0_i32_1 = arith.constant 0 : i32
    return %arg0, %c0_i32, %c0_i32_0 : i32, i32, i32
  }
}

</mosaic_0001>

<bundles_post_ra>
// kernel: tpu_custom_call.1
= control target key start
LH: loop header
LB: loop body
LE: loop exit
PB: predicated region body
PF: predicated region fallthrough
CT: control target
= control target key end

     0   :  { %s7575_s0 = inlined_call_operand.vmem [shape: f32[2,154,128], index: 0, kind: input, shape index: {}]   ;;  %s7576_s1 = inlined_call_operand.hbm [shape: f32[12,154], index: 1, kind: input, shape index: {}]   ;;  %s7577_s2 = inlined_call_operand.hbm [shape: f32[128,128], index: 2, kind: input, shape index: {}]   ;;  %s7578_s3 = inlined_call_operand.hbm [shape: f32[1,128], index: 3, kind: input, shape index: {}]   ;;  %s7579_s4 = inlined_call_operand.hbm [shape: f32[1536,1024], index: 4, kind: input, shape index: {}]   ;;  %s7580_s5 = inlined_call_operand.hbm [shape: f32[1,1024], index: 5, kind: input, shape index: {}]   ;;  %s7581_s6 = inlined_call_operand.hbm [shape: f32[1024,128], index: 6, kind: input, shape index: {}]   ;;  %s7582_s7 = inlined_call_operand.hbm [shape: f32[1,128], index: 7, kind: input, shape index: {}]   ;;  %s7583_s8 = inlined_call_operand.hbm [shape: f32[2,1,128], index: 8, kind: output, shape index: {}]  }
   0x1   :  { %7592 = sst [smem:[#allocation24_spill]] %s7577_s2 }
   0x2   :  { %13 = vsyncpa [#allocation4], 0 }
   0x3   :  { %14 = vsyncpa [#allocation7], 0 }
   0x4   :  { %15 = vsyncpa [#allocation10], 0 }
   0x5   :  { %16 = vsyncpa [#allocation13], 0 }
   0x6   :  { %17 = vsyncpa [#allocation5], 0 }
   0x7   :  { %19 = vsyncpa [#allocation5 + $0x1], 0  ;;  %s7065_s27 = smov 0   ;;  %s7067_s28 = smov 0  }
   0x8   :  { %s7069_s29 = smov 0   ;;  %s7071_s30 = smov 0  }
   0x9 LB: > { %7593 = sst [smem:[#allocation21_spill]] %s6997_s29  ;;  %s7086_s9 = sadd.s32 4294967295, %s7001_s30   ;;  %s7001_s30 = sphi %s7071_s30, %s7617_s30   ;;  %s6997_s29 = sphi %s7069_s29, %s7619_s29   ;;  %s6993_s28 = sphi %s7067_s28, %s7621_s28   ;;  %s6989_s27 = sphi %s7065_s27, %s7620_s27  }
   0xa   : > { %s4611_s10 = sadd.s32 4294967294, %s7001_s30   ;;  %s7090_s11 = sadd.s32 1, %s7001_s30  }
   0xb   : > { %7594 = sst [smem:[#allocation22_spill]] %s7090_s11  ;;  %s205_s12 = sadd.s32 1, %s6997_s29 }
   0xc   : > { %s202_s13 = ssub.s32 %s7001_s30, %s7090_s11  ;;  %p215_p0 = scmp.ne.s32.totalorder %s6997_s29, %s6993_s28 }
   0xd   : > { %p203_p1 = scmp.eq.s32.totalorder %s202_s13, 0  ;;  %p216_p2 = scmp.eq.s32.totalorder %s7086_s9, 1 }
   0xe   : > { %p221_p3 = scmp.ne.s32.totalorder %s6993_s28, %s6989_s27  ;;  %p222_p4 = scmp.eq.s32.totalorder %s4611_s10, 1 }
   0xf   : > { %s7101_s14 = scalar_select %p203_p1, %s6997_s29, %s205_s12  }
  0x10   : > { %p7103_p5 = por %p216_p2, %p215_p0  ;;  %p7107_p6 = por %p222_p4, %p221_p3 }
  0x11   : > { %7595 = sst [smem:[#allocation23_spill]] %s7101_s14  ;;  %p4612_p7 = scmp.ge.s32.totalorder %s7001_s30, 1 }
  0x12   : > { %s7596_s15 = scalar_select %p7103_p5, 1, 0 }
  0x13   : > { %s7597_s16 = scalar_select %p7107_p6, 1, 0 }
  0x14   : > { %p229_p8 = scmp.lt.s32.totalorder %s7001_s30, 3  ;;  %p7584_p9 = scmp.eq.s32.totalorder %s7086_s9, 0 }
  0x15   : > { %s7003_s18 = smov [#allocation6]   ;;  %s7004_s21 = smov [#allocation9]  }
  0x16   : > { %p7114_p10 = pnand %p4612_p7, %p229_p8  ;;  %s254_s19 = sshll.u32 %s7003_s18, 4  ;;  %s255_s19 = int_to_ptr.vmem [resolvable:$true] %s254_s19 }
  0x17   : > { %s278_s22 = sshll.u32 %s7004_s21, 4  ;;  %s7600_s2 = sld [smem:[#allocation24_spill]]  ;;  %s7126_s22 = int_to_ptr.vmem [resolvable:$true] %s278_s22 }
  0x18   : > { %s7598_s17 = scalar_select %p7114_p10, 1, 0 }
  0x19   : > { %p6636_p11 = pneg %p7114_p10 }
  0x1b   : > { %p7122_p12 = pnand %p7584_p9, %p6636_p11 }
  0x1d   : > { %s6727_s25 = scalar_lea.hbm %s7600_s2, 2048  ;;  %p7136_p0 = pneg %p7122_p12 }
  0x1e   : > { %p6728_p13 = scmp.ne.s32.totalorder %s7600_s2, %s6727_s25  ;;  %p6734_p3 = scmp.lt.u32.totalorder %s6727_s25, %s7600_s2 }
  0x20   : > { %p6730_p1 = pnand %p7136_p0, %p6728_p13 }
  0x22   : > { %p6731_p2 = pneg %p6730_p1 }
  0x24   : > { %p6736_p4 = pnand %p6734_p3, %p6731_p2 }
  0x26   : > { %6739 = shalt.err (!%p6736_p4)
}
  0x27   : > { %s6740_s21 = scalar_lea.vmem %s255_s19, 2048  ;;  %p6748_p9 = scmp.lt.s32.totalorder %s255_s19, %s255_s19 }
  0x28   : > { %p6741_p7 = scmp.ne.s32.totalorder %s255_s19, %s6740_s21  ;;  %p6749_p6 = scmp.lt.s32.totalorder %s6740_s21, %s6740_s21 }
  0x2a   : > { %p6743_p8 = pnand %p6741_p7, %p7136_p0  ;;  %p6750_p5 = por %p6749_p6, %p6748_p9 }
  0x2c   : > { %p6744_p11 = pneg %p6743_p8 }
  0x2e   : > { %p6751_p10 = pnand %p6750_p5, %p6744_p11 }
  0x30   : > { %6754 = shalt.err (!%p6751_p10)
}
  0x31   : > { %s7590_s23 = smov 128   ;;  %s7591_s24 = smov 8  }
  0x32   : > { %6642 = dma.hbm_to_vmem [thread:$0]  (!%p7122_p12), %s7600_s2, 2048, %s255_s19, [#allocation7], %s7590_s23, %s7590_s23, %s7591_s24  }
  0x33   : > { %s6755_s18 = scalar_lea.hbm %s7579_s4, 196608 }
  0x34   : > { %p6756_p5 = scmp.ne.s32.totalorder %s7579_s4, %s6755_s18  ;;  %p6762_p10 = scmp.lt.u32.totalorder %s6755_s18, %s7579_s4 }
  0x36   : > { %p6758_p6 = pnand %p6756_p5, %p7136_p0 }
  0x38   : > { %p6759_p9 = pneg %p6758_p6 }
  0x3a   : > { %p6764_p13 = pnand %p6762_p10, %p6759_p9 }
  0x3c   : > { %6767 = shalt.err (!%p6764_p13)
}
  0x3d   : > { %s6768_s19 = scalar_lea.vmem %s7126_s22, 196608  ;;  %p6776_p4 = scmp.lt.s32.totalorder %s7126_s22, %s7126_s22 }
  0x3e   : > { %p6769_p1 = scmp.ne.s32.totalorder %s7126_s22, %s6768_s19  ;;  %p6777_p7 = scmp.lt.s32.totalorder %s6768_s19, %s6768_s19 }
  0x40   : > { %p6771_p2 = pnand %p6769_p1, %p7136_p0  ;;  %p6778_p8 = por %p6777_p7, %p6776_p4 }
  0x42   : > { %p6772_p3 = pneg %p6771_p2 }
  0x44   : > { %p6779_p11 = pnand %p6778_p8, %p6772_p3 }
  0x46   : > { %6782 = shalt.err (!%p6779_p11)
}
  0x47   : > { %s7007_s14 = smov 1024   ;;  %s7008_s29 = smov 64  }
  0x48   : > { %6648 = dma.hbm_to_vmem [thread:$0]  (!%p7122_p12), %s7579_s4, 196608, %s7126_s22, [#allocation10], %s7007_s14, %s7007_s14, %s7008_s29  }
  0x49   : > { %s7009_s26 = smov [#allocation12]   ;;  %s7010_s13 = smov [#allocation3]  }
  0x4a   : > { %s302_s10 = sshll.u32 %s7009_s26, 4  ;;  %s241_s18 = sshll.u32 %s7010_s13, 4  ;;  %s303_s10 = int_to_ptr.vmem [resolvable:$true] %s302_s10  ;;  %s7178_s18 = int_to_ptr.vmem [resolvable:$true] %s241_s18 }
  0x4b   : > { %s6783_s23 = scalar_lea.hbm %s7581_s6, 16384 }
  0x4c   : > { %p6784_p5 = scmp.ne.s32.totalorder %s7581_s6, %s6783_s23  ;;  %p6790_p10 = scmp.lt.u32.totalorder %s6783_s23, %s7581_s6 }
  0x4e   : > { %p6786_p6 = pnand %p6784_p5, %p7136_p0 }
  0x50   : > { %p6787_p9 = pneg %p6786_p6 }
  0x52   : > { %p6792_p13 = pnand %p6790_p10, %p6787_p9 }
  0x54   : > { %6795 = shalt.err (!%p6792_p13)
}
  0x55   : > { %s6796_s14 = scalar_lea.vmem %s303_s10, 16384  ;;  %p6804_p4 = scmp.lt.s32.totalorder %s303_s10, %s303_s10 }
  0x56   : > { %p6797_p1 = scmp.ne.s32.totalorder %s303_s10, %s6796_s14  ;;  %p6805_p7 = scmp.lt.s32.totalorder %s6796_s14, %s6796_s14 }
  0x58   : > { %p6799_p2 = pnand %p6797_p1, %p7136_p0  ;;  %p6806_p8 = por %p6805_p7, %p6804_p4 }
  0x5a   : > { %p6800_p3 = pneg %p6799_p2 }
  0x5c   : > { %p6807_p11 = pnand %p6806_p8, %p6800_p3 }
  0x5e   : > { %6810 = shalt.err (!%p6807_p11)
}
  0x5f   : > { %s7602_s2 = smov 8   ;;  %s7603_s24 = smov 128  }
  0x60   : > { %6654 = dma.hbm_to_vmem [thread:$0]  (!%p7122_p12), %s7581_s6, 16384, %s303_s10, [#allocation13], %s7603_s24, %s7603_s24, %s7602_s2  }
  0x61   : > { %s6811_s13 = scalar_lea.hbm %s7576_s1, 512 }
  0x62   : > { %p6812_p5 = scmp.ne.s32.totalorder %s7576_s1, %s6811_s13  ;;  %p6818_p10 = scmp.lt.u32.totalorder %s6811_s13, %s7576_s1 }
  0x64   : > { %p6814_p6 = pnand %p6812_p5, %p7136_p0 }
  0x66   : > { %p6815_p9 = pneg %p6814_p6 }
  0x68   : > { %p6820_p13 = pnand %p6818_p10, %p6815_p9 }
  0x6a   : > { %6823 = shalt.err (!%p6820_p13)
}
  0x6b   : > { %s6824_s10 = scalar_lea.vmem %s7178_s18, 512  ;;  %p6832_p4 = scmp.lt.s32.totalorder %s7178_s18, %s7178_s18 }
  0x6c   : > { %p6825_p1 = scmp.ne.s32.totalorder %s7178_s18, %s6824_s10  ;;  %p6833_p7 = scmp.lt.s32.totalorder %s6824_s10, %s6824_s10 }
  0x6e   : > { %p6827_p2 = pnand %p6825_p1, %p7136_p0  ;;  %p6834_p8 = por %p6833_p7, %p6832_p4 }
  0x70   : > { %p6828_p3 = pneg %p6827_p2 }
  0x72   : > { %p6835_p11 = pnand %p6834_p8, %p6828_p3 }
  0x74   : > { %6838 = shalt.err (!%p6835_p11)
}
  0x75   : > { %s7011_s14 = smov 256   ;;  %s7012_s2 = smov 16  }
  0x76   : > { %6639 = dma.hbm_to_vmem [thread:$0]  (!%p7122_p12), %s7576_s1, 512, %s7178_s18, [#allocation4], %s7011_s14, %s7011_s14, %s7012_s2  }
  0x77   : > { %s7013_s23 = smov [#allocation8]   ;;  %s7014_s26 = smov [#allocation11]  }
  0x78   : > { %s268_s25 = sshll.u32 %s7013_s23, 4  ;;  %s292_s13 = sshll.u32 %s7014_s26, 4  ;;  %s269_s25 = int_to_ptr.vmem [resolvable:$true] %s268_s25  ;;  %s7224_s13 = int_to_ptr.vmem [resolvable:$true] %s292_s13 }
  0x79   : > { %s6839_s11 = scalar_lea.hbm %s7578_s3, 16 }
  0x7a   : > { %p6840_p5 = scmp.ne.s32.totalorder %s7578_s3, %s6839_s11  ;;  %p6846_p10 = scmp.lt.u32.totalorder %s6839_s11, %s7578_s3 }
  0x7c   : > { %p6842_p6 = pnand %p6840_p5, %p7136_p0 }
  0x7e   : > { %p6843_p9 = pneg %p6842_p6 }
  0x80   : > { %p6848_p13 = pnand %p6846_p10, %p6843_p9 }
  0x82   : > { %6851 = shalt.err (!%p6848_p13)
}
  0x83   : > { %s6852_s14 = scalar_lea.vmem %s269_s25, 16  ;;  %s6859_s2 = scalar_lea.vmem %s269_s25, 32 }
  0x84   : > { %p6853_p1 = scmp.ne.s32.totalorder %s269_s25, %s6852_s14  ;;  %p6860_p4 = scmp.lt.s32.totalorder %s269_s25, %s269_s25 }
  0x85   : > { %p6861_p7 = scmp.lt.s32.totalorder %s6859_s2, %s6852_s14 }
  0x86   : > { %p6855_p2 = pnand %p6853_p1, %p7136_p0 }
  0x87   : > { %p6862_p8 = por %p6861_p7, %p6860_p4 }
  0x88   : > { %p6856_p3 = pneg %p6855_p2 }
  0x8a   : > { %p6863_p11 = pnand %p6862_p8, %p6856_p3 }
  0x8c   : > { %6866 = shalt.err (!%p6863_p11)
}
  0x8d   : > { %6645 = dma.hbm_to_vmem [thread:$0]  (!%p7122_p12), %s7578_s3, 16, %s269_s25, [#allocation7]  }
  0x8e   : > { %s6867_s19 = scalar_lea.hbm %s7580_s5, 128 }
  0x8f   : > { %p6868_p5 = scmp.ne.s32.totalorder %s7580_s5, %s6867_s19  ;;  %p6874_p10 = scmp.lt.u32.totalorder %s6867_s19, %s7580_s5 }
  0x91   : > { %p6870_p6 = pnand %p6868_p5, %p7136_p0 }
  0x93   : > { %p6871_p9 = pneg %p6870_p6 }
  0x95   : > { %p6876_p13 = pnand %p6874_p10, %p6871_p9 }
  0x97   : > { %6879 = shalt.err (!%p6876_p13)
}
  0x98   : > { %s6880_s25 = scalar_lea.vmem %s7224_s13, 128  ;;  %p6888_p4 = scmp.lt.s32.totalorder %s7224_s13, %s7224_s13 }
  0x99   : > { %p6881_p1 = scmp.ne.s32.totalorder %s7224_s13, %s6880_s25  ;;  %p6889_p7 = scmp.lt.s32.totalorder %s6880_s25, %s6880_s25 }
  0x9b   : > { %p6883_p2 = pnand %p6881_p1, %p7136_p0  ;;  %p6890_p8 = por %p6889_p7, %p6888_p4 }
  0x9d   : > { %p6884_p3 = pneg %p6883_p2 }
  0x9f   : > { %p6891_p11 = pnand %p6890_p8, %p6884_p3 }
  0xa1   : > { %6894 = shalt.err (!%p6891_p11)
}
  0xa2   : > { %6651 = dma.hbm_to_vmem [thread:$0]  (!%p7122_p12), %s7580_s5, 128, %s7224_s13, [#allocation10]  }
  0xa3   : > { %s7015_s2 = smov [#allocation14]   ;;  %s6895_s21 = scalar_lea.hbm %s7582_s7, 16 }
  0xa4   : > { %s316_s29 = sshll.u32 %s7015_s2, 4  ;;  %p6896_p5 = scmp.ne.s32.totalorder %s7582_s7, %s6895_s21  ;;  %s317_s29 = int_to_ptr.vmem [resolvable:$true] %s316_s29 }
  0xa5   : > { %p6902_p10 = scmp.lt.u32.totalorder %s6895_s21, %s7582_s7 }
  0xa6   : > { %p6898_p6 = pnand %p6896_p5, %p7136_p0 }
  0xa8   : > { %p6899_p9 = pneg %p6898_p6 }
  0xaa   : > { %p6904_p13 = pnand %p6902_p10, %p6899_p9 }
  0xac   : > { %6907 = shalt.err (!%p6904_p13)
}
  0xad   : > { %s6908_s13 = scalar_lea.vmem %s317_s29, 16  ;;  %s6915_s24 = scalar_lea.vmem %s317_s29, 32 }
  0xae   : > { %p6909_p1 = scmp.ne.s32.totalorder %s317_s29, %s6908_s13  ;;  %p6916_p4 = scmp.lt.s32.totalorder %s317_s29, %s317_s29 }
  0xaf   : > { %p6917_p7 = scmp.lt.s32.totalorder %s6915_s24, %s6908_s13 }
  0xb0   : > { %p6911_p2 = pnand %p6909_p1, %p7136_p0 }
  0xb1   : > { %p6918_p8 = por %p6917_p7, %p6916_p4 }
  0xb2   : > { %p6912_p3 = pneg %p6911_p2 }
  0xb4   : > { %p6919_p11 = pnand %p6918_p8, %p6912_p3 }
  0xb6   : > { %6922 = shalt.err (!%p6919_p11)
}
  0xb7   : > { %6657 = dma.hbm_to_vmem [thread:$0]  (!%p7122_p12), %s7582_s7, 16, %s317_s29, [#allocation13]  }
  0xb8   : > { %p7604_p5 = scmp.ne.s32.totalorder %s7598_s17, 0 }
  0xb9   : > { %p7605_p6 = scmp.eq.s32.totalorder (!%p7604_p5), %s7086_s9, 0 }
  0xba   : > { %337 = sbr.rel (%p7604_p5) target bundleno = 1862 (0x746), region = 52 }
  0xc1   : > { %6968 = dma.done.wait (%p7605_p6), [#allocation4], 512   ;;  %p7606_p0 = pmov %p7605_p6 }
  0xc3   : > { %6970 = vsyncadd (%p7606_p0), [#allocation4], 4294966784  ;;  %p7607_p9 = pmov %p7606_p0 }
  0xc4   : > { %p7608_p10 = pmov %p7606_p0 }
  0xc5   : > { %6972 = dma.done.wait (%p7607_p9), [#allocation7], 2064  }
  0xc6   : > { %6974 = vsyncadd (%p7608_p10), [#allocation7], 4294965232  ;;  %p7609_p13 = pmov %p7606_p0 }
  0xc7   : > { %p7610_p12 = pmov %p7606_p0 }
  0xc8   : > { %6976 = dma.done.wait (%p7609_p13), [#allocation10], 196736  }
  0xc9   : > { %6978 = vsyncadd (%p7610_p12), [#allocation10], 4294770560  ;;  %p7611_p1 = pmov %p7606_p0 }
  0xca   : > { %p7612_p2 = pmov %p7606_p0 }
  0xcb   : > { %6980 = dma.done.wait (%p7611_p1), [#allocation13], 16400  }
  0xcc   : > { %6982 = vsyncadd (%p7612_p2), [#allocation13], 4294950896  ;;  %p394_p3 = scmp.lt.s32.totalorder %s7086_s9, 1  ;;  %v7016_v0 = vmov 0.0|0.0   ;;  %vm423_vm0 = vcmask 211968   ;;  %v400_v9 = vld [vmem:[#allocation3 + $0x8] sm:$0xff] }
  0xcd   : > { %4830 = vmatprep.subr.bf16.mxu0 %v7016_v0  ;;  %4631 = vmatprep.mubr.msk.f32.mxu0 %vm423_vm0, %v400_v9  ;;  %v509_v13 = vld [vmem:[#allocation6] sm:$0xff]  ;;  %v510_v14 = vld [vmem:[#allocation6 + $0x8] sm:$0xff]  ;;  %v511_v15 = vld [vmem:[#allocation6 + $0x10] sm:$0xff]  ;;  %vm430_vm1 = vcmask 1041408   ;;  %vm7017_vm2 = vmmov 1   ;;  %s392_s29 = sand.u32 1, %s6993_s28  }
  0xce   : > { %s395_s17 = scalar_select %p394_p3, %s7086_s9, 1  ;;  %v4861_v16 = vpack.c.bf16 %v510_v14, %v509_v13  ;;  %v512_v17 = vld [vmem:[#allocation6 + $0x18] sm:$0xff]  ;;  %v513_v19 = vld [vmem:[#allocation6 + $0x20] sm:$0xff]  ;;  %v514_v20 = vld [vmem:[#allocation6 + $0x28] sm:$0xff] }
  0xcf   : > { %v4865_v18 = vpack.c.bf16 %v512_v17, %v511_v15  ;;  %v4869_v24 = vpack.c.bf16 %v514_v20, %v513_v19  ;;  %v515_v25 = vld [vmem:[#allocation6 + $0x30] sm:$0xff]  ;;  %v516_v26 = vld [vmem:[#allocation6 + $0x38] sm:$0xff]  ;;  %v517_v31 = vld [vmem:[#allocation6 + $0x40] sm:$0xff]  ;;  %s4634_s23 = sshll.u32 %s7086_s9, 4  ;;  %s393_s26 = scalar_lea.vmem [#allocation15], %s392_s29 }
  0xd0   : > { %s6605_s20 = smul.u32 160, %s395_s17  ;;  %4862 = vmatprep.subr.bf16.mxu1 %v4861_v16  ;;  %v4873_v30 = vpack.c.bf16 %v516_v26, %v515_v25  ;;  %v518_v32 = vld [vmem:[#allocation6 + $0x48] sm:$0xff]  ;;  %v519_v37 = vld [vmem:[#allocation6 + $0x50] sm:$0xff]  ;;  %v520_v38 = vld [vmem:[#allocation6 + $0x58] sm:$0xff]  ;;  %s4487_s21 = sshll.u32 %s393_s26, 4  ;;  %s7535_s21 = int_to_ptr.vmem [resolvable:$true] %s4487_s21 }
  0xd1   : > { %4864 = vmatpush3.bf16.msra.mxu1 %v4861_v16  ;;  %v4877_v36 = vpack.c.bf16 %v518_v32, %v517_v31  ;;  %v4881_v42 = vpack.c.bf16 %v520_v38, %v519_v37  ;;  %v521_v43 = vld [vmem:[#allocation6 + $0x60] sm:$0xff]  ;;  %v522_v44 = vld [vmem:[#allocation6 + $0x68] sm:$0xff]  ;;  %vm4859_vm3 = vmpackc.low %vm430_vm1, %vm7017_vm2  ;;  %s7533_s22 = scalar_lea.hbm %s7583_s8, %s4634_s23  ;;  %s4475_s10 = scalar_lea.sflag [#allocation5], %s392_s29 }
  0xd2   : > { %s7309_s2 = scalar_lea.vmem %s7575_s0, %s6605_s20  ;;  %4866 = vmatprep.subr.bf16.mxu1 %v4865_v18  ;;  %v4885_v48 = vpack.c.bf16 %v522_v44, %v521_v43  ;;  %v399_v53 = vld [vmem:[#allocation3] sm:$0xff]  ;;  %v402_v54 = vld [vmem:[#allocation3 + $0x18] sm:$0xf]  ;;  %v401_v55 = vld [vmem:[#allocation3 + $0x10] sm:$0xf]  ;;  %s6923_s13 = scalar_lea.vmem %s7535_s21, 16 }
  0xd3   : > { %v403_v1 = vld [vmem:[%s7309_s2] sm:$0xff]  ;;  %v404_v2 = vld [vmem:[%s7309_s2 + $0x8] sm:$0xff]  ;;  %v405_v3 = vld [vmem:[%s7309_s2 + $0x10] sm:$0xff]  ;;  %p6924_p4 = scmp.ne.s32.totalorder %s7535_s21, %s6923_s13  ;;  %p7615_p7 = scmp.ne.s32.totalorder %s7596_s15, 0 }
  0xd4   : > { %v4831_v4 = vpack.c.bf16 %v404_v2, %v403_v1  ;;  %v406_v5 = vld [vmem:[%s7309_s2 + $0x18] sm:$0xff]  ;;  %v407_v7 = vld [vmem:[%s7309_s2 + $0x20] sm:$0xff]  ;;  %v408_v8 = vld [vmem:[%s7309_s2 + $0x28] sm:$0xff]  ;;  %s7019_s9 = smov [#allocation15]  }
  0xd5   : > { %v4834_v6 = vpack.c.bf16 %v406_v5, %v405_v3  ;;  %v4837_v10 = vpack.c.bf16 %v408_v8, %v407_v7  ;;  %v409_v11 = vld [vmem:[%s7309_s2 + $0x30] sm:$0xff]  ;;  %v410_v12 = vld [vmem:[%s7309_s2 + $0x38] sm:$0xff]  ;;  %v411_v22 = vld [vmem:[%s7309_s2 + $0x40] sm:$0xff]  ;;  %4868 = vmatpush3.bf16.msra.mxu1 %v4865_v18  ;;  %p6925_p8 = pnand %p6924_p4, %p7615_p7  ;;  %s6927_s24 = sshll.u32 %s7019_s9, 4  ;;  %s6928_s24 = int_to_ptr.vmem [resolvable:$false] %s6927_s24 }
  0xd6   : > { %4832 = vmatpush1.bf16.msra.mxu0 %v4831_v4  ;;  %v4840_v21 = vpack.c.bf16 %v410_v12, %v409_v11  ;;  %v412_v23 = vld [vmem:[%s7309_s2 + $0x48] sm:$0xff]  ;;  %v413_v28 = vld [vmem:[%s7309_s2 + $0x50] sm:$0xff]  ;;  %v414_v29 = vld [vmem:[%s7309_s2 + $0x58] sm:$0xff]  ;;  %4870 = vmatprep.subr.bf16.mxu1 %v4869_v24  ;;  %s6929_s25 = scalar_lea.vmem %s6928_s24, 32  ;;  %p6930_p5 = scmp.lt.s32.totalorder %s7535_s21, %s6928_s24 }
  0xd7   : > { %4833 = vmatprep.subr.bf16.mxu0 %v7016_v0  ;;  %v4843_v27 = vpack.c.bf16 %v412_v23, %v411_v22  ;;  %v4846_v33 = vpack.c.bf16 %v414_v29, %v413_v28  ;;  %v415_v34 = vld [vmem:[%s7309_s2 + $0x60] sm:$0xff]  ;;  %v416_v35 = vld [vmem:[%s7309_s2 + $0x68] sm:$0xff]  ;;  %v417_v40 = vld [vmem:[%s7309_s2 + $0x70] sm:$0xff]  ;;  %p6926_p11 = pneg %p6925_p8  ;;  %p6931_p6 = scmp.lt.s32.totalorder %s6929_s25, %s6923_s13 }
  0xd8   : > { %v4849_v39 = vpack.c.bf16 %v416_v35, %v415_v34  ;;  %v418_v41 = vld [vmem:[%s7309_s2 + $0x78] sm:$0xff]  ;;  %v419_v46 = vld [vmem:[%s7309_s2 + $0x80] sm:$0xff]  ;;  %v420_v47 = vld [vmem:[%s7309_s2 + $0x88] sm:$0xff] }
  0xd9   : > { %4872 = vmatpush3.bf16.msra.mxu1 %v4869_v24  ;;  %v4852_v45 = vpack.c.bf16 %v418_v41, %v417_v40  ;;  %v4855_v49 = vpack.c.bf16 %v420_v47, %v419_v46  ;;  %v421_v50 = vld [vmem:[%s7309_s2 + $0x90] sm:$0xff]  ;;  %v422_v51 = vld [vmem:[%s7309_s2 + $0x98] sm:$0x3]  ;;  %v523_v56 = vld [vmem:[#allocation6 + $0x70] sm:$0xff]  ;;  %p6932_p0 = por %p6931_p6, %p6930_p5 }
  0xda   : > { %4835 = vmatpush1.bf16.msra.mxu0 %v4834_v6  ;;  %4874 = vmatprep.subr.bf16.mxu1 %v4873_v30  ;;  %v4858_v52 = vpack.c.bf16 %v422_v51, %v421_v50  ;;  %v524_v57 = vld [vmem:[#allocation6 + $0x78] sm:$0xff]  ;;  %v713_v59 = vld [vmem:[#allocation9 + $0x8] sm:$0xff] }
  0xdb   : > { %4836 = vmatprep.subr.bf16.mxu0 %v7016_v0  ;;  %v4889_v58 = vpack.c.bf16 %v524_v57, %v523_v56  ;;  %v721_v60 = vld [vmem:[#allocation9 + $0x48] sm:$0xff]  ;;  %v715_v61 = vld [vmem:[#allocation9 + $0x18] sm:$0xff]  ;;  %v714_v1 = vld [vmem:[#allocation9 + $0x10] sm:$0xff]  ;;  %p6933_p9 = pnand %p6932_p0, %p6926_p11 }
  0xdc   : > { %v4893_v62 = vpack.c.bf16 %v721_v60, %v713_v59  ;;  %v723_v63 = vld [vmem:[#allocation9 + $0x58] sm:$0xff]  ;;  %v722_v2 = vld [vmem:[#allocation9 + $0x50] sm:$0xff]  ;;  %v720_v59 = vld [vmem:[#allocation9 + $0x40] sm:$0xff] }
  0xdd   : > { %4876 = vmatpush3.bf16.msra.mxu1 %v4873_v30  ;;  %v5279_v3 = vpack.c.bf16 %v722_v2, %v714_v1  ;;  %v731_v4 = vld [vmem:[#allocation9 + $0x98] sm:$0xff]  ;;  %v730_v7 = vld [vmem:[#allocation9 + $0x90] sm:$0xff]  ;;  %v728_v2 = vld [vmem:[#allocation9 + $0x80] sm:$0xff] }
  0xde   : > { %4838 = vmatpush1.bf16.msra.mxu0 %v4837_v10  ;;  %4878 = vmatprep.subr.bf16.mxu1 %v4877_v36  ;;  %v739_v5 = vld [vmem:[#allocation9 + $0xd8] sm:$0xff]  ;;  %v738_v8 = vld [vmem:[#allocation9 + $0xd0] sm:$0xff] }
  0xdf   : > { %4839 = vmatprep.subr.bf16.mxu0 %v7016_v0  ;;  %v5281_v6 = vpack.c.bf16 %v739_v5, %v731_v4  ;;  %v5283_v9 = vpack.c.bf16 %v738_v8, %v730_v7  ;;  %v747_v10 = vld [vmem:[#allocation9 + $0x118] sm:$0xff]  ;;  %v746_v13 = vld [vmem:[#allocation9 + $0x110] sm:$0xff]  ;;  %v745_v5 = vld [vmem:[#allocation9 + $0x108] sm:$0xff] }
  0xe0   : > { %v755_v11 = vld [vmem:[#allocation9 + $0x158] sm:$0xff]  ;;  %v754_v14 = vld [vmem:[#allocation9 + $0x150] sm:$0xff] }
  0xe1   : > { %4880 = vmatpush3.bf16.msra.mxu1 %v4877_v36  ;;  %v5285_v12 = vpack.c.bf16 %v755_v11, %v747_v10  ;;  %v5287_v15 = vpack.c.bf16 %v754_v14, %v746_v13  ;;  %v763_v16 = vld [vmem:[#allocation9 + $0x198] sm:$0xff]  ;;  %v762_v19 = vld [vmem:[#allocation9 + $0x190] sm:$0xff]  ;;  %v744_v10 = vld [vmem:[#allocation9 + $0x100] sm:$0xff] }
  0xe2   : > { %4841 = vmatpush1.bf16.msra.mxu0 %v4840_v21  ;;  %4882 = vmatprep.subr.bf16.mxu1 %v4881_v42  ;;  %v771_v17 = vld [vmem:[#allocation9 + $0x1d8] sm:$0xff]  ;;  %v770_v20 = vld [vmem:[#allocation9 + $0x1d0] sm:$0xff]  ;;  %v752_v11 = vld [vmem:[#allocation9 + $0x140] sm:$0xff] }
  0xe3   : > { %4842 = vmatprep.subr.bf16.mxu0 %v7016_v0  ;;  %v5289_v18 = vpack.c.bf16 %v771_v17, %v763_v16  ;;  %v5291_v21 = vpack.c.bf16 %v770_v20, %v762_v19  ;;  %v779_v22 = vld [vmem:[#allocation9 + $0x218] sm:$0xff]  ;;  %v778_v25 = vld [vmem:[#allocation9 + $0x210] sm:$0xff]  ;;  %v769_v13 = vld [vmem:[#allocation9 + $0x1c8] sm:$0xff]  ;;  %v4903_v14 = vpack.c.bf16 %v752_v11, %v744_v10 }
  0xe4   : > { %v787_v23 = vld [vmem:[#allocation9 + $0x258] sm:$0xff]  ;;  %v786_v26 = vld [vmem:[#allocation9 + $0x250] sm:$0xff]  ;;  %v760_v16 = vld [vmem:[#allocation9 + $0x180] sm:$0xff] }
  0xe5   : > { %4884 = vmatpush3.bf16.msra.mxu1 %v4881_v42  ;;  %v5293_v24 = vpack.c.bf16 %v787_v23, %v779_v22  ;;  %v795_v28 = vld [vmem:[#allocation9 + $0x298] sm:$0xff]  ;;  %v794_v31 = vld [vmem:[#allocation9 + $0x290] sm:$0xff]  ;;  %v768_v17 = vld [vmem:[#allocation9 + $0x1c0] sm:$0xff] }
  0xe6   : > { %4844 = vmatpush1.bf16.msra.mxu0 %v4843_v27  ;;  %4886 = vmatprep.subr.bf16.mxu1 %v4885_v48  ;;  %v5295_v27 = vpack.c.bf16 %v786_v26, %v778_v25  ;;  %v803_v29 = vld [vmem:[#allocation9 + $0x2d8] sm:$0xff]  ;;  %v802_v32 = vld [vmem:[#allocation9 + $0x2d0] sm:$0xff]  ;;  %v785_v19 = vld [vmem:[#allocation9 + $0x248] sm:$0xff]  ;;  %v4907_v20 = vpack.c.bf16 %v768_v17, %v760_v16 }
  0xe7   : > { %4845 = vmatprep.subr.bf16.mxu0 %v7016_v0  ;;  %v5297_v30 = vpack.c.bf16 %v803_v29, %v795_v28  ;;  %v811_v34 = vld [vmem:[#allocation9 + $0x318] sm:$0xff]  ;;  %v810_v37 = vld [vmem:[#allocation9 + $0x310] sm:$0xff]  ;;  %v776_v22 = vld [vmem:[#allocation9 + $0x200] sm:$0xff] }
  0xe8   : > { %v819_v35 = vld [vmem:[#allocation9 + $0x358] sm:$0xff]  ;;  %v818_v38 = vld [vmem:[#allocation9 + $0x350] sm:$0xff]  ;;  %v784_v23 = vld [vmem:[#allocation9 + $0x240] sm:$0xff] }
  0xe9   : > { %4888 = vmatpush3.bf16.msra.mxu1 %v4885_v48  ;;  %v5301_v36 = vpack.c.bf16 %v819_v35, %v811_v34  ;;  %v827_v40 = vld [vmem:[#allocation9 + $0x398] sm:$0xff]  ;;  %v826_v43 = vld [vmem:[#allocation9 + $0x390] sm:$0xff]  ;;  %v801_v25 = vld [vmem:[#allocation9 + $0x2c8] sm:$0xff]  ;;  %v4911_v26 = vpack.c.bf16 %v784_v23, %v776_v22 }
  0xea   : > { %4847 = vmatpush1.bf16.msra.mxu0 %v4846_v33  ;;  %4890 = vmatprep.subr.bf16.mxu1 %v4889_v58  ;;  %v5299_v33 = vpack.c.bf16 %v802_v32, %v794_v31  ;;  %v835_v41 = vld [vmem:[#allocation9 + $0x3d8] sm:$0xff]  ;;  %v834_v44 = vld [vmem:[#allocation9 + $0x3d0] sm:$0xff]  ;;  %v792_v28 = vld [vmem:[#allocation9 + $0x280] sm:$0xff] }
  0xeb   : > { %4848 = vmatprep.subr.bf16.mxu0 %v7016_v0  ;;  %v5305_v42 = vpack.c.bf16 %v835_v41, %v827_v40  ;;  %v843_v46 = vld [vmem:[#allocation9 + $0x418] sm:$0xff]  ;;  %v850_v50 = vld [vmem:[#allocation9 + $0x450] sm:$0xff]  ;;  %v800_v29 = vld [vmem:[#allocation9 + $0x2c0] sm:$0xff] }
  0xec   : > { %v851_v47 = vld [vmem:[#allocation9 + $0x458] sm:$0xff]  ;;  %v866_v56 = vld [vmem:[#allocation9 + $0x4d0] sm:$0xff]  ;;  %v817_v31 = vld [vmem:[#allocation9 + $0x348] sm:$0xff]  ;;  %v4915_v32 = vpack.c.bf16 %v800_v29, %v792_v28 }
  0xed   : > { %4892 = vmatpush3.bf16.msra.mxu1 %v4889_v58  ;;  %v5309_v48 = vpack.c.bf16 %v851_v47, %v843_v46  ;;  %v712_v58 = vld [vmem:[#allocation9] sm:$0xff]  ;;  %v913_v16 = vld [vmem:[#allocation9 + $0x648] sm:$0xff]  ;;  %v907_v17 = vld [vmem:[#allocation9 + $0x618] sm:$0xff] }
  0xee   : > { %4850 = vmatpush1.bf16.msra.mxu0 %v4849_v39  ;;  %4894 = vmatprep.subr.bf16.mxu1 %v4893_v62  ;;  %v5303_v39 = vpack.c.bf16 %v818_v38, %v810_v37  ;;  %v737_v62 = vld [vmem:[#allocation9 + $0xc8] sm:$0xff]  ;;  %v808_v34 = vld [vmem:[#allocation9 + $0x300] sm:$0xff]  ;;  %v923_v29 = vld [vmem:[#allocation9 + $0x698] sm:$0xff] }
  0xef   : > { %4851 = vmatprep.subr.bf16.mxu0 %v7016_v0  ;;  %v816_v35 = vld [vmem:[#allocation9 + $0x340] sm:$0xff]  ;;  %v833_v37 = vld [vmem:[#allocation9 + $0x3c8] sm:$0xff] }
  0xf0   : > { %v4919_v38 = vpack.c.bf16 %v816_v35, %v808_v34  ;;  %v824_v40 = vld [vmem:[#allocation9 + $0x380] sm:$0xff]  ;;  %v929_v28 = vld [vmem:[#allocation9 + $0x6c8] sm:$0xff] }
  0xf1   : > { %v832_v41 = vld [vmem:[#allocation9 + $0x3c0] sm:$0xff] }
  0xf2   : > { %4853 = vmatpush1.bf16.msra.mxu0 %v4852_v45  ;;  %v5307_v45 = vpack.c.bf16 %v834_v44, %v826_v43  ;;  %v849_v43 = vld [vmem:[#allocation9 + $0x448] sm:$0xff]  ;;  %v4923_v44 = vpack.c.bf16 %v832_v41, %v824_v40  ;;  %v840_v46 = vld [vmem:[#allocation9 + $0x400] sm:$0xff]  ;;  %v939_v41 = vld [vmem:[#allocation9 + $0x718] sm:$0xff] }
  0xf3   : > { %4854 = vmatprep.subr.bf16.mxu0 %v7016_v0  ;;  %v848_v47 = vld [vmem:[#allocation9 + $0x440] sm:$0xff]  ;;  %v945_v40 = vld [vmem:[#allocation9 + $0x748] sm:$0xff] }
  0xf6   : > { %4856 = vmatpush1.bf16.msra.mxu0 %v4855_v49  ;;  %v842_v49 = vld [vmem:[#allocation9 + $0x410] sm:$0xff] }
  0xf7   : > { %4857 = vmatprep.subr.bf16.mxu0 %v7016_v0  ;;  %v5277_v0 = vpack.c.bf16 %v723_v63, %v715_v61  ;;  %v5311_v51 = vpack.c.bf16 %v850_v50, %v842_v49  ;;  %v729_v61 = vld [vmem:[#allocation9 + $0x88] sm:$0xff]  ;;  %v4927_v50 = vpack.c.bf16 %v848_v47, %v840_v46 }
  0xf8   : > { %v4897_v1 = vpack.c.bf16 %v737_v62, %v729_v61  ;;  %v865_v49 = vld [vmem:[#allocation9 + $0x4c8] sm:$0xff]  ;;  %v880_v62 = vld [vmem:[#allocation9 + $0x540] sm:$0xff] }
  0xfa   : > { %4860 = vmatpush1.bf16.msk.msra.mxu0 %vm4859_vm3, %v4858_v52  ;;  %v859_v52 = vld [vmem:[#allocation9 + $0x498] sm:$0xff] }
  0xfb   : > { %5278 = vmatprep.subr.bf16.mxu0 %v5277_v0  ;;  %v4895_v0 = vpack.c.bf16 %v720_v59, %v712_v58  ;;  %v883_v59 = vld [vmem:[#allocation9 + $0x558] sm:$0xff] }
  0xfd   : > { %499 = vmatmul.mubr.f32.vlgmr.msra.gmra.mrb[0].mxu0 %v399_v53  ;;  %v867_v53 = vld [vmem:[#allocation9 + $0x4d8] sm:$0xff] }
  0xfe   : > { %4632 = vmatprep.mubr.msk.f32.mxu0 %vm423_vm0, %v402_v54  ;;  %5280 = vmatpush1.bf16.msra.mxu0 %v5279_v3  ;;  %v5313_v54 = vpack.c.bf16 %v867_v53, %v859_v52  ;;  %v736_v3 = vld [vmem:[#allocation9 + $0xc0] sm:$0xff] }
  0xff   : > { %5282 = vmatprep.subr.bf16.mxu0 %v5281_v6  ;;  %v753_v6 = vld [vmem:[#allocation9 + $0x148] sm:$0xff]  ;;  %v4899_v8 = vpack.c.bf16 %v736_v3, %v728_v2  ;;  %v856_v52 = vld [vmem:[#allocation9 + $0x480] sm:$0xff] }
 0x100   : > { %v864_v53 = vld [vmem:[#allocation9 + $0x4c0] sm:$0xff]  ;;  %v889_v3 = vld [vmem:[#allocation9 + $0x588] sm:$0xff] }
 0x101   : > { %504 = vmatmul.mubr.f32.gmra.mrb[2].mxu0 %v401_v55  ;;  %v858_v55 = vld [vmem:[#allocation9 + $0x490] sm:$0xff] }
 0x102   : > { %5284 = vmatpush1.bf16.msra.mxu0 %v5283_v9  ;;  %v5315_v57 = vpack.c.bf16 %v866_v56, %v858_v55  ;;  %v4901_v9 = vpack.c.bf16 %v753_v6, %v745_v5  ;;  %v873_v55 = vld [vmem:[#allocation9 + $0x508] sm:$0xff]  ;;  %v891_v5 = vld [vmem:[#allocation9 + $0x598] sm:$0xff] }
 0x103   : > { %5286 = vmatprep.subr.bf16.mxu0 %v5285_v12  ;;  %v761_v12 = vld [vmem:[#allocation9 + $0x188] sm:$0xff] }
 0x104   : > { %v881_v56 = vld [vmem:[#allocation9 + $0x548] sm:$0xff] }
 0x105   : > { %v4933_v58 = vpack.c.bf16 %v881_v56, %v873_v55 }
 0x106   : > { %5288 = vmatpush1.bf16.msra.mxu0 %v5287_v15  ;;  %v4905_v15 = vpack.c.bf16 %v769_v13, %v761_v12  ;;  %v890_v12 = vld [vmem:[#allocation9 + $0x590] sm:$0xff] }
 0x107   : > { %5290 = vmatprep.subr.bf16.mxu0 %v5289_v18  ;;  %v777_v18 = vld [vmem:[#allocation9 + $0x208] sm:$0xff]  ;;  %v898_v13 = vld [vmem:[#allocation9 + $0x5d0] sm:$0xff] }
 0x10a   : > { %5292 = vmatpush1.bf16.msra.mxu0 %v5291_v21  ;;  %v4909_v21 = vpack.c.bf16 %v785_v19, %v777_v18  ;;  %v915_v19 = vld [vmem:[#allocation9 + $0x658] sm:$0xff] }
 0x10b   : > { %5294 = vmatprep.subr.bf16.mxu0 %v5293_v24  ;;  %v793_v24 = vld [vmem:[#allocation9 + $0x288] sm:$0xff]  ;;  %v5325_v22 = vpack.c.bf16 %v915_v19, %v907_v17 }
 0x10e   : > { %5296 = vmatpush1.bf16.msra.mxu0 %v5295_v27  ;;  %v4913_v27 = vpack.c.bf16 %v801_v25, %v793_v24  ;;  %v906_v24 = vld [vmem:[#allocation9 + $0x610] sm:$0xff] }
 0x10f   : > { %5298 = vmatprep.subr.bf16.mxu0 %v5297_v30  ;;  %v809_v30 = vld [vmem:[#allocation9 + $0x308] sm:$0xff]  ;;  %v914_v25 = vld [vmem:[#allocation9 + $0x650] sm:$0xff] }
 0x112   : > { %5300 = vmatpush1.bf16.msra.mxu0 %v5299_v33  ;;  %v4917_v33 = vpack.c.bf16 %v817_v31, %v809_v30  ;;  %v931_v31 = vld [vmem:[#allocation9 + $0x6d8] sm:$0xff] }
 0x113   : > { %5302 = vmatprep.subr.bf16.mxu0 %v5301_v36  ;;  %v825_v36 = vld [vmem:[#allocation9 + $0x388] sm:$0xff]  ;;  %v5329_v34 = vpack.c.bf16 %v931_v31, %v923_v29 }
 0x116   : > { %5304 = vmatpush1.bf16.msra.mxu0 %v5303_v39  ;;  %v4921_v39 = vpack.c.bf16 %v833_v37, %v825_v36  ;;  %v922_v36 = vld [vmem:[#allocation9 + $0x690] sm:$0xff] }
 0x117   : > { %5306 = vmatprep.subr.bf16.mxu0 %v5305_v42  ;;  %v841_v42 = vld [vmem:[#allocation9 + $0x408] sm:$0xff]  ;;  %v930_v37 = vld [vmem:[#allocation9 + $0x6d0] sm:$0xff] }
 0x11a   : > { %5308 = vmatpush1.bf16.msra.mxu0 %v5307_v45  ;;  %v4925_v45 = vpack.c.bf16 %v849_v43, %v841_v42  ;;  %v947_v43 = vld [vmem:[#allocation9 + $0x758] sm:$0xff] }
 0x11b   : > { %5310 = vmatprep.subr.bf16.mxu0 %v5309_v48  ;;  %v857_v48 = vld [vmem:[#allocation9 + $0x488] sm:$0xff]  ;;  %v5333_v46 = vpack.c.bf16 %v947_v43, %v939_v41  ;;  %v978_v41 = vld [vmem:[#allocation9 + $0x850] sm:$0xff] }
 0x11e   : > { %5312 = vmatpush1.bf16.msra.mxu0 %v5311_v51  ;;  %v4929_v51 = vpack.c.bf16 %v865_v49, %v857_v48  ;;  %v938_v48 = vld [vmem:[#allocation9 + $0x710] sm:$0xff] }
 0x11f   : > { %5314 = vmatprep.subr.bf16.mxu0 %v5313_v54  ;;  %v4931_v54 = vpack.c.bf16 %v864_v53, %v856_v52  ;;  %v946_v49 = vld [vmem:[#allocation9 + $0x750] sm:$0xff]  ;;  %v961_v52 = vld [vmem:[#allocation9 + $0x7c8] sm:$0xff]  ;;  %v955_v53 = vld [vmem:[#allocation9 + $0x798] sm:$0xff] }
 0x122   : > { %5316 = vmatpush1.bf16.msra.mxu0 %v5315_v57  ;;  %v875_v57 = vld [vmem:[#allocation9 + $0x518] sm:$0xff] }
 0x123   : > { %v5317_v61 = vpack.c.bf16 %v883_v59, %v875_v57  ;;  %v952_v57 = vld [vmem:[#allocation9 + $0x780] sm:$0xff]  ;;  %v954_v59 = vld [vmem:[#allocation9 + $0x790] sm:$0xff] }
 0x125   : > { %5318 = vmatprep.subr.bf16.mxu0 %v5317_v61  ;;  %v962_v61 = vld [vmem:[#allocation9 + $0x7d0] sm:$0xff] }
 0x1d0   : > { %v500_v60 = vpop.f32.mrb[0].mxu0 }
 0x1d1   : > { %v502_v63 = vpop.f32.mrb[1].mxu0  ;;  %4827 = vmatprep.mubr.f32.mxu1 %v500_v60  ;;  %v872_v60 = vld [vmem:[#allocation9 + $0x500] sm:$0xff] }
 0x1d2   : > { %v874_v63 = vld [vmem:[#allocation9 + $0x510] sm:$0xff] }
 0x1d4   : > { %v505_v4 = vpop.f32.mrb[2].mxu0 }
 0x1d5   : > { %v507_v7 = vpop.f32.mrb[3].mxu0  ;;  %4828 = vmatmul.mubr.f32.vlgmr.msra.gmra.mrb[0].mxu1 %v505_v4  ;;  %v897_v4 = vld [vmem:[#allocation9 + $0x5c8] sm:$0xff] }
 0x1d6   : > { %4896 = vmatpush1.bf16.msra.mxu1 %v4895_v0  ;;  %v882_v0 = vld [vmem:[#allocation9 + $0x550] sm:$0xff]  ;;  %v4937_v6 = vpack.c.bf16 %v897_v4, %v889_v3  ;;  %v899_v7 = vld [vmem:[#allocation9 + $0x5d8] sm:$0xff] }
 0x1d7   : > { %4898 = vmatprep.subr.bf16.mxu1 %v4897_v1  ;;  %v4935_v1 = vpack.c.bf16 %v880_v62, %v872_v60  ;;  %v5319_v2 = vpack.c.bf16 %v882_v0, %v874_v63  ;;  %v5321_v10 = vpack.c.bf16 %v899_v7, %v891_v5  ;;  %v5339_v62 = vpack.c.bf16 %v962_v61, %v954_v59  ;;  %v969_v63 = vld [vmem:[#allocation9 + $0x808] sm:$0xff]  ;;  %v979_v3 = vld [vmem:[#allocation9 + $0x858] sm:$0xff] }
 0x1d8   : > { %v977_v0 = vld [vmem:[#allocation9 + $0x848] sm:$0xff]  ;;  %v609_v5 = vlaneseq }
 0x1d9   : > { %5320 = vmatpush1.bf16.msra.mxu0 %v5319_v2  ;;  %v4957_v2 = vpack.c.bf16 %v977_v0, %v969_v63  ;;  %v1009_v61 = vld [vmem:[#allocation9 + $0x948] sm:$0xff]  ;;  %v1011_v63 = vld [vmem:[#allocation9 + $0x958] sm:$0xff] }
 0x1da   : > { %4900 = vmatpush1.bf16.msra.mxu1 %v4899_v8  ;;  %v888_v8 = vld [vmem:[#allocation9 + $0x580] sm:$0xff]  ;;  %5322 = vmatprep.subr.bf16.mxu0 %v5321_v10  ;;  %v4633_v10 = vld [vmem:[#allocation8] ss:$0 sm:$0xff]  ;;  %vm7345_vm4 = vcmp.lt.s32.totalorder %v609_v5, 128 }
 0x1db   : > { %4902 = vmatprep.subr.bf16.mxu1 %v4901_v9  ;;  %v896_v9 = vld [vmem:[#allocation9 + $0x5c0] sm:$0xff] }
 0x1dc   : > { %v4939_v11 = vpack.c.bf16 %v896_v9, %v888_v8  ;;  %v7342_v9 = vshrl.u32 %v609_v5, 7 }
 0x1de   : > { %4904 = vmatpush1.bf16.msra.mxu1 %v4903_v14  ;;  %v5323_v14 = vpack.c.bf16 %v898_v13, %v890_v12  ;;  %v7377_v43 = vsub.s32 0, %v7342_v9 }
 0x1df   : > { %4906 = vmatprep.subr.bf16.mxu1 %v4905_v15  ;;  %v905_v15 = vld [vmem:[#allocation9 + $0x608] sm:$0xff] }
 0x1e0   : > { %5324 = vmatpush1.bf16.msra.mxu0 %v5323_v14  ;;  %v4941_v18 = vpack.c.bf16 %v913_v16, %v905_v15 }
 0x1e1   : > { %5326 = vmatprep.subr.bf16.mxu0 %v5325_v22 }
 0x1e2   : > { %4908 = vmatpush1.bf16.msra.mxu1 %v4907_v20  ;;  %v904_v20 = vld [vmem:[#allocation9 + $0x600] sm:$0xff] }
 0x1e3   : > { %4910 = vmatprep.subr.bf16.mxu1 %v4909_v21  ;;  %v912_v21 = vld [vmem:[#allocation9 + $0x640] sm:$0xff] }
 0x1e4   : > { %v4943_v23 = vpack.c.bf16 %v912_v21, %v904_v20 }
 0x1e6   : > { %4912 = vmatpush1.bf16.msra.mxu1 %v4911_v26  ;;  %v5327_v26 = vpack.c.bf16 %v914_v25, %v906_v24 }
 0x1e7   : > { %4914 = vmatprep.subr.bf16.mxu1 %v4913_v27  ;;  %v921_v27 = vld [vmem:[#allocation9 + $0x688] sm:$0xff] }
 0x1e8   : > { %5328 = vmatpush1.bf16.msra.mxu0 %v5327_v26  ;;  %v4945_v30 = vpack.c.bf16 %v929_v28, %v921_v27 }
 0x1e9   : > { %5330 = vmatprep.subr.bf16.mxu0 %v5329_v34 }
 0x1ea   : > { %4916 = vmatpush1.bf16.msra.mxu1 %v4915_v32  ;;  %v920_v32 = vld [vmem:[#allocation9 + $0x680] sm:$0xff] }
 0x1eb   : > { %4918 = vmatprep.subr.bf16.mxu1 %v4917_v33  ;;  %v928_v33 = vld [vmem:[#allocation9 + $0x6c0] sm:$0xff] }
 0x1ec   : > { %v4947_v35 = vpack.c.bf16 %v928_v33, %v920_v32 }
 0x1ee   : > { %4920 = vmatpush1.bf16.msra.mxu1 %v4919_v38  ;;  %v5331_v38 = vpack.c.bf16 %v930_v37, %v922_v36 }
 0x1ef   : > { %4922 = vmatprep.subr.bf16.mxu1 %v4921_v39  ;;  %v937_v39 = vld [vmem:[#allocation9 + $0x708] sm:$0xff] }
 0x1f0   : > { %5332 = vmatpush1.bf16.msra.mxu0 %v5331_v38  ;;  %v4949_v42 = vpack.c.bf16 %v945_v40, %v937_v39  ;;  %v968_v38 = vld [vmem:[#allocation9 + $0x800] sm:$0xff]  ;;  %v970_v40 = vld [vmem:[#allocation9 + $0x810] sm:$0xff] }
 0x1f1   : > { %5334 = vmatprep.subr.bf16.mxu0 %v5333_v46  ;;  %v976_v39 = vld [vmem:[#allocation9 + $0x840] sm:$0xff] }
 0x1f2   : > { %4924 = vmatpush1.bf16.msra.mxu1 %v4923_v44  ;;  %v936_v44 = vld [vmem:[#allocation9 + $0x700] sm:$0xff] }
 0x1f3   : > { %4926 = vmatprep.subr.bf16.mxu1 %v4925_v45  ;;  %v944_v45 = vld [vmem:[#allocation9 + $0x740] sm:$0xff] }
 0x1f4   : > { %v4951_v47 = vpack.c.bf16 %v944_v45, %v936_v44  ;;  %v985_v44 = vld [vmem:[#allocation9 + $0x888] sm:$0xff] }
 0x1f5   : > { %v993_v45 = vld [vmem:[#allocation9 + $0x8c8] sm:$0xff] }
 0x1f6   : > { %4928 = vmatpush1.bf16.msra.mxu1 %v4927_v50  ;;  %v953_v50 = vld [vmem:[#allocation9 + $0x788] sm:$0xff]  ;;  %v4961_v59 = vpack.c.bf16 %v993_v45, %v985_v44 }
 0x1f7   : > { %4930 = vmatprep.subr.bf16.mxu1 %v4929_v51  ;;  %v5335_v51 = vpack.c.bf16 %v946_v49, %v938_v48  ;;  %v4953_v55 = vpack.c.bf16 %v961_v52, %v953_v50  ;;  %v995_v48 = vld [vmem:[#allocation9 + $0x8d8] sm:$0xff]  ;;  %v5343_v52 = vpack.c.bf16 %v978_v41, %v970_v40  ;;  %v1048_v40 = vld [vmem:[#allocation9 + $0xa80] sm:$0xff] }
 0x1f8   : > { %v1056_v41 = vld [vmem:[#allocation9 + $0xac0] sm:$0xff] }
 0x1f9   : > { %5336 = vmatpush1.bf16.msra.mxu0 %v5335_v51  ;;  %v4959_v51 = vpack.c.bf16 %v976_v39, %v968_v38 }
 0x1fa   : > { %4932 = vmatpush1.bf16.msra.mxu1 %v4931_v54  ;;  %v963_v54 = vld [vmem:[#allocation9 + $0x7d8] sm:$0xff] }
 0x1fb   : > { %4934 = vmatprep.subr.bf16.mxu1 %v4933_v58  ;;  %v5337_v56 = vpack.c.bf16 %v963_v54, %v955_v53  ;;  %v960_v58 = vld [vmem:[#allocation9 + $0x7c0] sm:$0xff] }
 0x1fc   : > { %v4955_v60 = vpack.c.bf16 %v960_v58, %v952_v57  ;;  %v984_v53 = vld [vmem:[#allocation9 + $0x880] sm:$0xff]  ;;  %v994_v57 = vld [vmem:[#allocation9 + $0x8d0] sm:$0xff]  ;;  %v1001_v58 = vld [vmem:[#allocation9 + $0x908] sm:$0xff] }
 0x1fd   : > { %5338 = vmatprep.subr.bf16.mxu0 %v5337_v56  ;;  %v992_v54 = vld [vmem:[#allocation9 + $0x8c0] sm:$0xff]  ;;  %v986_v56 = vld [vmem:[#allocation9 + $0x890] sm:$0xff]  ;;  %v4965_v5 = vpack.c.bf16 %v1009_v61, %v1001_v58 }
 0x1fe   : > { %4936 = vmatpush1.bf16.msra.mxu1 %v4935_v1  ;;  %v971_v1 = vld [vmem:[#allocation9 + $0x818] sm:$0xff]  ;;  %5340 = vmatpush1.bf16.msra.mxu0 %v5339_v62  ;;  %v1064_v58 = vld [vmem:[#allocation9 + $0xb00] sm:$0xff] }
 0x1ff   : > { %4938 = vmatprep.subr.bf16.mxu1 %v4937_v6  ;;  %v5341_v4 = vpack.c.bf16 %v979_v3, %v971_v1  ;;  %v7018_v6 = vmov 1966171168   ;;  %v1003_v62 = vld [vmem:[#allocation9 + $0x918] sm:$0xff]  ;;  %v4963_v1 = vpack.c.bf16 %v992_v54, %v984_v53  ;;  %v1000_v3 = vld [vmem:[#allocation9 + $0x900] sm:$0xff] }
 0x200   : > { %v616_v7 = vunpack.c.l.s4 %v7018_v6  ;;  %v5349_v6 = vpack.c.bf16 %v1011_v63, %v1003_v62  ;;  %v1067_v53 = vld [vmem:[#allocation9 + $0xb18] sm:$0xff]  ;;  %v1066_v62 = vld [vmem:[#allocation9 + $0xb10] sm:$0xff] }
 0x201   : > { %5342 = vmatprep.subr.bf16.mxu0 %v5341_v4  ;;  %v1008_v4 = vld [vmem:[#allocation9 + $0x940] sm:$0xff]  ;;  %v1075_v54 = vld [vmem:[#allocation9 + $0xb58] sm:$0xff]  ;;  %v1074_v63 = vld [vmem:[#allocation9 + $0xb50] sm:$0xff] }
 0x202   : > { %4940 = vmatpush1.bf16.msra.mxu1 %v4939_v11  ;;  %v617_v8 = vunpack.c.0.s8 %v616_v7  ;;  %v1002_v7 = vld [vmem:[#allocation9 + $0x910] sm:$0xff]  ;;  %v5365_v61 = vpack.c.bf16 %v1075_v54, %v1067_v53 }
 0x203   : > { %4942 = vmatprep.subr.bf16.mxu1 %v4941_v18  ;;  %v1130_v53 = vld [vmem:[#allocation9 + $0xd10] sm:$0xff] }
 0x204   : > { %v620_v13 = vsub.s32 %v617_v8, %v7342_v9  ;;  %v1010_v8 = vld [vmem:[#allocation9 + $0x950] sm:$0xff] }
 0x205   : > { %v5351_v15 = vpack.c.bf16 %v1010_v8, %v1002_v7  ;;  %v1080_v7 = vld [vmem:[#allocation9 + $0xb80] sm:$0xff]  ;;  %v1138_v54 = vld [vmem:[#allocation9 + $0xd50] sm:$0xff] }
 0x206   : > { %4944 = vmatpush1.bf16.msra.mxu1 %v4943_v23  ;;  %v1088_v8 = vld [vmem:[#allocation9 + $0xbc0] sm:$0xff] }
 0x207   : > { %4946 = vmatprep.subr.bf16.mxu1 %v4945_v30 }
 0x20a   : > { %4948 = vmatpush1.bf16.msra.mxu1 %v4947_v35 }
 0x20b   : > { %4950 = vmatprep.subr.bf16.mxu1 %v4949_v42  ;;  %v7374_v42 = vsub.s32 1, %v7342_v9 }
 0x20e   : > { %4952 = vmatpush1.bf16.msra.mxu1 %v4951_v47  ;;  %v987_v47 = vld [vmem:[#allocation9 + $0x898] sm:$0xff] }
 0x20f   : > { %4954 = vmatprep.subr.bf16.mxu1 %v4953_v55  ;;  %v7390_v55 = vsub.s32 3, %v7342_v9 }
 0x212   : > { %4956 = vmatpush1.bf16.msra.mxu1 %v4955_v60  ;;  %v5345_v60 = vpack.c.bf16 %v995_v48, %v987_v47  ;;  %v1050_v47 = vld [vmem:[#allocation9 + $0xa90] sm:$0xff] }
 0x213   : > { %4958 = vmatprep.subr.bf16.mxu1 %v4957_v2  ;;  %v5347_v2 = vpack.c.bf16 %v994_v57, %v986_v56  ;;  %v1058_v48 = vld [vmem:[#allocation9 + $0xad0] sm:$0xff]  ;;  %v4979_v56 = vpack.c.bf16 %v1056_v41, %v1048_v40  ;;  %v1131_v40 = vld [vmem:[#allocation9 + $0xd18] sm:$0xff] }
 0x214   : > { %v5363_v57 = vpack.c.bf16 %v1058_v48, %v1050_v47  ;;  %v1139_v41 = vld [vmem:[#allocation9 + $0xd58] sm:$0xff]  ;;  %v1128_v47 = vld [vmem:[#allocation9 + $0xd00] sm:$0xff] }
 0x215   : > { %v1136_v48 = vld [vmem:[#allocation9 + $0xd40] sm:$0xff] }
 0x2a8   : > { %v4829_v11 = vpop.f32.mrb[0].mxu1 }
 0x2a9   : > { %v604_v12 = vadd.f32 %v4829_v11, %v4633_v10  ;;  %v598_v14 = vpop.f32.mrb[1].mxu1  ;;  %v1025_v11 = vld [vmem:[#allocation9 + $0x9c8] sm:$0xff] }
 0x2aa   : > { %v599_v16 = vadd.f32 %v4633_v10, %v598_v14  ;;  %v1017_v10 = vld [vmem:[#allocation9 + $0x988] sm:$0xff]  ;;  %v4967_v14 = vpack.c.bf16 %v1008_v4, %v1000_v3  ;;  %v1083_v3 = vld [vmem:[#allocation9 + $0xb98] sm:$0xff] }
 0x2ab   : > { %v608_v17 = vmax.f32 %v604_v12, 0.0  ;;  %v1019_v12 = vld [vmem:[#allocation9 + $0x998] sm:$0xff] }
 0x2ac   : > { %v607_v18 = vmax.f32 %v599_v16, 0.0  ;;  %v1016_v16 = vld [vmem:[#allocation9 + $0x980] sm:$0xff]  ;;  %v1091_v4 = vld [vmem:[#allocation9 + $0xbd8] sm:$0xff] }
 0x2ad   : > { %678 = vst.msk [vmem:[#allocation2 + $0x8] sm:$0x1] %vm7345_vm4, %v608_v17  ;;  %v686_v19 = vrot.slane %v608_v17, %v620_v13  ;;  %v1024_v17 = vld [vmem:[#allocation9 + $0x9c0] sm:$0xff] }
 0x2ae   : > { %613 = vst.msk [vmem:[#allocation2] sm:$0x1] %vm7345_vm4, %v607_v18  ;;  %v621_v20 = vrot.slane %v607_v18, %v620_v13  ;;  %v645_v21 = vcombine.high %v607_v18, %v607_v18  ;;  %v4969_v18 = vpack.c.bf16 %v1025_v11, %v1017_v10  ;;  %v5369_v11 = vpack.c.bf16 %v1091_v4, %v1083_v3  ;;  %v1146_v3 = vld [vmem:[#allocation9 + $0xd90] sm:$0xff] }
 0x2af   : > { %v687_v22 = vcombine.high %v686_v19, %v686_v19  ;;  %v694_v23 = vrot.slane %v686_v19, %v620_v13  ;;  %v1154_v4 = vld [vmem:[#allocation9 + $0xdd0] sm:$0xff] }
 0x2b0   : > { %v622_v24 = vcombine.high %v621_v20, %v621_v20  ;;  %v629_v25 = vrot.slane %v621_v20, %v620_v13  ;;  %v652_v26 = vrot.slane %v645_v21, %v620_v13  ;;  %v1018_v20 = vld [vmem:[#allocation9 + $0x990] sm:$0xff] }
 0x2b1   : > { %v701_v27 = vrot.slane %v687_v22, %v620_v13  ;;  %v704_v28 = vcombine.high %v694_v23, %v694_v23  ;;  %v1026_v21 = vld [vmem:[#allocation9 + $0x9d0] sm:$0xff]  ;;  %v1033_v22 = vld [vmem:[#allocation9 + $0xa08] sm:$0xff] }
 0x2b2   : > { %v636_v29 = vrot.slane %v622_v24, %v620_v13  ;;  %v639_v30 = vcombine.high %v629_v25, %v629_v25  ;;  %v659_v31 = vrot.slane %v652_v26, %v620_v13  ;;  %v662_v32 = vcombine.high %v652_v26, %v652_v26  ;;  %v1041_v23 = vld [vmem:[#allocation9 + $0xa48] sm:$0xff]  ;;  %v1035_v24 = vld [vmem:[#allocation9 + $0xa18] sm:$0xff] }
 0x2b3   : > { %703 = vst.msk [vmem:[#allocation2 + $0x9] sm:$0x1] %vm7345_vm4, %v701_v27  ;;  %706 = vst.msk [vmem:[#allocation2 + $0xa] sm:$0x1] %vm7345_vm4, %v704_v28  ;;  %v707_v33 = vcombine.high %v701_v27, %v701_v27  ;;  %v1043_v25 = vld [vmem:[#allocation9 + $0xa58] sm:$0xff]  ;;  %v4971_v26 = vpack.c.bf16 %v1024_v17, %v1016_v16  ;;  %v5355_v27 = vpack.c.bf16 %v1026_v21, %v1018_v20  ;;  %v1032_v28 = vld [vmem:[#allocation9 + $0xa00] sm:$0xff] }
 0x2b4   : > { %638 = vst.msk [vmem:[#allocation2 + $0x1] sm:$0x1] %vm7345_vm4, %v636_v29  ;;  %641 = vst.msk [vmem:[#allocation2 + $0x2] sm:$0x1] %vm7345_vm4, %v639_v30  ;;  %v642_v34 = vcombine.high %v636_v29, %v636_v29  ;;  %v669_v35 = vrot.slane %v662_v32, %v620_v13  ;;  %v672_v36 = vcombine.high %v659_v31, %v659_v31  ;;  %v1027_v13 = vld [vmem:[#allocation9 + $0x9d8] sm:$0xff]  ;;  %v1040_v29 = vld [vmem:[#allocation9 + $0xa40] sm:$0xff] }
 0x2b5   : > { %661 = vst.msk [vmem:[#allocation2 + $0x4] sm:$0x1] %vm7345_vm4, %v659_v31  ;;  %709 = vst.msk [vmem:[#allocation2 + $0xb] sm:$0x1] %vm7345_vm4, %v707_v33  ;;  %v5353_v19 = vpack.c.bf16 %v1027_v13, %v1019_v12  ;;  %v4973_v30 = vpack.c.bf16 %v1041_v23, %v1033_v22  ;;  %v5357_v31 = vpack.c.bf16 %v1043_v25, %v1035_v24  ;;  %v1034_v32 = vld [vmem:[#allocation9 + $0xa10] sm:$0xff]  ;;  %v1099_v16 = vld [vmem:[#allocation9 + $0xc18] sm:$0xff] }
 0x2b6   : > { %644 = vst.msk [vmem:[#allocation2 + $0x3] sm:$0x1] %vm7345_vm4, %v642_v34  ;;  %671 = vst.msk [vmem:[#allocation2 + $0x5] sm:$0x1] %vm7345_vm4, %v669_v35  ;;  %v675_v37 = vcombine.high %v669_v35, %v669_v35  ;;  %v1042_v33 = vld [vmem:[#allocation9 + $0xa50] sm:$0xff]  ;;  %v1049_v34 = vld [vmem:[#allocation9 + $0xa88] sm:$0xff]  ;;  %v4975_v38 = vpack.c.bf16 %v1040_v29, %v1032_v28 }
 0x2b7   : > { %674 = vst.msk [vmem:[#allocation2 + $0x6] sm:$0x1] %vm7345_vm4, %v672_v36  ;;  %v1057_v35 = vld [vmem:[#allocation9 + $0xac8] sm:$0xff]  ;;  %v1051_v36 = vld [vmem:[#allocation9 + $0xa98] sm:$0xff]  ;;  %v5359_v39 = vpack.c.bf16 %v1042_v33, %v1034_v32  ;;  %v1082_v12 = vld [vmem:[#allocation9 + $0xb90] sm:$0xff] }
 0x2b8   : > { %677 = vst.msk [vmem:[#allocation2 + $0x7] sm:$0x1] %vm7345_vm4, %v675_v37  ;;  %v1059_v37 = vld [vmem:[#allocation9 + $0xad8] sm:$0xff]  ;;  %v4977_v44 = vpack.c.bf16 %v1057_v35, %v1049_v34  ;;  %v1090_v13 = vld [vmem:[#allocation9 + $0xbd0] sm:$0xff]  ;;  %v1096_v20 = vld [vmem:[#allocation9 + $0xc00] sm:$0xff] }
 0x2b9   : > { %v5361_v45 = vpack.c.bf16 %v1059_v37, %v1051_v36  ;;  %v1107_v17 = vld [vmem:[#allocation9 + $0xc58] sm:$0xff]  ;;  %v1104_v21 = vld [vmem:[#allocation9 + $0xc40] sm:$0xff]  ;;  %v1098_v24 = vld [vmem:[#allocation9 + $0xc10] sm:$0xff] }
 0x2ba   : > { %v5373_v23 = vpack.c.bf16 %v1107_v17, %v1099_v16  ;;  %v1106_v25 = vld [vmem:[#allocation9 + $0xc50] sm:$0xff]  ;;  %v1115_v28 = vld [vmem:[#allocation9 + $0xc98] sm:$0xff]  ;;  %v1112_v32 = vld [vmem:[#allocation9 + $0xc80] sm:$0xff] }
 0x2bb   : > { %v1123_v29 = vld [vmem:[#allocation9 + $0xcd8] sm:$0xff]  ;;  %v1120_v33 = vld [vmem:[#allocation9 + $0xcc0] sm:$0xff]  ;;  %v1114_v36 = vld [vmem:[#allocation9 + $0xc90] sm:$0xff] }
 0x2bc   : > { %v5377_v35 = vpack.c.bf16 %v1123_v29, %v1115_v28  ;;  %v1122_v37 = vld [vmem:[#allocation9 + $0xcd0] sm:$0xff] }
 0x2bd   : > { %v1162_v16 = vld [vmem:[#allocation9 + $0xe10] sm:$0xff] }
 0x2be   : > { %v1170_v17 = vld [vmem:[#allocation9 + $0xe50] sm:$0xff] }
 0x2bf   : > { %v7379_v46 = vld [vmem:[#allocation2] sm:$0xff] }
 0x2c0   : > { %v7383_v49 = vrot.slane %v7379_v46, %v7374_v42  ;;  %v7387_v50 = vrot.slane %v7379_v46, %v7377_v43  ;;  %v7398_v0 = vrot.slane %v7379_v46, %v7390_v55  ;;  %v1178_v28 = vld [vmem:[#allocation9 + $0xe90] sm:$0xff] }
 0x2c1   : > { %v1186_v29 = vld [vmem:[#allocation9 + $0xed0] sm:$0xff] }
 0x2c2   : > { %2416 = vmatprep.mubr.f32.mxu1 %v7383_v49  ;;  %2842 = vmatprep.mubr.f32.mxu0 %v7383_v49 }
 0x2c3   : > { %2417 = vmatmul.mubr.f32.vlgmr.msra.gmra.mrb[2].mxu1 %v7387_v50  ;;  %2843 = vmatmul.mubr.f32.vlgmr.msra.gmra.mrb[4].mxu0 %v7387_v50 }
 0x2c4   : > { %4960 = vmatpush1.bf16.msra.mxu1 %v4959_v51  ;;  %5344 = vmatpush1.bf16.msra.mxu0 %v5343_v52  ;;  %v1065_v51 = vld [vmem:[#allocation9 + $0xb08] sm:$0xff] }
 0x2c5   : > { %2487 = vmatprep.mubr.f32.mxu1 %v7398_v0  ;;  %2913 = vmatprep.mubr.f32.mxu0 %v7398_v0  ;;  %v1073_v52 = vld [vmem:[#allocation9 + $0xb48] sm:$0xff] }
 0x2c6   : > { %4962 = vmatprep.subr.bf16.mxu1 %v4961_v59  ;;  %5346 = vmatprep.subr.bf16.mxu0 %v5345_v60  ;;  %v1072_v59 = vld [vmem:[#allocation9 + $0xb40] sm:$0xff]  ;;  %v4981_v60 = vpack.c.bf16 %v1073_v52, %v1065_v51  ;;  %v5381_v52 = vpack.c.bf16 %v1139_v41, %v1131_v40  ;;  %v1194_v40 = vld [vmem:[#allocation9 + $0xf10] sm:$0xff] }
 0x2c7   : > { %v1202_v41 = vld [vmem:[#allocation9 + $0xf50] sm:$0xff] }
 0x2c8   : > { %4964 = vmatpush1.bf16.msra.mxu1 %v4963_v1  ;;  %5348 = vmatpush1.bf16.msra.mxu0 %v5347_v2  ;;  %v1081_v1 = vld [vmem:[#allocation9 + $0xb88] sm:$0xff] }
 0x2c9   : > { %4966 = vmatprep.subr.bf16.mxu1 %v4965_v5  ;;  %5350 = vmatprep.subr.bf16.mxu0 %v5349_v6  ;;  %v1089_v2 = vld [vmem:[#allocation9 + $0xbc8] sm:$0xff]  ;;  %v4983_v5 = vpack.c.bf16 %v1072_v59, %v1064_v58  ;;  %v5367_v6 = vpack.c.bf16 %v1074_v63, %v1066_v62  ;;  %v1147_v58 = vld [vmem:[#allocation9 + $0xd98] sm:$0xff]  ;;  %v1144_v62 = vld [vmem:[#allocation9 + $0xd80] sm:$0xff] }
 0x2ca   : > { %v4985_v10 = vpack.c.bf16 %v1089_v2, %v1081_v1  ;;  %v1155_v59 = vld [vmem:[#allocation9 + $0xdd8] sm:$0xff]  ;;  %v1152_v63 = vld [vmem:[#allocation9 + $0xdc0] sm:$0xff] }
 0x2cb   : > { %v5385_v2 = vpack.c.bf16 %v1155_v59, %v1147_v58  ;;  %v1210_v58 = vld [vmem:[#allocation9 + $0xf90] sm:$0xff] }
 0x2cc   : > { %4968 = vmatpush1.bf16.msra.mxu1 %v4967_v14  ;;  %5352 = vmatpush1.bf16.msra.mxu0 %v5351_v15  ;;  %v1097_v14 = vld [vmem:[#allocation9 + $0xc08] sm:$0xff]  ;;  %v1218_v59 = vld [vmem:[#allocation9 + $0xfd0] sm:$0xff] }
 0x2cd   : > { %4970 = vmatprep.subr.bf16.mxu1 %v4969_v18  ;;  %5354 = vmatprep.subr.bf16.mxu0 %v5353_v19  ;;  %v1105_v15 = vld [vmem:[#allocation9 + $0xc48] sm:$0xff]  ;;  %v4987_v18 = vpack.c.bf16 %v1088_v8, %v1080_v7  ;;  %v5371_v19 = vpack.c.bf16 %v1090_v13, %v1082_v12  ;;  %v1163_v7 = vld [vmem:[#allocation9 + $0xe18] sm:$0xff]  ;;  %v1160_v12 = vld [vmem:[#allocation9 + $0xe00] sm:$0xff] }
 0x2ce   : > { %v4989_v22 = vpack.c.bf16 %v1105_v15, %v1097_v14  ;;  %v1171_v8 = vld [vmem:[#allocation9 + $0xe58] sm:$0xff]  ;;  %v1168_v13 = vld [vmem:[#allocation9 + $0xe40] sm:$0xff] }
 0x2cf   : > { %v5389_v15 = vpack.c.bf16 %v1171_v8, %v1163_v7  ;;  %v2273_v7 = vsub.s32 5, %v7342_v9  ;;  %v1226_v8 = vld [vmem:[#allocation9 + $0x1010] sm:$0xff] }
 0x2d0   : > { %4972 = vmatpush1.bf16.msra.mxu1 %v4971_v26  ;;  %5356 = vmatpush1.bf16.msra.mxu0 %v5355_v27  ;;  %v1113_v26 = vld [vmem:[#allocation9 + $0xc88] sm:$0xff] }
 0x2d1   : > { %4974 = vmatprep.subr.bf16.mxu1 %v4973_v30  ;;  %5358 = vmatprep.subr.bf16.mxu0 %v5357_v31  ;;  %v1121_v27 = vld [vmem:[#allocation9 + $0xcc8] sm:$0xff]  ;;  %v4991_v30 = vpack.c.bf16 %v1104_v21, %v1096_v20  ;;  %v5375_v31 = vpack.c.bf16 %v1106_v25, %v1098_v24  ;;  %v1179_v20 = vld [vmem:[#allocation9 + $0xe98] sm:$0xff]  ;;  %v1176_v24 = vld [vmem:[#allocation9 + $0xe80] sm:$0xff] }
 0x2d2   : > { %v4993_v34 = vpack.c.bf16 %v1121_v27, %v1113_v26  ;;  %v1187_v21 = vld [vmem:[#allocation9 + $0xed8] sm:$0xff]  ;;  %v1184_v25 = vld [vmem:[#allocation9 + $0xec0] sm:$0xff] }
 0x2d3   : > { %v5393_v27 = vpack.c.bf16 %v1187_v21, %v1179_v20  ;;  %v1248_v20 = vld [vmem:[#allocation9 + $0x10c0] sm:$0xff]  ;;  %v1242_v21 = vld [vmem:[#allocation9 + $0x1090] sm:$0xff] }
 0x2d4   : > { %4976 = vmatpush1.bf16.msra.mxu1 %v4975_v38  ;;  %5360 = vmatpush1.bf16.msra.mxu0 %v5359_v39  ;;  %v1129_v38 = vld [vmem:[#allocation9 + $0xd08] sm:$0xff] }
 0x2d5   : > { %4978 = vmatprep.subr.bf16.mxu1 %v4977_v44  ;;  %5362 = vmatprep.subr.bf16.mxu0 %v5361_v45  ;;  %v1137_v39 = vld [vmem:[#allocation9 + $0xd48] sm:$0xff]  ;;  %v4995_v44 = vpack.c.bf16 %v1120_v33, %v1112_v32  ;;  %v5379_v45 = vpack.c.bf16 %v1122_v37, %v1114_v36  ;;  %v1195_v32 = vld [vmem:[#allocation9 + $0xf18] sm:$0xff]  ;;  %v1192_v36 = vld [vmem:[#allocation9 + $0xf00] sm:$0xff] }
 0x2d6   : > { %v4997_v51 = vpack.c.bf16 %v1137_v39, %v1129_v38  ;;  %v1203_v33 = vld [vmem:[#allocation9 + $0xf58] sm:$0xff]  ;;  %v1200_v37 = vld [vmem:[#allocation9 + $0xf40] sm:$0xff] }
 0x2d7   : > { %v5397_v39 = vpack.c.bf16 %v1203_v33, %v1195_v32  ;;  %v1256_v32 = vld [vmem:[#allocation9 + $0x1100] sm:$0xff] }
 0x2d8   : > { %4980 = vmatpush1.bf16.msra.mxu1 %v4979_v56  ;;  %5364 = vmatpush1.bf16.msra.mxu0 %v5363_v57  ;;  %v1145_v56 = vld [vmem:[#allocation9 + $0xd88] sm:$0xff]  ;;  %v1264_v33 = vld [vmem:[#allocation9 + $0x1140] sm:$0xff] }
 0x2d9   : > { %4982 = vmatprep.subr.bf16.mxu1 %v4981_v60  ;;  %5366 = vmatprep.subr.bf16.mxu0 %v5365_v61  ;;  %v1153_v57 = vld [vmem:[#allocation9 + $0xdc8] sm:$0xff]  ;;  %v4999_v60 = vpack.c.bf16 %v1136_v48, %v1128_v47  ;;  %v5383_v61 = vpack.c.bf16 %v1138_v54, %v1130_v53  ;;  %v1211_v47 = vld [vmem:[#allocation9 + $0xf98] sm:$0xff]  ;;  %v1208_v53 = vld [vmem:[#allocation9 + $0xf80] sm:$0xff] }
 0x2da   : > { %v5001_v1 = vpack.c.bf16 %v1153_v57, %v1145_v56  ;;  %v1219_v48 = vld [vmem:[#allocation9 + $0xfd8] sm:$0xff]  ;;  %v1216_v54 = vld [vmem:[#allocation9 + $0xfc0] sm:$0xff] }
 0x2db   : > { %v5401_v57 = vpack.c.bf16 %v1219_v48, %v1211_v47  ;;  %v1272_v47 = vld [vmem:[#allocation9 + $0x1180] sm:$0xff] }
 0x2dc   : > { %4984 = vmatpush1.bf16.msra.mxu1 %v4983_v5  ;;  %5368 = vmatpush1.bf16.msra.mxu0 %v5367_v6  ;;  %v1161_v5 = vld [vmem:[#allocation9 + $0xe08] sm:$0xff]  ;;  %v1280_v48 = vld [vmem:[#allocation9 + $0x11c0] sm:$0xff] }
 0x2dd   : > { %4986 = vmatprep.subr.bf16.mxu1 %v4985_v10  ;;  %5370 = vmatprep.subr.bf16.mxu0 %v5369_v11  ;;  %v1169_v6 = vld [vmem:[#allocation9 + $0xe48] sm:$0xff]  ;;  %v5003_v10 = vpack.c.bf16 %v1152_v63, %v1144_v62  ;;  %v5387_v11 = vpack.c.bf16 %v1154_v4, %v1146_v3  ;;  %v1227_v62 = vld [vmem:[#allocation9 + $0x1018] sm:$0xff] }
 0x2de   : > { %v5005_v14 = vpack.c.bf16 %v1169_v6, %v1161_v5  ;;  %v1235_v63 = vld [vmem:[#allocation9 + $0x1058] sm:$0xff]  ;;  %v1224_v5 = vld [vmem:[#allocation9 + $0x1000] sm:$0xff] }
 0x2df   : > { %v5405_v4 = vpack.c.bf16 %v1235_v63, %v1227_v62  ;;  %v1232_v6 = vld [vmem:[#allocation9 + $0x1040] sm:$0xff] }
 0x2e0   : > { %4988 = vmatpush1.bf16.msra.mxu1 %v4987_v18  ;;  %5372 = vmatpush1.bf16.msra.mxu0 %v5371_v19  ;;  %v1177_v18 = vld [vmem:[#allocation9 + $0xe88] sm:$0xff]  ;;  %v1288_v62 = vld [vmem:[#allocation9 + $0x1200] sm:$0xff] }
 0x2e1   : > { %4990 = vmatprep.subr.bf16.mxu1 %v4989_v22  ;;  %5374 = vmatprep.subr.bf16.mxu0 %v5373_v23  ;;  %v1185_v19 = vld [vmem:[#allocation9 + $0xec8] sm:$0xff]  ;;  %v5007_v22 = vpack.c.bf16 %v1168_v13, %v1160_v12  ;;  %v5391_v23 = vpack.c.bf16 %v1170_v17, %v1162_v16  ;;  %v7404_v12 = vsub.s32 2, %v7342_v9  ;;  %v5023_v16 = vpack.c.bf16 %v1232_v6, %v1224_v5  ;;  %v1296_v63 = vld [vmem:[#allocation9 + $0x1240] sm:$0xff]  ;;  %v1307_v6 = vld [vmem:[#allocation9 + $0x1298] sm:$0xff] }
 0x2e2   : > { %v5009_v26 = vpack.c.bf16 %v1185_v19, %v1177_v18  ;;  %v1249_v13 = vld [vmem:[#allocation9 + $0x10c8] sm:$0xff]  ;;  %v1240_v19 = vld [vmem:[#allocation9 + $0x1080] sm:$0xff] }
 0x2e3   : > { %v7408_v17 = vrot.slane %v7379_v46, %v7404_v12  ;;  %v1313_v5 = vld [vmem:[#allocation9 + $0x12c8] sm:$0xff] }
 0x2e4   : > { %4992 = vmatpush1.bf16.msra.mxu1 %v4991_v30  ;;  %5376 = vmatpush1.bf16.msra.mxu0 %v5375_v31  ;;  %v1193_v30 = vld [vmem:[#allocation9 + $0xf08] sm:$0xff] }
 0x2e5   : > { %4994 = vmatprep.subr.bf16.mxu1 %v4993_v34  ;;  %5378 = vmatprep.subr.bf16.mxu0 %v5377_v35  ;;  %v1201_v31 = vld [vmem:[#allocation9 + $0xf48] sm:$0xff]  ;;  %v5011_v34 = vpack.c.bf16 %v1184_v25, %v1176_v24  ;;  %v5395_v35 = vpack.c.bf16 %v1186_v29, %v1178_v28  ;;  %v1250_v25 = vld [vmem:[#allocation9 + $0x10d0] sm:$0xff]  ;;  %v1259_v28 = vld [vmem:[#allocation9 + $0x1118] sm:$0xff] }
 0x2e6   : > { %v5013_v38 = vpack.c.bf16 %v1201_v31, %v1193_v30  ;;  %v1267_v29 = vld [vmem:[#allocation9 + $0x1158] sm:$0xff]  ;;  %v5027_v30 = vpack.c.bf16 %v1248_v20, %v1240_v19  ;;  %v1314_v19 = vld [vmem:[#allocation9 + $0x12d0] sm:$0xff]  ;;  %v1321_v20 = vld [vmem:[#allocation9 + $0x1308] sm:$0xff] }
 0x2e8   : > { %4996 = vmatpush1.bf16.msra.mxu1 %v4995_v44  ;;  %5380 = vmatpush1.bf16.msra.mxu0 %v5379_v45  ;;  %v1209_v44 = vld [vmem:[#allocation9 + $0xf88] sm:$0xff] }
 0x2e9   : > { %4998 = vmatprep.subr.bf16.mxu1 %v4997_v51  ;;  %5382 = vmatprep.subr.bf16.mxu0 %v5381_v52  ;;  %v1217_v45 = vld [vmem:[#allocation9 + $0xfc8] sm:$0xff]  ;;  %v5015_v51 = vpack.c.bf16 %v1200_v37, %v1192_v36  ;;  %v5399_v52 = vpack.c.bf16 %v1202_v41, %v1194_v40  ;;  %v1266_v36 = vld [vmem:[#allocation9 + $0x1150] sm:$0xff]  ;;  %v1283_v40 = vld [vmem:[#allocation9 + $0x11d8] sm:$0xff]  ;;  %v5031_v41 = vpack.c.bf16 %v1264_v33, %v1256_v32 }
 0x2ea   : > { %v5017_v56 = vpack.c.bf16 %v1217_v45, %v1209_v44  ;;  %v1273_v37 = vld [vmem:[#allocation9 + $0x1188] sm:$0xff] }
 0x2eb   : > { %v1337_v32 = vld [vmem:[#allocation9 + $0x1388] sm:$0xff] }
 0x2ec   : > { %5000 = vmatpush1.bf16.msra.mxu1 %v4999_v60  ;;  %5384 = vmatpush1.bf16.msra.mxu0 %v5383_v61  ;;  %v1225_v60 = vld [vmem:[#allocation9 + $0x1008] sm:$0xff] }
 0x2ed   : > { %5002 = vmatprep.subr.bf16.mxu1 %v5001_v1  ;;  %5386 = vmatprep.subr.bf16.mxu0 %v5385_v2  ;;  %v1233_v61 = vld [vmem:[#allocation9 + $0x1048] sm:$0xff]  ;;  %v5019_v1 = vpack.c.bf16 %v1216_v54, %v1208_v53  ;;  %v5403_v2 = vpack.c.bf16 %v1218_v59, %v1210_v58  ;;  %v1282_v53 = vld [vmem:[#allocation9 + $0x11d0] sm:$0xff]  ;;  %v1299_v58 = vld [vmem:[#allocation9 + $0x1258] sm:$0xff]  ;;  %v5035_v59 = vpack.c.bf16 %v1280_v48, %v1272_v47 }
 0x2ee   : > { %v5021_v3 = vpack.c.bf16 %v1233_v61, %v1225_v60  ;;  %v1289_v54 = vld [vmem:[#allocation9 + $0x1208] sm:$0xff] }
 0x2ef   : > { %v1345_v33 = vld [vmem:[#allocation9 + $0x13c8] sm:$0xff] }
 0x2f0   : > { %5004 = vmatpush1.bf16.msra.mxu1 %v5003_v10  ;;  %5388 = vmatpush1.bf16.msra.mxu0 %v5387_v11  ;;  %v1234_v10 = vld [vmem:[#allocation9 + $0x1050] sm:$0xff]  ;;  %v1241_v11 = vld [vmem:[#allocation9 + $0x1088] sm:$0xff] }
 0x2f1   : > { %5006 = vmatprep.subr.bf16.mxu1 %v5005_v14  ;;  %5390 = vmatprep.subr.bf16.mxu0 %v5389_v15  ;;  %v1243_v14 = vld [vmem:[#allocation9 + $0x1098] sm:$0xff]  ;;  %v5407_v18 = vpack.c.bf16 %v1234_v10, %v1226_v8  ;;  %v5039_v10 = vpack.c.bf16 %v1296_v63, %v1288_v62  ;;  %v1353_v47 = vld [vmem:[#allocation9 + $0x1408] sm:$0xff] }
 0x2f2   : > { %v1251_v15 = vld [vmem:[#allocation9 + $0x10d8] sm:$0xff]  ;;  %v1361_v48 = vld [vmem:[#allocation9 + $0x1448] sm:$0xff] }
 0x2f3   : > { %v5409_v24 = vpack.c.bf16 %v1251_v15, %v1243_v14  ;;  %v1315_v8 = vld [vmem:[#allocation9 + $0x12d8] sm:$0xff]  ;;  %v1304_v14 = vld [vmem:[#allocation9 + $0x1280] sm:$0xff]  ;;  %v1369_v62 = vld [vmem:[#allocation9 + $0x1488] sm:$0xff] }
 0x2f4   : > { %5008 = vmatpush1.bf16.msra.mxu1 %v5007_v22  ;;  %5392 = vmatpush1.bf16.msra.mxu0 %v5391_v23  ;;  %v7413_v22 = vrot.slane %v7379_v46, %v2273_v7  ;;  %v5025_v23 = vpack.c.bf16 %v1249_v13, %v1241_v11  ;;  %v5411_v46 = vpack.c.bf16 %v1250_v25, %v1242_v21  ;;  %v1312_v15 = vld [vmem:[#allocation9 + $0x12c0] sm:$0xff]  ;;  %v1329_v21 = vld [vmem:[#allocation9 + $0x1348] sm:$0xff] }
 0x2f5   : > { %5010 = vmatprep.subr.bf16.mxu1 %v5009_v26  ;;  %5394 = vmatprep.subr.bf16.mxu0 %v5393_v27  ;;  %v1257_v26 = vld [vmem:[#allocation9 + $0x1108] sm:$0xff]  ;;  %v5043_v25 = vpack.c.bf16 %v1312_v15, %v1304_v14 }
 0x2f6   : > { %v1265_v27 = vld [vmem:[#allocation9 + $0x1148] sm:$0xff] }
 0x2f7   : > { %v5029_v31 = vpack.c.bf16 %v1265_v27, %v1257_v26  ;;  %v5045_v27 = vpack.c.bf16 %v1329_v21, %v1321_v20  ;;  %v1377_v63 = vld [vmem:[#allocation9 + $0x14c8] sm:$0xff] }
 0x2f8   : > { %5012 = vmatpush1.bf16.msra.mxu1 %v5011_v34  ;;  %5396 = vmatpush1.bf16.msra.mxu0 %v5395_v35  ;;  %v1258_v34 = vld [vmem:[#allocation9 + $0x1110] sm:$0xff]  ;;  %v5413_v35 = vpack.c.bf16 %v1267_v29, %v1259_v28  ;;  %v1320_v28 = vld [vmem:[#allocation9 + $0x1300] sm:$0xff]  ;;  %v1385_v14 = vld [vmem:[#allocation9 + $0x1508] sm:$0xff] }
 0x2f9   : > { %5014 = vmatprep.subr.bf16.mxu1 %v5013_v38  ;;  %5398 = vmatprep.subr.bf16.mxu0 %v5397_v39  ;;  %v1281_v38 = vld [vmem:[#allocation9 + $0x11c8] sm:$0xff]  ;;  %v1275_v39 = vld [vmem:[#allocation9 + $0x1198] sm:$0xff]  ;;  %v5415_v44 = vpack.c.bf16 %v1266_v36, %v1258_v34  ;;  %v1328_v29 = vld [vmem:[#allocation9 + $0x1340] sm:$0xff] }
 0x2fa   : > { %v5033_v45 = vpack.c.bf16 %v1281_v38, %v1273_v37  ;;  %v1339_v34 = vld [vmem:[#allocation9 + $0x1398] sm:$0xff]  ;;  %v5047_v36 = vpack.c.bf16 %v1328_v29, %v1320_v28  ;;  %v5049_v38 = vpack.c.bf16 %v1345_v33, %v1337_v32  ;;  %v1393_v15 = vld [vmem:[#allocation9 + $0x1548] sm:$0xff] }
 0x2fb   : > { %v5061_v21 = vpack.c.bf16 %v1393_v15, %v1385_v14  ;;  %v1401_v28 = vld [vmem:[#allocation9 + $0x1588] sm:$0xff] }
 0x2fc   : > { %5016 = vmatpush1.bf16.msra.mxu1 %v5015_v51  ;;  %5400 = vmatpush1.bf16.msra.mxu0 %v5399_v52  ;;  %v1274_v51 = vld [vmem:[#allocation9 + $0x1190] sm:$0xff]  ;;  %v5417_v52 = vpack.c.bf16 %v1283_v40, %v1275_v39  ;;  %v1336_v39 = vld [vmem:[#allocation9 + $0x1380] sm:$0xff]  ;;  %v1409_v29 = vld [vmem:[#allocation9 + $0x15c8] sm:$0xff] }
 0x2fd   : > { %5018 = vmatprep.subr.bf16.mxu1 %v5017_v56  ;;  %5402 = vmatprep.subr.bf16.mxu0 %v5401_v57  ;;  %v1297_v56 = vld [vmem:[#allocation9 + $0x1248] sm:$0xff]  ;;  %v1291_v57 = vld [vmem:[#allocation9 + $0x1218] sm:$0xff]  ;;  %v5419_v60 = vpack.c.bf16 %v1282_v53, %v1274_v51  ;;  %v1344_v40 = vld [vmem:[#allocation9 + $0x13c0] sm:$0xff]  ;;  %v5065_v33 = vpack.c.bf16 %v1409_v29, %v1401_v28 }
 0x2fe   : > { %v5037_v61 = vpack.c.bf16 %v1297_v56, %v1289_v54  ;;  %v1355_v51 = vld [vmem:[#allocation9 + $0x1418] sm:$0xff]  ;;  %v5051_v53 = vpack.c.bf16 %v1344_v40, %v1336_v39  ;;  %v5053_v56 = vpack.c.bf16 %v1361_v48, %v1353_v47  ;;  %v1417_v39 = vld [vmem:[#allocation9 + $0x1608] sm:$0xff] }
 0x2ff   : > { %v1425_v40 = vld [vmem:[#allocation9 + $0x1648] sm:$0xff] }
 0x300   : > { %5020 = vmatpush1.bf16.msra.mxu1 %v5019_v1  ;;  %5404 = vmatpush1.bf16.msra.mxu0 %v5403_v2  ;;  %v1290_v1 = vld [vmem:[#allocation9 + $0x1210] sm:$0xff]  ;;  %v5421_v2 = vpack.c.bf16 %v1299_v58, %v1291_v57  ;;  %v1352_v57 = vld [vmem:[#allocation9 + $0x1400] sm:$0xff]  ;;  %v5069_v48 = vpack.c.bf16 %v1425_v40, %v1417_v39  ;;  %v2269_v40 = vsub.s32 4, %v7342_v9 }
 0x301   : > { %5022 = vmatprep.subr.bf16.mxu1 %v5021_v3  ;;  %5406 = vmatprep.subr.bf16.mxu0 %v5405_v4  ;;  %v1298_v3 = vld [vmem:[#allocation9 + $0x1250] sm:$0xff]  ;;  %v1305_v4 = vld [vmem:[#allocation9 + $0x1288] sm:$0xff]  ;;  %v1360_v58 = vld [vmem:[#allocation9 + $0x1440] sm:$0xff] }
 0x302   : > { %v5423_v11 = vpack.c.bf16 %v1298_v3, %v1290_v1  ;;  %v5041_v13 = vpack.c.bf16 %v1313_v5, %v1305_v4  ;;  %v1371_v1 = vld [vmem:[#allocation9 + $0x1498] sm:$0xff]  ;;  %v5055_v3 = vpack.c.bf16 %v1360_v58, %v1352_v57  ;;  %v5057_v5 = vpack.c.bf16 %v1377_v63, %v1369_v62  ;;  %v1433_v57 = vld [vmem:[#allocation9 + $0x1688] sm:$0xff] }
 0x303   : > { %2488 = vmatmul.mubr.f32.vlgmr.msra.gmra.mrb[2].mxu1 %v7408_v17  ;;  %2914 = vmatmul.mubr.f32.vlgmr.msra.gmra.mrb[4].mxu0 %v7408_v17  ;;  %v1441_v58 = vld [vmem:[#allocation9 + $0x16c8] sm:$0xff] }
 0x304   : > { %5024 = vmatpush1.bf16.msra.mxu1 %v5023_v16  ;;  %2558 = vmatprep.mubr.f32.mxu1 %v7413_v22  ;;  %v1306_v16 = vld [vmem:[#allocation9 + $0x1290] sm:$0xff]  ;;  %v5073_v63 = vpack.c.bf16 %v1441_v58, %v1433_v57  ;;  %v1499_v57 = vld [vmem:[#allocation9 + $0x1898] sm:$0xff] }
 0x305   : > { %5408 = vmatpush1.bf16.msra.mxu0 %v5407_v18  ;;  %2984 = vmatprep.mubr.f32.mxu0 %v7413_v22  ;;  %v5425_v18 = vpack.c.bf16 %v1315_v8, %v1307_v6  ;;  %v5427_v26 = vpack.c.bf16 %v1314_v19, %v1306_v16  ;;  %v1368_v6 = vld [vmem:[#allocation9 + $0x1480] sm:$0xff]  ;;  %v1387_v16 = vld [vmem:[#allocation9 + $0x1518] sm:$0xff] }
 0x306   : > { %5026 = vmatprep.subr.bf16.mxu1 %v5025_v23  ;;  %5410 = vmatprep.subr.bf16.mxu0 %v5409_v24  ;;  %v1323_v23 = vld [vmem:[#allocation9 + $0x1318] sm:$0xff]  ;;  %v1376_v8 = vld [vmem:[#allocation9 + $0x14c0] sm:$0xff] }
 0x307   : > { %v1331_v24 = vld [vmem:[#allocation9 + $0x1358] sm:$0xff]  ;;  %v5059_v19 = vpack.c.bf16 %v1376_v8, %v1368_v6  ;;  %v1449_v6 = vld [vmem:[#allocation9 + $0x1708] sm:$0xff] }
 0x308   : > { %5028 = vmatpush1.bf16.msra.mxu1 %v5027_v30  ;;  %v1322_v30 = vld [vmem:[#allocation9 + $0x1310] sm:$0xff]  ;;  %v1457_v8 = vld [vmem:[#allocation9 + $0x1748] sm:$0xff]  ;;  %v1507_v58 = vld [vmem:[#allocation9 + $0x18d8] sm:$0xff] }
 0x309   : > { %5412 = vmatpush1.bf16.msra.mxu0 %v5411_v46  ;;  %5030 = vmatprep.subr.bf16.mxu1 %v5029_v31  ;;  %v5429_v46 = vpack.c.bf16 %v1331_v24, %v1323_v23  ;;  %v1330_v31 = vld [vmem:[#allocation9 + $0x1350] sm:$0xff]  ;;  %v1384_v23 = vld [vmem:[#allocation9 + $0x1500] sm:$0xff]  ;;  %v5077_v15 = vpack.c.bf16 %v1457_v8, %v1449_v6  ;;  %v5473_v8 = vpack.c.bf16 %v1507_v58, %v1499_v57  ;;  %v1571_v57 = vld [vmem:[#allocation9 + $0x1ad8] sm:$0xff] }
 0x30a   : > { %5414 = vmatprep.subr.bf16.mxu0 %v5413_v35  ;;  %v1347_v35 = vld [vmem:[#allocation9 + $0x13d8] sm:$0xff]  ;;  %v5431_v37 = vpack.c.bf16 %v1330_v31, %v1322_v30  ;;  %v1392_v24 = vld [vmem:[#allocation9 + $0x1540] sm:$0xff] }
 0x30b   : > { %v1403_v30 = vld [vmem:[#allocation9 + $0x1598] sm:$0xff]  ;;  %v5063_v31 = vpack.c.bf16 %v1392_v24, %v1384_v23  ;;  %v1465_v23 = vld [vmem:[#allocation9 + $0x1788] sm:$0xff] }
 0x30c   : > { %5032 = vmatpush1.bf16.msra.mxu1 %v5031_v41  ;;  %v1338_v41 = vld [vmem:[#allocation9 + $0x1390] sm:$0xff]  ;;  %v1473_v24 = vld [vmem:[#allocation9 + $0x17c8] sm:$0xff] }
 0x30d   : > { %5416 = vmatpush1.bf16.msra.mxu0 %v5415_v44  ;;  %5034 = vmatprep.subr.bf16.mxu1 %v5033_v45  ;;  %v5433_v44 = vpack.c.bf16 %v1347_v35, %v1339_v34  ;;  %v1346_v45 = vld [vmem:[#allocation9 + $0x13d0] sm:$0xff]  ;;  %v1400_v34 = vld [vmem:[#allocation9 + $0x1580] sm:$0xff]  ;;  %v5081_v29 = vpack.c.bf16 %v1473_v24, %v1465_v23  ;;  %v1529_v23 = vld [vmem:[#allocation9 + $0x1988] sm:$0xff] }
 0x30e   : > { %5418 = vmatprep.subr.bf16.mxu0 %v5417_v52  ;;  %v1363_v52 = vld [vmem:[#allocation9 + $0x1458] sm:$0xff]  ;;  %v5435_v54 = vpack.c.bf16 %v1346_v45, %v1338_v41  ;;  %v1408_v35 = vld [vmem:[#allocation9 + $0x15c0] sm:$0xff]  ;;  %v1537_v24 = vld [vmem:[#allocation9 + $0x19c8] sm:$0xff] }
 0x30f   : > { %v1419_v41 = vld [vmem:[#allocation9 + $0x1618] sm:$0xff]  ;;  %v5067_v45 = vpack.c.bf16 %v1408_v35, %v1400_v34  ;;  %v1481_v34 = vld [vmem:[#allocation9 + $0x1808] sm:$0xff] }
 0x310   : > { %5036 = vmatpush1.bf16.msra.mxu1 %v5035_v59  ;;  %v1354_v59 = vld [vmem:[#allocation9 + $0x1410] sm:$0xff]  ;;  %v1489_v35 = vld [vmem:[#allocation9 + $0x1848] sm:$0xff] }
 0x311   : > { %5420 = vmatpush1.bf16.msra.mxu0 %v5419_v60  ;;  %5038 = vmatprep.subr.bf16.mxu1 %v5037_v61  ;;  %v5437_v60 = vpack.c.bf16 %v1363_v52, %v1355_v51  ;;  %v1362_v61 = vld [vmem:[#allocation9 + $0x1450] sm:$0xff]  ;;  %v1416_v51 = vld [vmem:[#allocation9 + $0x1600] sm:$0xff] }
 0x312   : > { %5422 = vmatprep.subr.bf16.mxu0 %v5421_v2  ;;  %v1379_v2 = vld [vmem:[#allocation9 + $0x14d8] sm:$0xff]  ;;  %v5439_v4 = vpack.c.bf16 %v1362_v61, %v1354_v59  ;;  %v1424_v52 = vld [vmem:[#allocation9 + $0x1640] sm:$0xff] }
 0x313   : > { %v1435_v59 = vld [vmem:[#allocation9 + $0x1698] sm:$0xff]  ;;  %v5071_v61 = vpack.c.bf16 %v1424_v52, %v1416_v51  ;;  %v1490_v51 = vld [vmem:[#allocation9 + $0x1850] sm:$0xff]  ;;  %v2281_v52 = vsub.s32 7, %v7342_v9 }
 0x314   : > { %5040 = vmatpush1.bf16.msra.mxu1 %v5039_v10  ;;  %v1370_v10 = vld [vmem:[#allocation9 + $0x1490] sm:$0xff] }
 0x315   : > { %5424 = vmatpush1.bf16.msra.mxu0 %v5423_v11  ;;  %5042 = vmatprep.subr.bf16.mxu1 %v5041_v13  ;;  %v5441_v11 = vpack.c.bf16 %v1379_v2, %v1371_v1  ;;  %v1378_v13 = vld [vmem:[#allocation9 + $0x14d0] sm:$0xff]  ;;  %v1432_v1 = vld [vmem:[#allocation9 + $0x1680] sm:$0xff] }
 0x316   : > { %5426 = vmatprep.subr.bf16.mxu0 %v5425_v18  ;;  %v1395_v18 = vld [vmem:[#allocation9 + $0x1558] sm:$0xff]  ;;  %v5443_v20 = vpack.c.bf16 %v1378_v13, %v1370_v10  ;;  %v1440_v2 = vld [vmem:[#allocation9 + $0x16c0] sm:$0xff] }
 0x317   : > { %v1451_v10 = vld [vmem:[#allocation9 + $0x1718] sm:$0xff]  ;;  %v5075_v13 = vpack.c.bf16 %v1440_v2, %v1432_v1  ;;  %v1498_v1 = vld [vmem:[#allocation9 + $0x1890] sm:$0xff] }
 0x318   : > { %5044 = vmatpush1.bf16.msra.mxu1 %v5043_v25  ;;  %v1386_v25 = vld [vmem:[#allocation9 + $0x1510] sm:$0xff] }
 0x319   : > { %5428 = vmatpush1.bf16.msra.mxu0 %v5427_v26  ;;  %5046 = vmatprep.subr.bf16.mxu1 %v5045_v27  ;;  %v5445_v26 = vpack.c.bf16 %v1395_v18, %v1387_v16  ;;  %v1394_v27 = vld [vmem:[#allocation9 + $0x1550] sm:$0xff]  ;;  %v1448_v16 = vld [vmem:[#allocation9 + $0x1700] sm:$0xff] }
 0x31a   : > { %5430 = vmatprep.subr.bf16.mxu0 %v5429_v46  ;;  %v1411_v46 = vld [vmem:[#allocation9 + $0x15d8] sm:$0xff]  ;;  %v5447_v32 = vpack.c.bf16 %v1394_v27, %v1386_v25  ;;  %v1456_v18 = vld [vmem:[#allocation9 + $0x1740] sm:$0xff] }
 0x31b   : > { %v1467_v25 = vld [vmem:[#allocation9 + $0x1798] sm:$0xff]  ;;  %v5079_v27 = vpack.c.bf16 %v1456_v18, %v1448_v16  ;;  %v1512_v16 = vld [vmem:[#allocation9 + $0x1900] sm:$0xff] }
 0x31c   : > { %5048 = vmatpush1.bf16.msra.mxu1 %v5047_v36  ;;  %v1402_v36 = vld [vmem:[#allocation9 + $0x1590] sm:$0xff]  ;;  %v1520_v18 = vld [vmem:[#allocation9 + $0x1940] sm:$0xff] }
 0x31d   : > { %5432 = vmatpush1.bf16.msra.mxu0 %v5431_v37  ;;  %5050 = vmatprep.subr.bf16.mxu1 %v5049_v38  ;;  %v5449_v37 = vpack.c.bf16 %v1411_v46, %v1403_v30  ;;  %v1410_v38 = vld [vmem:[#allocation9 + $0x15d0] sm:$0xff]  ;;  %v1464_v30 = vld [vmem:[#allocation9 + $0x1780] sm:$0xff] }
 0x31e   : > { %5434 = vmatprep.subr.bf16.mxu0 %v5433_v44  ;;  %v1427_v44 = vld [vmem:[#allocation9 + $0x1658] sm:$0xff]  ;;  %v5451_v47 = vpack.c.bf16 %v1410_v38, %v1402_v36  ;;  %v1472_v46 = vld [vmem:[#allocation9 + $0x17c0] sm:$0xff] }
 0x31f   : > { %v1483_v36 = vld [vmem:[#allocation9 + $0x1818] sm:$0xff]  ;;  %v5083_v38 = vpack.c.bf16 %v1472_v46, %v1464_v30  ;;  %v1528_v30 = vld [vmem:[#allocation9 + $0x1980] sm:$0xff] }
 0x320   : > { %5052 = vmatpush1.bf16.msra.mxu1 %v5051_v53  ;;  %v1418_v53 = vld [vmem:[#allocation9 + $0x1610] sm:$0xff]  ;;  %v1536_v46 = vld [vmem:[#allocation9 + $0x19c0] sm:$0xff] }
 0x321   : > { %5436 = vmatpush1.bf16.msra.mxu0 %v5435_v54  ;;  %5054 = vmatprep.subr.bf16.mxu1 %v5053_v56  ;;  %v5453_v54 = vpack.c.bf16 %v1427_v44, %v1419_v41  ;;  %v1426_v56 = vld [vmem:[#allocation9 + $0x1650] sm:$0xff]  ;;  %v5085_v41 = vpack.c.bf16 %v1489_v35, %v1481_v34  ;;  %v1480_v44 = vld [vmem:[#allocation9 + $0x1800] sm:$0xff]  ;;  %v1545_v34 = vld [vmem:[#allocation9 + $0x1a08] sm:$0xff] }
 0x322   : > { %5438 = vmatprep.subr.bf16.mxu0 %v5437_v60  ;;  %v1443_v60 = vld [vmem:[#allocation9 + $0x16d8] sm:$0xff]  ;;  %v5455_v62 = vpack.c.bf16 %v1426_v56, %v1418_v53  ;;  %v1497_v53 = vld [vmem:[#allocation9 + $0x1888] sm:$0xff] }
 0x323   : > { %v1553_v35 = vld [vmem:[#allocation9 + $0x1a48] sm:$0xff] }
 0x324   : > { %5056 = vmatpush1.bf16.msra.mxu1 %v5055_v3  ;;  %v1434_v3 = vld [vmem:[#allocation9 + $0x1690] sm:$0xff] }
 0x325   : > { %5440 = vmatpush1.bf16.msra.mxu0 %v5439_v4  ;;  %5058 = vmatprep.subr.bf16.mxu1 %v5057_v5  ;;  %v5457_v4 = vpack.c.bf16 %v1443_v60, %v1435_v59  ;;  %v1442_v5 = vld [vmem:[#allocation9 + $0x16d0] sm:$0xff] }
 0x326   : > { %5442 = vmatprep.subr.bf16.mxu0 %v5441_v11  ;;  %v1459_v11 = vld [vmem:[#allocation9 + $0x1758] sm:$0xff]  ;;  %v5459_v14 = vpack.c.bf16 %v1442_v5, %v1434_v3  ;;  %v1506_v3 = vld [vmem:[#allocation9 + $0x18d0] sm:$0xff]  ;;  %v1521_v5 = vld [vmem:[#allocation9 + $0x1948] sm:$0xff] }
 0x327   : > { %v7421_v59 = vld [vmem:[#allocation2] sm:$0xff] }
 0x328   : > { %5060 = vmatpush1.bf16.msra.mxu1 %v5059_v19  ;;  %v1450_v19 = vld [vmem:[#allocation9 + $0x1710] sm:$0xff]  ;;  %v7426_v60 = vrot.slane %v7421_v59, %v2269_v40  ;;  %v7432_v6 = vrot.slane %v7421_v59, %v2281_v52 }
 0x329   : > { %5444 = vmatpush1.bf16.msra.mxu0 %v5443_v20  ;;  %5062 = vmatprep.subr.bf16.mxu1 %v5061_v21  ;;  %v5461_v20 = vpack.c.bf16 %v1459_v11, %v1451_v10  ;;  %v1458_v21 = vld [vmem:[#allocation9 + $0x1750] sm:$0xff]  ;;  %v1515_v10 = vld [vmem:[#allocation9 + $0x1918] sm:$0xff] }
 0x32a   : > { %5446 = vmatprep.subr.bf16.mxu0 %v5445_v26  ;;  %v1475_v26 = vld [vmem:[#allocation9 + $0x17d8] sm:$0xff]  ;;  %v5463_v28 = vpack.c.bf16 %v1458_v21, %v1450_v19  ;;  %v1514_v19 = vld [vmem:[#allocation9 + $0x1910] sm:$0xff] }
 0x32b   : > { %v1523_v11 = vld [vmem:[#allocation9 + $0x1958] sm:$0xff]  ;;  %v1522_v21 = vld [vmem:[#allocation9 + $0x1950] sm:$0xff] }
 0x32c   : > { %5064 = vmatpush1.bf16.msra.mxu1 %v5063_v31  ;;  %v1466_v31 = vld [vmem:[#allocation9 + $0x1790] sm:$0xff] }
 0x32d   : > { %5448 = vmatpush1.bf16.msra.mxu0 %v5447_v32  ;;  %5066 = vmatprep.subr.bf16.mxu1 %v5065_v33  ;;  %v5465_v32 = vpack.c.bf16 %v1475_v26, %v1467_v25  ;;  %v1474_v33 = vld [vmem:[#allocation9 + $0x17d0] sm:$0xff]  ;;  %v1531_v25 = vld [vmem:[#allocation9 + $0x1998] sm:$0xff] }
 0x32e   : > { %5450 = vmatprep.subr.bf16.mxu0 %v5449_v37  ;;  %v1491_v37 = vld [vmem:[#allocation9 + $0x1858] sm:$0xff]  ;;  %v5467_v39 = vpack.c.bf16 %v1474_v33, %v1466_v31  ;;  %v1530_v31 = vld [vmem:[#allocation9 + $0x1990] sm:$0xff] }
 0x32f   : > { %v1539_v26 = vld [vmem:[#allocation9 + $0x19d8] sm:$0xff]  ;;  %v1538_v33 = vld [vmem:[#allocation9 + $0x19d0] sm:$0xff] }
 0x330   : > { %5068 = vmatpush1.bf16.msra.mxu1 %v5067_v45  ;;  %v1488_v45 = vld [vmem:[#allocation9 + $0x1840] sm:$0xff] }
 0x331   : > { %5452 = vmatpush1.bf16.msra.mxu0 %v5451_v47  ;;  %5070 = vmatprep.subr.bf16.mxu1 %v5069_v48  ;;  %v5469_v47 = vpack.c.bf16 %v1491_v37, %v1483_v36  ;;  %v1482_v48 = vld [vmem:[#allocation9 + $0x1810] sm:$0xff]  ;;  %v5087_v56 = vpack.c.bf16 %v1488_v45, %v1480_v44  ;;  %v1547_v36 = vld [vmem:[#allocation9 + $0x1a18] sm:$0xff]  ;;  %v1544_v44 = vld [vmem:[#allocation9 + $0x1a00] sm:$0xff] }
 0x332   : > { %5454 = vmatprep.subr.bf16.mxu0 %v5453_v54  ;;  %v1505_v54 = vld [vmem:[#allocation9 + $0x18c8] sm:$0xff]  ;;  %v1555_v37 = vld [vmem:[#allocation9 + $0x1a58] sm:$0xff]  ;;  %v1552_v45 = vld [vmem:[#allocation9 + $0x1a40] sm:$0xff] }
 0x333   : > { %v5089_v2 = vpack.c.bf16 %v1505_v54, %v1497_v53  ;;  %v1561_v53 = vld [vmem:[#allocation9 + $0x1a88] sm:$0xff]  ;;  %v5103_v58 = vpack.c.bf16 %v1552_v45, %v1544_v44  ;;  %v1608_v44 = vld [vmem:[#allocation9 + $0x1c00] sm:$0xff] }
 0x334   : > { %5072 = vmatpush1.bf16.msra.mxu1 %v5071_v61  ;;  %v5471_v61 = vpack.c.bf16 %v1490_v51, %v1482_v48  ;;  %v5485_v48 = vpack.c.bf16 %v1555_v37, %v1547_v36  ;;  %v1554_v51 = vld [vmem:[#allocation9 + $0x1a50] sm:$0xff]  ;;  %v1569_v54 = vld [vmem:[#allocation9 + $0x1ac8] sm:$0xff]  ;;  %v1611_v36 = vld [vmem:[#allocation9 + $0x1c18] sm:$0xff] }
 0x335   : > { %5456 = vmatpush1.bf16.msra.mxu0 %v5455_v62  ;;  %5074 = vmatprep.subr.bf16.mxu1 %v5073_v63  ;;  %v1496_v62 = vld [vmem:[#allocation9 + $0x1880] sm:$0xff]  ;;  %v1619_v37 = vld [vmem:[#allocation9 + $0x1c58] sm:$0xff] }
 0x336   : > { %5458 = vmatprep.subr.bf16.mxu0 %v5457_v4  ;;  %v1504_v63 = vld [vmem:[#allocation9 + $0x18c0] sm:$0xff]  ;;  %v1513_v4 = vld [vmem:[#allocation9 + $0x1908] sm:$0xff] }
 0x337   : > { %v1616_v45 = vld [vmem:[#allocation9 + $0x1c40] sm:$0xff] }
 0x338   : > { %5076 = vmatpush1.bf16.msra.mxu1 %v5075_v13  ;;  %v5091_v13 = vpack.c.bf16 %v1504_v63, %v1496_v62  ;;  %v5105_v62 = vpack.c.bf16 %v1569_v54, %v1561_v53  ;;  %v1560_v63 = vld [vmem:[#allocation9 + $0x1a80] sm:$0xff]  ;;  %v1625_v53 = vld [vmem:[#allocation9 + $0x1c88] sm:$0xff] }
 0x339   : > { %5460 = vmatpush1.bf16.msra.mxu0 %v5459_v14  ;;  %5078 = vmatprep.subr.bf16.mxu1 %v5077_v15  ;;  %v5475_v14 = vpack.c.bf16 %v1506_v3, %v1498_v1  ;;  %v5093_v15 = vpack.c.bf16 %v1521_v5, %v1513_v4  ;;  %v1568_v1 = vld [vmem:[#allocation9 + $0x1ac0] sm:$0xff]  ;;  %v1570_v4 = vld [vmem:[#allocation9 + $0x1ad0] sm:$0xff]  ;;  %v1577_v5 = vld [vmem:[#allocation9 + $0x1b08] sm:$0xff] }
 0x33a   : > { %5462 = vmatprep.subr.bf16.mxu0 %v5461_v20  ;;  %v5477_v20 = vpack.c.bf16 %v1523_v11, %v1515_v10  ;;  %v1579_v10 = vld [vmem:[#allocation9 + $0x1b18] sm:$0xff]  ;;  %v1633_v54 = vld [vmem:[#allocation9 + $0x1cc8] sm:$0xff] }
 0x33b   : > { %v1587_v11 = vld [vmem:[#allocation9 + $0x1b58] sm:$0xff] }
 0x33c   : > { %5080 = vmatpush1.bf16.msra.mxu1 %v5079_v27  ;;  %v5095_v27 = vpack.c.bf16 %v1520_v18, %v1512_v16  ;;  %v1576_v16 = vld [vmem:[#allocation9 + $0x1b00] sm:$0xff] }
 0x33d   : > { %5464 = vmatpush1.bf16.msra.mxu0 %v5463_v28  ;;  %5082 = vmatprep.subr.bf16.mxu1 %v5081_v29  ;;  %v5479_v28 = vpack.c.bf16 %v1522_v21, %v1514_v19  ;;  %v5097_v29 = vpack.c.bf16 %v1537_v24, %v1529_v23  ;;  %v1584_v18 = vld [vmem:[#allocation9 + $0x1b40] sm:$0xff]  ;;  %v1578_v19 = vld [vmem:[#allocation9 + $0x1b10] sm:$0xff]  ;;  %v1593_v23 = vld [vmem:[#allocation9 + $0x1b88] sm:$0xff] }
 0x33e   : > { %5466 = vmatprep.subr.bf16.mxu0 %v5465_v32  ;;  %v5481_v32 = vpack.c.bf16 %v1539_v26, %v1531_v25  ;;  %v1586_v21 = vld [vmem:[#allocation9 + $0x1b50] sm:$0xff]  ;;  %v1601_v24 = vld [vmem:[#allocation9 + $0x1bc8] sm:$0xff]  ;;  %v1595_v25 = vld [vmem:[#allocation9 + $0x1b98] sm:$0xff] }
 0x33f   : > { %v1603_v26 = vld [vmem:[#allocation9 + $0x1bd8] sm:$0xff] }
 0x340   : > { %5084 = vmatpush1.bf16.msra.mxu1 %v5083_v38  ;;  %v5099_v38 = vpack.c.bf16 %v1536_v46, %v1528_v30  ;;  %v1592_v30 = vld [vmem:[#allocation9 + $0x1b80] sm:$0xff] }
 0x341   : > { %5468 = vmatpush1.bf16.msra.mxu0 %v5467_v39  ;;  %5086 = vmatprep.subr.bf16.mxu1 %v5085_v41  ;;  %v5483_v39 = vpack.c.bf16 %v1538_v33, %v1530_v31  ;;  %v5101_v41 = vpack.c.bf16 %v1553_v35, %v1545_v34  ;;  %v1600_v46 = vld [vmem:[#allocation9 + $0x1bc0] sm:$0xff]  ;;  %v1594_v31 = vld [vmem:[#allocation9 + $0x1b90] sm:$0xff]  ;;  %v1609_v34 = vld [vmem:[#allocation9 + $0x1c08] sm:$0xff] }
 0x342   : > { %5470 = vmatprep.subr.bf16.mxu0 %v5469_v47  ;;  %v1546_v47 = vld [vmem:[#allocation9 + $0x1a10] sm:$0xff]  ;;  %v1617_v35 = vld [vmem:[#allocation9 + $0x1c48] sm:$0xff] }
 0x343   : > { %2559 = vmatmul.mubr.f32.vlgmr.msra.gmra.mrb[2].mxu1 %v7426_v60  ;;  %v1602_v33 = vld [vmem:[#allocation9 + $0x1bd0] sm:$0xff] }
 0x344   : > { %2985 = vmatmul.mubr.f32.vlgmr.msra.gmra.mrb[4].mxu0 %v7426_v60  ;;  %5088 = vmatpush1.bf16.msra.mxu1 %v5087_v56  ;;  %v1563_v56 = vld [vmem:[#allocation9 + $0x1a98] sm:$0xff] }
 0x345   : > { %2629 = vmatprep.mubr.f32.mxu1 %v7432_v6  ;;  %5472 = vmatpush1.bf16.msra.mxu0 %v5471_v61  ;;  %v5487_v61 = vpack.c.bf16 %v1554_v51, %v1546_v47  ;;  %v5489_v3 = vpack.c.bf16 %v1571_v57, %v1563_v56  ;;  %v1610_v47 = vld [vmem:[#allocation9 + $0x1c10] sm:$0xff]  ;;  %v1627_v56 = vld [vmem:[#allocation9 + $0x1c98] sm:$0xff] }
 0x346   : > { %3055 = vmatprep.mubr.f32.mxu0 %v7432_v6  ;;  %5090 = vmatprep.subr.bf16.mxu1 %v5089_v2  ;;  %v1562_v2 = vld [vmem:[#allocation9 + $0x1a90] sm:$0xff]  ;;  %v1635_v57 = vld [vmem:[#allocation9 + $0x1cd8] sm:$0xff] }
 0x347   : > { %5474 = vmatprep.subr.bf16.mxu0 %v5473_v8  ;;  %v1585_v8 = vld [vmem:[#allocation9 + $0x1b48] sm:$0xff]  ;;  %v1618_v51 = vld [vmem:[#allocation9 + $0x1c50] sm:$0xff] }
 0x348   : > { %5092 = vmatpush1.bf16.msra.mxu1 %v5091_v13  ;;  %v5107_v13 = vpack.c.bf16 %v1568_v1, %v1560_v63  ;;  %v1624_v63 = vld [vmem:[#allocation9 + $0x1c80] sm:$0xff] }
 0x349   : > { %5476 = vmatpush1.bf16.msra.mxu0 %v5475_v14  ;;  %5094 = vmatprep.subr.bf16.mxu1 %v5093_v15  ;;  %v5491_v14 = vpack.c.bf16 %v1570_v4, %v1562_v2  ;;  %v5109_v15 = vpack.c.bf16 %v1585_v8, %v1577_v5  ;;  %v1632_v1 = vld [vmem:[#allocation9 + $0x1cc0] sm:$0xff]  ;;  %v1626_v2 = vld [vmem:[#allocation9 + $0x1c90] sm:$0xff]  ;;  %v1641_v5 = vld [vmem:[#allocation9 + $0x1d08] sm:$0xff] }
 0x34a   : > { %5478 = vmatprep.subr.bf16.mxu0 %v5477_v20  ;;  %v5493_v20 = vpack.c.bf16 %v1587_v11, %v1579_v10  ;;  %v1634_v4 = vld [vmem:[#allocation9 + $0x1cd0] sm:$0xff]  ;;  %v1649_v8 = vld [vmem:[#allocation9 + $0x1d48] sm:$0xff]  ;;  %v1643_v10 = vld [vmem:[#allocation9 + $0x1d18] sm:$0xff] }
 0x34b   : > { %v1651_v11 = vld [vmem:[#allocation9 + $0x1d58] sm:$0xff] }
 0x34c   : > { %5096 = vmatpush1.bf16.msra.mxu1 %v5095_v27  ;;  %v5111_v27 = vpack.c.bf16 %v1584_v18, %v1576_v16  ;;  %v1640_v16 = vld [vmem:[#allocation9 + $0x1d00] sm:$0xff] }
 0x34d   : > { %5480 = vmatpush1.bf16.msra.mxu0 %v5479_v28  ;;  %5098 = vmatprep.subr.bf16.mxu1 %v5097_v29  ;;  %v5495_v28 = vpack.c.bf16 %v1586_v21, %v1578_v19  ;;  %v5113_v29 = vpack.c.bf16 %v1601_v24, %v1593_v23  ;;  %v1648_v18 = vld [vmem:[#allocation9 + $0x1d40] sm:$0xff]  ;;  %v1642_v19 = vld [vmem:[#allocation9 + $0x1d10] sm:$0xff]  ;;  %v1657_v23 = vld [vmem:[#allocation9 + $0x1d88] sm:$0xff] }
 0x34e   : > { %5482 = vmatprep.subr.bf16.mxu0 %v5481_v32  ;;  %v5497_v32 = vpack.c.bf16 %v1603_v26, %v1595_v25  ;;  %v1650_v21 = vld [vmem:[#allocation9 + $0x1d50] sm:$0xff]  ;;  %v1665_v24 = vld [vmem:[#allocation9 + $0x1dc8] sm:$0xff]  ;;  %v1659_v25 = vld [vmem:[#allocation9 + $0x1d98] sm:$0xff] }
 0x34f   : > { %v1667_v26 = vld [vmem:[#allocation9 + $0x1dd8] sm:$0xff] }
 0x350   : > { %5100 = vmatpush1.bf16.msra.mxu1 %v5099_v38  ;;  %v5115_v38 = vpack.c.bf16 %v1600_v46, %v1592_v30  ;;  %v1656_v30 = vld [vmem:[#allocation9 + $0x1d80] sm:$0xff] }
 0x351   : > { %5484 = vmatpush1.bf16.msra.mxu0 %v5483_v39  ;;  %5102 = vmatprep.subr.bf16.mxu1 %v5101_v41  ;;  %v5499_v39 = vpack.c.bf16 %v1602_v33, %v1594_v31  ;;  %v5117_v41 = vpack.c.bf16 %v1617_v35, %v1609_v34  ;;  %v1664_v46 = vld [vmem:[#allocation9 + $0x1dc0] sm:$0xff]  ;;  %v1658_v31 = vld [vmem:[#allocation9 + $0x1d90] sm:$0xff]  ;;  %v1673_v34 = vld [vmem:[#allocation9 + $0x1e08] sm:$0xff] }
 0x352   : > { %5486 = vmatprep.subr.bf16.mxu0 %v5485_v48  ;;  %v5501_v48 = vpack.c.bf16 %v1619_v37, %v1611_v36  ;;  %v1666_v33 = vld [vmem:[#allocation9 + $0x1dd0] sm:$0xff]  ;;  %v1681_v35 = vld [vmem:[#allocation9 + $0x1e48] sm:$0xff]  ;;  %v1675_v36 = vld [vmem:[#allocation9 + $0x1e18] sm:$0xff] }
 0x353   : > { %v1683_v37 = vld [vmem:[#allocation9 + $0x1e58] sm:$0xff] }
 0x354   : > { %5104 = vmatpush1.bf16.msra.mxu1 %v5103_v58  ;;  %v5119_v58 = vpack.c.bf16 %v1616_v45, %v1608_v44  ;;  %v1672_v44 = vld [vmem:[#allocation9 + $0x1e00] sm:$0xff] }
 0x355   : > { %5488 = vmatpush1.bf16.msra.mxu0 %v5487_v61  ;;  %5106 = vmatprep.subr.bf16.mxu1 %v5105_v62  ;;  %v5503_v61 = vpack.c.bf16 %v1618_v51, %v1610_v47  ;;  %v5121_v62 = vpack.c.bf16 %v1633_v54, %v1625_v53  ;;  %v1680_v45 = vld [vmem:[#allocation9 + $0x1e40] sm:$0xff]  ;;  %v1674_v47 = vld [vmem:[#allocation9 + $0x1e10] sm:$0xff]  ;;  %v1689_v53 = vld [vmem:[#allocation9 + $0x1e88] sm:$0xff] }
 0x356   : > { %5490 = vmatprep.subr.bf16.mxu0 %v5489_v3  ;;  %v5505_v3 = vpack.c.bf16 %v1635_v57, %v1627_v56  ;;  %v1682_v51 = vld [vmem:[#allocation9 + $0x1e50] sm:$0xff]  ;;  %v1697_v54 = vld [vmem:[#allocation9 + $0x1ec8] sm:$0xff]  ;;  %v1691_v56 = vld [vmem:[#allocation9 + $0x1e98] sm:$0xff] }
 0x357   : > { %v1699_v57 = vld [vmem:[#allocation9 + $0x1ed8] sm:$0xff] }
 0x358   : > { %5108 = vmatpush1.bf16.msra.mxu1 %v5107_v13  ;;  %v5123_v13 = vpack.c.bf16 %v1632_v1, %v1624_v63  ;;  %v1688_v63 = vld [vmem:[#allocation9 + $0x1e80] sm:$0xff] }
 0x359   : > { %5492 = vmatpush1.bf16.msra.mxu0 %v5491_v14  ;;  %5110 = vmatprep.subr.bf16.mxu1 %v5109_v15  ;;  %v5507_v14 = vpack.c.bf16 %v1634_v4, %v1626_v2  ;;  %v5125_v15 = vpack.c.bf16 %v1649_v8, %v1641_v5  ;;  %v1696_v1 = vld [vmem:[#allocation9 + $0x1ec0] sm:$0xff]  ;;  %v1690_v2 = vld [vmem:[#allocation9 + $0x1e90] sm:$0xff]  ;;  %v1705_v5 = vld [vmem:[#allocation9 + $0x1f08] sm:$0xff] }
 0x35a   : > { %5494 = vmatprep.subr.bf16.mxu0 %v5493_v20  ;;  %v5509_v20 = vpack.c.bf16 %v1651_v11, %v1643_v10  ;;  %v1698_v4 = vld [vmem:[#allocation9 + $0x1ed0] sm:$0xff]  ;;  %v1713_v8 = vld [vmem:[#allocation9 + $0x1f48] sm:$0xff]  ;;  %v1707_v10 = vld [vmem:[#allocation9 + $0x1f18] sm:$0xff] }
 0x35b   : > { %v1715_v11 = vld [vmem:[#allocation9 + $0x1f58] sm:$0xff] }
 0x35c   : > { %5112 = vmatpush1.bf16.msra.mxu1 %v5111_v27  ;;  %v5127_v27 = vpack.c.bf16 %v1648_v18, %v1640_v16  ;;  %v1704_v16 = vld [vmem:[#allocation9 + $0x1f00] sm:$0xff] }
 0x35d   : > { %5496 = vmatpush1.bf16.msra.mxu0 %v5495_v28  ;;  %5114 = vmatprep.subr.bf16.mxu1 %v5113_v29  ;;  %v5511_v28 = vpack.c.bf16 %v1650_v21, %v1642_v19  ;;  %v5129_v29 = vpack.c.bf16 %v1665_v24, %v1657_v23  ;;  %v1712_v18 = vld [vmem:[#allocation9 + $0x1f40] sm:$0xff]  ;;  %v1706_v19 = vld [vmem:[#allocation9 + $0x1f10] sm:$0xff]  ;;  %v1721_v23 = vld [vmem:[#allocation9 + $0x1f88] sm:$0xff] }
 0x35e   : > { %5498 = vmatprep.subr.bf16.mxu0 %v5497_v32  ;;  %v5513_v32 = vpack.c.bf16 %v1667_v26, %v1659_v25  ;;  %v1714_v21 = vld [vmem:[#allocation9 + $0x1f50] sm:$0xff]  ;;  %v1729_v24 = vld [vmem:[#allocation9 + $0x1fc8] sm:$0xff]  ;;  %v1723_v25 = vld [vmem:[#allocation9 + $0x1f98] sm:$0xff] }
 0x35f   : > { %v1731_v26 = vld [vmem:[#allocation9 + $0x1fd8] sm:$0xff] }
 0x360   : > { %5116 = vmatpush1.bf16.msra.mxu1 %v5115_v38  ;;  %v5131_v38 = vpack.c.bf16 %v1664_v46, %v1656_v30  ;;  %v1720_v30 = vld [vmem:[#allocation9 + $0x1f80] sm:$0xff] }
 0x361   : > { %5500 = vmatpush1.bf16.msra.mxu0 %v5499_v39  ;;  %5118 = vmatprep.subr.bf16.mxu1 %v5117_v41  ;;  %v5515_v39 = vpack.c.bf16 %v1666_v33, %v1658_v31  ;;  %v5133_v41 = vpack.c.bf16 %v1681_v35, %v1673_v34  ;;  %v1728_v46 = vld [vmem:[#allocation9 + $0x1fc0] sm:$0xff]  ;;  %v1722_v31 = vld [vmem:[#allocation9 + $0x1f90] sm:$0xff]  ;;  %v1737_v34 = vld [vmem:[#allocation9 + $0x2008] sm:$0xff] }
 0x362   : > { %5502 = vmatprep.subr.bf16.mxu0 %v5501_v48  ;;  %v5517_v48 = vpack.c.bf16 %v1683_v37, %v1675_v36  ;;  %v1730_v33 = vld [vmem:[#allocation9 + $0x1fd0] sm:$0xff]  ;;  %v1745_v35 = vld [vmem:[#allocation9 + $0x2048] sm:$0xff]  ;;  %v1739_v36 = vld [vmem:[#allocation9 + $0x2018] sm:$0xff] }
 0x363   : > { %v1747_v37 = vld [vmem:[#allocation9 + $0x2058] sm:$0xff] }
 0x364   : > { %5120 = vmatpush1.bf16.msra.mxu1 %v5119_v58  ;;  %v5135_v58 = vpack.c.bf16 %v1680_v45, %v1672_v44  ;;  %v5149_v44 = vpack.c.bf16 %v1745_v35, %v1737_v34  ;;  %v1736_v45 = vld [vmem:[#allocation9 + $0x2000] sm:$0xff]  ;;  %v1786_v34 = vld [vmem:[#allocation9 + $0x2190] sm:$0xff] }
 0x365   : > { %5504 = vmatpush1.bf16.msra.mxu0 %v5503_v61  ;;  %5122 = vmatprep.subr.bf16.mxu1 %v5121_v62  ;;  %v5519_v61 = vpack.c.bf16 %v1682_v51, %v1674_v47  ;;  %v5137_v62 = vpack.c.bf16 %v1697_v54, %v1689_v53  ;;  %v1744_v47 = vld [vmem:[#allocation9 + $0x2040] sm:$0xff]  ;;  %v1738_v51 = vld [vmem:[#allocation9 + $0x2010] sm:$0xff]  ;;  %v1753_v54 = vld [vmem:[#allocation9 + $0x2088] sm:$0xff] }
 0x366   : > { %5506 = vmatprep.subr.bf16.mxu0 %v5505_v3  ;;  %v5521_v3 = vpack.c.bf16 %v1699_v57, %v1691_v56  ;;  %v1746_v53 = vld [vmem:[#allocation9 + $0x2050] sm:$0xff]  ;;  %v1761_v56 = vld [vmem:[#allocation9 + $0x20c8] sm:$0xff]  ;;  %v5151_v57 = vpack.c.bf16 %v1744_v47, %v1736_v45 }
 0x368   : > { %5124 = vmatpush1.bf16.msra.mxu1 %v5123_v13  ;;  %v5139_v13 = vpack.c.bf16 %v1696_v1, %v1688_v63  ;;  %v5535_v1 = vpack.c.bf16 %v1746_v53, %v1738_v51  ;;  %v1800_v51 = vld [vmem:[#allocation9 + $0x2200] sm:$0xff] }
 0x369   : > { %5508 = vmatpush1.bf16.msra.mxu0 %v5507_v14  ;;  %5126 = vmatprep.subr.bf16.mxu1 %v5125_v15  ;;  %v5523_v14 = vpack.c.bf16 %v1698_v4, %v1690_v2  ;;  %v5141_v15 = vpack.c.bf16 %v1713_v8, %v1705_v5  ;;  %v1752_v2 = vld [vmem:[#allocation9 + $0x2080] sm:$0xff]  ;;  %v1754_v4 = vld [vmem:[#allocation9 + $0x2090] sm:$0xff]  ;;  %v5153_v5 = vpack.c.bf16 %v1761_v56, %v1753_v54 }
 0x36a   : > { %5510 = vmatprep.subr.bf16.mxu0 %v5509_v20  ;;  %v5525_v20 = vpack.c.bf16 %v1715_v11, %v1707_v10  ;;  %v1762_v8 = vld [vmem:[#allocation9 + $0x20d0] sm:$0xff]  ;;  %v1769_v10 = vld [vmem:[#allocation9 + $0x2108] sm:$0xff]  ;;  %v1808_v53 = vld [vmem:[#allocation9 + $0x2240] sm:$0xff] }
 0x36b   : > { %v1777_v11 = vld [vmem:[#allocation9 + $0x2148] sm:$0xff]  ;;  %v1802_v54 = vld [vmem:[#allocation9 + $0x2210] sm:$0xff] }
 0x36c   : > { %5128 = vmatpush1.bf16.msra.mxu1 %v5127_v27  ;;  %v5143_v27 = vpack.c.bf16 %v1712_v18, %v1704_v16  ;;  %v5539_v18 = vpack.c.bf16 %v1762_v8, %v1754_v4  ;;  %v1816_v8 = vld [vmem:[#allocation9 + $0x2280] sm:$0xff] }
 0x36d   : > { %5512 = vmatpush1.bf16.msra.mxu0 %v5511_v28  ;;  %5130 = vmatprep.subr.bf16.mxu1 %v5129_v29  ;;  %v5527_v28 = vpack.c.bf16 %v1714_v21, %v1706_v19  ;;  %v5145_v29 = vpack.c.bf16 %v1729_v24, %v1721_v23  ;;  %v5157_v19 = vpack.c.bf16 %v1777_v11, %v1769_v10  ;;  %v1776_v21 = vld [vmem:[#allocation9 + $0x2140] sm:$0xff]  ;;  %v1770_v23 = vld [vmem:[#allocation9 + $0x2110] sm:$0xff] }
 0x36e   : > { %5514 = vmatprep.subr.bf16.mxu0 %v5513_v32  ;;  %v5529_v32 = vpack.c.bf16 %v1731_v26, %v1723_v25  ;;  %v1778_v25 = vld [vmem:[#allocation9 + $0x2150] sm:$0xff]  ;;  %v1785_v26 = vld [vmem:[#allocation9 + $0x2188] sm:$0xff]  ;;  %v1824_v10 = vld [vmem:[#allocation9 + $0x22c0] sm:$0xff] }
 0x36f   : > { %v1818_v11 = vld [vmem:[#allocation9 + $0x2290] sm:$0xff] }
 0x370   : > { %5132 = vmatpush1.bf16.msra.mxu1 %v5131_v38  ;;  %v5147_v38 = vpack.c.bf16 %v1728_v46, %v1720_v30  ;;  %v5543_v46 = vpack.c.bf16 %v1778_v25, %v1770_v23  ;;  %v1840_v25 = vld [vmem:[#allocation9 + $0x2340] sm:$0xff] }
 0x371   : > { %5516 = vmatpush1.bf16.msra.mxu0 %v5515_v39  ;;  %5134 = vmatprep.subr.bf16.mxu1 %v5133_v41  ;;  %v5531_v39 = vpack.c.bf16 %v1730_v33, %v1722_v31  ;;  %v2277_v41 = vsub.s32 6, %v7342_v9  ;;  %v1792_v33 = vld [vmem:[#allocation9 + $0x21c0] sm:$0xff] }
 0x372   : > { %5518 = vmatprep.subr.bf16.mxu0 %v5517_v48  ;;  %v5533_v48 = vpack.c.bf16 %v1747_v37, %v1739_v36  ;;  %v1794_v36 = vld [vmem:[#allocation9 + $0x21d0] sm:$0xff]  ;;  %v1801_v37 = vld [vmem:[#allocation9 + $0x2208] sm:$0xff] }
 0x373   : > { %v7443_v63 = vrot.slane %v7421_v59, %v2277_v41  ;;  %v1779_v59 = vld [vmem:[#allocation9 + $0x2158] sm:$0xff]  ;;  %v5547_v47 = vpack.c.bf16 %v1794_v36, %v1786_v34  ;;  %v1856_v36 = vld [vmem:[#allocation9 + $0x23c0] sm:$0xff] }
 0x374   : > { %5136 = vmatpush1.bf16.msra.mxu1 %v5135_v58  ;;  %v7438_v58 = vld [vmem:[#allocation2 + $0x8] sm:$0xf] }
 0x375   : > { %5520 = vmatpush1.bf16.msra.mxu0 %v5519_v61  ;;  %5138 = vmatprep.subr.bf16.mxu1 %v5137_v62  ;;  %v1755_v61 = vld [vmem:[#allocation9 + $0x2098] sm:$0xff] }
 0x376   : > { %5522 = vmatprep.subr.bf16.mxu0 %v5521_v3  ;;  %v1763_v62 = vld [vmem:[#allocation9 + $0x20d8] sm:$0xff]  ;;  %v1760_v3 = vld [vmem:[#allocation9 + $0x20c0] sm:$0xff] }
 0x377   : > { %v5155_v16 = vpack.c.bf16 %v1760_v3, %v1752_v2  ;;  %v1827_v2 = vld [vmem:[#allocation9 + $0x22d8] sm:$0xff]  ;;  %v5167_v3 = vpack.c.bf16 %v1808_v53, %v1800_v51 }
 0x378   : > { %5140 = vmatpush1.bf16.msra.mxu1 %v5139_v13  ;;  %v7448_v13 = vrot.slane %v7438_v58, %v7374_v42 }
 0x379   : > { %5524 = vmatpush1.bf16.msra.mxu0 %v5523_v14  ;;  %5142 = vmatprep.subr.bf16.mxu1 %v5141_v15  ;;  %v5537_v14 = vpack.c.bf16 %v1763_v62, %v1755_v61  ;;  %v1771_v15 = vld [vmem:[#allocation9 + $0x2118] sm:$0xff]  ;;  %v1817_v61 = vld [vmem:[#allocation9 + $0x2288] sm:$0xff] }
 0x37a   : > { %5526 = vmatprep.subr.bf16.mxu0 %v5525_v20  ;;  %v1768_v20 = vld [vmem:[#allocation9 + $0x2100] sm:$0xff]  ;;  %v5541_v24 = vpack.c.bf16 %v1779_v59, %v1771_v15  ;;  %v1825_v62 = vld [vmem:[#allocation9 + $0x22c8] sm:$0xff]  ;;  %v1826_v15 = vld [vmem:[#allocation9 + $0x22d0] sm:$0xff] }
 0x37b   : > { %v5159_v30 = vpack.c.bf16 %v1776_v21, %v1768_v20  ;;  %v1833_v59 = vld [vmem:[#allocation9 + $0x2308] sm:$0xff]  ;;  %v5171_v20 = vpack.c.bf16 %v1824_v10, %v1816_v8  ;;  %v5555_v21 = vpack.c.bf16 %v1826_v15, %v1818_v11  ;;  %v1888_v15 = vld [vmem:[#allocation9 + $0x24c0] sm:$0xff] }
 0x37c   : > { %5144 = vmatpush1.bf16.msra.mxu1 %v5143_v27  ;;  %v1793_v27 = vld [vmem:[#allocation9 + $0x21c8] sm:$0xff] }
 0x37d   : > { %5528 = vmatpush1.bf16.msra.mxu0 %v5527_v28  ;;  %5146 = vmatprep.subr.bf16.mxu1 %v5145_v29  ;;  %v1787_v28 = vld [vmem:[#allocation9 + $0x2198] sm:$0xff]  ;;  %v5161_v31 = vpack.c.bf16 %v1793_v27, %v1785_v26  ;;  %v1834_v26 = vld [vmem:[#allocation9 + $0x2310] sm:$0xff] }
 0x37e   : > { %5530 = vmatprep.subr.bf16.mxu0 %v5529_v32  ;;  %v1795_v29 = vld [vmem:[#allocation9 + $0x21d8] sm:$0xff]  ;;  %v1784_v32 = vld [vmem:[#allocation9 + $0x2180] sm:$0xff] }
 0x37f   : > { %v5545_v35 = vpack.c.bf16 %v1795_v29, %v1787_v28  ;;  %v5163_v45 = vpack.c.bf16 %v1792_v33, %v1784_v32  ;;  %v1842_v28 = vld [vmem:[#allocation9 + $0x2350] sm:$0xff]  ;;  %v1849_v29 = vld [vmem:[#allocation9 + $0x2388] sm:$0xff] }
 0x380   : > { %5148 = vmatpush1.bf16.msra.mxu1 %v5147_v38  ;;  %v1809_v38 = vld [vmem:[#allocation9 + $0x2248] sm:$0xff]  ;;  %v5559_v33 = vpack.c.bf16 %v1842_v28, %v1834_v26  ;;  %v1904_v28 = vld [vmem:[#allocation9 + $0x2540] sm:$0xff] }
 0x381   : > { %5532 = vmatpush1.bf16.msra.mxu0 %v5531_v39  ;;  %5150 = vmatprep.subr.bf16.mxu1 %v5149_v44  ;;  %v1803_v39 = vld [vmem:[#allocation9 + $0x2218] sm:$0xff] }
 0x382   : > { %5534 = vmatprep.subr.bf16.mxu0 %v5533_v48  ;;  %v1811_v44 = vld [vmem:[#allocation9 + $0x2258] sm:$0xff]  ;;  %v5165_v48 = vpack.c.bf16 %v1809_v38, %v1801_v37  ;;  %v1850_v37 = vld [vmem:[#allocation9 + $0x2390] sm:$0xff] }
 0x383   : > { %2630 = vmatmul.mubr.f32.vlgmr.msra.gmra.mrb[2].mxu1 %v7443_v63  ;;  %v5549_v56 = vpack.c.bf16 %v1811_v44, %v1803_v39  ;;  %v1858_v39 = vld [vmem:[#allocation9 + $0x23d0] sm:$0xff]  ;;  %v1865_v44 = vld [vmem:[#allocation9 + $0x2408] sm:$0xff] }
 0x384   : > { %3056 = vmatmul.mubr.f32.vlgmr.msra.gmra.mrb[4].mxu0 %v7443_v63  ;;  %5152 = vmatpush1.bf16.msra.mxu1 %v5151_v57  ;;  %v1810_v57 = vld [vmem:[#allocation9 + $0x2250] sm:$0xff]  ;;  %v5563_v53 = vpack.c.bf16 %v1858_v39, %v1850_v37  ;;  %v1920_v39 = vld [vmem:[#allocation9 + $0x25c0] sm:$0xff] }
 0x385   : > { %2700 = vmatprep.mubr.f32.mxu1 %v7448_v13  ;;  %5536 = vmatpush1.bf16.msra.mxu0 %v5535_v1  ;;  %v1819_v1 = vld [vmem:[#allocation9 + $0x2298] sm:$0xff]  ;;  %v5551_v4 = vpack.c.bf16 %v1810_v57, %v1802_v54  ;;  %v1872_v57 = vld [vmem:[#allocation9 + $0x2440] sm:$0xff] }
 0x386   : > { %3126 = vmatprep.mubr.f32.mxu0 %v7448_v13  ;;  %5154 = vmatprep.subr.bf16.mxu1 %v5153_v5  ;;  %v5169_v5 = vpack.c.bf16 %v1825_v62, %v1817_v61  ;;  %v1866_v61 = vld [vmem:[#allocation9 + $0x2410] sm:$0xff] }
 0x387   : > { %5538 = vmatprep.subr.bf16.mxu0 %v5537_v14  ;;  %v5553_v14 = vpack.c.bf16 %v1827_v2, %v1819_v1  ;;  %v1874_v1 = vld [vmem:[#allocation9 + $0x2450] sm:$0xff]  ;;  %v1881_v2 = vld [vmem:[#allocation9 + $0x2488] sm:$0xff] }
 0x388   : > { %5156 = vmatpush1.bf16.msra.mxu1 %v5155_v16  ;;  %v1841_v16 = vld [vmem:[#allocation9 + $0x2348] sm:$0xff]  ;;  %v5567_v10 = vpack.c.bf16 %v1874_v1, %v1866_v61  ;;  %v1936_v1 = vld [vmem:[#allocation9 + $0x2640] sm:$0xff] }
 0x389   : > { %5540 = vmatpush1.bf16.msra.mxu0 %v5539_v18  ;;  %5158 = vmatprep.subr.bf16.mxu1 %v5157_v19  ;;  %v1835_v18 = vld [vmem:[#allocation9 + $0x2318] sm:$0xff]  ;;  %v5173_v23 = vpack.c.bf16 %v1841_v16, %v1833_v59  ;;  %v1882_v59 = vld [vmem:[#allocation9 + $0x2490] sm:$0xff] }
 0x38a   : > { %5542 = vmatprep.subr.bf16.mxu0 %v5541_v24  ;;  %v1843_v19 = vld [vmem:[#allocation9 + $0x2358] sm:$0xff]  ;;  %v1832_v24 = vld [vmem:[#allocation9 + $0x2300] sm:$0xff] }
 0x38b   : > { %v5557_v27 = vpack.c.bf16 %v1843_v19, %v1835_v18  ;;  %v5175_v32 = vpack.c.bf16 %v1840_v25, %v1832_v24  ;;  %v1890_v18 = vld [vmem:[#allocation9 + $0x24d0] sm:$0xff]  ;;  %v1897_v19 = vld [vmem:[#allocation9 + $0x2508] sm:$0xff] }
 0x38c   : > { %5160 = vmatpush1.bf16.msra.mxu1 %v5159_v30  ;;  %v1857_v30 = vld [vmem:[#allocation9 + $0x23c8] sm:$0xff]  ;;  %v5571_v25 = vpack.c.bf16 %v1890_v18, %v1882_v59  ;;  %v1952_v18 = vld [vmem:[#allocation9 + $0x26c0] sm:$0xff] }
 0x38d   : > { %5544 = vmatpush1.bf16.msra.mxu0 %v5543_v46  ;;  %5162 = vmatprep.subr.bf16.mxu1 %v5161_v31  ;;  %v1851_v46 = vld [vmem:[#allocation9 + $0x2398] sm:$0xff]  ;;  %v5177_v34 = vpack.c.bf16 %v1857_v30, %v1849_v29  ;;  %v1898_v29 = vld [vmem:[#allocation9 + $0x2510] sm:$0xff] }
 0x38e   : > { %5546 = vmatprep.subr.bf16.mxu0 %v5545_v35  ;;  %v1859_v31 = vld [vmem:[#allocation9 + $0x23d8] sm:$0xff]  ;;  %v1848_v35 = vld [vmem:[#allocation9 + $0x2380] sm:$0xff] }
 0x38f   : > { %v5561_v38 = vpack.c.bf16 %v1859_v31, %v1851_v46  ;;  %v5179_v51 = vpack.c.bf16 %v1856_v36, %v1848_v35  ;;  %v1906_v46 = vld [vmem:[#allocation9 + $0x2550] sm:$0xff]  ;;  %v1913_v31 = vld [vmem:[#allocation9 + $0x2588] sm:$0xff] }
 0x390   : > { %5164 = vmatpush1.bf16.msra.mxu1 %v5163_v45  ;;  %v1873_v45 = vld [vmem:[#allocation9 + $0x2448] sm:$0xff]  ;;  %v5575_v36 = vpack.c.bf16 %v1906_v46, %v1898_v29  ;;  %v1968_v46 = vld [vmem:[#allocation9 + $0x2740] sm:$0xff] }
 0x391   : > { %5548 = vmatpush1.bf16.msra.mxu0 %v5547_v47  ;;  %5166 = vmatprep.subr.bf16.mxu1 %v5165_v48  ;;  %v1867_v47 = vld [vmem:[#allocation9 + $0x2418] sm:$0xff]  ;;  %v5181_v54 = vpack.c.bf16 %v1873_v45, %v1865_v44  ;;  %v1914_v44 = vld [vmem:[#allocation9 + $0x2590] sm:$0xff] }
 0x392   : > { %5550 = vmatprep.subr.bf16.mxu0 %v5549_v56  ;;  %v1875_v48 = vld [vmem:[#allocation9 + $0x2458] sm:$0xff]  ;;  %v1864_v56 = vld [vmem:[#allocation9 + $0x2400] sm:$0xff] }
 0x393   : > { %v5565_v62 = vpack.c.bf16 %v1875_v48, %v1867_v47  ;;  %v5183_v8 = vpack.c.bf16 %v1872_v57, %v1864_v56  ;;  %v1922_v47 = vld [vmem:[#allocation9 + $0x25d0] sm:$0xff]  ;;  %v1929_v48 = vld [vmem:[#allocation9 + $0x2608] sm:$0xff] }
 0x394   : > { %5168 = vmatpush1.bf16.msra.mxu1 %v5167_v3  ;;  %v1889_v3 = vld [vmem:[#allocation9 + $0x24c8] sm:$0xff]  ;;  %v5579_v57 = vpack.c.bf16 %v1922_v47, %v1914_v44  ;;  %v1984_v47 = vld [vmem:[#allocation9 + $0x27c0] sm:$0xff] }
 0x395   : > { %5552 = vmatpush1.bf16.msra.mxu0 %v5551_v4  ;;  %5170 = vmatprep.subr.bf16.mxu1 %v5169_v5  ;;  %v1883_v4 = vld [vmem:[#allocation9 + $0x2498] sm:$0xff]  ;;  %v5185_v11 = vpack.c.bf16 %v1889_v3, %v1881_v2  ;;  %v1930_v2 = vld [vmem:[#allocation9 + $0x2610] sm:$0xff] }
 0x396   : > { %5554 = vmatprep.subr.bf16.mxu0 %v5553_v14  ;;  %v1891_v5 = vld [vmem:[#allocation9 + $0x24d8] sm:$0xff]  ;;  %v1880_v14 = vld [vmem:[#allocation9 + $0x2480] sm:$0xff] }
 0x397   : > { %v5569_v16 = vpack.c.bf16 %v1891_v5, %v1883_v4  ;;  %v5187_v24 = vpack.c.bf16 %v1888_v15, %v1880_v14  ;;  %v1938_v4 = vld [vmem:[#allocation9 + $0x2650] sm:$0xff]  ;;  %v1945_v5 = vld [vmem:[#allocation9 + $0x2688] sm:$0xff] }
 0x398   : > { %5172 = vmatpush1.bf16.msra.mxu1 %v5171_v20  ;;  %v1905_v20 = vld [vmem:[#allocation9 + $0x2548] sm:$0xff]  ;;  %v5583_v15 = vpack.c.bf16 %v1938_v4, %v1930_v2  ;;  %v2000_v4 = vld [vmem:[#allocation9 + $0x2840] sm:$0xff] }
 0x399   : > { %5556 = vmatpush1.bf16.msra.mxu0 %v5555_v21  ;;  %5174 = vmatprep.subr.bf16.mxu1 %v5173_v23  ;;  %v1899_v21 = vld [vmem:[#allocation9 + $0x2518] sm:$0xff]  ;;  %v5189_v26 = vpack.c.bf16 %v1905_v20, %v1897_v19  ;;  %v1946_v19 = vld [vmem:[#allocation9 + $0x2690] sm:$0xff] }
 0x39a   : > { %5558 = vmatprep.subr.bf16.mxu0 %v5557_v27  ;;  %v1907_v23 = vld [vmem:[#allocation9 + $0x2558] sm:$0xff]  ;;  %v1896_v27 = vld [vmem:[#allocation9 + $0x2500] sm:$0xff] }
 0x39b   : > { %v5573_v30 = vpack.c.bf16 %v1907_v23, %v1899_v21  ;;  %v5191_v35 = vpack.c.bf16 %v1904_v28, %v1896_v27  ;;  %v1954_v21 = vld [vmem:[#allocation9 + $0x26d0] sm:$0xff]  ;;  %v1961_v23 = vld [vmem:[#allocation9 + $0x2708] sm:$0xff] }
 0x39c   : > { %5176 = vmatpush1.bf16.msra.mxu1 %v5175_v32  ;;  %v1921_v32 = vld [vmem:[#allocation9 + $0x25c8] sm:$0xff]  ;;  %v5587_v28 = vpack.c.bf16 %v1954_v21, %v1946_v19  ;;  %v2016_v21 = vld [vmem:[#allocation9 + $0x28c0] sm:$0xff] }
 0x39d   : > { %5560 = vmatpush1.bf16.msra.mxu0 %v5559_v33  ;;  %5178 = vmatprep.subr.bf16.mxu1 %v5177_v34  ;;  %v1915_v33 = vld [vmem:[#allocation9 + $0x2598] sm:$0xff]  ;;  %v5193_v37 = vpack.c.bf16 %v1921_v32, %v1913_v31  ;;  %v1962_v31 = vld [vmem:[#allocation9 + $0x2710] sm:$0xff] }
 0x39e   : > { %5562 = vmatprep.subr.bf16.mxu0 %v5561_v38  ;;  %v1923_v34 = vld [vmem:[#allocation9 + $0x25d8] sm:$0xff]  ;;  %v1912_v38 = vld [vmem:[#allocation9 + $0x2580] sm:$0xff] }
 0x39f   : > { %v5577_v45 = vpack.c.bf16 %v1923_v34, %v1915_v33  ;;  %v5195_v56 = vpack.c.bf16 %v1920_v39, %v1912_v38  ;;  %v1970_v33 = vld [vmem:[#allocation9 + $0x2750] sm:$0xff]  ;;  %v1977_v34 = vld [vmem:[#allocation9 + $0x2788] sm:$0xff] }
 0x3a0   : > { %5180 = vmatpush1.bf16.msra.mxu1 %v5179_v51  ;;  %v1937_v51 = vld [vmem:[#allocation9 + $0x2648] sm:$0xff]  ;;  %v5591_v39 = vpack.c.bf16 %v1970_v33, %v1962_v31 }
 0x3a1   : > { %5564 = vmatpush1.bf16.msra.mxu0 %v5563_v53  ;;  %5182 = vmatprep.subr.bf16.mxu1 %v5181_v54  ;;  %v1931_v53 = vld [vmem:[#allocation9 + $0x2618] sm:$0xff]  ;;  %v5197_v61 = vpack.c.bf16 %v1937_v51, %v1929_v48  ;;  %v1978_v48 = vld [vmem:[#allocation9 + $0x2790] sm:$0xff] }
 0x3a2   : > { %5566 = vmatprep.subr.bf16.mxu0 %v5565_v62  ;;  %v1939_v54 = vld [vmem:[#allocation9 + $0x2658] sm:$0xff]  ;;  %v1928_v62 = vld [vmem:[#allocation9 + $0x2600] sm:$0xff] }
 0x3a3   : > { %v5581_v3 = vpack.c.bf16 %v1939_v54, %v1931_v53  ;;  %v5199_v14 = vpack.c.bf16 %v1936_v1, %v1928_v62  ;;  %v1986_v53 = vld [vmem:[#allocation9 + $0x27d0] sm:$0xff]  ;;  %v1993_v54 = vld [vmem:[#allocation9 + $0x2808] sm:$0xff] }
 0x3a4   : > { %5184 = vmatpush1.bf16.msra.mxu1 %v5183_v8  ;;  %v1953_v8 = vld [vmem:[#allocation9 + $0x26c8] sm:$0xff]  ;;  %v5595_v1 = vpack.c.bf16 %v1986_v53, %v1978_v48  ;;  %v2040_v53 = vld [vmem:[#allocation9 + $0x2980] sm:$0xff] }
 0x3a5   : > { %5568 = vmatpush1.bf16.msra.mxu0 %v5567_v10  ;;  %5186 = vmatprep.subr.bf16.mxu1 %v5185_v11  ;;  %v1947_v10 = vld [vmem:[#allocation9 + $0x2698] sm:$0xff]  ;;  %v5201_v59 = vpack.c.bf16 %v1953_v8, %v1945_v5  ;;  %v1994_v8 = vld [vmem:[#allocation9 + $0x2810] sm:$0xff] }
 0x3a6   : > { %5570 = vmatprep.subr.bf16.mxu0 %v5569_v16  ;;  %v1955_v11 = vld [vmem:[#allocation9 + $0x26d8] sm:$0xff]  ;;  %v1944_v16 = vld [vmem:[#allocation9 + $0x2680] sm:$0xff] }
 0x3a7   : > { %v5585_v20 = vpack.c.bf16 %v1955_v11, %v1947_v10  ;;  %v5203_v27 = vpack.c.bf16 %v1952_v18, %v1944_v16  ;;  %v2002_v10 = vld [vmem:[#allocation9 + $0x2850] sm:$0xff]  ;;  %v2009_v11 = vld [vmem:[#allocation9 + $0x2888] sm:$0xff]  ;;  %v2019_v16 = vld [vmem:[#allocation9 + $0x28d8] sm:$0xff]  ;;  %v7455_v18 = vrot.slane %v7438_v58, %v7377_v43 }
 0x3a8   : > { %5188 = vmatpush1.bf16.msra.mxu1 %v5187_v24  ;;  %v1969_v24 = vld [vmem:[#allocation9 + $0x2748] sm:$0xff]  ;;  %v5599_v19 = vpack.c.bf16 %v2002_v10, %v1994_v8  ;;  %v2056_v10 = vld [vmem:[#allocation9 + $0x2a00] sm:$0xff] }
 0x3a9   : > { %5572 = vmatpush1.bf16.msra.mxu0 %v5571_v25  ;;  %5190 = vmatprep.subr.bf16.mxu1 %v5189_v26  ;;  %v1963_v25 = vld [vmem:[#allocation9 + $0x2718] sm:$0xff]  ;;  %v5205_v29 = vpack.c.bf16 %v1969_v24, %v1961_v23  ;;  %v2010_v23 = vld [vmem:[#allocation9 + $0x2890] sm:$0xff] }
 0x3aa   : > { %5574 = vmatprep.subr.bf16.mxu0 %v5573_v30  ;;  %v1971_v26 = vld [vmem:[#allocation9 + $0x2758] sm:$0xff]  ;;  %v1960_v30 = vld [vmem:[#allocation9 + $0x2700] sm:$0xff] }
 0x3ab   : > { %v5589_v32 = vpack.c.bf16 %v1971_v26, %v1963_v25  ;;  %v5207_v38 = vpack.c.bf16 %v1968_v46, %v1960_v30  ;;  %v2018_v25 = vld [vmem:[#allocation9 + $0x28d0] sm:$0xff]  ;;  %v2025_v26 = vld [vmem:[#allocation9 + $0x2908] sm:$0xff]  ;;  %v2027_v30 = vld [vmem:[#allocation9 + $0x2918] sm:$0xff] }
 0x3ac   : > { %5192 = vmatpush1.bf16.msra.mxu1 %v5191_v35  ;;  %v1985_v35 = vld [vmem:[#allocation9 + $0x27c8] sm:$0xff]  ;;  %v2035_v46 = vld [vmem:[#allocation9 + $0x2958] sm:$0xff] }
 0x3ad   : > { %5576 = vmatpush1.bf16.msra.mxu0 %v5575_v36  ;;  %5194 = vmatprep.subr.bf16.mxu1 %v5193_v37  ;;  %v1979_v36 = vld [vmem:[#allocation9 + $0x2798] sm:$0xff]  ;;  %v5209_v44 = vpack.c.bf16 %v1985_v35, %v1977_v34  ;;  %v2024_v34 = vld [vmem:[#allocation9 + $0x2900] sm:$0xff] }
 0x3ae   : > { %5578 = vmatprep.subr.bf16.mxu0 %v5577_v45  ;;  %v1987_v37 = vld [vmem:[#allocation9 + $0x27d8] sm:$0xff]  ;;  %v1976_v45 = vld [vmem:[#allocation9 + $0x2780] sm:$0xff] }
 0x3af   : > { %v5593_v51 = vpack.c.bf16 %v1987_v37, %v1979_v36  ;;  %v5211_v62 = vpack.c.bf16 %v1984_v47, %v1976_v45  ;;  %v2032_v35 = vld [vmem:[#allocation9 + $0x2940] sm:$0xff]  ;;  %v2026_v36 = vld [vmem:[#allocation9 + $0x2910] sm:$0xff]  ;;  %v2051_v45 = vld [vmem:[#allocation9 + $0x29d8] sm:$0xff] }
 0x3b0   : > { %5196 = vmatpush1.bf16.msra.mxu1 %v5195_v56  ;;  %v2001_v56 = vld [vmem:[#allocation9 + $0x2848] sm:$0xff]  ;;  %v2034_v37 = vld [vmem:[#allocation9 + $0x2950] sm:$0xff]  ;;  %v5223_v47 = vpack.c.bf16 %v2032_v35, %v2024_v34  ;;  %v2099_v34 = vld [vmem:[#allocation9 + $0x2b58] sm:$0xff] }
 0x3b1   : > { %5580 = vmatpush1.bf16.msra.mxu0 %v5579_v57  ;;  %5198 = vmatprep.subr.bf16.mxu1 %v5197_v61  ;;  %v1995_v57 = vld [vmem:[#allocation9 + $0x2818] sm:$0xff]  ;;  %v5213_v2 = vpack.c.bf16 %v2001_v56, %v1993_v54  ;;  %v5607_v48 = vpack.c.bf16 %v2034_v37, %v2026_v36  ;;  %v2048_v54 = vld [vmem:[#allocation9 + $0x29c0] sm:$0xff]  ;;  %v2042_v56 = vld [vmem:[#allocation9 + $0x2990] sm:$0xff] }
 0x3b2   : > { %5582 = vmatprep.subr.bf16.mxu0 %v5581_v3  ;;  %v2003_v61 = vld [vmem:[#allocation9 + $0x2858] sm:$0xff]  ;;  %v1992_v3 = vld [vmem:[#allocation9 + $0x2800] sm:$0xff] }
 0x3b3   : > { %v5597_v5 = vpack.c.bf16 %v2003_v61, %v1995_v57  ;;  %v2050_v61 = vld [vmem:[#allocation9 + $0x29d0] sm:$0xff]  ;;  %v2088_v37 = vld [vmem:[#allocation9 + $0x2b00] sm:$0xff] }
 0x3b4   : > { %5200 = vmatpush1.bf16.msra.mxu1 %v5199_v14  ;;  %v2017_v14 = vld [vmem:[#allocation9 + $0x28c8] sm:$0xff] }
 0x3b5   : > { %5584 = vmatpush1.bf16.msra.mxu0 %v5583_v15  ;;  %5202 = vmatprep.subr.bf16.mxu1 %v5201_v59  ;;  %v5215_v15 = vpack.c.bf16 %v2000_v4, %v1992_v3  ;;  %v2011_v59 = vld [vmem:[#allocation9 + $0x2898] sm:$0xff]  ;;  %v5217_v24 = vpack.c.bf16 %v2017_v14, %v2009_v11  ;;  %v5227_v4 = vpack.c.bf16 %v2048_v54, %v2040_v53  ;;  %v2064_v11 = vld [vmem:[#allocation9 + $0x2a40] sm:$0xff]  ;;  %v2058_v14 = vld [vmem:[#allocation9 + $0x2a10] sm:$0xff] }
 0x3b6   : > { %5586 = vmatprep.subr.bf16.mxu0 %v5585_v20  ;;  %v2008_v20 = vld [vmem:[#allocation9 + $0x2880] sm:$0xff]  ;;  %v2067_v3 = vld [vmem:[#allocation9 + $0x2a58] sm:$0xff] }
 0x3b7   : > { %v5219_v31 = vpack.c.bf16 %v2016_v21, %v2008_v20  ;;  %v2075_v20 = vld [vmem:[#allocation9 + $0x2a98] sm:$0xff] }
 0x3b8   : > { %5204 = vmatpush1.bf16.msra.mxu1 %v5203_v27  ;;  %v2033_v27 = vld [vmem:[#allocation9 + $0x2948] sm:$0xff]  ;;  %v2083_v21 = vld [vmem:[#allocation9 + $0x2ad8] sm:$0xff] }
 0x3b9   : > { %5588 = vmatpush1.bf16.msra.mxu0 %v5587_v28  ;;  %5206 = vmatprep.subr.bf16.mxu1 %v5205_v29  ;;  %v7460_v28 = vrot.slane %v7438_v58, %v7390_v55  ;;  %v5601_v29 = vpack.c.bf16 %v2019_v16, %v2011_v59  ;;  %v5221_v33 = vpack.c.bf16 %v2033_v27, %v2025_v26  ;;  %v2066_v59 = vld [vmem:[#allocation9 + $0x2a50] sm:$0xff]  ;;  %v2073_v16 = vld [vmem:[#allocation9 + $0x2a88] sm:$0xff]  ;;  %v2072_v26 = vld [vmem:[#allocation9 + $0x2a80] sm:$0xff] }
 0x3ba   : > { %5590 = vmatprep.subr.bf16.mxu0 %v5589_v32  ;;  %v5603_v32 = vpack.c.bf16 %v2018_v25, %v2010_v23  ;;  %v5605_v58 = vpack.c.bf16 %v2035_v46, %v2027_v30  ;;  %v5231_v23 = vpack.c.bf16 %v2064_v11, %v2056_v10  ;;  %v2080_v27 = vld [vmem:[#allocation9 + $0x2ac0] sm:$0xff]  ;;  %v5617_v30 = vpack.c.bf16 %v2083_v21, %v2075_v20  ;;  %v2082_v46 = vld [vmem:[#allocation9 + $0x2ad0] sm:$0xff]  ;;  %v2115_v53 = vld [vmem:[#allocation9 + $0x2bd8] sm:$0xff] }
 0x3bb   : > { %v5235_v35 = vpack.c.bf16 %v2080_v27, %v2072_v26  ;;  %v2131_v10 = vld [vmem:[#allocation9 + $0x2c58] sm:$0xff]  ;;  %v2130_v21 = vld [vmem:[#allocation9 + $0x2c50] sm:$0xff] }
 0x3bc   : > { %5208 = vmatpush1.bf16.msra.mxu1 %v5207_v38  ;;  %v2041_v38 = vld [vmem:[#allocation9 + $0x2988] sm:$0xff]  ;;  %v2147_v26 = vld [vmem:[#allocation9 + $0x2cd8] sm:$0xff] }
 0x3bd   : > { %5592 = vmatpush1.bf16.msra.mxu0 %v5591_v39  ;;  %5210 = vmatprep.subr.bf16.mxu1 %v5209_v44  ;;  %v2049_v39 = vld [vmem:[#allocation9 + $0x29c8] sm:$0xff]  ;;  %v2043_v44 = vld [vmem:[#allocation9 + $0x2998] sm:$0xff] }
 0x3be   : > { %5594 = vmatprep.subr.bf16.mxu0 %v5593_v51  ;;  %v5225_v51 = vpack.c.bf16 %v2049_v39, %v2041_v38  ;;  %v5609_v57 = vpack.c.bf16 %v2051_v45, %v2043_v44  ;;  %v2096_v38 = vld [vmem:[#allocation9 + $0x2b40] sm:$0xff]  ;;  %v2090_v39 = vld [vmem:[#allocation9 + $0x2b10] sm:$0xff] }
 0x3bf   : > { %v2098_v45 = vld [vmem:[#allocation9 + $0x2b50] sm:$0xff]  ;;  %v5239_v54 = vpack.c.bf16 %v2096_v38, %v2088_v37  ;;  %v2163_v37 = vld [vmem:[#allocation9 + $0x2d58] sm:$0xff] }
 0x3c0   : > { %5212 = vmatpush1.bf16.msra.mxu1 %v5211_v62  ;;  %v2057_v62 = vld [vmem:[#allocation9 + $0x2a08] sm:$0xff] }
 0x3c1   : > { %5596 = vmatpush1.bf16.msra.mxu0 %v5595_v1  ;;  %5214 = vmatprep.subr.bf16.mxu1 %v5213_v2  ;;  %v2065_v1 = vld [vmem:[#allocation9 + $0x2a48] sm:$0xff]  ;;  %v2059_v2 = vld [vmem:[#allocation9 + $0x2a18] sm:$0xff] }
 0x3c2   : > { %5598 = vmatprep.subr.bf16.mxu0 %v5597_v5  ;;  %v5611_v5 = vpack.c.bf16 %v2050_v61, %v2042_v56  ;;  %v5229_v8 = vpack.c.bf16 %v2065_v1, %v2057_v62  ;;  %v5623_v56 = vpack.c.bf16 %v2098_v45, %v2090_v39  ;;  %v2104_v61 = vld [vmem:[#allocation9 + $0x2b80] sm:$0xff]  ;;  %v2106_v1 = vld [vmem:[#allocation9 + $0x2b90] sm:$0xff] }
 0x3c3   : > { %2701 = vmatmul.mubr.f32.vlgmr.msra.gmra.mrb[2].mxu1 %v7455_v18  ;;  %v2112_v62 = vld [vmem:[#allocation9 + $0x2bc0] sm:$0xff] }
 0x3c4   : > { %3127 = vmatmul.mubr.f32.vlgmr.msra.gmra.mrb[4].mxu0 %v7455_v18  ;;  %5216 = vmatpush1.bf16.msra.mxu1 %v5215_v15  ;;  %v5613_v15 = vpack.c.bf16 %v2067_v3, %v2059_v2  ;;  %v2114_v3 = vld [vmem:[#allocation9 + $0x2bd0] sm:$0xff]  ;;  %v5243_v11 = vpack.c.bf16 %v2112_v62, %v2104_v61  ;;  %v2152_v45 = vld [vmem:[#allocation9 + $0x2d00] sm:$0xff]  ;;  %v2179_v61 = vld [vmem:[#allocation9 + $0x2dd8] sm:$0xff] }
 0x3c5   : > { %2771 = vmatprep.mubr.f32.mxu1 %v7460_v28  ;;  %5600 = vmatpush1.bf16.msra.mxu0 %v5599_v19  ;;  %v2081_v19 = vld [vmem:[#allocation9 + $0x2ac8] sm:$0xff] }
 0x3c6   : > { %3197 = vmatprep.mubr.f32.mxu0 %v7460_v28  ;;  %5218 = vmatprep.subr.bf16.mxu1 %v5217_v24  ;;  %v5615_v24 = vpack.c.bf16 %v2066_v59, %v2058_v14  ;;  %v5233_v25 = vpack.c.bf16 %v2081_v19, %v2073_v16  ;;  %v5627_v14 = vpack.c.bf16 %v2114_v3, %v2106_v1  ;;  %v2120_v59 = vld [vmem:[#allocation9 + $0x2c00] sm:$0xff]  ;;  %v2122_v19 = vld [vmem:[#allocation9 + $0x2c10] sm:$0xff] }
 0x3c7   : > { %5602 = vmatprep.subr.bf16.mxu0 %v5601_v29  ;;  %v2074_v29 = vld [vmem:[#allocation9 + $0x2a90] sm:$0xff]  ;;  %v2128_v16 = vld [vmem:[#allocation9 + $0x2c40] sm:$0xff] }
 0x3c8   : > { %5220 = vmatpush1.bf16.msra.mxu1 %v5219_v31  ;;  %v2089_v31 = vld [vmem:[#allocation9 + $0x2b08] sm:$0xff]  ;;  %v5619_v36 = vpack.c.bf16 %v2082_v46, %v2074_v29  ;;  %v5247_v27 = vpack.c.bf16 %v2128_v16, %v2120_v59  ;;  %v5631_v29 = vpack.c.bf16 %v2130_v21, %v2122_v19  ;;  %v2136_v46 = vld [vmem:[#allocation9 + $0x2c80] sm:$0xff]  ;;  %v2195_v59 = vld [vmem:[#allocation9 + $0x2e58] sm:$0xff] }
 0x3c9   : > { %5604 = vmatpush1.bf16.msra.mxu0 %v5603_v32  ;;  %5222 = vmatprep.subr.bf16.mxu1 %v5221_v33  ;;  %v2097_v32 = vld [vmem:[#allocation9 + $0x2b48] sm:$0xff]  ;;  %v2091_v33 = vld [vmem:[#allocation9 + $0x2b18] sm:$0xff]  ;;  %v2168_v3 = vld [vmem:[#allocation9 + $0x2d80] sm:$0xff] }
 0x3ca   : > { %5606 = vmatprep.subr.bf16.mxu0 %v5605_v58  ;;  %v5237_v58 = vpack.c.bf16 %v2097_v32, %v2089_v31  ;;  %v5621_v44 = vpack.c.bf16 %v2099_v34, %v2091_v33  ;;  %v2144_v31 = vld [vmem:[#allocation9 + $0x2cc0] sm:$0xff]  ;;  %v2138_v32 = vld [vmem:[#allocation9 + $0x2c90] sm:$0xff] }
 0x3cb   : > { %v2146_v34 = vld [vmem:[#allocation9 + $0x2cd0] sm:$0xff]  ;;  %v5251_v38 = vpack.c.bf16 %v2144_v31, %v2136_v46  ;;  %v2184_v21 = vld [vmem:[#allocation9 + $0x2e00] sm:$0xff]  ;;  %v2211_v46 = vld [vmem:[#allocation9 + $0x2ed8] sm:$0xff] }
 0x3cc   : > { %5224 = vmatpush1.bf16.msra.mxu1 %v5223_v47  ;;  %v2105_v47 = vld [vmem:[#allocation9 + $0x2b88] sm:$0xff]  ;;  %v5635_v39 = vpack.c.bf16 %v2146_v34, %v2138_v32  ;;  %v2200_v34 = vld [vmem:[#allocation9 + $0x2e80] sm:$0xff] }
 0x3cd   : > { %5608 = vmatpush1.bf16.msra.mxu0 %v5607_v48  ;;  %5226 = vmatprep.subr.bf16.mxu1 %v5225_v51  ;;  %v2113_v48 = vld [vmem:[#allocation9 + $0x2bc8] sm:$0xff]  ;;  %v2107_v51 = vld [vmem:[#allocation9 + $0x2b98] sm:$0xff] }
 0x3ce   : > { %5610 = vmatprep.subr.bf16.mxu0 %v5609_v57  ;;  %v5241_v57 = vpack.c.bf16 %v2113_v48, %v2105_v47  ;;  %v5625_v2 = vpack.c.bf16 %v2115_v53, %v2107_v51  ;;  %v2160_v47 = vld [vmem:[#allocation9 + $0x2d40] sm:$0xff]  ;;  %v2154_v48 = vld [vmem:[#allocation9 + $0x2d10] sm:$0xff] }
 0x3cf   : > { %v2162_v53 = vld [vmem:[#allocation9 + $0x2d50] sm:$0xff]  ;;  %v5255_v62 = vpack.c.bf16 %v2160_v47, %v2152_v45  ;;  %v2227_v45 = vld [vmem:[#allocation9 + $0x2f58] sm:$0xff] }
 0x3d0   : > { %5228 = vmatpush1.bf16.msra.mxu1 %v5227_v4  ;;  %v2121_v4 = vld [vmem:[#allocation9 + $0x2c08] sm:$0xff]  ;;  %v5639_v1 = vpack.c.bf16 %v2162_v53, %v2154_v48  ;;  %v2216_v53 = vld [vmem:[#allocation9 + $0x2f00] sm:$0xff] }
 0x3d1   : > { %5612 = vmatpush1.bf16.msra.mxu0 %v5611_v5  ;;  %5230 = vmatprep.subr.bf16.mxu1 %v5229_v8  ;;  %v2129_v5 = vld [vmem:[#allocation9 + $0x2c48] sm:$0xff]  ;;  %v2123_v8 = vld [vmem:[#allocation9 + $0x2c18] sm:$0xff] }
 0x3d2   : > { %5614 = vmatprep.subr.bf16.mxu0 %v5613_v15  ;;  %v5245_v15 = vpack.c.bf16 %v2129_v5, %v2121_v4  ;;  %v5629_v20 = vpack.c.bf16 %v2131_v10, %v2123_v8  ;;  %v2176_v4 = vld [vmem:[#allocation9 + $0x2dc0] sm:$0xff]  ;;  %v2170_v5 = vld [vmem:[#allocation9 + $0x2d90] sm:$0xff] }
 0x3d3   : > { %v2178_v10 = vld [vmem:[#allocation9 + $0x2dd0] sm:$0xff]  ;;  %v5259_v16 = vpack.c.bf16 %v2176_v4, %v2168_v3  ;;  %v2243_v3 = vld [vmem:[#allocation9 + $0x2fd8] sm:$0xff] }
 0x3d4   : > { %5232 = vmatpush1.bf16.msra.mxu1 %v5231_v23  ;;  %v2137_v23 = vld [vmem:[#allocation9 + $0x2c88] sm:$0xff]  ;;  %v5643_v19 = vpack.c.bf16 %v2178_v10, %v2170_v5  ;;  %v2232_v10 = vld [vmem:[#allocation9 + $0x2f80] sm:$0xff] }
 0x3d5   : > { %5616 = vmatpush1.bf16.msra.mxu0 %v5615_v24  ;;  %5234 = vmatprep.subr.bf16.mxu1 %v5233_v25  ;;  %v2145_v24 = vld [vmem:[#allocation9 + $0x2cc8] sm:$0xff]  ;;  %v2139_v25 = vld [vmem:[#allocation9 + $0x2c98] sm:$0xff] }
 0x3d6   : > { %5618 = vmatprep.subr.bf16.mxu0 %v5617_v30  ;;  %v5249_v30 = vpack.c.bf16 %v2145_v24, %v2137_v23  ;;  %v5633_v33 = vpack.c.bf16 %v2147_v26, %v2139_v25  ;;  %v2192_v23 = vld [vmem:[#allocation9 + $0x2e40] sm:$0xff]  ;;  %v2186_v24 = vld [vmem:[#allocation9 + $0x2e10] sm:$0xff] }
 0x3d7   : > { %v2194_v26 = vld [vmem:[#allocation9 + $0x2e50] sm:$0xff]  ;;  %v5263_v31 = vpack.c.bf16 %v2192_v23, %v2184_v21  ;;  %v727_v21 = vld [vmem:[#allocation9 + $0x78] sm:$0xff] }
 0x3d8   : > { %5236 = vmatpush1.bf16.msra.mxu1 %v5235_v35  ;;  %v2153_v35 = vld [vmem:[#allocation9 + $0x2d08] sm:$0xff]  ;;  %v5647_v32 = vpack.c.bf16 %v2194_v26, %v2186_v24  ;;  %v716_v26 = vld [vmem:[#allocation9 + $0x20] sm:$0xff] }
 0x3d9   : > { %5620 = vmatpush1.bf16.msra.mxu0 %v5619_v36  ;;  %5238 = vmatprep.subr.bf16.mxu1 %v5237_v58  ;;  %v2161_v36 = vld [vmem:[#allocation9 + $0x2d48] sm:$0xff]  ;;  %v2155_v58 = vld [vmem:[#allocation9 + $0x2d18] sm:$0xff] }
 0x3da   : > { %5622 = vmatprep.subr.bf16.mxu0 %v5621_v44  ;;  %v5253_v44 = vpack.c.bf16 %v2161_v36, %v2153_v35  ;;  %v5637_v51 = vpack.c.bf16 %v2163_v37, %v2155_v58  ;;  %v2208_v35 = vld [vmem:[#allocation9 + $0x2ec0] sm:$0xff]  ;;  %v2202_v36 = vld [vmem:[#allocation9 + $0x2e90] sm:$0xff] }
 0x3db   : > { %v2210_v37 = vld [vmem:[#allocation9 + $0x2ed0] sm:$0xff]  ;;  %v5267_v47 = vpack.c.bf16 %v2208_v35, %v2200_v34  ;;  %v735_v34 = vld [vmem:[#allocation9 + $0xb8] sm:$0xff] }
 0x3dc   : > { %5240 = vmatpush1.bf16.msra.mxu1 %v5239_v54  ;;  %v2169_v54 = vld [vmem:[#allocation9 + $0x2d88] sm:$0xff]  ;;  %v5651_v48 = vpack.c.bf16 %v2210_v37, %v2202_v36  ;;  %v743_v35 = vld [vmem:[#allocation9 + $0xf8] sm:$0xff] }
 0x3dd   : > { %5624 = vmatpush1.bf16.msra.mxu0 %v5623_v56  ;;  %5242 = vmatprep.subr.bf16.mxu1 %v5241_v57  ;;  %v2177_v56 = vld [vmem:[#allocation9 + $0x2dc8] sm:$0xff]  ;;  %v2171_v57 = vld [vmem:[#allocation9 + $0x2d98] sm:$0xff] }
 0x3de   : > { %5626 = vmatprep.subr.bf16.mxu0 %v5625_v2  ;;  %v5257_v2 = vpack.c.bf16 %v2177_v56, %v2169_v54  ;;  %v5641_v8 = vpack.c.bf16 %v2179_v61, %v2171_v57  ;;  %v2224_v54 = vld [vmem:[#allocation9 + $0x2f40] sm:$0xff]  ;;  %v2218_v56 = vld [vmem:[#allocation9 + $0x2f10] sm:$0xff]  ;;  %v6726_v36 = vld [vmem:[#allocation2 + $0x8] sm:$0xf] }
 0x3df   : > { %v2226_v61 = vld [vmem:[#allocation9 + $0x2f50] sm:$0xff]  ;;  %v5271_v4 = vpack.c.bf16 %v2224_v54, %v2216_v53  ;;  %v6049_v53 = vpack.c.bf16 %v743_v35, %v735_v34  ;;  %v751_v54 = vld [vmem:[#allocation9 + $0x138] sm:$0xff] }
 0x3e0   : > { %5244 = vmatpush1.bf16.msra.mxu1 %v5243_v11  ;;  %v2185_v11 = vld [vmem:[#allocation9 + $0x2e08] sm:$0xff]  ;;  %v5655_v5 = vpack.c.bf16 %v2226_v61, %v2218_v56  ;;  %v759_v56 = vld [vmem:[#allocation9 + $0x178] sm:$0xff]  ;;  %v790_v35 = vld [vmem:[#allocation9 + $0x270] sm:$0xff] }
 0x3e1   : > { %5628 = vmatpush1.bf16.msra.mxu0 %v5627_v14  ;;  %5246 = vmatprep.subr.bf16.mxu1 %v5245_v15  ;;  %v2193_v14 = vld [vmem:[#allocation9 + $0x2e48] sm:$0xff]  ;;  %v2187_v15 = vld [vmem:[#allocation9 + $0x2e18] sm:$0xff] }
 0x3e2   : > { %5630 = vmatprep.subr.bf16.mxu0 %v5629_v20  ;;  %v5261_v20 = vpack.c.bf16 %v2193_v14, %v2185_v11  ;;  %v5645_v25 = vpack.c.bf16 %v2195_v59, %v2187_v15  ;;  %v2240_v11 = vld [vmem:[#allocation9 + $0x2fc0] sm:$0xff]  ;;  %v2234_v14 = vld [vmem:[#allocation9 + $0x2f90] sm:$0xff] }
 0x3e3   : > { %v2242_v59 = vld [vmem:[#allocation9 + $0x2fd0] sm:$0xff]  ;;  %v5275_v23 = vpack.c.bf16 %v2240_v11, %v2232_v10  ;;  %v773_v10 = vld [vmem:[#allocation9 + $0x1e8] sm:$0xff]  ;;  %v767_v11 = vld [vmem:[#allocation9 + $0x1b8] sm:$0xff] }
 0x3e4   : > { %5248 = vmatpush1.bf16.msra.mxu1 %v5247_v27  ;;  %v2201_v27 = vld [vmem:[#allocation9 + $0x2e88] sm:$0xff]  ;;  %v5659_v24 = vpack.c.bf16 %v2242_v59, %v2234_v14  ;;  %v775_v14 = vld [vmem:[#allocation9 + $0x1f8] sm:$0xff] }
 0x3e5   : > { %5632 = vmatpush1.bf16.msra.mxu0 %v5631_v29  ;;  %5250 = vmatprep.subr.bf16.mxu1 %v5249_v30  ;;  %v2209_v29 = vld [vmem:[#allocation9 + $0x2ec8] sm:$0xff]  ;;  %v2203_v30 = vld [vmem:[#allocation9 + $0x2e98] sm:$0xff] }
 0x3e6   : > { %5634 = vmatprep.subr.bf16.mxu0 %v5633_v33  ;;  %v5265_v33 = vpack.c.bf16 %v2209_v29, %v2201_v27  ;;  %v5649_v58 = vpack.c.bf16 %v2211_v46, %v2203_v30  ;;  %v724_v27 = vld [vmem:[#allocation9 + $0x60] sm:$0xff]  ;;  %v718_v30 = vld [vmem:[#allocation9 + $0x30] sm:$0xff] }
 0x3e7   : > { %v726_v46 = vld [vmem:[#allocation9 + $0x70] sm:$0xff] }
 0x3e8   : > { %5252 = vmatpush1.bf16.msra.mxu1 %v5251_v38  ;;  %v2217_v38 = vld [vmem:[#allocation9 + $0x2f08] sm:$0xff]  ;;  %v6047_v37 = vpack.c.bf16 %v726_v46, %v718_v30 }
 0x3e9   : > { %5636 = vmatpush1.bf16.msra.mxu0 %v5635_v39  ;;  %5254 = vmatprep.subr.bf16.mxu1 %v5253_v44  ;;  %v2225_v39 = vld [vmem:[#allocation9 + $0x2f48] sm:$0xff]  ;;  %v2219_v44 = vld [vmem:[#allocation9 + $0x2f18] sm:$0xff] }
 0x3ea   : > { %5638 = vmatprep.subr.bf16.mxu0 %v5637_v51  ;;  %v5269_v51 = vpack.c.bf16 %v2225_v39, %v2217_v38  ;;  %v5653_v57 = vpack.c.bf16 %v2227_v45, %v2219_v44  ;;  %v732_v38 = vld [vmem:[#allocation9 + $0xa0] sm:$0xff]  ;;  %v734_v44 = vld [vmem:[#allocation9 + $0xb0] sm:$0xff] }
 0x3eb   : > { %v740_v39 = vld [vmem:[#allocation9 + $0xe0] sm:$0xff] }
 0x3ec   : > { %5256 = vmatpush1.bf16.msra.mxu1 %v5255_v62  ;;  %v2233_v62 = vld [vmem:[#allocation9 + $0x2f88] sm:$0xff] }
 0x3ed   : > { %5640 = vmatpush1.bf16.msra.mxu0 %v5639_v1  ;;  %5258 = vmatprep.subr.bf16.mxu1 %v5257_v2  ;;  %v2241_v1 = vld [vmem:[#allocation9 + $0x2fc8] sm:$0xff]  ;;  %v2235_v2 = vld [vmem:[#allocation9 + $0x2f98] sm:$0xff] }
 0x3ee   : > { %5642 = vmatprep.subr.bf16.mxu0 %v5641_v8  ;;  %v5273_v8 = vpack.c.bf16 %v2241_v1, %v2233_v62  ;;  %v5657_v15 = vpack.c.bf16 %v2243_v3, %v2235_v2  ;;  %v748_v1 = vld [vmem:[#allocation9 + $0x120] sm:$0xff]  ;;  %v750_v3 = vld [vmem:[#allocation9 + $0x130] sm:$0xff] }
 0x3ef   : > { %v756_v2 = vld [vmem:[#allocation9 + $0x160] sm:$0xff] }
 0x3f0   : > { %5260 = vmatpush1.bf16.msra.mxu1 %v5259_v16  ;;  %v717_v16 = vld [vmem:[#allocation9 + $0x28] sm:$0xff] }
 0x3f1   : > { %5644 = vmatpush1.bf16.msra.mxu0 %v5643_v19  ;;  %5262 = vmatprep.subr.bf16.mxu1 %v5261_v20  ;;  %v725_v19 = vld [vmem:[#allocation9 + $0x68] sm:$0xff]  ;;  %v719_v20 = vld [vmem:[#allocation9 + $0x38] sm:$0xff] }
 0x3f2   : > { %5646 = vmatprep.subr.bf16.mxu0 %v5645_v25  ;;  %v5661_v25 = vpack.c.bf16 %v725_v19, %v717_v16  ;;  %v6045_v29 = vpack.c.bf16 %v727_v21, %v719_v20  ;;  %v764_v19 = vld [vmem:[#allocation9 + $0x1a0] sm:$0xff]  ;;  %v766_v21 = vld [vmem:[#allocation9 + $0x1b0] sm:$0xff] }
 0x3f3   : > { %v772_v20 = vld [vmem:[#allocation9 + $0x1e0] sm:$0xff] }
 0x3f4   : > { %5264 = vmatpush1.bf16.msra.mxu1 %v5263_v31  ;;  %v733_v31 = vld [vmem:[#allocation9 + $0xa8] sm:$0xff] }
 0x3f5   : > { %5648 = vmatpush1.bf16.msra.mxu0 %v5647_v32  ;;  %5266 = vmatprep.subr.bf16.mxu1 %v5265_v33  ;;  %v741_v32 = vld [vmem:[#allocation9 + $0xe8] sm:$0xff]  ;;  %v5663_v33 = vpack.c.bf16 %v724_v27, %v716_v26  ;;  %v783_v26 = vld [vmem:[#allocation9 + $0x238] sm:$0xff] }
 0x3f6   : > { %5650 = vmatprep.subr.bf16.mxu0 %v5649_v58  ;;  %v7466_v58 = vrot.slane %v6726_v36, %v7404_v12  ;;  %v5665_v45 = vpack.c.bf16 %v741_v32, %v733_v31  ;;  %v791_v27 = vld [vmem:[#allocation9 + $0x278] sm:$0xff]  ;;  %v780_v31 = vld [vmem:[#allocation9 + $0x220] sm:$0xff]  ;;  %v797_v36 = vld [vmem:[#allocation9 + $0x2a8] sm:$0xff] }
 0x3f7   : > { %v788_v32 = vld [vmem:[#allocation9 + $0x260] sm:$0xff]  ;;  %v6061_v34 = vpack.c.bf16 %v791_v27, %v783_v26  ;;  %v838_v27 = vld [vmem:[#allocation9 + $0x3f0] sm:$0xff] }
 0x3f8   : > { %5268 = vmatpush1.bf16.msra.mxu1 %v5267_v47  ;;  %v742_v47 = vld [vmem:[#allocation9 + $0xf0] sm:$0xff] }
 0x3f9   : > { %5652 = vmatpush1.bf16.msra.mxu0 %v5651_v48  ;;  %5270 = vmatprep.subr.bf16.mxu1 %v5269_v51  ;;  %v749_v48 = vld [vmem:[#allocation9 + $0x128] sm:$0xff]  ;;  %v6051_v61 = vpack.c.bf16 %v742_v47, %v734_v44  ;;  %v5679_v44 = vpack.c.bf16 %v788_v32, %v780_v31  ;;  %v855_v31 = vld [vmem:[#allocation9 + $0x478] sm:$0xff] }
 0x3fa   : > { %5654 = vmatprep.subr.bf16.mxu0 %v5653_v57  ;;  %v757_v51 = vld [vmem:[#allocation9 + $0x168] sm:$0xff]  ;;  %v5667_v57 = vpack.c.bf16 %v740_v39, %v732_v38  ;;  %v799_v38 = vld [vmem:[#allocation9 + $0x2b8] sm:$0xff] }
 0x3fb   : > { %v5669_v62 = vpack.c.bf16 %v757_v51, %v749_v48  ;;  %v807_v39 = vld [vmem:[#allocation9 + $0x2f8] sm:$0xff]  ;;  %v796_v48 = vld [vmem:[#allocation9 + $0x2a0] sm:$0xff] }
 0x3fc   : > { %5272 = vmatpush1.bf16.msra.mxu1 %v5271_v4  ;;  %v6053_v4 = vpack.c.bf16 %v759_v56, %v751_v54  ;;  %v804_v51 = vld [vmem:[#allocation9 + $0x2e0] sm:$0xff]  ;;  %v6065_v54 = vpack.c.bf16 %v807_v39, %v799_v38  ;;  %v806_v56 = vld [vmem:[#allocation9 + $0x2f0] sm:$0xff] }
 0x3fd   : > { %5656 = vmatpush1.bf16.msra.mxu0 %v5655_v5  ;;  %5274 = vmatprep.subr.bf16.mxu1 %v5273_v8  ;;  %v758_v5 = vld [vmem:[#allocation9 + $0x170] sm:$0xff]  ;;  %v765_v8 = vld [vmem:[#allocation9 + $0x1a8] sm:$0xff] }
 0x3fe   : > { %5658 = vmatprep.subr.bf16.mxu0 %v5657_v15  ;;  %v5671_v15 = vpack.c.bf16 %v756_v2, %v748_v1  ;;  %v6055_v59 = vpack.c.bf16 %v758_v5, %v750_v3  ;;  %v5673_v16 = vpack.c.bf16 %v773_v10, %v765_v8  ;;  %v823_v1 = vld [vmem:[#allocation9 + $0x378] sm:$0xff]  ;;  %v5683_v2 = vpack.c.bf16 %v804_v51, %v796_v48  ;;  %v812_v5 = vld [vmem:[#allocation9 + $0x320] sm:$0xff]  ;;  %v814_v10 = vld [vmem:[#allocation9 + $0x330] sm:$0xff] }
 0x3ff   : > { %v820_v8 = vld [vmem:[#allocation9 + $0x360] sm:$0xff]  ;;  %v854_v39 = vld [vmem:[#allocation9 + $0x470] sm:$0xff]  ;;  %v871_v48 = vld [vmem:[#allocation9 + $0x4f8] sm:$0xff] }
 0x400   : > { %5276 = vmatpush1.bf16.msra.mxu1 %v5275_v23  ;;  %v6057_v23 = vpack.c.bf16 %v775_v14, %v767_v11  ;;  %v822_v14 = vld [vmem:[#allocation9 + $0x370] sm:$0xff] }
 0x401   : > { %5660 = vmatpush1.bf16.msra.mxu0 %v5659_v24  ;;  %5662 = vmatprep.subr.bf16.mxu1 %v5661_v25  ;;  %v781_v24 = vld [vmem:[#allocation9 + $0x228] sm:$0xff] }
 0x402   : > { %6046 = vmatprep.subr.bf16.mxu0 %v6045_v29  ;;  %v789_v25 = vld [vmem:[#allocation9 + $0x268] sm:$0xff]  ;;  %v5675_v29 = vpack.c.bf16 %v772_v20, %v764_v19  ;;  %v839_v19 = vld [vmem:[#allocation9 + $0x3f8] sm:$0xff]  ;;  %v5687_v20 = vpack.c.bf16 %v820_v8, %v812_v5 }
 0x403   : > { %2772 = vmatmul.mubr.f32.vlgmr.msra.gmra.mrb[2].mxu1 %v7466_v58  ;;  %v5677_v46 = vpack.c.bf16 %v789_v25, %v781_v24  ;;  %v836_v24 = vld [vmem:[#allocation9 + $0x3e0] sm:$0xff]  ;;  %v830_v25 = vld [vmem:[#allocation9 + $0x3b0] sm:$0xff]  ;;  %v887_v5 = vld [vmem:[#allocation9 + $0x578] sm:$0xff] }
 0x404   : > { %3198 = vmatmul.mubr.f32.vlgmr.msra.gmra.mrb[4].mxu0 %v7466_v58  ;;  %5664 = vmatpush1.bf16.msra.mxu1 %v5663_v33  ;;  %v782_v33 = vld [vmem:[#allocation9 + $0x230] sm:$0xff] }
 0x405   : > { %3268 = vmatprep.mubr.f32.mxu1 %v7383_v49  ;;  %6048 = vmatpush1.bf16.msra.mxu0 %v6047_v37  ;;  %v805_v37 = vld [vmem:[#allocation9 + $0x2e8] sm:$0xff] }
 0x406   : > { %3694 = vmatprep.mubr.f32.mxu0 %v7383_v49  ;;  %5666 = vmatprep.subr.bf16.mxu1 %v5665_v45  ;;  %v774_v49 = vld [vmem:[#allocation9 + $0x1f0] sm:$0xff]  ;;  %v6063_v45 = vpack.c.bf16 %v790_v35, %v782_v33  ;;  %v5681_v47 = vpack.c.bf16 %v805_v37, %v797_v36  ;;  %v6075_v33 = vpack.c.bf16 %v838_v27, %v830_v25  ;;  %v844_v35 = vld [vmem:[#allocation9 + $0x420] sm:$0xff] }
 0x407   : > { %6050 = vmatprep.subr.bf16.mxu0 %v6049_v53  ;;  %v6059_v30 = vpack.c.bf16 %v774_v49, %v766_v21  ;;  %v798_v53 = vld [vmem:[#allocation9 + $0x2b0] sm:$0xff]  ;;  %v6071_v21 = vpack.c.bf16 %v822_v14, %v814_v10  ;;  %v828_v49 = vld [vmem:[#allocation9 + $0x3a0] sm:$0xff] }
 0x408   : > { %5668 = vmatpush1.bf16.msra.mxu1 %v5667_v57  ;;  %v813_v57 = vld [vmem:[#allocation9 + $0x328] sm:$0xff]  ;;  %v6067_v3 = vpack.c.bf16 %v806_v56, %v798_v53  ;;  %v5691_v32 = vpack.c.bf16 %v836_v24, %v828_v49  ;;  %v852_v36 = vld [vmem:[#allocation9 + $0x460] sm:$0xff]  ;;  %v846_v37 = vld [vmem:[#allocation9 + $0x430] sm:$0xff] }
 0x409   : > { %6052 = vmatpush1.bf16.msra.mxu0 %v6051_v61  ;;  %5670 = vmatprep.subr.bf16.mxu1 %v5669_v62  ;;  %v821_v61 = vld [vmem:[#allocation9 + $0x368] sm:$0xff]  ;;  %v815_v62 = vld [vmem:[#allocation9 + $0x338] sm:$0xff]  ;;  %v5695_v51 = vpack.c.bf16 %v852_v36, %v844_v35  ;;  %v6079_v53 = vpack.c.bf16 %v854_v39, %v846_v37  ;;  %v860_v56 = vld [vmem:[#allocation9 + $0x4a0] sm:$0xff] }
 0x40a   : > { %6054 = vmatprep.subr.bf16.mxu0 %v6053_v4  ;;  %v5685_v4 = vpack.c.bf16 %v821_v61, %v813_v57  ;;  %v6069_v11 = vpack.c.bf16 %v823_v1, %v815_v62  ;;  %v868_v57 = vld [vmem:[#allocation9 + $0x4e0] sm:$0xff]  ;;  %v862_v61 = vld [vmem:[#allocation9 + $0x4b0] sm:$0xff]  ;;  %v903_v49 = vld [vmem:[#allocation9 + $0x5f8] sm:$0xff] }
 0x40b   : > { %v870_v1 = vld [vmem:[#allocation9 + $0x4f0] sm:$0xff]  ;;  %v5699_v8 = vpack.c.bf16 %v868_v57, %v860_v56  ;;  %v876_v14 = vld [vmem:[#allocation9 + $0x520] sm:$0xff]  ;;  %v919_v35 = vld [vmem:[#allocation9 + $0x678] sm:$0xff] }
 0x40c   : > { %5672 = vmatpush1.bf16.msra.mxu1 %v5671_v15  ;;  %v829_v15 = vld [vmem:[#allocation9 + $0x3a8] sm:$0xff]  ;;  %v6083_v10 = vpack.c.bf16 %v870_v1, %v862_v61  ;;  %v892_v27 = vld [vmem:[#allocation9 + $0x5a0] sm:$0xff]  ;;  %v935_v56 = vld [vmem:[#allocation9 + $0x6f8] sm:$0xff] }
 0x40d   : > { %6056 = vmatpush1.bf16.msra.mxu0 %v6055_v59  ;;  %5674 = vmatprep.subr.bf16.mxu1 %v5673_v16  ;;  %v837_v59 = vld [vmem:[#allocation9 + $0x3e8] sm:$0xff]  ;;  %v831_v16 = vld [vmem:[#allocation9 + $0x3b8] sm:$0xff]  ;;  %v908_v39 = vld [vmem:[#allocation9 + $0x620] sm:$0xff] }
 0x40e   : > { %6058 = vmatprep.subr.bf16.mxu0 %v6057_v23  ;;  %v5689_v23 = vpack.c.bf16 %v837_v59, %v829_v15  ;;  %v6073_v26 = vpack.c.bf16 %v839_v19, %v831_v16  ;;  %v884_v15 = vld [vmem:[#allocation9 + $0x560] sm:$0xff]  ;;  %v878_v59 = vld [vmem:[#allocation9 + $0x530] sm:$0xff] }
 0x40f   : > { %v886_v19 = vld [vmem:[#allocation9 + $0x570] sm:$0xff]  ;;  %v5703_v24 = vpack.c.bf16 %v884_v15, %v876_v14  ;;  %v924_v1 = vld [vmem:[#allocation9 + $0x6a0] sm:$0xff]  ;;  %v951_v14 = vld [vmem:[#allocation9 + $0x778] sm:$0xff] }
 0x410   : > { %5676 = vmatpush1.bf16.msra.mxu1 %v5675_v29  ;;  %v845_v29 = vld [vmem:[#allocation9 + $0x428] sm:$0xff]  ;;  %v6087_v25 = vpack.c.bf16 %v886_v19, %v878_v59  ;;  %v940_v19 = vld [vmem:[#allocation9 + $0x720] sm:$0xff] }
 0x411   : > { %6060 = vmatpush1.bf16.msra.mxu0 %v6059_v30  ;;  %5678 = vmatprep.subr.bf16.mxu1 %v5677_v46  ;;  %v853_v30 = vld [vmem:[#allocation9 + $0x468] sm:$0xff]  ;;  %v847_v46 = vld [vmem:[#allocation9 + $0x438] sm:$0xff] }
 0x412   : > { %6062 = vmatprep.subr.bf16.mxu0 %v6061_v34  ;;  %v5693_v34 = vpack.c.bf16 %v853_v30, %v845_v29  ;;  %v6077_v38 = vpack.c.bf16 %v855_v31, %v847_v46  ;;  %v900_v29 = vld [vmem:[#allocation9 + $0x5e0] sm:$0xff]  ;;  %v894_v30 = vld [vmem:[#allocation9 + $0x5b0] sm:$0xff] }
 0x413   : > { %v902_v31 = vld [vmem:[#allocation9 + $0x5f0] sm:$0xff]  ;;  %v5707_v36 = vpack.c.bf16 %v900_v29, %v892_v27  ;;  %v967_v27 = vld [vmem:[#allocation9 + $0x7f8] sm:$0xff] }
 0x414   : > { %5680 = vmatpush1.bf16.msra.mxu1 %v5679_v44  ;;  %v861_v44 = vld [vmem:[#allocation9 + $0x4a8] sm:$0xff]  ;;  %v6091_v37 = vpack.c.bf16 %v902_v31, %v894_v30  ;;  %v956_v31 = vld [vmem:[#allocation9 + $0x7a0] sm:$0xff] }
 0x415   : > { %6064 = vmatpush1.bf16.msra.mxu0 %v6063_v45  ;;  %5682 = vmatprep.subr.bf16.mxu1 %v5681_v47  ;;  %v869_v45 = vld [vmem:[#allocation9 + $0x4e8] sm:$0xff]  ;;  %v863_v47 = vld [vmem:[#allocation9 + $0x4b8] sm:$0xff] }
 0x416   : > { %6066 = vmatprep.subr.bf16.mxu0 %v6065_v54  ;;  %v5697_v54 = vpack.c.bf16 %v869_v45, %v861_v44  ;;  %v6081_v62 = vpack.c.bf16 %v871_v48, %v863_v47  ;;  %v916_v44 = vld [vmem:[#allocation9 + $0x660] sm:$0xff]  ;;  %v910_v45 = vld [vmem:[#allocation9 + $0x630] sm:$0xff] }
 0x417   : > { %v918_v48 = vld [vmem:[#allocation9 + $0x670] sm:$0xff]  ;;  %v5711_v57 = vpack.c.bf16 %v916_v44, %v908_v39  ;;  %v983_v39 = vld [vmem:[#allocation9 + $0x878] sm:$0xff] }
 0x418   : > { %5684 = vmatpush1.bf16.msra.mxu1 %v5683_v2  ;;  %v877_v2 = vld [vmem:[#allocation9 + $0x528] sm:$0xff]  ;;  %v6095_v61 = vpack.c.bf16 %v918_v48, %v910_v45  ;;  %v972_v48 = vld [vmem:[#allocation9 + $0x820] sm:$0xff] }
 0x419   : > { %6068 = vmatpush1.bf16.msra.mxu0 %v6067_v3  ;;  %5686 = vmatprep.subr.bf16.mxu1 %v5685_v4  ;;  %v885_v3 = vld [vmem:[#allocation9 + $0x568] sm:$0xff]  ;;  %v879_v4 = vld [vmem:[#allocation9 + $0x538] sm:$0xff] }
 0x41a   : > { %6070 = vmatprep.subr.bf16.mxu0 %v6069_v11  ;;  %v5701_v11 = vpack.c.bf16 %v885_v3, %v877_v2  ;;  %v6085_v16 = vpack.c.bf16 %v887_v5, %v879_v4  ;;  %v932_v2 = vld [vmem:[#allocation9 + $0x6e0] sm:$0xff]  ;;  %v926_v3 = vld [vmem:[#allocation9 + $0x6b0] sm:$0xff] }
 0x41b   : > { %v934_v5 = vld [vmem:[#allocation9 + $0x6f0] sm:$0xff]  ;;  %v5715_v15 = vpack.c.bf16 %v932_v2, %v924_v1  ;;  %v991_v1 = vld [vmem:[#allocation9 + $0x8b8] sm:$0xff] }
 0x41c   : > { %5688 = vmatpush1.bf16.msra.mxu1 %v5687_v20  ;;  %v893_v20 = vld [vmem:[#allocation9 + $0x5a8] sm:$0xff]  ;;  %v6099_v59 = vpack.c.bf16 %v934_v5, %v926_v3  ;;  %v999_v2 = vld [vmem:[#allocation9 + $0x8f8] sm:$0xff]  ;;  %v996_v5 = vld [vmem:[#allocation9 + $0x8e0] sm:$0xff] }
 0x41d   : > { %6072 = vmatpush1.bf16.msra.mxu0 %v6071_v21  ;;  %5690 = vmatprep.subr.bf16.mxu1 %v5689_v23  ;;  %v901_v21 = vld [vmem:[#allocation9 + $0x5e8] sm:$0xff]  ;;  %v895_v23 = vld [vmem:[#allocation9 + $0x5b8] sm:$0xff] }
 0x41e   : > { %6074 = vmatprep.subr.bf16.mxu0 %v6073_v26  ;;  %v5705_v26 = vpack.c.bf16 %v901_v21, %v893_v20  ;;  %v6089_v46 = vpack.c.bf16 %v903_v49, %v895_v23  ;;  %v948_v20 = vld [vmem:[#allocation9 + $0x760] sm:$0xff]  ;;  %v942_v21 = vld [vmem:[#allocation9 + $0x730] sm:$0xff] }
 0x41f   : > { %v950_v49 = vld [vmem:[#allocation9 + $0x770] sm:$0xff]  ;;  %v5719_v29 = vpack.c.bf16 %v948_v20, %v940_v19  ;;  %v1015_v19 = vld [vmem:[#allocation9 + $0x978] sm:$0xff] }
 0x420   : > { %5692 = vmatpush1.bf16.msra.mxu1 %v5691_v32  ;;  %v909_v32 = vld [vmem:[#allocation9 + $0x628] sm:$0xff]  ;;  %v6103_v30 = vpack.c.bf16 %v950_v49, %v942_v21  ;;  %v1004_v49 = vld [vmem:[#allocation9 + $0x920] sm:$0xff] }
 0x421   : > { %6076 = vmatpush1.bf16.msra.mxu0 %v6075_v33  ;;  %5694 = vmatprep.subr.bf16.mxu1 %v5693_v34  ;;  %v917_v33 = vld [vmem:[#allocation9 + $0x668] sm:$0xff]  ;;  %v911_v34 = vld [vmem:[#allocation9 + $0x638] sm:$0xff] }
 0x422   : > { %6078 = vmatprep.subr.bf16.mxu0 %v6077_v38  ;;  %v5709_v38 = vpack.c.bf16 %v917_v33, %v909_v32  ;;  %v6093_v47 = vpack.c.bf16 %v919_v35, %v911_v34  ;;  %v964_v32 = vld [vmem:[#allocation9 + $0x7e0] sm:$0xff]  ;;  %v958_v33 = vld [vmem:[#allocation9 + $0x7b0] sm:$0xff] }
 0x423   : > { %v966_v35 = vld [vmem:[#allocation9 + $0x7f0] sm:$0xff]  ;;  %v5723_v44 = vpack.c.bf16 %v964_v32, %v956_v31 }
 0x424   : > { %5696 = vmatpush1.bf16.msra.mxu1 %v5695_v51  ;;  %v925_v51 = vld [vmem:[#allocation9 + $0x6a8] sm:$0xff]  ;;  %v6107_v45 = vpack.c.bf16 %v966_v35, %v958_v33  ;;  %v1028_v35 = vld [vmem:[#allocation9 + $0x9e0] sm:$0xff] }
 0x425   : > { %6080 = vmatpush1.bf16.msra.mxu0 %v6079_v53  ;;  %5698 = vmatprep.subr.bf16.mxu1 %v5697_v54  ;;  %v933_v53 = vld [vmem:[#allocation9 + $0x6e8] sm:$0xff]  ;;  %v927_v54 = vld [vmem:[#allocation9 + $0x6b8] sm:$0xff] }
 0x426   : > { %6082 = vmatprep.subr.bf16.mxu0 %v6081_v62  ;;  %v5713_v62 = vpack.c.bf16 %v933_v53, %v925_v51  ;;  %v6097_v4 = vpack.c.bf16 %v935_v56, %v927_v54  ;;  %v980_v51 = vld [vmem:[#allocation9 + $0x860] sm:$0xff]  ;;  %v974_v54 = vld [vmem:[#allocation9 + $0x830] sm:$0xff] }
 0x427   : > { %v982_v56 = vld [vmem:[#allocation9 + $0x870] sm:$0xff] }
 0x428   : > { %5700 = vmatpush1.bf16.msra.mxu1 %v5699_v8  ;;  %v941_v8 = vld [vmem:[#allocation9 + $0x728] sm:$0xff]  ;;  %v6111_v3 = vpack.c.bf16 %v982_v56, %v974_v54  ;;  %v1044_v54 = vld [vmem:[#allocation9 + $0xa60] sm:$0xff]  ;;  %v1038_v56 = vld [vmem:[#allocation9 + $0xa30] sm:$0xff] }
 0x429   : > { %6084 = vmatpush1.bf16.msra.mxu0 %v6083_v10  ;;  %5702 = vmatprep.subr.bf16.mxu1 %v5701_v11  ;;  %v949_v10 = vld [vmem:[#allocation9 + $0x768] sm:$0xff]  ;;  %v943_v11 = vld [vmem:[#allocation9 + $0x738] sm:$0xff] }
 0x42a   : > { %6086 = vmatprep.subr.bf16.mxu0 %v6085_v16  ;;  %v5717_v16 = vpack.c.bf16 %v949_v10, %v941_v8  ;;  %v6101_v23 = vpack.c.bf16 %v951_v14, %v943_v11  ;;  %v990_v8 = vld [vmem:[#allocation9 + $0x8b0] sm:$0xff]  ;;  %v1005_v14 = vld [vmem:[#allocation9 + $0x928] sm:$0xff] }
 0x42b   : > { %v998_v11 = vld [vmem:[#allocation9 + $0x8f0] sm:$0xff] }
 0x42c   : > { %5704 = vmatpush1.bf16.msra.mxu1 %v5703_v24  ;;  %v957_v24 = vld [vmem:[#allocation9 + $0x7a8] sm:$0xff]  ;;  %v6115_v21 = vpack.c.bf16 %v998_v11, %v990_v8  ;;  %v1060_v11 = vld [vmem:[#allocation9 + $0xae0] sm:$0xff] }
 0x42d   : > { %6088 = vmatpush1.bf16.msra.mxu0 %v6087_v25  ;;  %5706 = vmatprep.subr.bf16.mxu1 %v5705_v26  ;;  %v965_v25 = vld [vmem:[#allocation9 + $0x7e8] sm:$0xff]  ;;  %v959_v26 = vld [vmem:[#allocation9 + $0x7b8] sm:$0xff] }
 0x42e   : > { %6090 = vmatprep.subr.bf16.mxu0 %v6089_v46  ;;  %v5721_v46 = vpack.c.bf16 %v965_v25, %v957_v24  ;;  %v6105_v34 = vpack.c.bf16 %v967_v27, %v959_v26  ;;  %v1012_v24 = vld [vmem:[#allocation9 + $0x960] sm:$0xff]  ;;  %v1006_v25 = vld [vmem:[#allocation9 + $0x930] sm:$0xff] }
 0x42f   : > { %v1014_v27 = vld [vmem:[#allocation9 + $0x970] sm:$0xff]  ;;  %v5735_v31 = vpack.c.bf16 %v1012_v24, %v1004_v49 }
 0x430   : > { %5708 = vmatpush1.bf16.msra.mxu1 %v5707_v36  ;;  %v973_v36 = vld [vmem:[#allocation9 + $0x828] sm:$0xff]  ;;  %v6119_v32 = vpack.c.bf16 %v1014_v27, %v1006_v25  ;;  %v1068_v25 = vld [vmem:[#allocation9 + $0xb20] sm:$0xff]  ;;  %v1070_v27 = vld [vmem:[#allocation9 + $0xb30] sm:$0xff] }
 0x431   : > { %6092 = vmatpush1.bf16.msra.mxu0 %v6091_v37  ;;  %5710 = vmatprep.subr.bf16.mxu1 %v5709_v38  ;;  %v981_v37 = vld [vmem:[#allocation9 + $0x868] sm:$0xff]  ;;  %v975_v38 = vld [vmem:[#allocation9 + $0x838] sm:$0xff] }
 0x432   : > { %6094 = vmatprep.subr.bf16.mxu0 %v6093_v47  ;;  %v5725_v47 = vpack.c.bf16 %v981_v37, %v973_v36  ;;  %v6109_v53 = vpack.c.bf16 %v983_v39, %v975_v38  ;;  %v1022_v36 = vld [vmem:[#allocation9 + $0x9b0] sm:$0xff]  ;;  %v1037_v38 = vld [vmem:[#allocation9 + $0xa28] sm:$0xff] }
 0x433   : > { %v1045_v39 = vld [vmem:[#allocation9 + $0xa68] sm:$0xff] }
 0x434   : > { %5712 = vmatpush1.bf16.msra.mxu1 %v5711_v57  ;;  %v989_v57 = vld [vmem:[#allocation9 + $0x8a8] sm:$0xff] }
 0x435   : > { %6096 = vmatpush1.bf16.msra.mxu0 %v6095_v61  ;;  %5714 = vmatprep.subr.bf16.mxu1 %v5713_v62  ;;  %v997_v61 = vld [vmem:[#allocation9 + $0x8e8] sm:$0xff]  ;;  %v5727_v62 = vpack.c.bf16 %v980_v51, %v972_v48  ;;  %v5741_v51 = vpack.c.bf16 %v1045_v39, %v1037_v38  ;;  %v1094_v39 = vld [vmem:[#allocation9 + $0xbf0] sm:$0xff] }
 0x436   : > { %6098 = vmatprep.subr.bf16.mxu0 %v6097_v4  ;;  %v988_v4 = vld [vmem:[#allocation9 + $0x8a0] sm:$0xff]  ;;  %v5729_v10 = vpack.c.bf16 %v997_v61, %v989_v57  ;;  %v1046_v61 = vld [vmem:[#allocation9 + $0xa70] sm:$0xff] }
 0x437   : > { %v5731_v20 = vpack.c.bf16 %v996_v5, %v988_v4  ;;  %v6127_v5 = vpack.c.bf16 %v1046_v61, %v1038_v56  ;;  %v1100_v56 = vld [vmem:[#allocation9 + $0xc20] sm:$0xff]  ;;  %v1102_v61 = vld [vmem:[#allocation9 + $0xc30] sm:$0xff] }
 0x438   : > { %5716 = vmatpush1.bf16.msra.mxu1 %v5715_v15  ;;  %v1013_v15 = vld [vmem:[#allocation9 + $0x968] sm:$0xff] }
 0x439   : > { %6100 = vmatpush1.bf16.msra.mxu0 %v6099_v59  ;;  %5718 = vmatprep.subr.bf16.mxu1 %v5717_v16  ;;  %v6113_v59 = vpack.c.bf16 %v999_v2, %v991_v1  ;;  %v1007_v16 = vld [vmem:[#allocation9 + $0x938] sm:$0xff]  ;;  %v1061_v1 = vld [vmem:[#allocation9 + $0xae8] sm:$0xff] }
 0x43a   : > { %6102 = vmatprep.subr.bf16.mxu0 %v6101_v23  ;;  %v5733_v23 = vpack.c.bf16 %v1013_v15, %v1005_v14  ;;  %v6117_v26 = vpack.c.bf16 %v1015_v19, %v1007_v16  ;;  %v1055_v2 = vld [vmem:[#allocation9 + $0xab8] sm:$0xff]  ;;  %v1054_v14 = vld [vmem:[#allocation9 + $0xab0] sm:$0xff]  ;;  %v1069_v16 = vld [vmem:[#allocation9 + $0xb28] sm:$0xff] }
 0x43b   : > { %v1077_v19 = vld [vmem:[#allocation9 + $0xb68] sm:$0xff] }
 0x43c   : > { %5720 = vmatpush1.bf16.msra.mxu1 %v5719_v29  ;;  %v1021_v29 = vld [vmem:[#allocation9 + $0x9a8] sm:$0xff]  ;;  %v5749_v24 = vpack.c.bf16 %v1077_v19, %v1069_v16  ;;  %v1126_v19 = vld [vmem:[#allocation9 + $0xcf0] sm:$0xff] }
 0x43d   : > { %6104 = vmatpush1.bf16.msra.mxu0 %v6103_v30  ;;  %5722 = vmatprep.subr.bf16.mxu1 %v5721_v46  ;;  %v1029_v30 = vld [vmem:[#allocation9 + $0x9e8] sm:$0xff]  ;;  %v1023_v46 = vld [vmem:[#allocation9 + $0x9b8] sm:$0xff] }
 0x43e   : > { %6106 = vmatprep.subr.bf16.mxu0 %v6105_v34  ;;  %v5737_v33 = vpack.c.bf16 %v1029_v30, %v1021_v29  ;;  %v1020_v34 = vld [vmem:[#allocation9 + $0x9a0] sm:$0xff]  ;;  %v1078_v30 = vld [vmem:[#allocation9 + $0xb70] sm:$0xff] }
 0x440   : > { %5724 = vmatpush1.bf16.msra.mxu1 %v5723_v44  ;;  %v1039_v44 = vld [vmem:[#allocation9 + $0xa38] sm:$0xff] }
 0x441   : > { %6108 = vmatpush1.bf16.msra.mxu0 %v6107_v45  ;;  %5726 = vmatprep.subr.bf16.mxu1 %v5725_v47  ;;  %v1047_v45 = vld [vmem:[#allocation9 + $0xa78] sm:$0xff]  ;;  %v5739_v47 = vpack.c.bf16 %v1028_v35, %v1020_v34  ;;  %v6135_v34 = vpack.c.bf16 %v1078_v30, %v1070_v27  ;;  %v1132_v27 = vld [vmem:[#allocation9 + $0xd20] sm:$0xff]  ;;  %v1134_v30 = vld [vmem:[#allocation9 + $0xd30] sm:$0xff] }
 0x442   : > { %6110 = vmatprep.subr.bf16.mxu0 %v6109_v53  ;;  %v1036_v53 = vld [vmem:[#allocation9 + $0xa20] sm:$0xff]  ;;  %v6125_v57 = vpack.c.bf16 %v1047_v45, %v1039_v44  ;;  %v1101_v44 = vld [vmem:[#allocation9 + $0xc28] sm:$0xff] }
 0x443   : > { %3269 = vmatmul.mubr.f32.vlgmr.msra.gmra.mrb[4].mxu1 %v7387_v50  ;;  %v5743_v4 = vpack.c.bf16 %v1044_v54, %v1036_v53  ;;  %v1109_v45 = vld [vmem:[#allocation9 + $0xc68] sm:$0xff] }
 0x444   : > { %3695 = vmatmul.mubr.f32.vlgmr.msra.gmra.mrb[6].mxu0 %v7387_v50  ;;  %5728 = vmatpush1.bf16.msra.mxu1 %v5727_v62  ;;  %v1031_v50 = vld [vmem:[#allocation9 + $0x9f8] sm:$0xff]  ;;  %v1053_v62 = vld [vmem:[#allocation9 + $0xaa8] sm:$0xff]  ;;  %v5757_v54 = vpack.c.bf16 %v1109_v45, %v1101_v44  ;;  %v1158_v45 = vld [vmem:[#allocation9 + $0xdf0] sm:$0xff] }
 0x445   : > { %3339 = vmatprep.mubr.f32.mxu1 %v7398_v0  ;;  %6112 = vmatpush1.bf16.msra.mxu0 %v6111_v3  ;;  %v6121_v37 = vpack.c.bf16 %v1031_v50, %v1023_v46  ;;  %v1063_v3 = vld [vmem:[#allocation9 + $0xaf8] sm:$0xff]  ;;  %v5745_v8 = vpack.c.bf16 %v1061_v1, %v1053_v62  ;;  %v1085_v46 = vld [vmem:[#allocation9 + $0xba8] sm:$0xff]  ;;  %v1110_v1 = vld [vmem:[#allocation9 + $0xc70] sm:$0xff] }
 0x446   : > { %3765 = vmatprep.mubr.f32.mxu0 %v7398_v0  ;;  %5730 = vmatprep.subr.bf16.mxu1 %v5729_v10  ;;  %v1030_v0 = vld [vmem:[#allocation9 + $0x9f0] sm:$0xff]  ;;  %v1052_v10 = vld [vmem:[#allocation9 + $0xaa0] sm:$0xff]  ;;  %v6129_v15 = vpack.c.bf16 %v1063_v3, %v1055_v2  ;;  %v1093_v50 = vld [vmem:[#allocation9 + $0xbe8] sm:$0xff] }
 0x447   : > { %6114 = vmatprep.subr.bf16.mxu0 %v6113_v59  ;;  %v6123_v48 = vpack.c.bf16 %v1030_v0, %v1022_v36  ;;  %v1062_v59 = vld [vmem:[#allocation9 + $0xaf0] sm:$0xff]  ;;  %v5753_v35 = vpack.c.bf16 %v1093_v50, %v1085_v46  ;;  %v1084_v36 = vld [vmem:[#allocation9 + $0xba0] sm:$0xff]  ;;  %v1117_v2 = vld [vmem:[#allocation9 + $0xca8] sm:$0xff] }
 0x448   : > { %5732 = vmatpush1.bf16.msra.mxu1 %v5731_v20  ;;  %v1071_v20 = vld [vmem:[#allocation9 + $0xb38] sm:$0xff]  ;;  %v6131_v49 = vpack.c.bf16 %v1062_v59, %v1054_v14  ;;  %v1086_v0 = vld [vmem:[#allocation9 + $0xbb0] sm:$0xff]  ;;  %v1125_v3 = vld [vmem:[#allocation9 + $0xce8] sm:$0xff] }
 0x449   : > { %6116 = vmatpush1.bf16.msra.mxu0 %v6115_v21  ;;  %5734 = vmatprep.subr.bf16.mxu1 %v5733_v23  ;;  %v1079_v21 = vld [vmem:[#allocation9 + $0xb78] sm:$0xff]  ;;  %v5747_v23 = vpack.c.bf16 %v1060_v11, %v1052_v10  ;;  %v6139_v53 = vpack.c.bf16 %v1094_v39, %v1086_v0  ;;  %v6143_v10 = vpack.c.bf16 %v1110_v1, %v1102_v61  ;;  %v1116_v14 = vld [vmem:[#allocation9 + $0xca0] sm:$0xff]  ;;  %v1118_v59 = vld [vmem:[#allocation9 + $0xcb0] sm:$0xff] }
 0x44a   : > { %6118 = vmatprep.subr.bf16.mxu0 %v6117_v26  ;;  %v1076_v26 = vld [vmem:[#allocation9 + $0xb60] sm:$0xff]  ;;  %v6133_v29 = vpack.c.bf16 %v1079_v21, %v1071_v20  ;;  %v5761_v11 = vpack.c.bf16 %v1125_v3, %v1117_v2  ;;  %v1133_v20 = vld [vmem:[#allocation9 + $0xd28] sm:$0xff]  ;;  %v1142_v50 = vld [vmem:[#allocation9 + $0xd70] sm:$0xff] }
 0x44b   : > { %v1141_v21 = vld [vmem:[#allocation9 + $0xd68] sm:$0xff]  ;;  %v1148_v0 = vld [vmem:[#allocation9 + $0xda0] sm:$0xff]  ;;  %v1150_v39 = vld [vmem:[#allocation9 + $0xdb0] sm:$0xff] }
 0x44c   : > { %5736 = vmatpush1.bf16.msra.mxu1 %v5735_v31  ;;  %v1087_v31 = vld [vmem:[#allocation9 + $0xbb8] sm:$0xff]  ;;  %v1164_v61 = vld [vmem:[#allocation9 + $0xe20] sm:$0xff]  ;;  %v1166_v1 = vld [vmem:[#allocation9 + $0xe30] sm:$0xff] }
 0x44d   : > { %6120 = vmatpush1.bf16.msra.mxu0 %v6119_v32  ;;  %5738 = vmatprep.subr.bf16.mxu1 %v5737_v33  ;;  %v1095_v32 = vld [vmem:[#allocation9 + $0xbf8] sm:$0xff]  ;;  %v5751_v33 = vpack.c.bf16 %v1076_v26, %v1068_v25  ;;  %v6147_v25 = vpack.c.bf16 %v1126_v19, %v1118_v59  ;;  %v5765_v26 = vpack.c.bf16 %v1141_v21, %v1133_v20  ;;  %v1174_v3 = vld [vmem:[#allocation9 + $0xe70] sm:$0xff]  ;;  %v1180_v59 = vld [vmem:[#allocation9 + $0xea0] sm:$0xff] }
 0x44e   : > { %6122 = vmatprep.subr.bf16.mxu0 %v6121_v37  ;;  %v1092_v37 = vld [vmem:[#allocation9 + $0xbe0] sm:$0xff]  ;;  %v6137_v38 = vpack.c.bf16 %v1095_v32, %v1087_v31  ;;  %v1149_v31 = vld [vmem:[#allocation9 + $0xda8] sm:$0xff]  ;;  %v1182_v19 = vld [vmem:[#allocation9 + $0xeb0] sm:$0xff] }
 0x44f   : > { %v1157_v32 = vld [vmem:[#allocation9 + $0xde8] sm:$0xff]  ;;  %v1190_v21 = vld [vmem:[#allocation9 + $0xef0] sm:$0xff] }
 0x450   : > { %5740 = vmatpush1.bf16.msra.mxu1 %v5739_v47  ;;  %v1103_v47 = vld [vmem:[#allocation9 + $0xc38] sm:$0xff] }
 0x451   : > { %6124 = vmatpush1.bf16.msra.mxu0 %v6123_v48  ;;  %5742 = vmatprep.subr.bf16.mxu1 %v5741_v51  ;;  %v1111_v48 = vld [vmem:[#allocation9 + $0xc78] sm:$0xff]  ;;  %v5755_v51 = vpack.c.bf16 %v1092_v37, %v1084_v36  ;;  %v6151_v36 = vpack.c.bf16 %v1142_v50, %v1134_v30  ;;  %v5769_v37 = vpack.c.bf16 %v1157_v32, %v1149_v31  ;;  %v1196_v30 = vld [vmem:[#allocation9 + $0xf20] sm:$0xff]  ;;  %v1198_v50 = vld [vmem:[#allocation9 + $0xf30] sm:$0xff] }
 0x452   : > { %6126 = vmatprep.subr.bf16.mxu0 %v6125_v57  ;;  %v1108_v57 = vld [vmem:[#allocation9 + $0xc60] sm:$0xff]  ;;  %v6141_v62 = vpack.c.bf16 %v1111_v48, %v1103_v47  ;;  %v1165_v47 = vld [vmem:[#allocation9 + $0xe28] sm:$0xff]  ;;  %v1206_v32 = vld [vmem:[#allocation9 + $0xf70] sm:$0xff] }
 0x453   : > { %v1173_v48 = vld [vmem:[#allocation9 + $0xe68] sm:$0xff] }
 0x454   : > { %5744 = vmatpush1.bf16.msra.mxu1 %v5743_v4  ;;  %v1119_v4 = vld [vmem:[#allocation9 + $0xcb8] sm:$0xff] }
 0x455   : > { %6128 = vmatpush1.bf16.msra.mxu0 %v6127_v5  ;;  %5746 = vmatprep.subr.bf16.mxu1 %v5745_v8  ;;  %v1127_v5 = vld [vmem:[#allocation9 + $0xcf8] sm:$0xff]  ;;  %v5759_v8 = vpack.c.bf16 %v1108_v57, %v1100_v56  ;;  %v6155_v56 = vpack.c.bf16 %v1158_v45, %v1150_v39  ;;  %v5773_v57 = vpack.c.bf16 %v1173_v48, %v1165_v47  ;;  %v1212_v39 = vld [vmem:[#allocation9 + $0xfa0] sm:$0xff]  ;;  %v1214_v45 = vld [vmem:[#allocation9 + $0xfb0] sm:$0xff] }
 0x456   : > { %6130 = vmatprep.subr.bf16.mxu0 %v6129_v15  ;;  %v1124_v15 = vld [vmem:[#allocation9 + $0xce0] sm:$0xff]  ;;  %v6145_v16 = vpack.c.bf16 %v1127_v5, %v1119_v4  ;;  %v1181_v4 = vld [vmem:[#allocation9 + $0xea8] sm:$0xff]  ;;  %v1222_v48 = vld [vmem:[#allocation9 + $0xff0] sm:$0xff] }
 0x457   : > { %v1189_v5 = vld [vmem:[#allocation9 + $0xee8] sm:$0xff] }
 0x458   : > { %5748 = vmatpush1.bf16.msra.mxu1 %v5747_v23  ;;  %v1135_v23 = vld [vmem:[#allocation9 + $0xd38] sm:$0xff] }
 0x459   : > { %6132 = vmatpush1.bf16.msra.mxu0 %v6131_v49  ;;  %5750 = vmatprep.subr.bf16.mxu1 %v5749_v24  ;;  %v1143_v49 = vld [vmem:[#allocation9 + $0xd78] sm:$0xff]  ;;  %v5763_v24 = vpack.c.bf16 %v1124_v15, %v1116_v14  ;;  %v6159_v14 = vpack.c.bf16 %v1174_v3, %v1166_v1  ;;  %v5777_v15 = vpack.c.bf16 %v1189_v5, %v1181_v4  ;;  %v1228_v1 = vld [vmem:[#allocation9 + $0x1020] sm:$0xff]  ;;  %v1230_v4 = vld [vmem:[#allocation9 + $0x1030] sm:$0xff] }
 0x45a   : > { %6134 = vmatprep.subr.bf16.mxu0 %v6133_v29  ;;  %v1140_v29 = vld [vmem:[#allocation9 + $0xd60] sm:$0xff]  ;;  %v6149_v46 = vpack.c.bf16 %v1143_v49, %v1135_v23  ;;  %v1197_v23 = vld [vmem:[#allocation9 + $0xf28] sm:$0xff]  ;;  %v1238_v5 = vld [vmem:[#allocation9 + $0x1070] sm:$0xff] }
 0x45b   : > { %v1205_v49 = vld [vmem:[#allocation9 + $0xf68] sm:$0xff] }
 0x45c   : > { %5752 = vmatpush1.bf16.msra.mxu1 %v5751_v33  ;;  %v1151_v33 = vld [vmem:[#allocation9 + $0xdb8] sm:$0xff] }
 0x45d   : > { %6136 = vmatpush1.bf16.msra.mxu0 %v6135_v34  ;;  %5754 = vmatprep.subr.bf16.mxu1 %v5753_v35  ;;  %v1159_v34 = vld [vmem:[#allocation9 + $0xdf8] sm:$0xff]  ;;  %v5767_v35 = vpack.c.bf16 %v1140_v29, %v1132_v27  ;;  %v6163_v27 = vpack.c.bf16 %v1190_v21, %v1182_v19  ;;  %v5781_v29 = vpack.c.bf16 %v1205_v49, %v1197_v23  ;;  %v1252_v19 = vld [vmem:[#allocation9 + $0x10e0] sm:$0xff]  ;;  %v1254_v23 = vld [vmem:[#allocation9 + $0x10f0] sm:$0xff] }
 0x45e   : > { %6138 = vmatprep.subr.bf16.mxu0 %v6137_v38  ;;  %v1156_v38 = vld [vmem:[#allocation9 + $0xde0] sm:$0xff]  ;;  %v6153_v44 = vpack.c.bf16 %v1159_v34, %v1151_v33  ;;  %v1213_v33 = vld [vmem:[#allocation9 + $0xfa8] sm:$0xff] }
 0x45f   : > { %v1221_v34 = vld [vmem:[#allocation9 + $0xfe8] sm:$0xff] }
 0x460   : > { %5756 = vmatpush1.bf16.msra.mxu1 %v5755_v51  ;;  %v1167_v51 = vld [vmem:[#allocation9 + $0xe38] sm:$0xff]  ;;  %v1261_v49 = vld [vmem:[#allocation9 + $0x1128] sm:$0xff] }
 0x461   : > { %6140 = vmatpush1.bf16.msra.mxu0 %v6139_v53  ;;  %5758 = vmatprep.subr.bf16.mxu1 %v5757_v54  ;;  %v1175_v53 = vld [vmem:[#allocation9 + $0xe78] sm:$0xff]  ;;  %v5771_v54 = vpack.c.bf16 %v1156_v38, %v1148_v0  ;;  %v6167_v0 = vpack.c.bf16 %v1206_v32, %v1198_v50  ;;  %v5785_v38 = vpack.c.bf16 %v1221_v34, %v1213_v33  ;;  %v1260_v50 = vld [vmem:[#allocation9 + $0x1120] sm:$0xff]  ;;  %v1262_v32 = vld [vmem:[#allocation9 + $0x1130] sm:$0xff] }
 0x462   : > { %6142 = vmatprep.subr.bf16.mxu0 %v6141_v62  ;;  %v1172_v62 = vld [vmem:[#allocation9 + $0xe60] sm:$0xff]  ;;  %v6157_v2 = vpack.c.bf16 %v1175_v53, %v1167_v51  ;;  %v1229_v51 = vld [vmem:[#allocation9 + $0x1028] sm:$0xff]  ;;  %v1270_v34 = vld [vmem:[#allocation9 + $0x1170] sm:$0xff] }
 0x463   : > { %v1237_v53 = vld [vmem:[#allocation9 + $0x1068] sm:$0xff] }
 0x464   : > { %5760 = vmatpush1.bf16.msra.mxu1 %v5759_v8  ;;  %v1183_v8 = vld [vmem:[#allocation9 + $0xeb8] sm:$0xff] }
 0x465   : > { %6144 = vmatpush1.bf16.msra.mxu0 %v6143_v10  ;;  %5762 = vmatprep.subr.bf16.mxu1 %v5761_v11  ;;  %v1191_v10 = vld [vmem:[#allocation9 + $0xef8] sm:$0xff]  ;;  %v5775_v11 = vpack.c.bf16 %v1172_v62, %v1164_v61  ;;  %v6171_v61 = vpack.c.bf16 %v1222_v48, %v1214_v45  ;;  %v5789_v62 = vpack.c.bf16 %v1237_v53, %v1229_v51  ;;  %v1284_v45 = vld [vmem:[#allocation9 + $0x11e0] sm:$0xff]  ;;  %v1293_v51 = vld [vmem:[#allocation9 + $0x1228] sm:$0xff] }
 0x466   : > { %6146 = vmatprep.subr.bf16.mxu0 %v6145_v16  ;;  %v1188_v16 = vld [vmem:[#allocation9 + $0xee0] sm:$0xff]  ;;  %v6161_v20 = vpack.c.bf16 %v1191_v10, %v1183_v8  ;;  %v1245_v8 = vld [vmem:[#allocation9 + $0x10a8] sm:$0xff] }
 0x467   : > { %v1253_v10 = vld [vmem:[#allocation9 + $0x10e8] sm:$0xff] }
 0x468   : > { %5764 = vmatpush1.bf16.msra.mxu1 %v5763_v24  ;;  %v1199_v24 = vld [vmem:[#allocation9 + $0xf38] sm:$0xff]  ;;  %v5793_v21 = vpack.c.bf16 %v1253_v10, %v1245_v8  ;;  %v1301_v53 = vld [vmem:[#allocation9 + $0x1268] sm:$0xff] }
 0x469   : > { %6148 = vmatpush1.bf16.msra.mxu0 %v6147_v25  ;;  %5766 = vmatprep.subr.bf16.mxu1 %v5765_v26  ;;  %v1207_v25 = vld [vmem:[#allocation9 + $0xf78] sm:$0xff]  ;;  %v5779_v26 = vpack.c.bf16 %v1188_v16, %v1180_v59  ;;  %v6175_v59 = vpack.c.bf16 %v1238_v5, %v1230_v4  ;;  %v1244_v16 = vld [vmem:[#allocation9 + $0x10a0] sm:$0xff]  ;;  %v1302_v5 = vld [vmem:[#allocation9 + $0x1270] sm:$0xff] }
 0x46a   : > { %6150 = vmatprep.subr.bf16.mxu0 %v6149_v46  ;;  %v1204_v46 = vld [vmem:[#allocation9 + $0xf60] sm:$0xff]  ;;  %v6165_v31 = vpack.c.bf16 %v1207_v25, %v1199_v24  ;;  %v1269_v24 = vld [vmem:[#allocation9 + $0x1168] sm:$0xff] }
 0x46b   : > { %v1309_v8 = vld [vmem:[#allocation9 + $0x12a8] sm:$0xff] }
 0x46c   : > { %5768 = vmatpush1.bf16.msra.mxu1 %v5767_v35  ;;  %v1215_v35 = vld [vmem:[#allocation9 + $0xfb8] sm:$0xff]  ;;  %v1317_v10 = vld [vmem:[#allocation9 + $0x12e8] sm:$0xff] }
 0x46d   : > { %6152 = vmatpush1.bf16.msra.mxu0 %v6151_v36  ;;  %5770 = vmatprep.subr.bf16.mxu1 %v5769_v37  ;;  %v1223_v36 = vld [vmem:[#allocation9 + $0xff8] sm:$0xff]  ;;  %v5783_v37 = vpack.c.bf16 %v1204_v46, %v1196_v30  ;;  %v5797_v46 = vpack.c.bf16 %v1269_v24, %v1261_v49  ;;  %v1318_v49 = vld [vmem:[#allocation9 + $0x12f0] sm:$0xff]  ;;  %v1325_v24 = vld [vmem:[#allocation9 + $0x1328] sm:$0xff] }
 0x46e   : > { %6154 = vmatprep.subr.bf16.mxu0 %v6153_v44  ;;  %v1220_v44 = vld [vmem:[#allocation9 + $0xfe0] sm:$0xff]  ;;  %v6169_v47 = vpack.c.bf16 %v1223_v36, %v1215_v35  ;;  %v1277_v35 = vld [vmem:[#allocation9 + $0x11a8] sm:$0xff] }
 0x46f   : > { %v1285_v36 = vld [vmem:[#allocation9 + $0x11e8] sm:$0xff] }
 0x470   : > { %5772 = vmatpush1.bf16.msra.mxu1 %v5771_v54  ;;  %v1231_v54 = vld [vmem:[#allocation9 + $0x1038] sm:$0xff] }
 0x471   : > { %6156 = vmatpush1.bf16.msra.mxu0 %v6155_v56  ;;  %5774 = vmatprep.subr.bf16.mxu1 %v5773_v57  ;;  %v1239_v56 = vld [vmem:[#allocation9 + $0x1078] sm:$0xff]  ;;  %v5787_v57 = vpack.c.bf16 %v1220_v44, %v1212_v39  ;;  %v5801_v39 = vpack.c.bf16 %v1285_v36, %v1277_v35  ;;  %v1276_v44 = vld [vmem:[#allocation9 + $0x11a0] sm:$0xff]  ;;  %v1341_v35 = vld [vmem:[#allocation9 + $0x13a8] sm:$0xff] }
 0x472   : > { %6158 = vmatprep.subr.bf16.mxu0 %v6157_v2  ;;  %v1236_v2 = vld [vmem:[#allocation9 + $0x1060] sm:$0xff]  ;;  %v6173_v3 = vpack.c.bf16 %v1239_v56, %v1231_v54  ;;  %v1295_v54 = vld [vmem:[#allocation9 + $0x1238] sm:$0xff]  ;;  %v1349_v36 = vld [vmem:[#allocation9 + $0x13e8] sm:$0xff] }
 0x473   : > { %v1303_v56 = vld [vmem:[#allocation9 + $0x1278] sm:$0xff] }
 0x474   : > { %5776 = vmatpush1.bf16.msra.mxu1 %v5775_v11  ;;  %v5791_v11 = vpack.c.bf16 %v1236_v2, %v1228_v1  ;;  %v1292_v1 = vld [vmem:[#allocation9 + $0x1220] sm:$0xff]  ;;  %v6189_v4 = vpack.c.bf16 %v1303_v56, %v1295_v54  ;;  %v1359_v54 = vld [vmem:[#allocation9 + $0x1438] sm:$0xff] }
 0x475   : > { %6160 = vmatpush1.bf16.msra.mxu0 %v6159_v14  ;;  %5778 = vmatprep.subr.bf16.mxu1 %v5777_v15  ;;  %v1247_v14 = vld [vmem:[#allocation9 + $0x10b8] sm:$0xff]  ;;  %v1300_v2 = vld [vmem:[#allocation9 + $0x1260] sm:$0xff] }
 0x476   : > { %6162 = vmatprep.subr.bf16.mxu0 %v6161_v20  ;;  %v1255_v15 = vld [vmem:[#allocation9 + $0x10f8] sm:$0xff]  ;;  %v1246_v20 = vld [vmem:[#allocation9 + $0x10b0] sm:$0xff] }
 0x477   : > { %v6177_v25 = vpack.c.bf16 %v1255_v15, %v1247_v14  ;;  %v6179_v30 = vpack.c.bf16 %v1254_v23, %v1246_v20  ;;  %v1319_v14 = vld [vmem:[#allocation9 + $0x12f8] sm:$0xff]  ;;  %v5807_v15 = vpack.c.bf16 %v1300_v2, %v1292_v1  ;;  %v1316_v20 = vld [vmem:[#allocation9 + $0x12e0] sm:$0xff] }
 0x478   : > { %5780 = vmatpush1.bf16.msra.mxu1 %v5779_v26  ;;  %v1263_v26 = vld [vmem:[#allocation9 + $0x1138] sm:$0xff]  ;;  %v1356_v1 = vld [vmem:[#allocation9 + $0x1420] sm:$0xff] }
 0x479   : > { %6164 = vmatpush1.bf16.msra.mxu0 %v6163_v27  ;;  %5782 = vmatprep.subr.bf16.mxu1 %v5781_v29  ;;  %v1271_v27 = vld [vmem:[#allocation9 + $0x1178] sm:$0xff]  ;;  %v5795_v29 = vpack.c.bf16 %v1252_v19, %v1244_v16  ;;  %v5809_v16 = vpack.c.bf16 %v1317_v10, %v1309_v8  ;;  %v1308_v19 = vld [vmem:[#allocation9 + $0x12a0] sm:$0xff]  ;;  %v1373_v8 = vld [vmem:[#allocation9 + $0x14a8] sm:$0xff] }
 0x47a   : > { %6166 = vmatprep.subr.bf16.mxu0 %v6165_v31  ;;  %v1268_v31 = vld [vmem:[#allocation9 + $0x1160] sm:$0xff]  ;;  %v6181_v33 = vpack.c.bf16 %v1271_v27, %v1263_v26  ;;  %v1327_v26 = vld [vmem:[#allocation9 + $0x1338] sm:$0xff]  ;;  %v1381_v10 = vld [vmem:[#allocation9 + $0x14e8] sm:$0xff] }
 0x47b   : > { %v1335_v27 = vld [vmem:[#allocation9 + $0x1378] sm:$0xff]  ;;  %v1364_v2 = vld [vmem:[#allocation9 + $0x1460] sm:$0xff] }
 0x47c   : > { %5784 = vmatpush1.bf16.msra.mxu1 %v5783_v37  ;;  %v1279_v37 = vld [vmem:[#allocation9 + $0x11b8] sm:$0xff] }
 0x47d   : > { %6168 = vmatpush1.bf16.msra.mxu0 %v6167_v0  ;;  %5786 = vmatprep.subr.bf16.mxu1 %v5785_v38  ;;  %v5799_v0 = vpack.c.bf16 %v1268_v31, %v1260_v50  ;;  %v6183_v38 = vpack.c.bf16 %v1270_v34, %v1262_v32  ;;  %v1324_v50 = vld [vmem:[#allocation9 + $0x1320] sm:$0xff]  ;;  %v1326_v32 = vld [vmem:[#allocation9 + $0x1330] sm:$0xff]  ;;  %v1367_v56 = vld [vmem:[#allocation9 + $0x1478] sm:$0xff] }
 0x47e   : > { %6170 = vmatprep.subr.bf16.mxu0 %v6169_v47  ;;  %v1278_v47 = vld [vmem:[#allocation9 + $0x11b0] sm:$0xff]  ;;  %v1332_v31 = vld [vmem:[#allocation9 + $0x1360] sm:$0xff] }
 0x47f   : > { %v1334_v34 = vld [vmem:[#allocation9 + $0x1370] sm:$0xff] }
 0x480   : > { %5788 = vmatpush1.bf16.msra.mxu1 %v5787_v57  ;;  %v5803_v57 = vpack.c.bf16 %v1284_v45, %v1276_v44  ;;  %v1340_v44 = vld [vmem:[#allocation9 + $0x13a0] sm:$0xff] }
 0x481   : > { %6172 = vmatpush1.bf16.msra.mxu0 %v6171_v61  ;;  %5790 = vmatprep.subr.bf16.mxu1 %v5789_v62  ;;  %v5805_v62 = vpack.c.bf16 %v1301_v53, %v1293_v51  ;;  %v1348_v45 = vld [vmem:[#allocation9 + $0x13e0] sm:$0xff]  ;;  %v1357_v51 = vld [vmem:[#allocation9 + $0x1428] sm:$0xff] }
 0x482   : > { %6174 = vmatprep.subr.bf16.mxu0 %v6173_v3  ;;  %v1294_v3 = vld [vmem:[#allocation9 + $0x1230] sm:$0xff]  ;;  %v1365_v53 = vld [vmem:[#allocation9 + $0x1468] sm:$0xff] }
 0x483   : > { %3340 = vmatmul.mubr.f32.vlgmr.msra.gmra.mrb[4].mxu1 %v7408_v17 }
 0x484   : > { %3766 = vmatmul.mubr.f32.vlgmr.msra.gmra.mrb[6].mxu0 %v7408_v17  ;;  %5792 = vmatpush1.bf16.msra.mxu1 %v5791_v11  ;;  %v1287_v17 = vld [vmem:[#allocation9 + $0x11f8] sm:$0xff] }
 0x485   : > { %3410 = vmatprep.mubr.f32.mxu1 %v7413_v22  ;;  %6176 = vmatpush1.bf16.msra.mxu0 %v6175_v59  ;;  %v6185_v48 = vpack.c.bf16 %v1287_v17, %v1279_v37  ;;  %v1311_v11 = vld [vmem:[#allocation9 + $0x12b8] sm:$0xff]  ;;  %v6191_v59 = vpack.c.bf16 %v1302_v5, %v1294_v3  ;;  %v1358_v3 = vld [vmem:[#allocation9 + $0x1430] sm:$0xff] }
 0x486   : > { %3836 = vmatprep.mubr.f32.mxu0 %v7413_v22  ;;  %5794 = vmatprep.subr.bf16.mxu1 %v5793_v21  ;;  %v1286_v22 = vld [vmem:[#allocation9 + $0x11f0] sm:$0xff]  ;;  %v6193_v23 = vpack.c.bf16 %v1319_v14, %v1311_v11  ;;  %v1343_v37 = vld [vmem:[#allocation9 + $0x13b8] sm:$0xff] }
 0x487   : > { %6178 = vmatprep.subr.bf16.mxu0 %v6177_v25  ;;  %v6187_v61 = vpack.c.bf16 %v1286_v22, %v1278_v47  ;;  %v1310_v21 = vld [vmem:[#allocation9 + $0x12b0] sm:$0xff]  ;;  %v1333_v25 = vld [vmem:[#allocation9 + $0x1368] sm:$0xff]  ;;  %v1351_v17 = vld [vmem:[#allocation9 + $0x13f8] sm:$0xff] }
 0x488   : > { %5796 = vmatpush1.bf16.msra.mxu1 %v5795_v29  ;;  %v5811_v29 = vpack.c.bf16 %v1316_v20, %v1308_v19  ;;  %v1342_v47 = vld [vmem:[#allocation9 + $0x13b0] sm:$0xff]  ;;  %v1375_v11 = vld [vmem:[#allocation9 + $0x14b8] sm:$0xff]  ;;  %v1372_v19 = vld [vmem:[#allocation9 + $0x14a0] sm:$0xff] }
 0x489   : > { %6180 = vmatpush1.bf16.msra.mxu0 %v6179_v30  ;;  %5798 = vmatprep.subr.bf16.mxu1 %v5797_v46  ;;  %v6195_v30 = vpack.c.bf16 %v1318_v49, %v1310_v21  ;;  %v5813_v46 = vpack.c.bf16 %v1333_v25, %v1325_v24  ;;  %v1350_v22 = vld [vmem:[#allocation9 + $0x13f0] sm:$0xff]  ;;  %v1383_v14 = vld [vmem:[#allocation9 + $0x14f8] sm:$0xff]  ;;  %v1380_v20 = vld [vmem:[#allocation9 + $0x14e0] sm:$0xff] }
 0x48a   : > { %6182 = vmatprep.subr.bf16.mxu0 %v6181_v33  ;;  %v6197_v33 = vpack.c.bf16 %v1335_v27, %v1327_v26  ;;  %v1366_v5 = vld [vmem:[#allocation9 + $0x1470] sm:$0xff]  ;;  %v1389_v24 = vld [vmem:[#allocation9 + $0x1528] sm:$0xff]  ;;  %v1391_v26 = vld [vmem:[#allocation9 + $0x1538] sm:$0xff] }
 0x48b   : > { %v1374_v21 = vld [vmem:[#allocation9 + $0x14b0] sm:$0xff]  ;;  %v1397_v25 = vld [vmem:[#allocation9 + $0x1568] sm:$0xff]  ;;  %v1399_v27 = vld [vmem:[#allocation9 + $0x1578] sm:$0xff] }
 0x48c   : > { %5800 = vmatpush1.bf16.msra.mxu1 %v5799_v0  ;;  %v5815_v0 = vpack.c.bf16 %v1332_v31, %v1324_v50  ;;  %v1382_v49 = vld [vmem:[#allocation9 + $0x14f0] sm:$0xff]  ;;  %v1388_v50 = vld [vmem:[#allocation9 + $0x1520] sm:$0xff] }
 0x48d   : > { %6184 = vmatpush1.bf16.msra.mxu0 %v6183_v38  ;;  %5802 = vmatprep.subr.bf16.mxu1 %v5801_v39  ;;  %v6199_v38 = vpack.c.bf16 %v1334_v34, %v1326_v32  ;;  %v5817_v39 = vpack.c.bf16 %v1349_v36, %v1341_v35  ;;  %v1396_v31 = vld [vmem:[#allocation9 + $0x1560] sm:$0xff]  ;;  %v1390_v32 = vld [vmem:[#allocation9 + $0x1530] sm:$0xff]  ;;  %v1405_v35 = vld [vmem:[#allocation9 + $0x15a8] sm:$0xff] }
 0x48e   : > { %6186 = vmatprep.subr.bf16.mxu0 %v6185_v48  ;;  %v6201_v48 = vpack.c.bf16 %v1351_v17, %v1343_v37  ;;  %v1398_v34 = vld [vmem:[#allocation9 + $0x1570] sm:$0xff]  ;;  %v1413_v36 = vld [vmem:[#allocation9 + $0x15e8] sm:$0xff]  ;;  %v1407_v37 = vld [vmem:[#allocation9 + $0x15b8] sm:$0xff] }
 0x48f   : > { %v1415_v17 = vld [vmem:[#allocation9 + $0x15f8] sm:$0xff] }
 0x490   : > { %5804 = vmatpush1.bf16.msra.mxu1 %v5803_v57  ;;  %v5819_v57 = vpack.c.bf16 %v1348_v45, %v1340_v44  ;;  %v1404_v44 = vld [vmem:[#allocation9 + $0x15a0] sm:$0xff] }
 0x491   : > { %6188 = vmatpush1.bf16.msra.mxu0 %v6187_v61  ;;  %5806 = vmatprep.subr.bf16.mxu1 %v5805_v62  ;;  %v6203_v61 = vpack.c.bf16 %v1350_v22, %v1342_v47  ;;  %v5821_v62 = vpack.c.bf16 %v1365_v53, %v1357_v51  ;;  %v1412_v45 = vld [vmem:[#allocation9 + $0x15e0] sm:$0xff]  ;;  %v1406_v47 = vld [vmem:[#allocation9 + $0x15b0] sm:$0xff]  ;;  %v1421_v51 = vld [vmem:[#allocation9 + $0x1628] sm:$0xff] }
 0x492   : > { %6190 = vmatprep.subr.bf16.mxu0 %v6189_v4  ;;  %v6205_v4 = vpack.c.bf16 %v1367_v56, %v1359_v54  ;;  %v1414_v22 = vld [vmem:[#allocation9 + $0x15f0] sm:$0xff]  ;;  %v1429_v53 = vld [vmem:[#allocation9 + $0x1668] sm:$0xff]  ;;  %v1423_v54 = vld [vmem:[#allocation9 + $0x1638] sm:$0xff] }
 0x493   : > { %v1431_v56 = vld [vmem:[#allocation9 + $0x1678] sm:$0xff] }
 0x494   : > { %5808 = vmatpush1.bf16.msra.mxu1 %v5807_v15  ;;  %v5823_v15 = vpack.c.bf16 %v1364_v2, %v1356_v1  ;;  %v1420_v1 = vld [vmem:[#allocation9 + $0x1620] sm:$0xff] }
 0x495   : > { %6192 = vmatpush1.bf16.msra.mxu0 %v6191_v59  ;;  %5810 = vmatprep.subr.bf16.mxu1 %v5809_v16  ;;  %v6207_v59 = vpack.c.bf16 %v1366_v5, %v1358_v3  ;;  %v5825_v16 = vpack.c.bf16 %v1381_v10, %v1373_v8  ;;  %v1428_v2 = vld [vmem:[#allocation9 + $0x1660] sm:$0xff]  ;;  %v1422_v3 = vld [vmem:[#allocation9 + $0x1630] sm:$0xff]  ;;  %v1437_v8 = vld [vmem:[#allocation9 + $0x16a8] sm:$0xff] }
 0x496   : > { %6194 = vmatprep.subr.bf16.mxu0 %v6193_v23  ;;  %v6209_v23 = vpack.c.bf16 %v1383_v14, %v1375_v11  ;;  %v1430_v5 = vld [vmem:[#allocation9 + $0x1670] sm:$0xff]  ;;  %v1445_v10 = vld [vmem:[#allocation9 + $0x16e8] sm:$0xff]  ;;  %v1439_v11 = vld [vmem:[#allocation9 + $0x16b8] sm:$0xff] }
 0x497   : > { %v1447_v14 = vld [vmem:[#allocation9 + $0x16f8] sm:$0xff] }
 0x498   : > { %5812 = vmatpush1.bf16.msra.mxu1 %v5811_v29  ;;  %v5827_v29 = vpack.c.bf16 %v1380_v20, %v1372_v19  ;;  %v1436_v19 = vld [vmem:[#allocation9 + $0x16a0] sm:$0xff] }
 0x499   : > { %6196 = vmatpush1.bf16.msra.mxu0 %v6195_v30  ;;  %5814 = vmatprep.subr.bf16.mxu1 %v5813_v46  ;;  %v6211_v30 = vpack.c.bf16 %v1382_v49, %v1374_v21  ;;  %v5829_v46 = vpack.c.bf16 %v1397_v25, %v1389_v24  ;;  %v1444_v20 = vld [vmem:[#allocation9 + $0x16e0] sm:$0xff]  ;;  %v1438_v21 = vld [vmem:[#allocation9 + $0x16b0] sm:$0xff]  ;;  %v1453_v24 = vld [vmem:[#allocation9 + $0x1728] sm:$0xff] }
 0x49a   : > { %6198 = vmatprep.subr.bf16.mxu0 %v6197_v33  ;;  %v6213_v33 = vpack.c.bf16 %v1399_v27, %v1391_v26  ;;  %v1446_v49 = vld [vmem:[#allocation9 + $0x16f0] sm:$0xff]  ;;  %v1461_v25 = vld [vmem:[#allocation9 + $0x1768] sm:$0xff]  ;;  %v1455_v26 = vld [vmem:[#allocation9 + $0x1738] sm:$0xff] }
 0x49b   : > { %v1463_v27 = vld [vmem:[#allocation9 + $0x1778] sm:$0xff] }
 0x49c   : > { %5816 = vmatpush1.bf16.msra.mxu1 %v5815_v0  ;;  %v5831_v0 = vpack.c.bf16 %v1396_v31, %v1388_v50  ;;  %v1452_v50 = vld [vmem:[#allocation9 + $0x1720] sm:$0xff] }
 0x49d   : > { %6200 = vmatpush1.bf16.msra.mxu0 %v6199_v38  ;;  %5818 = vmatprep.subr.bf16.mxu1 %v5817_v39  ;;  %v6215_v38 = vpack.c.bf16 %v1398_v34, %v1390_v32  ;;  %v5833_v39 = vpack.c.bf16 %v1413_v36, %v1405_v35  ;;  %v1460_v31 = vld [vmem:[#allocation9 + $0x1760] sm:$0xff]  ;;  %v1454_v32 = vld [vmem:[#allocation9 + $0x1730] sm:$0xff]  ;;  %v1469_v35 = vld [vmem:[#allocation9 + $0x17a8] sm:$0xff] }
 0x49e   : > { %6202 = vmatprep.subr.bf16.mxu0 %v6201_v48  ;;  %v6217_v48 = vpack.c.bf16 %v1415_v17, %v1407_v37  ;;  %v1462_v34 = vld [vmem:[#allocation9 + $0x1770] sm:$0xff]  ;;  %v1477_v36 = vld [vmem:[#allocation9 + $0x17e8] sm:$0xff]  ;;  %v1471_v37 = vld [vmem:[#allocation9 + $0x17b8] sm:$0xff] }
 0x49f   : > { %v1479_v17 = vld [vmem:[#allocation9 + $0x17f8] sm:$0xff] }
 0x4a0   : > { %5820 = vmatpush1.bf16.msra.mxu1 %v5819_v57  ;;  %v5835_v57 = vpack.c.bf16 %v1412_v45, %v1404_v44  ;;  %v1468_v44 = vld [vmem:[#allocation9 + $0x17a0] sm:$0xff] }
 0x4a1   : > { %6204 = vmatpush1.bf16.msra.mxu0 %v6203_v61  ;;  %5822 = vmatprep.subr.bf16.mxu1 %v5821_v62  ;;  %v6219_v61 = vpack.c.bf16 %v1414_v22, %v1406_v47  ;;  %v5837_v62 = vpack.c.bf16 %v1429_v53, %v1421_v51  ;;  %v1476_v45 = vld [vmem:[#allocation9 + $0x17e0] sm:$0xff]  ;;  %v1470_v47 = vld [vmem:[#allocation9 + $0x17b0] sm:$0xff]  ;;  %v1485_v51 = vld [vmem:[#allocation9 + $0x1828] sm:$0xff] }
 0x4a2   : > { %6206 = vmatprep.subr.bf16.mxu0 %v6205_v4  ;;  %v6221_v4 = vpack.c.bf16 %v1431_v56, %v1423_v54  ;;  %v1478_v22 = vld [vmem:[#allocation9 + $0x17f0] sm:$0xff]  ;;  %v1493_v53 = vld [vmem:[#allocation9 + $0x1868] sm:$0xff]  ;;  %v1487_v54 = vld [vmem:[#allocation9 + $0x1838] sm:$0xff] }
 0x4a3   : > { %v1495_v56 = vld [vmem:[#allocation9 + $0x1878] sm:$0xff] }
 0x4a4   : > { %5824 = vmatpush1.bf16.msra.mxu1 %v5823_v15  ;;  %v5839_v15 = vpack.c.bf16 %v1428_v2, %v1420_v1  ;;  %v1484_v1 = vld [vmem:[#allocation9 + $0x1820] sm:$0xff] }
 0x4a5   : > { %6208 = vmatpush1.bf16.msra.mxu0 %v6207_v59  ;;  %5826 = vmatprep.subr.bf16.mxu1 %v5825_v16  ;;  %v6223_v59 = vpack.c.bf16 %v1430_v5, %v1422_v3  ;;  %v5841_v16 = vpack.c.bf16 %v1445_v10, %v1437_v8  ;;  %v1492_v2 = vld [vmem:[#allocation9 + $0x1860] sm:$0xff]  ;;  %v6237_v3 = vpack.c.bf16 %v1495_v56, %v1487_v54  ;;  %v1494_v5 = vld [vmem:[#allocation9 + $0x1870] sm:$0xff]  ;;  %v1501_v8 = vld [vmem:[#allocation9 + $0x18a8] sm:$0xff] }
 0x4a6   : > { %6210 = vmatprep.subr.bf16.mxu0 %v6209_v23  ;;  %v6225_v23 = vpack.c.bf16 %v1447_v14, %v1439_v11  ;;  %v1509_v10 = vld [vmem:[#allocation9 + $0x18e8] sm:$0xff]  ;;  %v5855_v11 = vpack.c.bf16 %v1492_v2, %v1484_v1  ;;  %v1503_v14 = vld [vmem:[#allocation9 + $0x18b8] sm:$0xff]  ;;  %v1550_v1 = vld [vmem:[#allocation9 + $0x1a30] sm:$0xff] }
 0x4a8   : > { %5828 = vmatpush1.bf16.msra.mxu1 %v5827_v29  ;;  %v5843_v29 = vpack.c.bf16 %v1444_v20, %v1436_v19  ;;  %v1508_v19 = vld [vmem:[#allocation9 + $0x18e0] sm:$0xff]  ;;  %v1502_v20 = vld [vmem:[#allocation9 + $0x18b0] sm:$0xff] }
 0x4a9   : > { %6212 = vmatpush1.bf16.msra.mxu0 %v6211_v30  ;;  %5830 = vmatprep.subr.bf16.mxu1 %v5829_v46  ;;  %v6227_v30 = vpack.c.bf16 %v1446_v49, %v1438_v21  ;;  %v5845_v46 = vpack.c.bf16 %v1461_v25, %v1453_v24  ;;  %v5857_v21 = vpack.c.bf16 %v1509_v10, %v1501_v8  ;;  %v1517_v49 = vld [vmem:[#allocation9 + $0x1928] sm:$0xff]  ;;  %v1567_v8 = vld [vmem:[#allocation9 + $0x1ab8] sm:$0xff] }
 0x4aa   : > { %6214 = vmatprep.subr.bf16.mxu0 %v6213_v33  ;;  %v6229_v33 = vpack.c.bf16 %v1463_v27, %v1455_v26  ;;  %v1525_v24 = vld [vmem:[#allocation9 + $0x1968] sm:$0xff]  ;;  %v1519_v26 = vld [vmem:[#allocation9 + $0x1938] sm:$0xff] }
 0x4ab   : > { %v1527_v27 = vld [vmem:[#allocation9 + $0x1978] sm:$0xff] }
 0x4ac   : > { %5832 = vmatpush1.bf16.msra.mxu1 %v5831_v0  ;;  %v5847_v0 = vpack.c.bf16 %v1460_v31, %v1452_v50  ;;  %v1516_v50 = vld [vmem:[#allocation9 + $0x1920] sm:$0xff]  ;;  %v1575_v10 = vld [vmem:[#allocation9 + $0x1af8] sm:$0xff] }
 0x4ad   : > { %6216 = vmatpush1.bf16.msra.mxu0 %v6215_v38  ;;  %5834 = vmatprep.subr.bf16.mxu1 %v5833_v39  ;;  %v6231_v38 = vpack.c.bf16 %v1462_v34, %v1454_v32  ;;  %v5849_v39 = vpack.c.bf16 %v1477_v36, %v1469_v35  ;;  %v1524_v31 = vld [vmem:[#allocation9 + $0x1960] sm:$0xff]  ;;  %v1518_v32 = vld [vmem:[#allocation9 + $0x1930] sm:$0xff]  ;;  %v1533_v35 = vld [vmem:[#allocation9 + $0x19a8] sm:$0xff] }
 0x4ae   : > { %6218 = vmatprep.subr.bf16.mxu0 %v6217_v48  ;;  %v6233_v48 = vpack.c.bf16 %v1479_v17, %v1471_v37  ;;  %v1526_v34 = vld [vmem:[#allocation9 + $0x1970] sm:$0xff]  ;;  %v1541_v36 = vld [vmem:[#allocation9 + $0x19e8] sm:$0xff]  ;;  %v1535_v37 = vld [vmem:[#allocation9 + $0x19b8] sm:$0xff]  ;;  %v5863_v17 = vpack.c.bf16 %v1524_v31, %v1516_v50 }
 0x4af   : > { %v1582_v50 = vld [vmem:[#allocation9 + $0x1b30] sm:$0xff] }
 0x4b0   : > { %5836 = vmatpush1.bf16.msra.mxu1 %v5835_v57  ;;  %v5851_v57 = vpack.c.bf16 %v1476_v45, %v1468_v44  ;;  %v1540_v44 = vld [vmem:[#allocation9 + $0x19e0] sm:$0xff]  ;;  %v1534_v45 = vld [vmem:[#allocation9 + $0x19b0] sm:$0xff] }
 0x4b1   : > { %6220 = vmatpush1.bf16.msra.mxu0 %v6219_v61  ;;  %5838 = vmatprep.subr.bf16.mxu1 %v5837_v62  ;;  %v6235_v61 = vpack.c.bf16 %v1478_v22, %v1470_v47  ;;  %v5853_v62 = vpack.c.bf16 %v1493_v53, %v1485_v51  ;;  %v1557_v22 = vld [vmem:[#allocation9 + $0x1a68] sm:$0xff]  ;;  %v1551_v51 = vld [vmem:[#allocation9 + $0x1a38] sm:$0xff] }
 0x4b2   : > { %6222 = vmatprep.subr.bf16.mxu0 %v6221_v4  ;;  %v1486_v4 = vld [vmem:[#allocation9 + $0x1830] sm:$0xff]  ;;  %v1559_v53 = vld [vmem:[#allocation9 + $0x1a78] sm:$0xff] }
 0x4b3   : > { %v6253_v2 = vpack.c.bf16 %v1559_v53, %v1551_v51  ;;  %v1613_v51 = vld [vmem:[#allocation9 + $0x1c28] sm:$0xff] }
 0x4b4   : > { %5840 = vmatpush1.bf16.msra.mxu1 %v5839_v15  ;;  %v1511_v15 = vld [vmem:[#allocation9 + $0x18f8] sm:$0xff]  ;;  %v1621_v53 = vld [vmem:[#allocation9 + $0x1c68] sm:$0xff] }
 0x4b5   : > { %6224 = vmatpush1.bf16.msra.mxu0 %v6223_v59  ;;  %5842 = vmatprep.subr.bf16.mxu1 %v5841_v16  ;;  %v6239_v59 = vpack.c.bf16 %v1494_v5, %v1486_v4  ;;  %v1500_v16 = vld [vmem:[#allocation9 + $0x18a0] sm:$0xff]  ;;  %v6241_v25 = vpack.c.bf16 %v1511_v15, %v1503_v14  ;;  %v1565_v4 = vld [vmem:[#allocation9 + $0x1aa8] sm:$0xff] }
 0x4b6   : > { %6226 = vmatprep.subr.bf16.mxu0 %v6225_v23  ;;  %v1510_v23 = vld [vmem:[#allocation9 + $0x18f0] sm:$0xff]  ;;  %v1573_v5 = vld [vmem:[#allocation9 + $0x1ae8] sm:$0xff] }
 0x4b7   : > { %v5873_v15 = vpack.c.bf16 %v1573_v5, %v1565_v4  ;;  %v1622_v5 = vld [vmem:[#allocation9 + $0x1c70] sm:$0xff] }
 0x4b8   : > { %5844 = vmatpush1.bf16.msra.mxu1 %v5843_v29  ;;  %v5859_v29 = vpack.c.bf16 %v1508_v19, %v1500_v16  ;;  %v1572_v16 = vld [vmem:[#allocation9 + $0x1ae0] sm:$0xff]  ;;  %v1566_v19 = vld [vmem:[#allocation9 + $0x1ab0] sm:$0xff] }
 0x4b9   : > { %6228 = vmatpush1.bf16.msra.mxu0 %v6227_v30  ;;  %5846 = vmatprep.subr.bf16.mxu1 %v5845_v46  ;;  %v6243_v30 = vpack.c.bf16 %v1510_v23, %v1502_v20  ;;  %v5861_v46 = vpack.c.bf16 %v1525_v24, %v1517_v49  ;;  %v6257_v20 = vpack.c.bf16 %v1575_v10, %v1567_v8  ;;  %v1581_v23 = vld [vmem:[#allocation9 + $0x1b28] sm:$0xff]  ;;  %v1583_v24 = vld [vmem:[#allocation9 + $0x1b38] sm:$0xff] }
 0x4ba   : > { %6230 = vmatprep.subr.bf16.mxu0 %v6229_v33  ;;  %v6245_v33 = vpack.c.bf16 %v1527_v27, %v1519_v26  ;;  %v1589_v49 = vld [vmem:[#allocation9 + $0x1b68] sm:$0xff] }
 0x4bb   : > { %v1629_v8 = vld [vmem:[#allocation9 + $0x1ca8] sm:$0xff] }
 0x4bc   : > { %5848 = vmatpush1.bf16.msra.mxu1 %v5847_v0  ;;  %v6247_v0 = vpack.c.bf16 %v1526_v34, %v1518_v32  ;;  %v1597_v34 = vld [vmem:[#allocation9 + $0x1ba8] sm:$0xff] }
 0x4bd   : > { %6232 = vmatpush1.bf16.msra.mxu0 %v6231_v38  ;;  %5850 = vmatprep.subr.bf16.mxu1 %v5849_v39  ;;  %v5865_v38 = vpack.c.bf16 %v1541_v36, %v1533_v35  ;;  %v1532_v39 = vld [vmem:[#allocation9 + $0x19a0] sm:$0xff]  ;;  %v1605_v35 = vld [vmem:[#allocation9 + $0x1be8] sm:$0xff] }
 0x4be   : > { %6234 = vmatprep.subr.bf16.mxu0 %v6233_v48  ;;  %v1549_v48 = vld [vmem:[#allocation9 + $0x1a28] sm:$0xff]  ;;  %v5867_v54 = vpack.c.bf16 %v1540_v44, %v1532_v39  ;;  %v5881_v44 = vpack.c.bf16 %v1605_v35, %v1597_v34  ;;  %v1654_v35 = vld [vmem:[#allocation9 + $0x1d70] sm:$0xff] }
 0x4bf   : > { %v1637_v10 = vld [vmem:[#allocation9 + $0x1ce8] sm:$0xff] }
 0x4c0   : > { %5852 = vmatpush1.bf16.msra.mxu1 %v5851_v57  ;;  %v5869_v57 = vpack.c.bf16 %v1557_v22, %v1549_v48  ;;  %v1606_v22 = vld [vmem:[#allocation9 + $0x1bf0] sm:$0xff] }
 0x4c1   : > { %6236 = vmatpush1.bf16.msra.mxu0 %v6235_v61  ;;  %5854 = vmatprep.subr.bf16.mxu1 %v5853_v62  ;;  %v1548_v61 = vld [vmem:[#allocation9 + $0x1a20] sm:$0xff] }
 0x4c2   : > { %6238 = vmatprep.subr.bf16.mxu0 %v6237_v3  ;;  %v1556_v62 = vld [vmem:[#allocation9 + $0x1a60] sm:$0xff]  ;;  %v1558_v3 = vld [vmem:[#allocation9 + $0x1a70] sm:$0xff] }
 0x4c3   : > { %3411 = vmatmul.mubr.f32.vlgmr.msra.gmra.mrb[4].mxu1 %v7426_v60  ;;  %v6255_v14 = vpack.c.bf16 %v1558_v3, %v1550_v1  ;;  %v1612_v1 = vld [vmem:[#allocation9 + $0x1c20] sm:$0xff]  ;;  %v1614_v3 = vld [vmem:[#allocation9 + $0x1c30] sm:$0xff] }
 0x4c4   : > { %3837 = vmatmul.mubr.f32.vlgmr.msra.gmra.mrb[6].mxu0 %v7426_v60  ;;  %5856 = vmatpush1.bf16.msra.mxu1 %v5855_v11  ;;  %v1543_v60 = vld [vmem:[#allocation9 + $0x19f8] sm:$0xff]  ;;  %v5871_v11 = vpack.c.bf16 %v1556_v62, %v1548_v61  ;;  %v5885_v62 = vpack.c.bf16 %v1621_v53, %v1613_v51  ;;  %v1670_v53 = vld [vmem:[#allocation9 + $0x1df0] sm:$0xff] }
 0x4c5   : > { %3481 = vmatprep.mubr.f32.mxu1 %v7432_v6  ;;  %6240 = vmatpush1.bf16.msra.mxu0 %v6239_v59  ;;  %v6249_v47 = vpack.c.bf16 %v1543_v60, %v1535_v37  ;;  %v1564_v59 = vld [vmem:[#allocation9 + $0x1aa0] sm:$0xff]  ;;  %v1599_v60 = vld [vmem:[#allocation9 + $0x1bb8] sm:$0xff] }
 0x4c6   : > { %3907 = vmatprep.mubr.f32.mxu0 %v7432_v6  ;;  %5858 = vmatprep.subr.bf16.mxu1 %v5857_v21  ;;  %v1542_v6 = vld [vmem:[#allocation9 + $0x19f0] sm:$0xff]  ;;  %v5875_v26 = vpack.c.bf16 %v1572_v16, %v1564_v59  ;;  %v6271_v59 = vpack.c.bf16 %v1622_v5, %v1614_v3  ;;  %v5889_v16 = vpack.c.bf16 %v1637_v10, %v1629_v8  ;;  %v1676_v3 = vld [vmem:[#allocation9 + $0x1e20] sm:$0xff] }
 0x4c7   : > { %6242 = vmatprep.subr.bf16.mxu0 %v6241_v25  ;;  %v6251_v56 = vpack.c.bf16 %v1542_v6, %v1534_v45  ;;  %v1574_v21 = vld [vmem:[#allocation9 + $0x1af0] sm:$0xff]  ;;  %v1591_v25 = vld [vmem:[#allocation9 + $0x1b78] sm:$0xff]  ;;  %v1596_v45 = vld [vmem:[#allocation9 + $0x1ba0] sm:$0xff] }
 0x4c8   : > { %5860 = vmatpush1.bf16.msra.mxu1 %v5859_v29  ;;  %v6259_v27 = vpack.c.bf16 %v1574_v21, %v1566_v19  ;;  %v5877_v29 = vpack.c.bf16 %v1589_v49, %v1581_v23  ;;  %v6261_v32 = vpack.c.bf16 %v1591_v25, %v1583_v24  ;;  %v1598_v6 = vld [vmem:[#allocation9 + $0x1bb0] sm:$0xff]  ;;  %v1628_v19 = vld [vmem:[#allocation9 + $0x1ca0] sm:$0xff]  ;;  %v1645_v24 = vld [vmem:[#allocation9 + $0x1d28] sm:$0xff] }
 0x4c9   : > { %6244 = vmatpush1.bf16.msra.mxu0 %v6243_v30  ;;  %5862 = vmatprep.subr.bf16.mxu1 %v5861_v46  ;;  %v1580_v30 = vld [vmem:[#allocation9 + $0x1b20] sm:$0xff]  ;;  %v6267_v61 = vpack.c.bf16 %v1606_v22, %v1598_v6  ;;  %v1630_v21 = vld [vmem:[#allocation9 + $0x1cb0] sm:$0xff]  ;;  %v1653_v25 = vld [vmem:[#allocation9 + $0x1d68] sm:$0xff] }
 0x4ca   : > { %6246 = vmatprep.subr.bf16.mxu0 %v6245_v33  ;;  %v1588_v46 = vld [vmem:[#allocation9 + $0x1b60] sm:$0xff]  ;;  %v1590_v33 = vld [vmem:[#allocation9 + $0x1b70] sm:$0xff] }
 0x4cb   : > { %v6263_v39 = vpack.c.bf16 %v1590_v33, %v1582_v50  ;;  %v1638_v49 = vld [vmem:[#allocation9 + $0x1cf0] sm:$0xff]  ;;  %v1644_v50 = vld [vmem:[#allocation9 + $0x1d20] sm:$0xff] }
 0x4cc   : > { %5864 = vmatpush1.bf16.msra.mxu1 %v5863_v17  ;;  %v1607_v17 = vld [vmem:[#allocation9 + $0x1bf8] sm:$0xff]  ;;  %v1646_v33 = vld [vmem:[#allocation9 + $0x1d30] sm:$0xff]  ;;  %v1660_v6 = vld [vmem:[#allocation9 + $0x1da0] sm:$0xff] }
 0x4cd   : > { %6248 = vmatpush1.bf16.msra.mxu0 %v6247_v0  ;;  %5866 = vmatprep.subr.bf16.mxu1 %v5865_v38  ;;  %v5879_v38 = vpack.c.bf16 %v1588_v46, %v1580_v30  ;;  %v6265_v48 = vpack.c.bf16 %v1607_v17, %v1599_v60  ;;  %v6275_v30 = vpack.c.bf16 %v1638_v49, %v1630_v21  ;;  %v1661_v60 = vld [vmem:[#allocation9 + $0x1da8] sm:$0xff]  ;;  %v1662_v22 = vld [vmem:[#allocation9 + $0x1db0] sm:$0xff]  ;;  %v1692_v21 = vld [vmem:[#allocation9 + $0x1ea0] sm:$0xff] }
 0x4ce   : > { %6250 = vmatprep.subr.bf16.mxu0 %v6249_v47  ;;  %v1604_v47 = vld [vmem:[#allocation9 + $0x1be0] sm:$0xff]  ;;  %v5893_v46 = vpack.c.bf16 %v1653_v25, %v1645_v24  ;;  %v1669_v17 = vld [vmem:[#allocation9 + $0x1de8] sm:$0xff]  ;;  %v1678_v5 = vld [vmem:[#allocation9 + $0x1e30] sm:$0xff] }
 0x4cf   : > { %v1686_v10 = vld [vmem:[#allocation9 + $0x1e70] sm:$0xff] }
 0x4d0   : > { %5868 = vmatpush1.bf16.msra.mxu1 %v5867_v54  ;;  %v1615_v54 = vld [vmem:[#allocation9 + $0x1c38] sm:$0xff]  ;;  %v1694_v49 = vld [vmem:[#allocation9 + $0x1eb0] sm:$0xff] }
 0x4d1   : > { %6252 = vmatpush1.bf16.msra.mxu0 %v6251_v56  ;;  %5870 = vmatprep.subr.bf16.mxu1 %v5869_v57  ;;  %v1623_v56 = vld [vmem:[#allocation9 + $0x1c78] sm:$0xff]  ;;  %v5883_v57 = vpack.c.bf16 %v1604_v47, %v1596_v45  ;;  %v6279_v45 = vpack.c.bf16 %v1654_v35, %v1646_v33  ;;  %v5897_v47 = vpack.c.bf16 %v1669_v17, %v1661_v60  ;;  %v1702_v25 = vld [vmem:[#allocation9 + $0x1ef0] sm:$0xff]  ;;  %v1708_v33 = vld [vmem:[#allocation9 + $0x1f20] sm:$0xff] }
 0x4d2   : > { %6254 = vmatprep.subr.bf16.mxu0 %v6253_v2  ;;  %v1620_v2 = vld [vmem:[#allocation9 + $0x1c60] sm:$0xff]  ;;  %v6269_v4 = vpack.c.bf16 %v1623_v56, %v1615_v54  ;;  %v1677_v54 = vld [vmem:[#allocation9 + $0x1e28] sm:$0xff]  ;;  %v1710_v35 = vld [vmem:[#allocation9 + $0x1f30] sm:$0xff] }
 0x4d3   : > { %v1685_v56 = vld [vmem:[#allocation9 + $0x1e68] sm:$0xff]  ;;  %v1718_v17 = vld [vmem:[#allocation9 + $0x1f70] sm:$0xff] }
 0x4d4   : > { %5872 = vmatpush1.bf16.msra.mxu1 %v5871_v11  ;;  %v1631_v11 = vld [vmem:[#allocation9 + $0x1cb8] sm:$0xff] }
 0x4d5   : > { %6256 = vmatpush1.bf16.msra.mxu0 %v6255_v14  ;;  %5874 = vmatprep.subr.bf16.mxu1 %v5873_v15  ;;  %v1639_v14 = vld [vmem:[#allocation9 + $0x1cf8] sm:$0xff]  ;;  %v5887_v15 = vpack.c.bf16 %v1620_v2, %v1612_v1  ;;  %v6283_v1 = vpack.c.bf16 %v1670_v53, %v1662_v22  ;;  %v5901_v2 = vpack.c.bf16 %v1685_v56, %v1677_v54  ;;  %v1724_v22 = vld [vmem:[#allocation9 + $0x1fa0] sm:$0xff]  ;;  %v1726_v53 = vld [vmem:[#allocation9 + $0x1fb0] sm:$0xff] }
 0x4d6   : > { %v7484_v31 = vpop.f32.mrb[2].mxu1  ;;  %6258 = vmatprep.subr.bf16.mxu0 %v6257_v20  ;;  %v1636_v20 = vld [vmem:[#allocation9 + $0x1ce0] sm:$0xff]  ;;  %v6273_v23 = vpack.c.bf16 %v1639_v14, %v1631_v11  ;;  %v1693_v11 = vld [vmem:[#allocation9 + $0x1ea8] sm:$0xff]  ;;  %v1734_v56 = vld [vmem:[#allocation9 + $0x1ff0] sm:$0xff] }
 0x4d7   : > { %v7486_v36 = vpop.f32.mrb[4].mxu0  ;;  %v7488_v37 = vpop.f32.mrb[3].mxu1  ;;  %v1701_v14 = vld [vmem:[#allocation9 + $0x1ee8] sm:$0xff] }
 0x4d8   : > { %v7490_v0 = vpop.f32.mrb[5].mxu0  ;;  %5876 = vmatpush1.bf16.msra.mxu1 %v5875_v26  ;;  %v1647_v26 = vld [vmem:[#allocation9 + $0x1d38] sm:$0xff] }
 0x4d9   : > { %6260 = vmatpush1.bf16.msra.mxu0 %v6259_v27  ;;  %5878 = vmatprep.subr.bf16.mxu1 %v5877_v29  ;;  %v1655_v27 = vld [vmem:[#allocation9 + $0x1d78] sm:$0xff]  ;;  %v5891_v29 = vpack.c.bf16 %v1636_v20, %v1628_v19  ;;  %v6287_v19 = vpack.c.bf16 %v1686_v10, %v1678_v5  ;;  %v5905_v20 = vpack.c.bf16 %v1701_v14, %v1693_v11  ;;  %v1740_v5 = vld [vmem:[#allocation9 + $0x2020] sm:$0xff]  ;;  %v1742_v11 = vld [vmem:[#allocation9 + $0x2030] sm:$0xff] }
 0x4da   : > { %6262 = vmatprep.subr.bf16.mxu0 %v6261_v32  ;;  %v1652_v32 = vld [vmem:[#allocation9 + $0x1d60] sm:$0xff]  ;;  %v6277_v34 = vpack.c.bf16 %v1655_v27, %v1647_v26  ;;  %v1709_v26 = vld [vmem:[#allocation9 + $0x1f28] sm:$0xff]  ;;  %v1750_v14 = vld [vmem:[#allocation9 + $0x2070] sm:$0xff] }
 0x4db   : > { %v1717_v27 = vld [vmem:[#allocation9 + $0x1f68] sm:$0xff] }
 0x4dc   : > { %5880 = vmatpush1.bf16.msra.mxu1 %v5879_v38  ;;  %v1663_v38 = vld [vmem:[#allocation9 + $0x1db8] sm:$0xff] }
 0x4dd   : > { %6264 = vmatpush1.bf16.msra.mxu0 %v6263_v39  ;;  %5882 = vmatprep.subr.bf16.mxu1 %v5881_v44  ;;  %v1671_v39 = vld [vmem:[#allocation9 + $0x1df8] sm:$0xff]  ;;  %v5895_v44 = vpack.c.bf16 %v1652_v32, %v1644_v50  ;;  %v6291_v50 = vpack.c.bf16 %v1702_v25, %v1694_v49  ;;  %v5909_v32 = vpack.c.bf16 %v1717_v27, %v1709_v26  ;;  %v1764_v49 = vld [vmem:[#allocation9 + $0x20e0] sm:$0xff]  ;;  %v1766_v26 = vld [vmem:[#allocation9 + $0x20f0] sm:$0xff] }
 0x4de   : > { %6266 = vmatprep.subr.bf16.mxu0 %v6265_v48  ;;  %v1668_v48 = vld [vmem:[#allocation9 + $0x1de0] sm:$0xff]  ;;  %v6281_v51 = vpack.c.bf16 %v1671_v39, %v1663_v38  ;;  %v1725_v38 = vld [vmem:[#allocation9 + $0x1fa8] sm:$0xff] }
 0x4df   : > { %v1733_v39 = vld [vmem:[#allocation9 + $0x1fe8] sm:$0xff] }
 0x4e0   : > { %5884 = vmatpush1.bf16.msra.mxu1 %v5883_v57  ;;  %v1679_v57 = vld [vmem:[#allocation9 + $0x1e38] sm:$0xff]  ;;  %v1773_v27 = vld [vmem:[#allocation9 + $0x2128] sm:$0xff] }
 0x4e1   : > { %6268 = vmatpush1.bf16.msra.mxu0 %v6267_v61  ;;  %5886 = vmatprep.subr.bf16.mxu1 %v5885_v62  ;;  %v1687_v61 = vld [vmem:[#allocation9 + $0x1e78] sm:$0xff]  ;;  %v5899_v62 = vpack.c.bf16 %v1668_v48, %v1660_v6  ;;  %v6295_v6 = vpack.c.bf16 %v1718_v17, %v1710_v35  ;;  %v5913_v48 = vpack.c.bf16 %v1733_v39, %v1725_v38  ;;  %v1772_v35 = vld [vmem:[#allocation9 + $0x2120] sm:$0xff]  ;;  %v1774_v17 = vld [vmem:[#allocation9 + $0x2130] sm:$0xff] }
 0x4e2   : > { %6270 = vmatprep.subr.bf16.mxu0 %v6269_v4  ;;  %v1684_v4 = vld [vmem:[#allocation9 + $0x1e60] sm:$0xff]  ;;  %v6285_v8 = vpack.c.bf16 %v1687_v61, %v1679_v57  ;;  %v1741_v57 = vld [vmem:[#allocation9 + $0x2028] sm:$0xff]  ;;  %v1782_v39 = vld [vmem:[#allocation9 + $0x2170] sm:$0xff] }
 0x4e3   : > { %v1749_v61 = vld [vmem:[#allocation9 + $0x2068] sm:$0xff] }
 0x4e4   : > { %5888 = vmatpush1.bf16.msra.mxu1 %v5887_v15  ;;  %v1695_v15 = vld [vmem:[#allocation9 + $0x1eb8] sm:$0xff] }
 0x4e5   : > { %6272 = vmatpush1.bf16.msra.mxu0 %v6271_v59  ;;  %5890 = vmatprep.subr.bf16.mxu1 %v5889_v16  ;;  %v1703_v59 = vld [vmem:[#allocation9 + $0x1ef8] sm:$0xff]  ;;  %v5903_v16 = vpack.c.bf16 %v1684_v4, %v1676_v3  ;;  %v6299_v3 = vpack.c.bf16 %v1734_v56, %v1726_v53  ;;  %v5917_v4 = vpack.c.bf16 %v1749_v61, %v1741_v57  ;;  %v1796_v53 = vld [vmem:[#allocation9 + $0x21e0] sm:$0xff]  ;;  %v1805_v57 = vld [vmem:[#allocation9 + $0x2228] sm:$0xff] }
 0x4e6   : > { %6274 = vmatprep.subr.bf16.mxu0 %v6273_v23  ;;  %v1700_v23 = vld [vmem:[#allocation9 + $0x1ee0] sm:$0xff]  ;;  %v6289_v24 = vpack.c.bf16 %v1703_v59, %v1695_v15  ;;  %v1757_v15 = vld [vmem:[#allocation9 + $0x20a8] sm:$0xff] }
 0x4e7   : > { %v1765_v59 = vld [vmem:[#allocation9 + $0x20e8] sm:$0xff] }
 0x4e8   : > { %5892 = vmatpush1.bf16.msra.mxu1 %v5891_v29  ;;  %v1711_v29 = vld [vmem:[#allocation9 + $0x1f38] sm:$0xff]  ;;  %v5921_v25 = vpack.c.bf16 %v1765_v59, %v1757_v15  ;;  %v1813_v61 = vld [vmem:[#allocation9 + $0x2268] sm:$0xff] }
 0x4e9   : > { %6276 = vmatpush1.bf16.msra.mxu0 %v6275_v30  ;;  %5894 = vmatprep.subr.bf16.mxu1 %v5893_v46  ;;  %v1719_v30 = vld [vmem:[#allocation9 + $0x1f78] sm:$0xff]  ;;  %v5907_v46 = vpack.c.bf16 %v1700_v23, %v1692_v21  ;;  %v6303_v21 = vpack.c.bf16 %v1750_v14, %v1742_v11  ;;  %v1756_v23 = vld [vmem:[#allocation9 + $0x20a0] sm:$0xff]  ;;  %v1814_v14 = vld [vmem:[#allocation9 + $0x2270] sm:$0xff] }
 0x4ea   : > { %6278 = vmatprep.subr.bf16.mxu0 %v6277_v34  ;;  %v1716_v34 = vld [vmem:[#allocation9 + $0x1f60] sm:$0xff]  ;;  %v6293_v60 = vpack.c.bf16 %v1719_v30, %v1711_v29  ;;  %v1781_v29 = vld [vmem:[#allocation9 + $0x2168] sm:$0xff] }
 0x4eb   : > { %v1821_v15 = vld [vmem:[#allocation9 + $0x22a8] sm:$0xff] }
 0x4ec   : > { %5896 = vmatpush1.bf16.msra.mxu1 %v5895_v44  ;;  %v1727_v44 = vld [vmem:[#allocation9 + $0x1fb8] sm:$0xff]  ;;  %v1829_v59 = vld [vmem:[#allocation9 + $0x22e8] sm:$0xff] }
 0x4ed   : > { %6280 = vmatpush1.bf16.msra.mxu0 %v6279_v45  ;;  %5898 = vmatprep.subr.bf16.mxu1 %v5897_v47  ;;  %v1735_v45 = vld [vmem:[#allocation9 + $0x1ff8] sm:$0xff]  ;;  %v5911_v47 = vpack.c.bf16 %v1716_v34, %v1708_v33  ;;  %v5925_v34 = vpack.c.bf16 %v1781_v29, %v1773_v27  ;;  %v1830_v27 = vld [vmem:[#allocation9 + $0x22f0] sm:$0xff]  ;;  %v1837_v29 = vld [vmem:[#allocation9 + $0x2328] sm:$0xff] }
 0x4ee   : > { %6282 = vmatprep.subr.bf16.mxu0 %v6281_v51  ;;  %v1732_v51 = vld [vmem:[#allocation9 + $0x1fe0] sm:$0xff]  ;;  %v6297_v54 = vpack.c.bf16 %v1735_v45, %v1727_v44  ;;  %v1789_v44 = vld [vmem:[#allocation9 + $0x21a8] sm:$0xff] }
 0x4ef   : > { %v1797_v45 = vld [vmem:[#allocation9 + $0x21e8] sm:$0xff] }
 0x4f0   : > { %5900 = vmatpush1.bf16.msra.mxu1 %v5899_v62  ;;  %v1743_v62 = vld [vmem:[#allocation9 + $0x2038] sm:$0xff] }
 0x4f1   : > { %6284 = vmatpush1.bf16.msra.mxu0 %v6283_v1  ;;  %5902 = vmatprep.subr.bf16.mxu1 %v5901_v2  ;;  %v1751_v1 = vld [vmem:[#allocation9 + $0x2078] sm:$0xff]  ;;  %v5915_v2 = vpack.c.bf16 %v1732_v51, %v1724_v22  ;;  %v5929_v22 = vpack.c.bf16 %v1797_v45, %v1789_v44  ;;  %v1788_v51 = vld [vmem:[#allocation9 + $0x21a0] sm:$0xff]  ;;  %v1853_v44 = vld [vmem:[#allocation9 + $0x23a8] sm:$0xff] }
 0x4f2   : > { %6286 = vmatprep.subr.bf16.mxu0 %v6285_v8  ;;  %v1748_v8 = vld [vmem:[#allocation9 + $0x2060] sm:$0xff]  ;;  %v6301_v10 = vpack.c.bf16 %v1751_v1, %v1743_v62  ;;  %v1807_v62 = vld [vmem:[#allocation9 + $0x2238] sm:$0xff]  ;;  %v1861_v45 = vld [vmem:[#allocation9 + $0x23e8] sm:$0xff] }
 0x4f3   : > { %v1815_v1 = vld [vmem:[#allocation9 + $0x2278] sm:$0xff] }
 0x4f4   : > { %5904 = vmatpush1.bf16.msra.mxu1 %v5903_v16  ;;  %v5919_v16 = vpack.c.bf16 %v1748_v8, %v1740_v5  ;;  %v1804_v5 = vld [vmem:[#allocation9 + $0x2220] sm:$0xff]  ;;  %v6317_v11 = vpack.c.bf16 %v1815_v1, %v1807_v62  ;;  %v1871_v62 = vld [vmem:[#allocation9 + $0x2438] sm:$0xff] }
 0x4f5   : > { %6288 = vmatpush1.bf16.msra.mxu0 %v6287_v19  ;;  %5906 = vmatprep.subr.bf16.mxu1 %v5905_v20  ;;  %v1759_v19 = vld [vmem:[#allocation9 + $0x20b8] sm:$0xff]  ;;  %v1812_v8 = vld [vmem:[#allocation9 + $0x2260] sm:$0xff] }
 0x4f6   : > { %6290 = vmatprep.subr.bf16.mxu0 %v6289_v24  ;;  %v1767_v20 = vld [vmem:[#allocation9 + $0x20f8] sm:$0xff]  ;;  %v1758_v24 = vld [vmem:[#allocation9 + $0x20b0] sm:$0xff] }
 0x4f7   : > { %v6305_v30 = vpack.c.bf16 %v1767_v20, %v1759_v19  ;;  %v6307_v33 = vpack.c.bf16 %v1766_v26, %v1758_v24  ;;  %v1831_v19 = vld [vmem:[#allocation9 + $0x22f8] sm:$0xff]  ;;  %v5935_v20 = vpack.c.bf16 %v1812_v8, %v1804_v5  ;;  %v1828_v24 = vld [vmem:[#allocation9 + $0x22e0] sm:$0xff] }
 0x4f8   : > { %5908 = vmatpush1.bf16.msra.mxu1 %v5907_v46  ;;  %v1775_v46 = vld [vmem:[#allocation9 + $0x2138] sm:$0xff]  ;;  %v1868_v5 = vld [vmem:[#allocation9 + $0x2420] sm:$0xff] }
 0x4f9   : > { %6292 = vmatpush1.bf16.msra.mxu0 %v6291_v50  ;;  %5910 = vmatprep.subr.bf16.mxu1 %v5909_v32  ;;  %v1783_v50 = vld [vmem:[#allocation9 + $0x2178] sm:$0xff]  ;;  %v5923_v32 = vpack.c.bf16 %v1764_v49, %v1756_v23  ;;  %v5937_v23 = vpack.c.bf16 %v1829_v59, %v1821_v15  ;;  %v1820_v49 = vld [vmem:[#allocation9 + $0x22a0] sm:$0xff]  ;;  %v1885_v15 = vld [vmem:[#allocation9 + $0x24a8] sm:$0xff] }
 0x4fa   : > { %6294 = vmatprep.subr.bf16.mxu0 %v6293_v60  ;;  %v1780_v60 = vld [vmem:[#allocation9 + $0x2160] sm:$0xff]  ;;  %v6309_v38 = vpack.c.bf16 %v1783_v50, %v1775_v46  ;;  %v1839_v46 = vld [vmem:[#allocation9 + $0x2338] sm:$0xff]  ;;  %v1893_v59 = vld [vmem:[#allocation9 + $0x24e8] sm:$0xff] }
 0x4fb   : > { %v1847_v50 = vld [vmem:[#allocation9 + $0x2378] sm:$0xff]  ;;  %v1876_v8 = vld [vmem:[#allocation9 + $0x2460] sm:$0xff] }
 0x4fc   : > { %5912 = vmatpush1.bf16.msra.mxu1 %v5911_v47  ;;  %v1791_v47 = vld [vmem:[#allocation9 + $0x21b8] sm:$0xff] }
 0x4fd   : > { %6296 = vmatpush1.bf16.msra.mxu0 %v6295_v6  ;;  %5914 = vmatprep.subr.bf16.mxu1 %v5913_v48  ;;  %v5927_v6 = vpack.c.bf16 %v1780_v60, %v1772_v35  ;;  %v6311_v48 = vpack.c.bf16 %v1782_v39, %v1774_v17  ;;  %v1836_v35 = vld [vmem:[#allocation9 + $0x2320] sm:$0xff]  ;;  %v1838_v17 = vld [vmem:[#allocation9 + $0x2330] sm:$0xff]  ;;  %v1879_v1 = vld [vmem:[#allocation9 + $0x2478] sm:$0xff] }
 0x4fe   : > { %6298 = vmatprep.subr.bf16.mxu0 %v6297_v54  ;;  %v1790_v54 = vld [vmem:[#allocation9 + $0x21b0] sm:$0xff]  ;;  %v1844_v60 = vld [vmem:[#allocation9 + $0x2360] sm:$0xff] }
 0x4ff   : > { %v1846_v39 = vld [vmem:[#allocation9 + $0x2370] sm:$0xff] }
 0x500   : > { %5916 = vmatpush1.bf16.msra.mxu1 %v5915_v2  ;;  %v5931_v2 = vpack.c.bf16 %v1796_v53, %v1788_v51  ;;  %v1852_v51 = vld [vmem:[#allocation9 + $0x23a0] sm:$0xff] }
 0x501   : > { %6300 = vmatpush1.bf16.msra.mxu0 %v6299_v3  ;;  %5918 = vmatprep.subr.bf16.mxu1 %v5917_v4  ;;  %v5933_v4 = vpack.c.bf16 %v1813_v61, %v1805_v57  ;;  %v1860_v53 = vld [vmem:[#allocation9 + $0x23e0] sm:$0xff]  ;;  %v1869_v57 = vld [vmem:[#allocation9 + $0x2428] sm:$0xff] }
 0x502   : > { %6302 = vmatprep.subr.bf16.mxu0 %v6301_v10  ;;  %v1806_v10 = vld [vmem:[#allocation9 + $0x2230] sm:$0xff]  ;;  %v1877_v61 = vld [vmem:[#allocation9 + $0x2468] sm:$0xff] }
 0x503   : > { %3482 = vmatmul.mubr.f32.vlgmr.msra.gmra.mrb[4].mxu1 %v7443_v63 }
 0x504   : > { %3908 = vmatmul.mubr.f32.vlgmr.msra.gmra.mrb[6].mxu0 %v7443_v63  ;;  %5920 = vmatpush1.bf16.msra.mxu1 %v5919_v16  ;;  %v1799_v63 = vld [vmem:[#allocation9 + $0x21f8] sm:$0xff] }
 0x505   : > { %3552 = vmatprep.mubr.f32.mxu1 %v7448_v13  ;;  %6304 = vmatpush1.bf16.msra.mxu0 %v6303_v21  ;;  %v6313_v56 = vpack.c.bf16 %v1799_v63, %v1791_v47  ;;  %v1823_v16 = vld [vmem:[#allocation9 + $0x22b8] sm:$0xff]  ;;  %v6319_v21 = vpack.c.bf16 %v1814_v14, %v1806_v10  ;;  %v1870_v10 = vld [vmem:[#allocation9 + $0x2430] sm:$0xff] }
 0x506   : > { %3978 = vmatprep.mubr.f32.mxu0 %v7448_v13  ;;  %5922 = vmatprep.subr.bf16.mxu1 %v5921_v25  ;;  %v1798_v13 = vld [vmem:[#allocation9 + $0x21f0] sm:$0xff]  ;;  %v6321_v26 = vpack.c.bf16 %v1831_v19, %v1823_v16  ;;  %v1855_v47 = vld [vmem:[#allocation9 + $0x23b8] sm:$0xff] }
 0x507   : > { %6306 = vmatprep.subr.bf16.mxu0 %v6305_v30  ;;  %v6315_v3 = vpack.c.bf16 %v1798_v13, %v1790_v54  ;;  %v1822_v25 = vld [vmem:[#allocation9 + $0x22b0] sm:$0xff]  ;;  %v1845_v30 = vld [vmem:[#allocation9 + $0x2368] sm:$0xff]  ;;  %v1863_v63 = vld [vmem:[#allocation9 + $0x23f8] sm:$0xff] }
 0x508   : > { %5924 = vmatpush1.bf16.msra.mxu1 %v5923_v32  ;;  %v5939_v32 = vpack.c.bf16 %v1828_v24, %v1820_v49  ;;  %v1854_v54 = vld [vmem:[#allocation9 + $0x23b0] sm:$0xff]  ;;  %v1887_v16 = vld [vmem:[#allocation9 + $0x24b8] sm:$0xff]  ;;  %v1884_v49 = vld [vmem:[#allocation9 + $0x24a0] sm:$0xff] }
 0x509   : > { %6308 = vmatpush1.bf16.msra.mxu0 %v6307_v33  ;;  %5926 = vmatprep.subr.bf16.mxu1 %v5925_v34  ;;  %v6323_v33 = vpack.c.bf16 %v1830_v27, %v1822_v25  ;;  %v5941_v34 = vpack.c.bf16 %v1845_v30, %v1837_v29  ;;  %v1862_v13 = vld [vmem:[#allocation9 + $0x23f0] sm:$0xff]  ;;  %v1895_v19 = vld [vmem:[#allocation9 + $0x24f8] sm:$0xff]  ;;  %v1892_v24 = vld [vmem:[#allocation9 + $0x24e0] sm:$0xff] }
 0x50a   : > { %6310 = vmatprep.subr.bf16.mxu0 %v6309_v38  ;;  %v6325_v38 = vpack.c.bf16 %v1847_v50, %v1839_v46  ;;  %v1878_v14 = vld [vmem:[#allocation9 + $0x2470] sm:$0xff]  ;;  %v1901_v29 = vld [vmem:[#allocation9 + $0x2528] sm:$0xff]  ;;  %v1903_v46 = vld [vmem:[#allocation9 + $0x2538] sm:$0xff] }
 0x50b   : > { %v1886_v25 = vld [vmem:[#allocation9 + $0x24b0] sm:$0xff]  ;;  %v1909_v30 = vld [vmem:[#allocation9 + $0x2568] sm:$0xff]  ;;  %v1911_v50 = vld [vmem:[#allocation9 + $0x2578] sm:$0xff] }
 0x50c   : > { %5928 = vmatpush1.bf16.msra.mxu1 %v5927_v6  ;;  %v5943_v6 = vpack.c.bf16 %v1844_v60, %v1836_v35  ;;  %v1894_v27 = vld [vmem:[#allocation9 + $0x24f0] sm:$0xff]  ;;  %v1900_v35 = vld [vmem:[#allocation9 + $0x2520] sm:$0xff] }
 0x50d   : > { %6312 = vmatpush1.bf16.msra.mxu0 %v6311_v48  ;;  %5930 = vmatprep.subr.bf16.mxu1 %v5929_v22  ;;  %v6327_v48 = vpack.c.bf16 %v1846_v39, %v1838_v17  ;;  %v5945_v22 = vpack.c.bf16 %v1861_v45, %v1853_v44  ;;  %v1908_v60 = vld [vmem:[#allocation9 + $0x2560] sm:$0xff]  ;;  %v1902_v17 = vld [vmem:[#allocation9 + $0x2530] sm:$0xff]  ;;  %v1917_v44 = vld [vmem:[#allocation9 + $0x25a8] sm:$0xff] }
 0x50e   : > { %6314 = vmatprep.subr.bf16.mxu0 %v6313_v56  ;;  %v6329_v56 = vpack.c.bf16 %v1863_v63, %v1855_v47  ;;  %v1910_v39 = vld [vmem:[#allocation9 + $0x2570] sm:$0xff]  ;;  %v1925_v45 = vld [vmem:[#allocation9 + $0x25e8] sm:$0xff]  ;;  %v1919_v47 = vld [vmem:[#allocation9 + $0x25b8] sm:$0xff] }
 0x50f   : > { %v1927_v63 = vld [vmem:[#allocation9 + $0x25f8] sm:$0xff] }
 0x510   : > { %5932 = vmatpush1.bf16.msra.mxu1 %v5931_v2  ;;  %v5947_v2 = vpack.c.bf16 %v1860_v53, %v1852_v51  ;;  %v1916_v51 = vld [vmem:[#allocation9 + $0x25a0] sm:$0xff] }
 0x511   : > { %6316 = vmatpush1.bf16.msra.mxu0 %v6315_v3  ;;  %5934 = vmatprep.subr.bf16.mxu1 %v5933_v4  ;;  %v6331_v3 = vpack.c.bf16 %v1862_v13, %v1854_v54  ;;  %v5949_v4 = vpack.c.bf16 %v1877_v61, %v1869_v57  ;;  %v1924_v53 = vld [vmem:[#allocation9 + $0x25e0] sm:$0xff]  ;;  %v1918_v54 = vld [vmem:[#allocation9 + $0x25b0] sm:$0xff]  ;;  %v1933_v57 = vld [vmem:[#allocation9 + $0x2628] sm:$0xff] }
 0x512   : > { %6318 = vmatprep.subr.bf16.mxu0 %v6317_v11  ;;  %v6333_v11 = vpack.c.bf16 %v1879_v1, %v1871_v62  ;;  %v1926_v13 = vld [vmem:[#allocation9 + $0x25f0] sm:$0xff]  ;;  %v1941_v61 = vld [vmem:[#allocation9 + $0x2668] sm:$0xff]  ;;  %v1935_v62 = vld [vmem:[#allocation9 + $0x2638] sm:$0xff] }
 0x513   : > { %v1943_v1 = vld [vmem:[#allocation9 + $0x2678] sm:$0xff] }
 0x514   : > { %5936 = vmatpush1.bf16.msra.mxu1 %v5935_v20  ;;  %v5951_v20 = vpack.c.bf16 %v1876_v8, %v1868_v5  ;;  %v1932_v5 = vld [vmem:[#allocation9 + $0x2620] sm:$0xff] }
 0x515   : > { %6320 = vmatpush1.bf16.msra.mxu0 %v6319_v21  ;;  %5938 = vmatprep.subr.bf16.mxu1 %v5937_v23  ;;  %v6335_v21 = vpack.c.bf16 %v1878_v14, %v1870_v10  ;;  %v5953_v23 = vpack.c.bf16 %v1893_v59, %v1885_v15  ;;  %v1940_v8 = vld [vmem:[#allocation9 + $0x2660] sm:$0xff]  ;;  %v1934_v10 = vld [vmem:[#allocation9 + $0x2630] sm:$0xff]  ;;  %v1949_v15 = vld [vmem:[#allocation9 + $0x26a8] sm:$0xff] }
 0x516   : > { %6322 = vmatprep.subr.bf16.mxu0 %v6321_v26  ;;  %v6337_v26 = vpack.c.bf16 %v1895_v19, %v1887_v16  ;;  %v1942_v14 = vld [vmem:[#allocation9 + $0x2670] sm:$0xff]  ;;  %v1957_v59 = vld [vmem:[#allocation9 + $0x26e8] sm:$0xff]  ;;  %v1951_v16 = vld [vmem:[#allocation9 + $0x26b8] sm:$0xff] }
 0x517   : > { %v1959_v19 = vld [vmem:[#allocation9 + $0x26f8] sm:$0xff] }
 0x518   : > { %5940 = vmatpush1.bf16.msra.mxu1 %v5939_v32  ;;  %v5955_v32 = vpack.c.bf16 %v1892_v24, %v1884_v49  ;;  %v1948_v49 = vld [vmem:[#allocation9 + $0x26a0] sm:$0xff] }
 0x519   : > { %6324 = vmatpush1.bf16.msra.mxu0 %v6323_v33  ;;  %5942 = vmatprep.subr.bf16.mxu1 %v5941_v34  ;;  %v6339_v33 = vpack.c.bf16 %v1894_v27, %v1886_v25  ;;  %v5957_v34 = vpack.c.bf16 %v1909_v30, %v1901_v29  ;;  %v1956_v24 = vld [vmem:[#allocation9 + $0x26e0] sm:$0xff]  ;;  %v1950_v25 = vld [vmem:[#allocation9 + $0x26b0] sm:$0xff]  ;;  %v1965_v29 = vld [vmem:[#allocation9 + $0x2728] sm:$0xff] }
 0x51a   : > { %6326 = vmatprep.subr.bf16.mxu0 %v6325_v38  ;;  %v6341_v38 = vpack.c.bf16 %v1911_v50, %v1903_v46  ;;  %v1958_v27 = vld [vmem:[#allocation9 + $0x26f0] sm:$0xff]  ;;  %v1973_v30 = vld [vmem:[#allocation9 + $0x2768] sm:$0xff]  ;;  %v1967_v46 = vld [vmem:[#allocation9 + $0x2738] sm:$0xff] }
 0x51b   : > { %v1975_v50 = vld [vmem:[#allocation9 + $0x2778] sm:$0xff] }
 0x51c   : > { %5944 = vmatpush1.bf16.msra.mxu1 %v5943_v6  ;;  %v5959_v6 = vpack.c.bf16 %v1908_v60, %v1900_v35  ;;  %v1964_v35 = vld [vmem:[#allocation9 + $0x2720] sm:$0xff] }
 0x51d   : > { %6328 = vmatpush1.bf16.msra.mxu0 %v6327_v48  ;;  %5946 = vmatprep.subr.bf16.mxu1 %v5945_v22  ;;  %v6343_v48 = vpack.c.bf16 %v1910_v39, %v1902_v17  ;;  %v5961_v22 = vpack.c.bf16 %v1925_v45, %v1917_v44  ;;  %v1972_v60 = vld [vmem:[#allocation9 + $0x2760] sm:$0xff]  ;;  %v1966_v17 = vld [vmem:[#allocation9 + $0x2730] sm:$0xff]  ;;  %v1981_v44 = vld [vmem:[#allocation9 + $0x27a8] sm:$0xff] }
 0x51e   : > { %6330 = vmatprep.subr.bf16.mxu0 %v6329_v56  ;;  %v6345_v56 = vpack.c.bf16 %v1927_v63, %v1919_v47  ;;  %v1974_v39 = vld [vmem:[#allocation9 + $0x2770] sm:$0xff]  ;;  %v1989_v45 = vld [vmem:[#allocation9 + $0x27e8] sm:$0xff]  ;;  %v1983_v47 = vld [vmem:[#allocation9 + $0x27b8] sm:$0xff] }
 0x51f   : > { %v1991_v63 = vld [vmem:[#allocation9 + $0x27f8] sm:$0xff] }
 0x520   : > { %5948 = vmatpush1.bf16.msra.mxu1 %v5947_v2  ;;  %v5963_v2 = vpack.c.bf16 %v1924_v53, %v1916_v51  ;;  %v1980_v51 = vld [vmem:[#allocation9 + $0x27a0] sm:$0xff] }
 0x521   : > { %6332 = vmatpush1.bf16.msra.mxu0 %v6331_v3  ;;  %5950 = vmatprep.subr.bf16.mxu1 %v5949_v4  ;;  %v6347_v3 = vpack.c.bf16 %v1926_v13, %v1918_v54  ;;  %v5965_v4 = vpack.c.bf16 %v1941_v61, %v1933_v57  ;;  %v1988_v53 = vld [vmem:[#allocation9 + $0x27e0] sm:$0xff]  ;;  %v1982_v54 = vld [vmem:[#allocation9 + $0x27b0] sm:$0xff]  ;;  %v1997_v57 = vld [vmem:[#allocation9 + $0x2828] sm:$0xff] }
 0x522   : > { %6334 = vmatprep.subr.bf16.mxu0 %v6333_v11  ;;  %v6349_v11 = vpack.c.bf16 %v1943_v1, %v1935_v62  ;;  %v1990_v13 = vld [vmem:[#allocation9 + $0x27f0] sm:$0xff]  ;;  %v2005_v61 = vld [vmem:[#allocation9 + $0x2868] sm:$0xff]  ;;  %v1999_v62 = vld [vmem:[#allocation9 + $0x2838] sm:$0xff] }
 0x523   : > { %v2007_v1 = vld [vmem:[#allocation9 + $0x2878] sm:$0xff] }
 0x524   : > { %5952 = vmatpush1.bf16.msra.mxu1 %v5951_v20  ;;  %v5967_v20 = vpack.c.bf16 %v1940_v8, %v1932_v5  ;;  %v1996_v5 = vld [vmem:[#allocation9 + $0x2820] sm:$0xff] }
 0x525   : > { %6336 = vmatpush1.bf16.msra.mxu0 %v6335_v21  ;;  %5954 = vmatprep.subr.bf16.mxu1 %v5953_v23  ;;  %v6351_v21 = vpack.c.bf16 %v1942_v14, %v1934_v10  ;;  %v5969_v23 = vpack.c.bf16 %v1957_v59, %v1949_v15  ;;  %v2004_v8 = vld [vmem:[#allocation9 + $0x2860] sm:$0xff]  ;;  %v6365_v10 = vpack.c.bf16 %v2007_v1, %v1999_v62  ;;  %v2006_v14 = vld [vmem:[#allocation9 + $0x2870] sm:$0xff]  ;;  %v2013_v15 = vld [vmem:[#allocation9 + $0x28a8] sm:$0xff] }
 0x526   : > { %6338 = vmatprep.subr.bf16.mxu0 %v6337_v26  ;;  %v6353_v26 = vpack.c.bf16 %v1959_v19, %v1951_v16  ;;  %v2021_v59 = vld [vmem:[#allocation9 + $0x28e8] sm:$0xff]  ;;  %v5983_v16 = vpack.c.bf16 %v2004_v8, %v1996_v5  ;;  %v2015_v19 = vld [vmem:[#allocation9 + $0x28b8] sm:$0xff]  ;;  %v2062_v5 = vld [vmem:[#allocation9 + $0x2a30] sm:$0xff] }
 0x528   : > { %5956 = vmatpush1.bf16.msra.mxu1 %v5955_v32  ;;  %v5971_v32 = vpack.c.bf16 %v1956_v24, %v1948_v49  ;;  %v2020_v49 = vld [vmem:[#allocation9 + $0x28e0] sm:$0xff]  ;;  %v2014_v24 = vld [vmem:[#allocation9 + $0x28b0] sm:$0xff] }
 0x529   : > { %6340 = vmatpush1.bf16.msra.mxu0 %v6339_v33  ;;  %5958 = vmatprep.subr.bf16.mxu1 %v5957_v34  ;;  %v6355_v33 = vpack.c.bf16 %v1958_v27, %v1950_v25  ;;  %v5973_v34 = vpack.c.bf16 %v1973_v30, %v1965_v29  ;;  %v5985_v25 = vpack.c.bf16 %v2021_v59, %v2013_v15  ;;  %v2029_v27 = vld [vmem:[#allocation9 + $0x2928] sm:$0xff]  ;;  %v2079_v15 = vld [vmem:[#allocation9 + $0x2ab8] sm:$0xff] }
 0x52a   : > { %6342 = vmatprep.subr.bf16.mxu0 %v6341_v38  ;;  %v6357_v38 = vpack.c.bf16 %v1975_v50, %v1967_v46  ;;  %v2037_v29 = vld [vmem:[#allocation9 + $0x2968] sm:$0xff]  ;;  %v2031_v46 = vld [vmem:[#allocation9 + $0x2938] sm:$0xff] }
 0x52b   : > { %v2039_v50 = vld [vmem:[#allocation9 + $0x2978] sm:$0xff] }
 0x52c   : > { %5960 = vmatpush1.bf16.msra.mxu1 %v5959_v6  ;;  %v5975_v6 = vpack.c.bf16 %v1972_v60, %v1964_v35  ;;  %v2028_v35 = vld [vmem:[#allocation9 + $0x2920] sm:$0xff]  ;;  %v2087_v59 = vld [vmem:[#allocation9 + $0x2af8] sm:$0xff] }
 0x52d   : > { %6344 = vmatpush1.bf16.msra.mxu0 %v6343_v48  ;;  %5962 = vmatprep.subr.bf16.mxu1 %v5961_v22  ;;  %v6359_v48 = vpack.c.bf16 %v1974_v39, %v1966_v17  ;;  %v5977_v22 = vpack.c.bf16 %v1989_v45, %v1981_v44  ;;  %v2036_v60 = vld [vmem:[#allocation9 + $0x2960] sm:$0xff]  ;;  %v2030_v17 = vld [vmem:[#allocation9 + $0x2930] sm:$0xff]  ;;  %v2045_v44 = vld [vmem:[#allocation9 + $0x29a8] sm:$0xff] }
 0x52e   : > { %6346 = vmatprep.subr.bf16.mxu0 %v6345_v56  ;;  %v6361_v56 = vpack.c.bf16 %v1991_v63, %v1983_v47  ;;  %v2038_v39 = vld [vmem:[#allocation9 + $0x2970] sm:$0xff]  ;;  %v2053_v45 = vld [vmem:[#allocation9 + $0x29e8] sm:$0xff]  ;;  %v2047_v47 = vld [vmem:[#allocation9 + $0x29b8] sm:$0xff]  ;;  %v5991_v63 = vpack.c.bf16 %v2036_v60, %v2028_v35 }
 0x52f   : > { %v2094_v35 = vld [vmem:[#allocation9 + $0x2b30] sm:$0xff] }
 0x530   : > { %5964 = vmatpush1.bf16.msra.mxu1 %v5963_v2  ;;  %v5979_v2 = vpack.c.bf16 %v1988_v53, %v1980_v51  ;;  %v2052_v51 = vld [vmem:[#allocation9 + $0x29e0] sm:$0xff]  ;;  %v2046_v53 = vld [vmem:[#allocation9 + $0x29b0] sm:$0xff] }
 0x531   : > { %6348 = vmatpush1.bf16.msra.mxu0 %v6347_v3  ;;  %5966 = vmatprep.subr.bf16.mxu1 %v5965_v4  ;;  %v6363_v3 = vpack.c.bf16 %v1990_v13, %v1982_v54  ;;  %v5981_v4 = vpack.c.bf16 %v2005_v61, %v1997_v57  ;;  %v2069_v13 = vld [vmem:[#allocation9 + $0x2a68] sm:$0xff]  ;;  %v2063_v57 = vld [vmem:[#allocation9 + $0x2a38] sm:$0xff] }
 0x532   : > { %6350 = vmatprep.subr.bf16.mxu0 %v6349_v11  ;;  %v1998_v11 = vld [vmem:[#allocation9 + $0x2830] sm:$0xff]  ;;  %v2071_v61 = vld [vmem:[#allocation9 + $0x2a78] sm:$0xff] }
 0x533   : > { %v6381_v8 = vpack.c.bf16 %v2071_v61, %v2063_v57 }
 0x534   : > { %5968 = vmatpush1.bf16.msra.mxu1 %v5967_v20  ;;  %v2023_v20 = vld [vmem:[#allocation9 + $0x28f8] sm:$0xff] }
 0x535   : > { %6352 = vmatpush1.bf16.msra.mxu0 %v6351_v21  ;;  %5970 = vmatprep.subr.bf16.mxu1 %v5969_v23  ;;  %v6367_v21 = vpack.c.bf16 %v2006_v14, %v1998_v11  ;;  %v2012_v23 = vld [vmem:[#allocation9 + $0x28a0] sm:$0xff]  ;;  %v6369_v30 = vpack.c.bf16 %v2023_v20, %v2015_v19  ;;  %v2077_v11 = vld [vmem:[#allocation9 + $0x2aa8] sm:$0xff] }
 0x536   : > { %6354 = vmatprep.subr.bf16.mxu0 %v6353_v26  ;;  %v2022_v26 = vld [vmem:[#allocation9 + $0x28f0] sm:$0xff]  ;;  %v2085_v14 = vld [vmem:[#allocation9 + $0x2ae8] sm:$0xff] }
 0x537   : > { %v6001_v20 = vpack.c.bf16 %v2085_v14, %v2077_v11  ;;  %v2143_v11 = vld [vmem:[#allocation9 + $0x2cb8] sm:$0xff] }
 0x538   : > { %5972 = vmatpush1.bf16.msra.mxu1 %v5971_v32  ;;  %v5987_v32 = vpack.c.bf16 %v2020_v49, %v2012_v23  ;;  %v2084_v23 = vld [vmem:[#allocation9 + $0x2ae0] sm:$0xff]  ;;  %v2078_v49 = vld [vmem:[#allocation9 + $0x2ab0] sm:$0xff]  ;;  %v2151_v14 = vld [vmem:[#allocation9 + $0x2cf8] sm:$0xff] }
 0x539   : > { %6356 = vmatpush1.bf16.msra.mxu0 %v6355_v33  ;;  %5974 = vmatprep.subr.bf16.mxu1 %v5973_v34  ;;  %v6371_v33 = vpack.c.bf16 %v2022_v26, %v2014_v24  ;;  %v5989_v34 = vpack.c.bf16 %v2037_v29, %v2029_v27  ;;  %v6385_v24 = vpack.c.bf16 %v2087_v59, %v2079_v15  ;;  %v2093_v26 = vld [vmem:[#allocation9 + $0x2b28] sm:$0xff]  ;;  %v2095_v29 = vld [vmem:[#allocation9 + $0x2b38] sm:$0xff] }
 0x53a   : > { %6358 = vmatprep.subr.bf16.mxu0 %v6357_v38  ;;  %v6373_v38 = vpack.c.bf16 %v2039_v50, %v2031_v46  ;;  %v2101_v27 = vld [vmem:[#allocation9 + $0x2b68] sm:$0xff] }
 0x53c   : > { %5976 = vmatpush1.bf16.msra.mxu1 %v5975_v6  ;;  %v6375_v6 = vpack.c.bf16 %v2038_v39, %v2030_v17  ;;  %v2102_v17 = vld [vmem:[#allocation9 + $0x2b70] sm:$0xff]  ;;  %v2117_v39 = vld [vmem:[#allocation9 + $0x2be8] sm:$0xff] }
 0x53d   : > { %6360 = vmatpush1.bf16.msra.mxu0 %v6359_v48  ;;  %5978 = vmatprep.subr.bf16.mxu1 %v5977_v22  ;;  %v5993_v48 = vpack.c.bf16 %v2053_v45, %v2045_v44  ;;  %v2044_v22 = vld [vmem:[#allocation9 + $0x29a0] sm:$0xff]  ;;  %v2111_v44 = vld [vmem:[#allocation9 + $0x2bb8] sm:$0xff] }
 0x53e   : > { %6362 = vmatprep.subr.bf16.mxu0 %v6361_v56  ;;  %v2061_v56 = vld [vmem:[#allocation9 + $0x2a28] sm:$0xff]  ;;  %v5995_v62 = vpack.c.bf16 %v2052_v51, %v2044_v22  ;;  %v2119_v45 = vld [vmem:[#allocation9 + $0x2bf8] sm:$0xff]  ;;  %v2110_v22 = vld [vmem:[#allocation9 + $0x2bb0] sm:$0xff] }
 0x53f   : > { %v6393_v51 = vpack.c.bf16 %v2119_v45, %v2111_v44 }
 0x540   : > { %5980 = vmatpush1.bf16.msra.mxu1 %v5979_v2  ;;  %v5997_v2 = vpack.c.bf16 %v2069_v13, %v2061_v56  ;;  %v2127_v56 = vld [vmem:[#allocation9 + $0x2c38] sm:$0xff] }
 0x541   : > { %6364 = vmatpush1.bf16.msra.mxu0 %v6363_v3  ;;  %5982 = vmatprep.subr.bf16.mxu1 %v5981_v4  ;;  %v2060_v3 = vld [vmem:[#allocation9 + $0x2a20] sm:$0xff]  ;;  %v2135_v13 = vld [vmem:[#allocation9 + $0x2c78] sm:$0xff] }
 0x542   : > { %6366 = vmatprep.subr.bf16.mxu0 %v6365_v10  ;;  %v2068_v4 = vld [vmem:[#allocation9 + $0x2a60] sm:$0xff]  ;;  %v2070_v10 = vld [vmem:[#allocation9 + $0x2a70] sm:$0xff] }
 0x543   : > { %3553 = vmatmul.mubr.f32.vlgmr.msra.gmra.mrb[4].mxu1 %v7455_v18  ;;  %v6383_v19 = vpack.c.bf16 %v2070_v10, %v2062_v5  ;;  %v2134_v5 = vld [vmem:[#allocation9 + $0x2c70] sm:$0xff]  ;;  %v2149_v10 = vld [vmem:[#allocation9 + $0x2ce8] sm:$0xff] }
 0x544   : > { %3979 = vmatmul.mubr.f32.vlgmr.msra.gmra.mrb[6].mxu0 %v7455_v18  ;;  %5984 = vmatpush1.bf16.msra.mxu1 %v5983_v16  ;;  %v2055_v18 = vld [vmem:[#allocation9 + $0x29f8] sm:$0xff]  ;;  %v5999_v16 = vpack.c.bf16 %v2068_v4, %v2060_v3  ;;  %v2126_v3 = vld [vmem:[#allocation9 + $0x2c30] sm:$0xff]  ;;  %v6397_v4 = vpack.c.bf16 %v2135_v13, %v2127_v56 }
 0x545   : > { %3623 = vmatprep.mubr.f32.mxu1 %v7460_v28  ;;  %6368 = vmatpush1.bf16.msra.mxu0 %v6367_v21  ;;  %v6377_v54 = vpack.c.bf16 %v2055_v18, %v2047_v47  ;;  %v2076_v21 = vld [vmem:[#allocation9 + $0x2aa0] sm:$0xff]  ;;  %v6391_v18 = vpack.c.bf16 %v2102_v17, %v2094_v35  ;;  %v6399_v59 = vpack.c.bf16 %v2134_v5, %v2126_v3  ;;  %v2166_v35 = vld [vmem:[#allocation9 + $0x2d70] sm:$0xff]  ;;  %v2181_v17 = vld [vmem:[#allocation9 + $0x2de8] sm:$0xff] }
 0x546   : > { %4049 = vmatprep.mubr.f32.mxu0 %v7460_v28  ;;  %5986 = vmatprep.subr.bf16.mxu1 %v5985_v25  ;;  %v2054_v28 = vld [vmem:[#allocation9 + $0x29f0] sm:$0xff]  ;;  %v6003_v46 = vpack.c.bf16 %v2084_v23, %v2076_v21  ;;  %v6401_v23 = vpack.c.bf16 %v2151_v14, %v2143_v11  ;;  %v2213_v5 = vld [vmem:[#allocation9 + $0x2ee8] sm:$0xff] }
 0x547   : > { %6370 = vmatprep.subr.bf16.mxu0 %v6369_v30  ;;  %v6379_v1 = vpack.c.bf16 %v2054_v28, %v2046_v53  ;;  %v2086_v25 = vld [vmem:[#allocation9 + $0x2af0] sm:$0xff]  ;;  %v2103_v30 = vld [vmem:[#allocation9 + $0x2b78] sm:$0xff]  ;;  %v2133_v28 = vld [vmem:[#allocation9 + $0x2c68] sm:$0xff] }
 0x548   : > { %5988 = vmatpush1.bf16.msra.mxu1 %v5987_v32  ;;  %v6387_v50 = vpack.c.bf16 %v2086_v25, %v2078_v49  ;;  %v6005_v32 = vpack.c.bf16 %v2101_v27, %v2093_v26  ;;  %v6389_v60 = vpack.c.bf16 %v2103_v30, %v2095_v29  ;;  %v2118_v53 = vld [vmem:[#allocation9 + $0x2bf0] sm:$0xff]  ;;  %v2165_v25 = vld [vmem:[#allocation9 + $0x2d68] sm:$0xff]  ;;  %v2159_v26 = vld [vmem:[#allocation9 + $0x2d38] sm:$0xff] }
 0x549   : > { %6372 = vmatpush1.bf16.msra.mxu0 %v6371_v33  ;;  %5990 = vmatprep.subr.bf16.mxu1 %v5989_v34  ;;  %v2092_v33 = vld [vmem:[#allocation9 + $0x2b20] sm:$0xff]  ;;  %v6395_v61 = vpack.c.bf16 %v2118_v53, %v2110_v22  ;;  %v2142_v21 = vld [vmem:[#allocation9 + $0x2cb0] sm:$0xff]  ;;  %v2167_v27 = vld [vmem:[#allocation9 + $0x2d78] sm:$0xff] }
 0x54a   : > { %6374 = vmatprep.subr.bf16.mxu0 %v6373_v38  ;;  %v2100_v34 = vld [vmem:[#allocation9 + $0x2b60] sm:$0xff]  ;;  %v2109_v38 = vld [vmem:[#allocation9 + $0x2ba8] sm:$0xff]  ;;  %v2150_v49 = vld [vmem:[#allocation9 + $0x2cf0] sm:$0xff] }
 0x54b   : > { %v6007_v47 = vpack.c.bf16 %v2100_v34, %v2092_v33  ;;  %v6403_v30 = vpack.c.bf16 %v2150_v49, %v2142_v21  ;;  %v2158_v33 = vld [vmem:[#allocation9 + $0x2d30] sm:$0xff]  ;;  %v6405_v34 = vpack.c.bf16 %v2167_v27, %v2159_v26  ;;  %v2197_v53 = vld [vmem:[#allocation9 + $0x2e68] sm:$0xff] }
 0x54c   : > { %5992 = vmatpush1.bf16.msra.mxu1 %v5991_v63  ;;  %v6009_v63 = vpack.c.bf16 %v2117_v39, %v2109_v38  ;;  %v2175_v38 = vld [vmem:[#allocation9 + $0x2db8] sm:$0xff]  ;;  %v6407_v45 = vpack.c.bf16 %v2166_v35, %v2158_v33  ;;  %v2182_v22 = vld [vmem:[#allocation9 + $0x2df0] sm:$0xff]  ;;  %v2229_v49 = vld [vmem:[#allocation9 + $0x2f68] sm:$0xff] }
 0x54d   : > { %6376 = vmatpush1.bf16.msra.mxu0 %v6375_v6  ;;  %5994 = vmatprep.subr.bf16.mxu1 %v5993_v48  ;;  %v2108_v6 = vld [vmem:[#allocation9 + $0x2ba0] sm:$0xff]  ;;  %v2183_v39 = vld [vmem:[#allocation9 + $0x2df8] sm:$0xff]  ;;  %v2198_v3 = vld [vmem:[#allocation9 + $0x2e70] sm:$0xff] }
 0x54e   : > { %6378 = vmatprep.subr.bf16.mxu0 %v6377_v54  ;;  %v2116_v48 = vld [vmem:[#allocation9 + $0x2be0] sm:$0xff]  ;;  %v2125_v54 = vld [vmem:[#allocation9 + $0x2c28] sm:$0xff]  ;;  %v2214_v21 = vld [vmem:[#allocation9 + $0x2ef0] sm:$0xff] }
 0x54f   : > { %v6011_v57 = vpack.c.bf16 %v2116_v48, %v2108_v6  ;;  %v2174_v6 = vld [vmem:[#allocation9 + $0x2db0] sm:$0xff]  ;;  %v6409_v48 = vpack.c.bf16 %v2183_v39, %v2175_v38  ;;  %v2245_v35 = vld [vmem:[#allocation9 + $0x2fe8] sm:$0xff]  ;;  %v7500_v38 = vld [vmem:[#allocation11] sm:$0xff] }
 0x550   : > { %5996 = vmatpush1.bf16.msra.mxu1 %v5995_v62  ;;  %v6013_v62 = vpack.c.bf16 %v2133_v28, %v2125_v54  ;;  %v2191_v54 = vld [vmem:[#allocation9 + $0x2e38] sm:$0xff]  ;;  %v6411_v13 = vpack.c.bf16 %v2182_v22, %v2174_v6  ;;  %v2230_v33 = vld [vmem:[#allocation9 + $0x2f70] sm:$0xff]  ;;  %v4080_v22 = vld [vmem:[#allocation12 + $0x80] sm:$0xff] }
 0x551   : > { %6380 = vmatpush1.bf16.msra.mxu0 %v6379_v1  ;;  %5998 = vmatprep.subr.bf16.mxu1 %v5997_v2  ;;  %v2124_v1 = vld [vmem:[#allocation9 + $0x2c20] sm:$0xff]  ;;  %v2199_v28 = vld [vmem:[#allocation9 + $0x2e78] sm:$0xff] }
 0x552   : > { %6382 = vmatprep.subr.bf16.mxu0 %v6381_v8  ;;  %v2132_v2 = vld [vmem:[#allocation9 + $0x2c60] sm:$0xff]  ;;  %v2141_v8 = vld [vmem:[#allocation9 + $0x2ca8] sm:$0xff] }
 0x553   : > { %v6015_v15 = vpack.c.bf16 %v2132_v2, %v2124_v1  ;;  %v2190_v1 = vld [vmem:[#allocation9 + $0x2e30] sm:$0xff]  ;;  %v6413_v2 = vpack.c.bf16 %v2199_v28, %v2191_v54  ;;  %v4112_v54 = vld [vmem:[#allocation12 + $0x180] sm:$0xff] }
 0x554   : > { %6000 = vmatpush1.bf16.msra.mxu1 %v5999_v16  ;;  %v6017_v16 = vpack.c.bf16 %v2149_v10, %v2141_v8  ;;  %v2207_v8 = vld [vmem:[#allocation9 + $0x2eb8] sm:$0xff]  ;;  %v6415_v14 = vpack.c.bf16 %v2198_v3, %v2190_v1  ;;  %v4113_v28 = vld [vmem:[#allocation12 + $0x188] sm:$0xff]  ;;  %v4096_v3 = vld [vmem:[#allocation12 + $0x100] sm:$0xff] }
 0x555   : > { %6384 = vmatpush1.bf16.msra.mxu0 %v6383_v19  ;;  %6002 = vmatprep.subr.bf16.mxu1 %v6001_v20  ;;  %v2140_v19 = vld [vmem:[#allocation9 + $0x2ca0] sm:$0xff]  ;;  %v2215_v10 = vld [vmem:[#allocation9 + $0x2ef8] sm:$0xff]  ;;  %v4065_v1 = vld [vmem:[#allocation12 + $0x8] sm:$0xff] }
 0x556   : > { %6386 = vmatprep.subr.bf16.mxu0 %v6385_v24  ;;  %v2148_v20 = vld [vmem:[#allocation9 + $0x2ce0] sm:$0xff]  ;;  %v2157_v24 = vld [vmem:[#allocation9 + $0x2d28] sm:$0xff] }
 0x557   : > { %v6019_v29 = vpack.c.bf16 %v2148_v20, %v2140_v19  ;;  %v2206_v19 = vld [vmem:[#allocation9 + $0x2eb0] sm:$0xff]  ;;  %v6417_v20 = vpack.c.bf16 %v2215_v10, %v2207_v8  ;;  %v4083_v8 = vld [vmem:[#allocation12 + $0x98] sm:$0xff] }
 0x558   : > { %6004 = vmatpush1.bf16.msra.mxu1 %v6003_v46  ;;  %v6021_v46 = vpack.c.bf16 %v2165_v25, %v2157_v24  ;;  %v2223_v24 = vld [vmem:[#allocation9 + $0x2f38] sm:$0xff]  ;;  %v6419_v27 = vpack.c.bf16 %v2214_v21, %v2206_v19  ;;  %v4099_v21 = vld [vmem:[#allocation12 + $0x118] sm:$0xff] }
 0x559   : > { %6388 = vmatpush1.bf16.msra.mxu0 %v6387_v50  ;;  %6006 = vmatprep.subr.bf16.mxu1 %v6005_v32  ;;  %v2156_v50 = vld [vmem:[#allocation9 + $0x2d20] sm:$0xff]  ;;  %v2231_v25 = vld [vmem:[#allocation9 + $0x2f78] sm:$0xff] }
 0x55a   : > { %6390 = vmatprep.subr.bf16.mxu0 %v6389_v60  ;;  %v2164_v32 = vld [vmem:[#allocation9 + $0x2d60] sm:$0xff]  ;;  %v2173_v60 = vld [vmem:[#allocation9 + $0x2da8] sm:$0xff]  ;;  %v4098_v19 = vld [vmem:[#allocation12 + $0x110] sm:$0xff] }
 0x55b   : > { %v6023_v44 = vpack.c.bf16 %v2164_v32, %v2156_v50  ;;  %v2222_v50 = vld [vmem:[#allocation9 + $0x2f30] sm:$0xff]  ;;  %v6421_v32 = vpack.c.bf16 %v2231_v25, %v2223_v24 }
 0x55c   : > { %6008 = vmatpush1.bf16.msra.mxu1 %v6007_v47  ;;  %v6025_v47 = vpack.c.bf16 %v2181_v17, %v2173_v60  ;;  %v2239_v60 = vld [vmem:[#allocation9 + $0x2fb8] sm:$0xff]  ;;  %v4117_v25 = vld [vmem:[#allocation12 + $0x1a8] sm:$0xff] }
 0x55d   : > { %6392 = vmatpush1.bf16.msra.mxu0 %v6391_v18  ;;  %6010 = vmatprep.subr.bf16.mxu1 %v6009_v63  ;;  %v2172_v18 = vld [vmem:[#allocation9 + $0x2da0] sm:$0xff]  ;;  %v2247_v17 = vld [vmem:[#allocation9 + $0x2ff8] sm:$0xff] }
 0x55e   : > { %6394 = vmatprep.subr.bf16.mxu0 %v6393_v51  ;;  %v2180_v63 = vld [vmem:[#allocation9 + $0x2de0] sm:$0xff]  ;;  %v2189_v51 = vld [vmem:[#allocation9 + $0x2e28] sm:$0xff]  ;;  %v6425_v6 = vpack.c.bf16 %v2247_v17, %v2239_v60  ;;  %v4118_v17 = vld [vmem:[#allocation12 + $0x1b0] sm:$0xff] }
 0x55f   : > { %v6027_v56 = vpack.c.bf16 %v2180_v63, %v2172_v18  ;;  %v2244_v18 = vld [vmem:[#allocation9 + $0x2fe0] sm:$0xff]  ;;  %v2238_v63 = vld [vmem:[#allocation9 + $0x2fb0] sm:$0xff] }
 0x560   : > { %6012 = vmatpush1.bf16.msra.mxu1 %v6011_v57  ;;  %v6029_v57 = vpack.c.bf16 %v2197_v53, %v2189_v51  ;;  %v4081_v51 = vld [vmem:[#allocation12 + $0x88] sm:$0xff]  ;;  %v2319_v53 = vrot.slane %v7500_v38, %v7374_v42  ;;  %v4082_v42 = vld [vmem:[#allocation12 + $0x90] sm:$0xff]  ;;  %v4087_v60 = vld [vmem:[#allocation12 + $0xb8] sm:$0xff] }
 0x561   : > { %6396 = vmatpush1.bf16.msra.mxu0 %v6395_v61  ;;  %6014 = vmatprep.subr.bf16.mxu1 %v6013_v62  ;;  %v2188_v61 = vld [vmem:[#allocation9 + $0x2e20] sm:$0xff] }
 0x562   : > { %6398 = vmatprep.subr.bf16.mxu0 %v6397_v4  ;;  %v2196_v62 = vld [vmem:[#allocation9 + $0x2e60] sm:$0xff]  ;;  %v2205_v4 = vld [vmem:[#allocation9 + $0x2ea8] sm:$0xff] }
 0x563   : > { %v6031_v11 = vpack.c.bf16 %v2196_v62, %v2188_v61  ;;  %v6429_v61 = vpack.c.bf16 %v4081_v51, %v4080_v22  ;;  %v4064_v62 = vld [vmem:[#allocation12] sm:$0xff]  ;;  %v4089_v51 = vld [vmem:[#allocation12 + $0xc8] sm:$0xff] }
 0x564   : > { %6016 = vmatpush1.bf16.msra.mxu1 %v6015_v15  ;;  %v6033_v15 = vpack.c.bf16 %v2213_v5, %v2205_v4  ;;  %v4097_v4 = vld [vmem:[#allocation12 + $0x108] sm:$0xff]  ;;  %v6558_v5 = vadd.f32 %v7488_v37, %v2319_v53  ;;  %v4088_v22 = vld [vmem:[#allocation12 + $0xc0] sm:$0xff] }
 0x565   : > { %6400 = vmatpush1.bf16.msra.mxu0 %v6399_v59  ;;  %6018 = vmatprep.subr.bf16.mxu1 %v6017_v16  ;;  %v2204_v59 = vld [vmem:[#allocation9 + $0x2ea0] sm:$0xff]  ;;  %v4120_v53 = vld [vmem:[#allocation12 + $0x1c0] sm:$0xff] }
 0x566   : > { %6402 = vmatprep.subr.bf16.mxu0 %v6401_v23  ;;  %v2212_v16 = vld [vmem:[#allocation9 + $0x2ee0] sm:$0xff]  ;;  %v2221_v23 = vld [vmem:[#allocation9 + $0x2f28] sm:$0xff]  ;;  %v4057_v37 = vmax.f32 %v6558_v5, 0.0  ;;  %v4122_v5 = vld [vmem:[#allocation12 + $0x1d0] sm:$0xff] }
 0x567   : > { %v6035_v26 = vpack.c.bf16 %v2212_v16, %v2204_v59  ;;  %v4066_v59 = vld [vmem:[#allocation12 + $0x10] sm:$0xff]  ;;  %v4067_v16 = vld [vmem:[#allocation12 + $0x18] sm:$0xff] }
 0x568   : > { %6020 = vmatpush1.bf16.msra.mxu1 %v6019_v29  ;;  %v6037_v29 = vpack.c.bf16 %v2229_v49, %v2221_v23  ;;  %v4084_v23 = vld [vmem:[#allocation12 + $0xa0] sm:$0xff]  ;;  %v4085_v49 = vld [vmem:[#allocation12 + $0xa8] sm:$0xff] }
 0x569   : > { %6404 = vmatpush1.bf16.msra.mxu0 %v6403_v30  ;;  %6022 = vmatprep.subr.bf16.mxu1 %v6021_v46  ;;  %v2220_v30 = vld [vmem:[#allocation9 + $0x2f20] sm:$0xff] }
 0x56a   : > { %6406 = vmatprep.subr.bf16.mxu0 %v6405_v34  ;;  %v2228_v46 = vld [vmem:[#allocation9 + $0x2f60] sm:$0xff]  ;;  %v2237_v34 = vld [vmem:[#allocation9 + $0x2fa8] sm:$0xff] }
 0x56b   : > { %v6039_v39 = vpack.c.bf16 %v2228_v46, %v2220_v30  ;;  %v6437_v30 = vpack.c.bf16 %v4085_v49, %v4084_v23  ;;  %v4068_v46 = vld [vmem:[#allocation12 + $0x20] sm:$0xff]  ;;  %v4125_v23 = vld [vmem:[#allocation12 + $0x1e8] sm:$0xff] }
 0x56c   : > { %6024 = vmatpush1.bf16.msra.mxu1 %v6023_v44  ;;  %v6423_v44 = vpack.c.bf16 %v2230_v33, %v2222_v50  ;;  %v4069_v50 = vld [vmem:[#allocation12 + $0x28] sm:$0xff] }
 0x56d   : > { %6408 = vmatpush1.bf16.msra.mxu0 %v6407_v45  ;;  %6026 = vmatprep.subr.bf16.mxu1 %v6025_v47  ;;  %v6041_v45 = vpack.c.bf16 %v2245_v35, %v2237_v34  ;;  %v2236_v47 = vld [vmem:[#allocation9 + $0x2fa0] sm:$0xff]  ;;  %v4101_v34 = vld [vmem:[#allocation12 + $0x128] sm:$0xff]  ;;  %v4086_v35 = vld [vmem:[#allocation12 + $0xb0] sm:$0xff] }
 0x56e   : > { %6410 = vmatprep.subr.bf16.mxu0 %v6409_v48  ;;  %v2246_v48 = vld [vmem:[#allocation9 + $0x2ff0] sm:$0xff] }
 0x570   : > { %6028 = vmatpush1.bf16.msra.mxu1 %v6027_v56  ;;  %v2327_v56 = vrot.slane %v7500_v38, %v7390_v55  ;;  %v6431_v55 = vpack.c.bf16 %v4065_v1, %v4064_v62  ;;  %v4104_v62 = vld [vmem:[#allocation12 + $0x140] sm:$0xff] }
 0x571   : > { %6412 = vmatpush1.bf16.msra.mxu0 %v6411_v13  ;;  %6030 = vmatprep.subr.bf16.mxu1 %v6029_v57  ;;  %v6043_v13 = vpack.c.bf16 %v2244_v18, %v2236_v47  ;;  %v6427_v57 = vpack.c.bf16 %v2246_v48, %v2238_v63  ;;  %v4070_v47 = vld [vmem:[#allocation12 + $0x30] sm:$0xff]  ;;  %v4071_v18 = vld [vmem:[#allocation12 + $0x38] sm:$0xff] }
 0x572   : > { %6414 = vmatprep.subr.bf16.mxu0 %v6413_v2  ;;  %v6461_v2 = vpack.c.bf16 %v4113_v28, %v4112_v54  ;;  %v6560_v10 = vadd.f32 %v7490_v0, %v2327_v56  ;;  %v4116_v0 = vld [vmem:[#allocation12 + $0x1a0] sm:$0xff]  ;;  %v4102_v63 = vld [vmem:[#allocation12 + $0x130] sm:$0xff]  ;;  %v4103_v48 = vld [vmem:[#allocation12 + $0x138] sm:$0xff]  ;;  %v6443_v28 = vpack.c.bf16 %v4071_v18, %v4070_v47 }
 0x573   : > { %v6469_v33 = vpack.c.bf16 %v4117_v25, %v4116_v0  ;;  %v4121_v54 = vld [vmem:[#allocation12 + $0x1c8] sm:$0xff]  ;;  %v6475_v56 = vpack.c.bf16 %v4103_v48, %v4102_v63  ;;  %v4076_v0 = vld [vmem:[#allocation12 + $0x60] sm:$0xff]  ;;  %v4111_v47 = vld [vmem:[#allocation12 + $0x178] sm:$0xff] }
 0x574   : > { %6032 = vmatpush1.bf16.msra.mxu1 %v6031_v11  ;;  %v4114_v11 = vld [vmem:[#allocation12 + $0x190] sm:$0xff]  ;;  %v6477_v1 = vpack.c.bf16 %v4121_v54, %v4120_v53  ;;  %v4077_v25 = vld [vmem:[#allocation12 + $0x68] sm:$0xff]  ;;  %v4144_v18 = vld [vmem:[#allocation12 + $0x280] sm:$0xff] }
 0x575   : > { %6416 = vmatpush1.bf16.msra.mxu0 %v6415_v14  ;;  %6034 = vmatprep.subr.bf16.mxu1 %v6033_v15  ;;  %v4115_v14 = vld [vmem:[#allocation12 + $0x198] sm:$0xff]  ;;  %v6463_v15 = vpack.c.bf16 %v4097_v4, %v4096_v3  ;;  %v4090_v3 = vld [vmem:[#allocation12 + $0xd0] sm:$0xff]  ;;  %v4145_v63 = vld [vmem:[#allocation12 + $0x288] sm:$0xff] }
 0x576   : > { %6418 = vmatprep.subr.bf16.mxu0 %v6417_v20  ;;  %v6433_v20 = vpack.c.bf16 %v4083_v8, %v4082_v42  ;;  %v6465_v24 = vpack.c.bf16 %v4115_v14, %v4114_v11  ;;  %v4091_v4 = vld [vmem:[#allocation12 + $0xd8] sm:$0xff]  ;;  %v4074_v11 = vld [vmem:[#allocation12 + $0x50] sm:$0xff]  ;;  %v4177_v48 = vld [vmem:[#allocation12 + $0x388] sm:$0xff]  ;;  %v6493_v53 = vpack.c.bf16 %v4145_v63, %v4144_v18 }
 0x577   : > { %v4123_v42 = vld [vmem:[#allocation12 + $0x1d8] sm:$0xff]  ;;  %v4128_v54 = vld [vmem:[#allocation12 + $0x200] sm:$0xff] }
 0x578   : > { %6036 = vmatpush1.bf16.msra.mxu1 %v6035_v26  ;;  %v4059_v26 = vmax.f32 %v6560_v10, 0.0  ;;  %v4075_v14 = vld [vmem:[#allocation12 + $0x58] sm:$0xff]  ;;  %v4136_v63 = vld [vmem:[#allocation12 + $0x240] sm:$0xff] }
 0x579   : > { %6420 = vmatpush1.bf16.msra.mxu0 %v6419_v27  ;;  %6038 = vmatprep.subr.bf16.mxu1 %v6037_v29  ;;  %v6435_v27 = vpack.c.bf16 %v4067_v16, %v4066_v59  ;;  %v6467_v29 = vpack.c.bf16 %v4099_v21, %v4098_v19  ;;  %v6481_v59 = vpack.c.bf16 %v4123_v42, %v4122_v5  ;;  %v4107_v16 = vld [vmem:[#allocation12 + $0x158] sm:$0xff]  ;;  %v4092_v19 = vld [vmem:[#allocation12 + $0xe0] sm:$0xff]  ;;  %v4130_v42 = vld [vmem:[#allocation12 + $0x210] sm:$0xff] }
 0x57a   : > { %6422 = vmatprep.subr.bf16.mxu0 %v6421_v32  ;;  %v4100_v32 = vld [vmem:[#allocation12 + $0x120] sm:$0xff]  ;;  %v6451_v49 = vpack.c.bf16 %v4075_v14, %v4074_v11  ;;  %v4163_v11 = vld [vmem:[#allocation12 + $0x318] sm:$0xff] }
 0x57b   : > { %v4124_v21 = vld [vmem:[#allocation12 + $0x1e0] sm:$0xff] }
 0x57c   : > { %6040 = vmatpush1.bf16.msra.mxu1 %v6039_v39  ;;  %v4119_v39 = vld [vmem:[#allocation12 + $0x1b8] sm:$0xff]  ;;  %v4148_v14 = vld [vmem:[#allocation12 + $0x2a0] sm:$0xff] }
 0x57d   : > { %6424 = vmatpush1.bf16.msra.mxu0 %v6423_v44  ;;  %6042 = vmatprep.subr.bf16.mxu1 %v6041_v45  ;;  %v6471_v44 = vpack.c.bf16 %v4101_v34, %v4100_v32  ;;  %v6441_v45 = vpack.c.bf16 %v4087_v60, %v4086_v35  ;;  %v4127_v32 = vld [vmem:[#allocation12 + $0x1f8] sm:$0xff]  ;;  %v2315_v34 = vrot.slane %v7500_v38, %v7377_v43 }
 0x57e   : > { %6426 = vmatprep.subr.bf16.mxu0 %v6425_v6  ;;  %v6473_v6 = vpack.c.bf16 %v4119_v39, %v4118_v17  ;;  %v4078_v17 = vld [vmem:[#allocation12 + $0x70] sm:$0xff]  ;;  %v4079_v39 = vld [vmem:[#allocation12 + $0x78] sm:$0xff] }
 0x57f   : > { %v6557_v43 = vadd.f32 %v7484_v31, %v2315_v34  ;;  %v4166_v34 = vld [vmem:[#allocation12 + $0x330] sm:$0xff] }
 0x580   : > { %6044 = vmatpush1.bf16.msra.mxu1 %v6043_v13  ;;  %v6445_v13 = vpack.c.bf16 %v4089_v51, %v4088_v22  ;;  %v6459_v22 = vpack.c.bf16 %v4079_v39, %v4078_v17  ;;  %v4152_v17 = vld [vmem:[#allocation12 + $0x2c0] sm:$0xff]  ;;  %v4153_v39 = vld [vmem:[#allocation12 + $0x2c8] sm:$0xff] }
 0x581   : > { %6428 = vmatpush1.bf16.msra.mxu0 %v6427_v57  ;;  %6430 = vmatprep.subr.bf16.mxu1 %v6429_v61  ;;  %v4072_v57 = vld [vmem:[#allocation12 + $0x40] sm:$0xff]  ;;  %v4073_v61 = vld [vmem:[#allocation12 + $0x48] sm:$0xff]  ;;  %v6509_v18 = vpack.c.bf16 %v4153_v39, %v4152_v17 }
 0x582   : > { %6462 = vmatprep.subr.bf16.mxu0 %v6461_v2  ;;  %v4105_v2 = vld [vmem:[#allocation12 + $0x148] sm:$0xff]  ;;  %v6447_v8 = vpack.c.bf16 %v4073_v61, %v4072_v57  ;;  %v4146_v61 = vld [vmem:[#allocation12 + $0x290] sm:$0xff] }
 0x583   : > { %3624 = vmatmul.mubr.f32.vlgmr.msra.gmra.mrb[4].mxu1 %v7466_v58  ;;  %v6479_v10 = vpack.c.bf16 %v4105_v2, %v4104_v62  ;;  %v4161_v57 = vld [vmem:[#allocation12 + $0x308] sm:$0xff]  ;;  %v4147_v62 = vld [vmem:[#allocation12 + $0x298] sm:$0xff] }
 0x584   : > { %4050 = vmatmul.mubr.f32.vlgmr.msra.gmra.mrb[6].mxu0 %v7466_v58  ;;  %6432 = vmatpush3.bf16.msra.mxu1 %v6431_v55  ;;  %v6439_v58 = vpack.c.bf16 %v4069_v50, %v4068_v46  ;;  %v6449_v55 = vpack.c.bf16 %v4091_v4, %v4090_v3  ;;  %v4095_v46 = vld [vmem:[#allocation12 + $0xf8] sm:$0xff]  ;;  %v4126_v50 = vld [vmem:[#allocation12 + $0x1f0] sm:$0xff]  ;;  %v4056_v4 = vmax.f32 %v6557_v43, 0.0  ;;  %v6497_v5 = vpack.c.bf16 %v4147_v62, %v4146_v61  ;;  %v4169_v43 = vld [vmem:[#allocation12 + $0x348] sm:$0xff] }
 0x585   : > { %4257 = vmatprep.mubr.f32.mxu1 %v4057_v37  ;;  %6464 = vmatpush3.bf16.msra.mxu0 %v6463_v15  ;;  %v4106_v15 = vld [vmem:[#allocation12 + $0x150] sm:$0xff]  ;;  %v4179_v2 = vld [vmem:[#allocation12 + $0x398] sm:$0xff] }
 0x586   : > { %4327 = vmatprep.mubr.f32.mxu0 %v4059_v26  ;;  %6434 = vmatprep.subr.bf16.mxu1 %v6433_v20  ;;  %v4093_v20 = vld [vmem:[#allocation12 + $0xe8] sm:$0xff]  ;;  %v6483_v37 = vpack.c.bf16 %v4107_v16, %v4106_v15  ;;  %v4108_v26 = vld [vmem:[#allocation12 + $0x160] sm:$0xff]  ;;  %v4139_v61 = vld [vmem:[#allocation12 + $0x258] sm:$0xff] }
 0x587   : > { %6466 = vmatprep.subr.bf16.mxu0 %v6465_v24  ;;  %v6453_v24 = vpack.c.bf16 %v4093_v20, %v4092_v19  ;;  %v4149_v15 = vld [vmem:[#allocation12 + $0x2a8] sm:$0xff]  ;;  %v4170_v62 = vld [vmem:[#allocation12 + $0x350] sm:$0xff] }
 0x588   : > { %6436 = vmatpush3.bf16.msra.mxu1 %v6435_v27  ;;  %v6485_v27 = vpack.c.bf16 %v4125_v23, %v4124_v21  ;;  %v4181_v16 = vld [vmem:[#allocation12 + $0x3a8] sm:$0xff]  ;;  %v6501_v21 = vpack.c.bf16 %v4149_v15, %v4148_v14  ;;  %v4132_v23 = vld [vmem:[#allocation12 + $0x220] sm:$0xff] }
 0x589   : > { %6468 = vmatpush3.bf16.msra.mxu0 %v6467_v29  ;;  %6438 = vmatprep.subr.bf16.mxu1 %v6437_v30  ;;  %v4109_v29 = vld [vmem:[#allocation12 + $0x168] sm:$0xff]  ;;  %v4094_v30 = vld [vmem:[#allocation12 + $0xf0] sm:$0xff]  ;;  %v4172_v14 = vld [vmem:[#allocation12 + $0x360] sm:$0xff] }
 0x58a   : > { %6470 = vmatprep.subr.bf16.mxu0 %v6469_v33  ;;  %v6455_v33 = vpack.c.bf16 %v4077_v25, %v4076_v0  ;;  %v6487_v35 = vpack.c.bf16 %v4109_v29, %v4108_v26  ;;  %v6457_v60 = vpack.c.bf16 %v4095_v46, %v4094_v30  ;;  %v4165_v0 = vld [vmem:[#allocation12 + $0x328] sm:$0xff]  ;;  %v4150_v25 = vld [vmem:[#allocation12 + $0x2b0] sm:$0xff]  ;;  %v4151_v26 = vld [vmem:[#allocation12 + $0x2b8] sm:$0xff] }
 0x58b   : > { %v4183_v29 = vld [vmem:[#allocation12 + $0x3b8] sm:$0xff] }
 0x58c   : > { %6440 = vmatpush3.bf16.msra.mxu1 %v6439_v58  ;;  %v4110_v58 = vld [vmem:[#allocation12 + $0x170] sm:$0xff] }
 0x58d   : > { %6472 = vmatpush3.bf16.msra.mxu0 %v6471_v44  ;;  %6442 = vmatprep.subr.bf16.mxu1 %v6441_v45  ;;  %v2323_v44 = vrot.slane %v7500_v38, %v7404_v12  ;;  %v6489_v45 = vpack.c.bf16 %v4127_v32, %v4126_v50  ;;  %v6491_v51 = vpack.c.bf16 %v4111_v47, %v4110_v58  ;;  %v4134_v32 = vld [vmem:[#allocation12 + $0x230] sm:$0xff]  ;;  %v4184_v58 = vld [vmem:[#allocation12 + $0x3c0] sm:$0xff] }
 0x58e   : > { %6474 = vmatprep.subr.bf16.mxu0 %v6473_v6  ;;  %v4176_v6 = vld [vmem:[#allocation12 + $0x380] sm:$0xff]  ;;  %v6505_v50 = vpack.c.bf16 %v4151_v26, %v4150_v25  ;;  %v4174_v26 = vld [vmem:[#allocation12 + $0x370] sm:$0xff] }
 0x58f   : > { %v6559_v12 = vadd.f32 %v7486_v36, %v2323_v44  ;;  %v4185_v44 = vld [vmem:[#allocation12 + $0x3c8] sm:$0xff] }
 0x590   : > { %6444 = vmatpush3.bf16.msra.mxu1 %v6443_v28  ;;  %v4129_v28 = vld [vmem:[#allocation12 + $0x208] sm:$0xff] }
 0x591   : > { %6476 = vmatpush3.bf16.msra.mxu0 %v6475_v56  ;;  %6446 = vmatprep.subr.bf16.mxu1 %v6445_v13  ;;  %v4160_v56 = vld [vmem:[#allocation12 + $0x300] sm:$0xff]  ;;  %v6525_v13 = vpack.c.bf16 %v4177_v48, %v4176_v6  ;;  %v6495_v3 = vpack.c.bf16 %v4129_v28, %v4128_v54  ;;  %v4137_v6 = vld [vmem:[#allocation12 + $0x248] sm:$0xff]  ;;  %v4186_v54 = vld [vmem:[#allocation12 + $0x3d0] sm:$0xff] }
 0x592   : > { %6478 = vmatprep.subr.bf16.mxu0 %v6477_v1  ;;  %v4178_v1 = vld [vmem:[#allocation12 + $0x390] sm:$0xff]  ;;  %v6527_v31 = vpack.c.bf16 %v4161_v57, %v4160_v56  ;;  %v4168_v48 = vld [vmem:[#allocation12 + $0x340] sm:$0xff]  ;;  %v4187_v28 = vld [vmem:[#allocation12 + $0x3d8] sm:$0xff]  ;;  %v6511_v56 = vpack.c.bf16 %v4137_v6, %v4136_v63 }
 0x593   : > { %v6529_v36 = vpack.c.bf16 %v4179_v2, %v4178_v1  ;;  %v4138_v57 = vld [vmem:[#allocation12 + $0x250] sm:$0xff]  ;;  %v6545_v1 = vpack.c.bf16 %v4187_v28, %v4186_v54  ;;  %v4171_v2 = vld [vmem:[#allocation12 + $0x358] sm:$0xff] }
 0x594   : > { %6448 = vmatpush3.bf16.msra.mxu1 %v6447_v8  ;;  %v4131_v8 = vld [vmem:[#allocation12 + $0x218] sm:$0xff] }
 0x595   : > { %6480 = vmatpush3.bf16.msra.mxu0 %v6479_v10  ;;  %6450 = vmatprep.subr.bf16.mxu1 %v6449_v55  ;;  %v4162_v10 = vld [vmem:[#allocation12 + $0x310] sm:$0xff]  ;;  %v4058_v55 = vmax.f32 %v6559_v12, 0.0  ;;  %v6499_v19 = vpack.c.bf16 %v4131_v8, %v4130_v42  ;;  %v6543_v12 = vpack.c.bf16 %v4169_v43, %v4168_v48  ;;  %v6515_v42 = vpack.c.bf16 %v4139_v61, %v4138_v57 }
 0x596   : > { %6482 = vmatprep.subr.bf16.mxu0 %v6481_v59  ;;  %v4180_v59 = vld [vmem:[#allocation12 + $0x3a0] sm:$0xff]  ;;  %v6531_v20 = vpack.c.bf16 %v4163_v11, %v4162_v10  ;;  %v6547_v8 = vpack.c.bf16 %v4171_v2, %v4170_v62  ;;  %v4141_v11 = vld [vmem:[#allocation12 + $0x268] sm:$0xff] }
 0x598   : > { %6452 = vmatpush3.bf16.msra.mxu1 %v6451_v49  ;;  %v4133_v49 = vld [vmem:[#allocation12 + $0x228] sm:$0xff] }
 0x599   : > { %6484 = vmatpush3.bf16.msra.mxu0 %v6483_v37  ;;  %6454 = vmatprep.subr.bf16.mxu1 %v6453_v24  ;;  %v4164_v37 = vld [vmem:[#allocation12 + $0x320] sm:$0xff]  ;;  %v6533_v24 = vpack.c.bf16 %v4181_v16, %v4180_v59  ;;  %v6503_v30 = vpack.c.bf16 %v4133_v49, %v4132_v23  ;;  %v4173_v59 = vld [vmem:[#allocation12 + $0x368] sm:$0xff]  ;;  %v4191_v49 = vld [vmem:[#allocation12 + $0x3f8] sm:$0xff] }
 0x59a   : > { %6486 = vmatprep.subr.bf16.mxu0 %v6485_v27  ;;  %v4182_v27 = vld [vmem:[#allocation12 + $0x3b0] sm:$0xff]  ;;  %v6535_v46 = vpack.c.bf16 %v4165_v0, %v4164_v37  ;;  %v6551_v16 = vpack.c.bf16 %v4173_v59, %v4172_v14 }
 0x59b   : > { %v4142_v37 = vld [vmem:[#allocation12 + $0x270] sm:$0xff] }
 0x59c   : > { %6456 = vmatpush3.bf16.msra.mxu1 %v6455_v33  ;;  %v4135_v33 = vld [vmem:[#allocation12 + $0x238] sm:$0xff] }
 0x59d   : > { %6488 = vmatpush3.bf16.msra.mxu0 %v6487_v35  ;;  %6458 = vmatprep.subr.bf16.mxu1 %v6457_v60  ;;  %v6537_v35 = vpack.c.bf16 %v4183_v29, %v4182_v27  ;;  %v4167_v60 = vld [vmem:[#allocation12 + $0x338] sm:$0xff] }
 0x59e   : > { %6490 = vmatprep.subr.bf16.mxu0 %v6489_v45  ;;  %v6507_v45 = vpack.c.bf16 %v4135_v33, %v4134_v32  ;;  %v6539_v47 = vpack.c.bf16 %v4167_v60, %v4166_v34  ;;  %v4175_v27 = vld [vmem:[#allocation12 + $0x378] sm:$0xff]  ;;  %v2343_v32 = vrot.slane %v7500_v38, %v2281_v52  ;;  %v4192_v52 = vld [vmem:[#allocation14] sm:$0x1] }
 0x59f   : > { %v6555_v29 = vpack.c.bf16 %v4175_v27, %v4174_v26 }
 0x5a0   : > { %6460 = vmatpush3.bf16.msra.mxu1 %v6459_v22  ;;  %v6541_v22 = vpack.c.bf16 %v4185_v44, %v4184_v58 }
 0x5a1   : > { %6492 = vmatpush3.bf16.msra.mxu0 %v6491_v51  ;;  %6494 = vmatprep.subr.bf16.mxu1 %v6493_v53  ;;  %v4154_v51 = vld [vmem:[#allocation12 + $0x2d0] sm:$0xff]  ;;  %v4155_v53 = vld [vmem:[#allocation12 + $0x2d8] sm:$0xff] }
 0x5a2   : > { %6526 = vmatprep.subr.bf16.mxu0 %v6525_v13  ;;  %v6513_v13 = vpack.c.bf16 %v4155_v53, %v4154_v51 }
 0x5a3   : > { %4258 = vmatmul.mubr.f32.vlgmr.msra.gmra.mrb[6].mxu1 %v4056_v4  ;;  %v4157_v4 = vld [vmem:[#allocation12 + $0x2e8] sm:$0xff] }
 0x5a4   : > { %4328 = vmatmul.mubr.f32.vlgmr.msra.gmra.mrb[8].mxu0 %v4058_v55  ;;  %6496 = vmatpush3.bf16.msra.mxu1 %v6495_v3  ;;  %v4156_v3 = vld [vmem:[#allocation12 + $0x2e0] sm:$0xff] }
 0x5a5   : > { %6528 = vmatpush3.bf16.msra.mxu0 %v6527_v31  ;;  %6498 = vmatprep.subr.bf16.mxu1 %v6497_v5  ;;  %v4188_v31 = vld [vmem:[#allocation12 + $0x3e0] sm:$0xff]  ;;  %v4189_v5 = vld [vmem:[#allocation12 + $0x3e8] sm:$0xff]  ;;  %v6517_v10 = vpack.c.bf16 %v4157_v4, %v4156_v3 }
 0x5a6   : > { %6530 = vmatprep.subr.bf16.mxu0 %v6529_v36  ;;  %v6549_v55 = vpack.c.bf16 %v4189_v5, %v4188_v31  ;;  %v4140_v36 = vld [vmem:[#allocation12 + $0x260] sm:$0xff] }
 0x5a7   : > { %v6519_v15 = vpack.c.bf16 %v4141_v11, %v4140_v36 }
 0x5a8   : > { %6500 = vmatpush3.bf16.msra.mxu1 %v6499_v19  ;;  %v4158_v19 = vld [vmem:[#allocation12 + $0x2f0] sm:$0xff] }
 0x5a9   : > { %6532 = vmatpush3.bf16.msra.mxu0 %v6531_v20  ;;  %6502 = vmatprep.subr.bf16.mxu1 %v6501_v21  ;;  %v4159_v20 = vld [vmem:[#allocation12 + $0x2f8] sm:$0xff]  ;;  %v4190_v21 = vld [vmem:[#allocation12 + $0x3f0] sm:$0xff] }
 0x5aa   : > { %6534 = vmatprep.subr.bf16.mxu0 %v6533_v24  ;;  %v6521_v23 = vpack.c.bf16 %v4159_v20, %v4158_v19  ;;  %v4143_v24 = vld [vmem:[#allocation12 + $0x278] sm:$0xff]  ;;  %v6553_v0 = vpack.c.bf16 %v4191_v49, %v4190_v21 }
 0x5ab   : > { %v6523_v25 = vpack.c.bf16 %v4143_v24, %v4142_v37 }
 0x5ac   : > { %6504 = vmatpush3.bf16.msra.mxu1 %v6503_v30  ;;  %v2331_v30 = vrot.slane %v7500_v38, %v2269_v40 }
 0x5ad   : > { %6536 = vmatpush3.bf16.msra.mxu0 %v6535_v46  ;;  %6506 = vmatprep.subr.bf16.mxu1 %v6505_v50  ;;  %v2339_v46 = vrot.slane %v7500_v38, %v2277_v41  ;;  %v2335_v50 = vrot.slane %v7500_v38, %v2273_v7 }
 0x5ae   : > { %6538 = vmatprep.subr.bf16.mxu0 %v6537_v35 }
 0x5b0   : > { %6508 = vmatpush3.bf16.msra.mxu1 %v6507_v45 }
 0x5b1   : > { %6540 = vmatpush3.bf16.msra.mxu0 %v6539_v47  ;;  %6510 = vmatprep.subr.bf16.mxu1 %v6509_v18 }
 0x5b2   : > { %6542 = vmatprep.subr.bf16.mxu0 %v6541_v22 }
 0x5b4   : > { %6512 = vmatpush3.bf16.msra.mxu1 %v6511_v56 }
 0x5b5   : > { %6544 = vmatpush3.bf16.msra.mxu0 %v6543_v12  ;;  %6514 = vmatprep.subr.bf16.mxu1 %v6513_v13 }
 0x5b6   : > { %6546 = vmatprep.subr.bf16.mxu0 %v6545_v1 }
 0x5b8   : > { %6516 = vmatpush3.bf16.msra.mxu1 %v6515_v42 }
 0x5b9   : > { %6548 = vmatpush3.bf16.msra.mxu0 %v6547_v8  ;;  %6518 = vmatprep.subr.bf16.mxu1 %v6517_v10 }
 0x5ba   : > { %6550 = vmatprep.subr.bf16.mxu0 %v6549_v55 }
 0x5bc   : > { %6520 = vmatpush3.bf16.msra.mxu1 %v6519_v15 }
 0x5bd   : > { %6552 = vmatpush3.bf16.msra.mxu0 %v6551_v16  ;;  %6522 = vmatprep.subr.bf16.mxu1 %v6521_v23 }
 0x5be   : > { %6554 = vmatprep.subr.bf16.mxu0 %v6553_v0 }
 0x5c0   : > { %6524 = vmatpush3.bf16.msra.mxu1 %v6523_v25 }
 0x5c1   : > { %6556 = vmatpush3.bf16.msra.mxu0 %v6555_v29 }
 0x656   : > { %v3625_v33 = vpop.f32.mrb[4].mxu1 }
 0x657   : > { %v6561_v34 = vadd.f32 %v3625_v33, %v2331_v30  ;;  %v4051_v35 = vpop.f32.mrb[6].mxu0  ;;  %v3627_v60 = vpop.f32.mrb[5].mxu1 }
 0x658   : > { %v6563_v17 = vadd.f32 %v4051_v35, %v2339_v46  ;;  %v6562_v39 = vadd.f32 %v3627_v60, %v2335_v50  ;;  %v4053_v58 = vpop.f32.mrb[7].mxu0 }
 0x659   : > { %v6564_v40 = vadd.f32 %v4053_v58, %v2343_v32  ;;  %v4060_v45 = vmax.f32 %v6561_v34, 0.0 }
 0x65a   : > { %v4061_v44 = vmax.f32 %v6562_v39, 0.0  ;;  %v4062_v47 = vmax.f32 %v6563_v17, 0.0 }
 0x65b   : > { %v4063_v41 = vmax.f32 %v6564_v40, 0.0 }
 0x65c   : > { %4397 = vmatprep.mubr.f32.mxu1 %v4061_v44 }
 0x65d   : > { %4467 = vmatprep.mubr.f32.mxu0 %v4063_v41  ;;  %4398 = vmatmul.mubr.f32.vlgmr.msra.gmra.mrb[8].mxu1 %v4060_v45 }
 0x65e   : > { %4468 = vmatmul.mubr.f32.vlgmr.msra.gmra.mrb[10].mxu0 %v4062_v47 }
 0x676   : > { %v4687_v9 = vpop.f32.mrb[6].mxu1 }
 0x677   : > { %v4722_v7 = vpop.f32.mrb[8].mxu0  ;;  %v4688_v38 = vpop.f32.mrb[7].mxu1 }
 0x678   : > { %v4689_v18 = vadd.f32 %v4688_v38, %v4687_v9  ;;  %v4723_v63 = vpop.f32.mrb[9].mxu0 }
 0x679   : > { %v4724_v6 = vadd.f32 %v4723_v63, %v4722_v7 }
 0x67a   : > { %v4260_v48 = vadd.f32 %v4689_v18, %v4192_v52 }
 0x67c   : > { %v4330_v22 = vadd.f32 %v4724_v6, %v4260_v48 }
 0x730   : > { %v4757_v43 = vpop.f32.mrb[8].mxu1 }
 0x731   : > { %v4792_v51 = vpop.f32.mrb[10].mxu0  ;;  %v4758_v53 = vpop.f32.mrb[9].mxu1 }
 0x732   : > { %v4759_v54 = vadd.f32 %v4758_v53, %v4757_v43  ;;  %v4793_v28 = vpop.f32.mrb[11].mxu0 }
 0x733   : > { %v4794_v56 = vadd.f32 %v4793_v28, %v4792_v51 }
 0x734   : > { %v4400_v12 = vadd.f32 %v4759_v54, %v4330_v22 }
 0x736   : > { %v4470_v13 = vadd.f32 %v4794_v56, %v4400_v12 }
 0x738   : > { %4473 = vst [vmem:[%s393_s26] sm:$0x1] %v4470_v13 }
 0x739   : > { %6936 = shalt.err (!%p6933_p9)
}
 0x73a   : > { %s6937_s18 = scalar_lea.hbm %s7533_s22, 16  ;;  %s6941_s12 = scalar_lea.hbm %s7583_s8, 32 }
 0x73b   : > { %p6938_p10 = scmp.ne.s32.totalorder %s7533_s22, %s6937_s18  ;;  %p6942_p1 = scmp.lt.u32.totalorder %s7533_s22, %s7583_s8 }
 0x73c   : > { %p6943_p2 = scmp.lt.u32.totalorder %s6941_s12, %s6937_s18  ;;  %p6945_p4 = scmp.lt.u32.totalorder %s6937_s18, %s7533_s22 }
 0x73d   : > { %p6939_p13 = pnand %p6938_p10, %p7615_p7 }
 0x73e   : > { %p6944_p3 = por %p6943_p2, %p6942_p1 }
 0x73f   : > { %p6940_p12 = pneg %p6939_p13 }
 0x740   : > { %p6946_p8 = por %p6945_p4, %p6944_p3 }
 0x742   : > { %p6947_p11 = pnand %p6946_p8, %p6940_p12 }
 0x744   : > { %6950 = shalt.err (!%p6947_p11)
}
 0x745   : > { %6634 = dma.vmem_to_hbm [thread:$0]  (%p7615_p7), %s7535_s21, 16, %s7533_s22, %s4475_s10  }
 0x746 PF: > { %p6676_p5 = scmp.ge.s32.totalorder %s7001_s30, 2  ;;  %s4499_s29 = sand.u32 1, %s6989_s27  }
 0x747   : > { %p7616_p6 = scmp.ne.s32.totalorder %s7597_s16, 0  ;;  %s4500_s23 = scalar_lea.sflag [#allocation5], %s4499_s29 }
 0x749   : > { %p6659_p0 = pnand %p6676_p5, %p7616_p6 }
 0x74b   : > { %6984 = dma.done.wait (!%p6659_p0), %s4500_s23, 16  }
 0x74c   : > { %6986 = vsyncadd (!%p6659_p0), %s4500_s23, 4294967280  ;;  %s7617_s30 = sld [smem:[#allocation22_spill]]  ;;  %s7618_s26 = sld [smem:[#allocation21_spill]] }
 0x74d   : > { %s7619_s29 = sld [smem:[#allocation23_spill]]  ;;  %s7620_s27 = smov %s6993_s28 }
 0x752   : > { %p22_p9 = scmp.ge.s32.totalorder %s7617_s30, 4   ;;  %s7621_s28 = smov %s7618_s26 }
 0x754   :  { %24 = sbr.rel (!%p22_p9) target bundleno = 9 (0x9), region = 116 }
 0x75b   :  { %4504 = vsyncpa [#allocation4], 1 }
 0x75c   :  { %4506 = vsyncpa [#allocation4 + $0x1], 1 }
 0x75d   :  { %4507 = vsyncpa [#allocation7], 1 }
 0x75e   :  { %4508 = vsyncpa [#allocation10], 1 }
 0x75f   :  { %4509 = vsyncpa [#allocation13], 1 }
 0x760   :  { %4510 = vsyncpa [#allocation5], 1 }
 0x761   :  { %4512 = vsyncpa [#allocation5 + $0x1], 1 }

</bundles_post_ra>
